<compile_context>
chip_gen: v7x
topology: tpu7x:2x2x1
jax: 0.10.0
libtpu: 0.0.40
codegen_flags: <defaults>
</compile_context>

<pallas_src>
import functools
import math

import jax
import jax.numpy as jnp
from jax import lax
from jax.experimental import pallas as pl
from jax.experimental.pallas import tpu as pltpu


# ----------------------------------------------------------------- utilities
def _round_up(x, m):
    return (x + m - 1) // m * m


# ----------------------------------------------------------------- kernel
def _grb_kernel(x_ref, w1_ref, b1_ref, w2_ref, b2_ref, *rest,
                has_down, H, W, C, CP):
    """One (batch*object) image per grid step, fully fused GroupResBlock."""
    if has_down:
        wd_ref, bd_ref, o_ref, a1p_ref = rest
    else:
        o_ref, a1p_ref = rest

    HW = H * W
    taps = [(dy, dx) for dy in range(3) for dx in range(3)]

    # ---- conv1: acc = sum_t relu(x_tap_t) @ w1_t ---------------------------
    acc = jnp.zeros((HW, CP), jnp.float32)
    for t, (dy, dx) in enumerate(taps):
        tap = x_ref[0, dy:dy + H, dx:dx + W, :].reshape(HW, C)
        acc = acc + jnp.dot(jnp.maximum(tap, 0), w1_ref[t],
                            preferred_element_type=jnp.float32)
    a1 = jnp.maximum(acc + b1_ref[...], 0.0).astype(jnp.bfloat16)

    # Stage relu(conv1(relu(g))) spatially padded in VMEM (no HBM round trip).
    a1p_ref[...] = jnp.zeros_like(a1p_ref)
    a1p_ref[1:H + 1, 1:W + 1, :] = a1.reshape(H, W, CP)

    # ---- residual path (re-uses the already resident input tile) -----------
    if has_down:
        bias2 = b2_ref[...] + bd_ref[...]                    # (1, CP) f32
        acc = jnp.zeros((HW, CP), jnp.float32) + bias2
        for t, (dy, dx) in enumerate(taps):
            tap = x_ref[0, dy:dy + H, dx:dx + W, :].reshape(HW, C)
            acc = acc + jnp.dot(tap, wd_ref[t],
                                preferred_element_type=jnp.float32)
    else:
        res = x_ref[0, 1:H + 1, 1:W + 1, :].reshape(HW, C).astype(jnp.float32)
        if C != CP:
            # TODO(synk): only reached when in_dim == out_dim is not a
            # multiple of 128; padded lanes are sliced off at the boundary.
            res = jnp.pad(res, ((0, 0), (0, CP - C)))
        acc = res + b2_ref[...]

    # ---- conv2 on the staged intermediate -----------------------------------
    for t, (dy, dx) in enumerate(taps):
        tap = a1p_ref[dy:dy + H, dx:dx + W, :].reshape(HW, CP)
        acc = acc + jnp.dot(tap, w2_ref[t], preferred_element_type=jnp.float32)

    o_ref[0] = acc.reshape(H, W, CP).astype(o_ref.dtype)


def _fused_group_res_block(x_pad, params, H, W):
    """x_pad: (BN, H+2, W+2, C) bf16, spatially zero-padded, channels-last."""
    BN, _, _, C = x_pad.shape
    CP = params["cout_p"]
    has_down = params["has_down"]

    operands = [x_pad, params["w1"], params["b1"], params["w2"], params["b2"]]
    in_specs = [
        pl.BlockSpec((1, H + 2, W + 2, C), lambda b: (b, 0, 0, 0)),
        pl.BlockSpec((9, C, CP), lambda b: (0, 0, 0)),
        pl.BlockSpec((1, CP), lambda b: (0, 0)),
        pl.BlockSpec((9, CP, CP), lambda b: (0, 0, 0)),
        pl.BlockSpec((1, CP), lambda b: (0, 0)),
    ]
    if has_down:
        operands += [params["wd"], params["bd"]]
        in_specs += [
            pl.BlockSpec((9, C, CP), lambda b: (0, 0, 0)),
            pl.BlockSpec((1, CP), lambda b: (0, 0)),
        ]

    # Explicit VMEM budget from the actual block sizes (double-buffered
    # in/out blocks + scratch); capped so it is also valid on v7x (64 MiB).
    blk_bytes = ((H + 2) * (W + 2) * C * 2        # input block (bf16)
                 + H * W * CP * 4                 # output block (f32)
                 + 9 * C * CP * 2 + 9 * CP * CP * 2
                 + 2 * CP * 4)
    if has_down:
        blk_bytes += 9 * C * CP * 2 + CP * 4
    scratch_bytes = (H + 2) * (W + 2) * CP * 2
    vmem_limit = int(min(max(2 * blk_bytes + scratch_bytes + (4 << 20),
                             16 << 20), 64 << 20))

    kernel = functools.partial(_grb_kernel, has_down=has_down,
                               H=H, W=W, C=C, CP=CP)
    return pl.pallas_call(
        kernel,
        out_shape=jax.ShapeDtypeStruct((BN, H, W, CP), jnp.float32),
        grid_spec=pltpu.PrefetchScalarGridSpec(
            num_scalar_prefetch=0,
            grid=(BN,),
            in_specs=in_specs,
            out_specs=pl.BlockSpec((1, H, W, CP), lambda b: (b, 0, 0, 0)),
            scratch_shapes=[pltpu.VMEM((H + 2, W + 2, CP), jnp.bfloat16)]),
        compiler_params=pltpu.CompilerParams(
            dimension_semantics=("parallel",),
            vmem_limit_bytes=vmem_limit),
    )(*operands)


# ----------------------------------------------------------- parameter setup
def _conv_init(key, cout, cin, k=3):
    fan_in = cin * k * k
    bound = 1.0 / math.sqrt(fan_in)
    kw, kb = jax.random.split(key)
    w = jax.random.uniform(kw, (cout, cin, k, k), jnp.float32, -bound, bound)
    b = jax.random.uniform(kb, (cout,), jnp.float32, -bound, bound)
    return w, b


def _weight_to_taps(w, cin_pad, cout_pad):
    """PyTorch (Cout, Cin, 3, 3) -> (9, cin_pad, cout_pad) bf16, tap-major."""
    cout, cin, kh, kw = w.shape
    if cin_pad > cin:
        w = jnp.pad(w, ((0, 0), (0, cin_pad - cin), (0, 0), (0, 0)))
    m = jnp.transpose(w, (2, 3, 1, 0)).reshape(kh * kw, cin_pad, cout)
    if cout_pad > cout:
        m = jnp.pad(m, ((0, 0), (0, 0), (0, cout_pad - cout)))
    return m.astype(jnp.bfloat16)


def _pad_bias(b, cout_pad):
    c = b.shape[0]
    if cout_pad > c:
        b = jnp.pad(b, (0, cout_pad - c))
    return b.astype(jnp.float32).reshape(1, cout_pad)


def init_group_res_block(key, in_dim, out_dim):
    k1, k2, k3 = jax.random.split(key, 3)
    cout_p = _round_up(out_dim, 128)
    w1, b1 = _conv_init(k1, out_dim, in_dim)
    w2, b2 = _conv_init(k2, out_dim, out_dim)
    p = {
        "in_dim": in_dim, "out_dim": out_dim, "cout_p": cout_p,
        "has_down": in_dim != out_dim,
        # Weights pre-cast to bf16, tap-major, pre-padded once at init.
        "w1": _weight_to_taps(w1, in_dim, cout_p), "b1": _pad_bias(b1, cout_p),
        # conv2 consumes the channel-padded intermediate -> pad its Cin too.
        "w2": _weight_to_taps(w2, cout_p, cout_p), "b2": _pad_bias(b2, cout_p),
        "raw": {"w1": w1, "b1": b1, "w2": w2, "b2": b2},
    }
    if p["has_down"]:
        wd, bd = _conv_init(k3, out_dim, in_dim)
        p["wd"] = _weight_to_taps(wd, in_dim, cout_p)
        p["bd"] = _pad_bias(bd, cout_p)
        p["raw"]["wd"], p["raw"]["bd"] = wd, bd
    return p


# ---------------------------------------------------------------- forward
def group_res_block_forward(params, g):
    """g: (B, num_objects, C_in, H, W) -> (B, num_objects, C_out, H, W)."""
    B, N, C, H, W = g.shape
    out_dim, CP = params["out_dim"], params["cout_p"]
    BN = B * N

    # Boundary conversion (once): NCHW -> NHWC bf16 + spatial zero pad.
    x = jnp.transpose(g.astype(jnp.bfloat16).reshape(BN, C, H, W), (0, 2, 3, 1))
    x_pad = jnp.pad(x, ((0, 0), (1, 1), (1, 1), (0, 0)))

    out = _fused_group_res_block(x_pad, params, H, W)      # (BN, H, W, CP) f32
    if CP != out_dim:
        out = out[..., :out_dim]
    return jnp.transpose(out, (0, 3, 1, 2)).reshape(B, N, out_dim, H, W)


# ------------------------------------------------------------ pure-JAX ref
def group_res_block_reference(params, g):
    raw = params["raw"]

    def conv(x, w, b):
        y = lax.conv_general_dilated(
            x, w, window_strides=(1, 1), padding=((1, 1), (1, 1)),
            dimension_numbers=("NCHW", "OIHW", "NCHW"))
        return y + b[None, :, None, None]

    B, N = g.shape[:2]
    x = g.reshape((B * N,) + g.shape[2:])
    out = conv(jax.nn.relu(x), raw["w1"], raw["b1"])
    out = conv(jax.nn.relu(out), raw["w2"], raw["b2"])
    res = conv(x, raw["wd"], raw["bd"]) if params["has_down"] else x
    out = out + res
    return out.reshape((B, N) + out.shape[1:])


# -------------------------------------------------------------------- main
if __name__ == "__main__":
    B, NUM_OBJ, H, W = 2, 2, 16, 16
    key = jax.random.PRNGKey(0)

    for in_dim, out_dim in ((64, 128), (128, 128)):   # with & without downsample
        kp, kg, key = jax.random.split(key, 3)
        params = init_group_res_block(kp, in_dim, out_dim)
        g_in = jax.random.normal(kg, (B, NUM_OBJ, in_dim, H, W), jnp.float32)

        fwd = jax.jit(functools.partial(group_res_block_forward, params))
        out = jax.block_until_ready(fwd(g_in))

        assert out.shape == (B, NUM_OBJ, out_dim, H, W)
        assert bool(jnp.all(jnp.isfinite(out)))

        ref = group_res_block_reference(params, g_in)
        # Loose norm-wise tolerance: MXU operands are bf16 (f32 accumulation).
        rel = jnp.linalg.norm(out - ref) / (jnp.linalg.norm(ref) + 1e-8)
        assert float(rel) < 3e-2, f"relative error too large: {float(rel)}"

    print("KERNEL_OK")
</pallas_src>

<mosaic_0001>
module attributes {stable_mosaic.version = 11 : i64} {
  func.func @_grb_kernel(%arg0: i32, %arg1: memref<1x18x18x64xbf16, #tpu.memory_space<vmem>>, %arg2: memref<9x64x128xbf16, #tpu.memory_space<vmem>>, %arg3: memref<1x128xf32, #tpu.memory_space<vmem>>, %arg4: memref<9x128x128xbf16, #tpu.memory_space<vmem>>, %arg5: memref<1x128xf32, #tpu.memory_space<vmem>>, %arg6: memref<9x64x128xbf16, #tpu.memory_space<vmem>>, %arg7: memref<1x128xf32, #tpu.memory_space<vmem>>, %arg8: memref<1x16x16x128xf32, #tpu.memory_space<vmem>>, %arg9: memref<18x18x128xbf16, #tpu.memory_space<vmem>>) attributes {dimension_semantics = [#tpu.dimension_semantics<parallel>], iteration_bounds = array<i64: 4>, scalar_prefetch = 0 : i64, scratch_operands = 1 : i64, tpu.core_type = #tpu.core_type<tc>, window_params = [{transform_indices = @transform_0, window_bounds = array<i64: 1, 18, 18, 64>}, {pipeline_mode = #tpu.pipeline_mode<synchronous>, transform_indices = @transform_1, window_bounds = array<i64: 9, 64, 128>}, {pipeline_mode = #tpu.pipeline_mode<synchronous>, transform_indices = @transform_2, window_bounds = array<i64: 1, 128>}, {pipeline_mode = #tpu.pipeline_mode<synchronous>, transform_indices = @transform_3, window_bounds = array<i64: 9, 128, 128>}, {pipeline_mode = #tpu.pipeline_mode<synchronous>, transform_indices = @transform_4, window_bounds = array<i64: 1, 128>}, {pipeline_mode = #tpu.pipeline_mode<synchronous>, transform_indices = @transform_5, window_bounds = array<i64: 9, 64, 128>}, {pipeline_mode = #tpu.pipeline_mode<synchronous>, transform_indices = @transform_6, window_bounds = array<i64: 1, 128>}, {transform_indices = @transform_7, window_bounds = array<i64: 1, 16, 16, 128>}]} {
    %cst = arith.constant 0.000000e+00 : f32
    %0 = vector.broadcast %cst : f32 to vector<256x128xf32>
    %c0 = arith.constant 0 : index
    %c0_0 = arith.constant 0 : index
    %c0_1 = arith.constant 0 : index
    %c0_2 = arith.constant 0 : index
    %1 = vector.load %arg1[%c0, %c0_0, %c0_1, %c0_2] : memref<1x18x18x64xbf16, #tpu.memory_space<vmem>>, vector<1x16x16x64xbf16>
    %2 = vector.shape_cast %1 : vector<1x16x16x64xbf16> to vector<16x16x64xbf16>
    %3 = vector.shape_cast %2 : vector<16x16x64xbf16> to vector<256x64xbf16>
    %cst_3 = arith.constant 0.000000e+00 : bf16
    %4 = vector.broadcast %cst_3 : bf16 to vector<256x64xbf16>
    %5 = arith.maximumf %3, %4 : vector<256x64xbf16>
    %c0_4 = arith.constant 0 : index
    %c0_5 = arith.constant 0 : index
    %c0_6 = arith.constant 0 : index
    %6 = vector.load %arg2[%c0_4, %c0_5, %c0_6] : memref<9x64x128xbf16, #tpu.memory_space<vmem>>, vector<1x64x128xbf16>
    %7 = vector.shape_cast %6 : vector<1x64x128xbf16> to vector<64x128xbf16>
    %cst_7 = arith.constant dense<0.000000e+00> : vector<256x128xf32>
    %8 = tpu.matmul %5, %7, %cst_7 {dimension_numbers = #tpu.dot_dimension_numbers<[1], [0], [0], [1], [0, 0, 1, 1], [], []>} : vector<256x64xbf16>, vector<64x128xbf16>, vector<256x128xf32> -> vector<256x128xf32>
    %9 = arith.addf %0, %8 : vector<256x128xf32>
    %c0_8 = arith.constant 0 : index
    %c0_9 = arith.constant 0 : index
    %c1 = arith.constant 1 : index
    %c0_10 = arith.constant 0 : index
    %10 = vector.load %arg1[%c0_8, %c0_9, %c1, %c0_10] : memref<1x18x18x64xbf16, #tpu.memory_space<vmem>>, vector<1x16x16x64xbf16>
    %11 = vector.shape_cast %10 : vector<1x16x16x64xbf16> to vector<16x16x64xbf16>
    %12 = vector.shape_cast %11 : vector<16x16x64xbf16> to vector<256x64xbf16>
    %cst_11 = arith.constant 0.000000e+00 : bf16
    %13 = vector.broadcast %cst_11 : bf16 to vector<256x64xbf16>
    %14 = arith.maximumf %12, %13 : vector<256x64xbf16>
    %c1_12 = arith.constant 1 : index
    %c0_13 = arith.constant 0 : index
    %c0_14 = arith.constant 0 : index
    %15 = vector.load %arg2[%c1_12, %c0_13, %c0_14] : memref<9x64x128xbf16, #tpu.memory_space<vmem>>, vector<1x64x128xbf16>
    %16 = vector.shape_cast %15 : vector<1x64x128xbf16> to vector<64x128xbf16>
    %cst_15 = arith.constant dense<0.000000e+00> : vector<256x128xf32>
    %17 = tpu.matmul %14, %16, %cst_15 {dimension_numbers = #tpu.dot_dimension_numbers<[1], [0], [0], [1], [0, 0, 1, 1], [], []>} : vector<256x64xbf16>, vector<64x128xbf16>, vector<256x128xf32> -> vector<256x128xf32>
    %18 = arith.addf %9, %17 : vector<256x128xf32>
    %c0_16 = arith.constant 0 : index
    %c0_17 = arith.constant 0 : index
    %c2 = arith.constant 2 : index
    %c0_18 = arith.constant 0 : index
    %19 = vector.load %arg1[%c0_16, %c0_17, %c2, %c0_18] : memref<1x18x18x64xbf16, #tpu.memory_space<vmem>>, vector<1x16x16x64xbf16>
    %20 = vector.shape_cast %19 : vector<1x16x16x64xbf16> to vector<16x16x64xbf16>
    %21 = vector.shape_cast %20 : vector<16x16x64xbf16> to vector<256x64xbf16>
    %cst_19 = arith.constant 0.000000e+00 : bf16
    %22 = vector.broadcast %cst_19 : bf16 to vector<256x64xbf16>
    %23 = arith.maximumf %21, %22 : vector<256x64xbf16>
    %c2_20 = arith.constant 2 : index
    %c0_21 = arith.constant 0 : index
    %c0_22 = arith.constant 0 : index
    %24 = vector.load %arg2[%c2_20, %c0_21, %c0_22] : memref<9x64x128xbf16, #tpu.memory_space<vmem>>, vector<1x64x128xbf16>
    %25 = vector.shape_cast %24 : vector<1x64x128xbf16> to vector<64x128xbf16>
    %cst_23 = arith.constant dense<0.000000e+00> : vector<256x128xf32>
    %26 = tpu.matmul %23, %25, %cst_23 {dimension_numbers = #tpu.dot_dimension_numbers<[1], [0], [0], [1], [0, 0, 1, 1], [], []>} : vector<256x64xbf16>, vector<64x128xbf16>, vector<256x128xf32> -> vector<256x128xf32>
    %27 = arith.addf %18, %26 : vector<256x128xf32>
    %c0_24 = arith.constant 0 : index
    %c1_25 = arith.constant 1 : index
    %c0_26 = arith.constant 0 : index
    %c0_27 = arith.constant 0 : index
    %28 = vector.load %arg1[%c0_24, %c1_25, %c0_26, %c0_27] : memref<1x18x18x64xbf16, #tpu.memory_space<vmem>>, vector<1x16x16x64xbf16>
    %29 = vector.shape_cast %28 : vector<1x16x16x64xbf16> to vector<16x16x64xbf16>
    %30 = vector.shape_cast %29 : vector<16x16x64xbf16> to vector<256x64xbf16>
    %cst_28 = arith.constant 0.000000e+00 : bf16
    %31 = vector.broadcast %cst_28 : bf16 to vector<256x64xbf16>
    %32 = arith.maximumf %30, %31 : vector<256x64xbf16>
    %c3 = arith.constant 3 : index
    %c0_29 = arith.constant 0 : index
    %c0_30 = arith.constant 0 : index
    %33 = vector.load %arg2[%c3, %c0_29, %c0_30] : memref<9x64x128xbf16, #tpu.memory_space<vmem>>, vector<1x64x128xbf16>
    %34 = vector.shape_cast %33 : vector<1x64x128xbf16> to vector<64x128xbf16>
    %cst_31 = arith.constant dense<0.000000e+00> : vector<256x128xf32>
    %35 = tpu.matmul %32, %34, %cst_31 {dimension_numbers = #tpu.dot_dimension_numbers<[1], [0], [0], [1], [0, 0, 1, 1], [], []>} : vector<256x64xbf16>, vector<64x128xbf16>, vector<256x128xf32> -> vector<256x128xf32>
    %36 = arith.addf %27, %35 : vector<256x128xf32>
    %c0_32 = arith.constant 0 : index
    %c1_33 = arith.constant 1 : index
    %c1_34 = arith.constant 1 : index
    %c0_35 = arith.constant 0 : index
    %37 = vector.load %arg1[%c0_32, %c1_33, %c1_34, %c0_35] : memref<1x18x18x64xbf16, #tpu.memory_space<vmem>>, vector<1x16x16x64xbf16>
    %38 = vector.shape_cast %37 : vector<1x16x16x64xbf16> to vector<16x16x64xbf16>
    %39 = vector.shape_cast %38 : vector<16x16x64xbf16> to vector<256x64xbf16>
    %cst_36 = arith.constant 0.000000e+00 : bf16
    %40 = vector.broadcast %cst_36 : bf16 to vector<256x64xbf16>
    %41 = arith.maximumf %39, %40 : vector<256x64xbf16>
    %c4 = arith.constant 4 : index
    %c0_37 = arith.constant 0 : index
    %c0_38 = arith.constant 0 : index
    %42 = vector.load %arg2[%c4, %c0_37, %c0_38] : memref<9x64x128xbf16, #tpu.memory_space<vmem>>, vector<1x64x128xbf16>
    %43 = vector.shape_cast %42 : vector<1x64x128xbf16> to vector<64x128xbf16>
    %cst_39 = arith.constant dense<0.000000e+00> : vector<256x128xf32>
    %44 = tpu.matmul %41, %43, %cst_39 {dimension_numbers = #tpu.dot_dimension_numbers<[1], [0], [0], [1], [0, 0, 1, 1], [], []>} : vector<256x64xbf16>, vector<64x128xbf16>, vector<256x128xf32> -> vector<256x128xf32>
    %45 = arith.addf %36, %44 : vector<256x128xf32>
    %c0_40 = arith.constant 0 : index
    %c1_41 = arith.constant 1 : index
    %c2_42 = arith.constant 2 : index
    %c0_43 = arith.constant 0 : index
    %46 = vector.load %arg1[%c0_40, %c1_41, %c2_42, %c0_43] : memref<1x18x18x64xbf16, #tpu.memory_space<vmem>>, vector<1x16x16x64xbf16>
    %47 = vector.shape_cast %46 : vector<1x16x16x64xbf16> to vector<16x16x64xbf16>
    %48 = vector.shape_cast %47 : vector<16x16x64xbf16> to vector<256x64xbf16>
    %cst_44 = arith.constant 0.000000e+00 : bf16
    %49 = vector.broadcast %cst_44 : bf16 to vector<256x64xbf16>
    %50 = arith.maximumf %48, %49 : vector<256x64xbf16>
    %c5 = arith.constant 5 : index
    %c0_45 = arith.constant 0 : index
    %c0_46 = arith.constant 0 : index
    %51 = vector.load %arg2[%c5, %c0_45, %c0_46] : memref<9x64x128xbf16, #tpu.memory_space<vmem>>, vector<1x64x128xbf16>
    %52 = vector.shape_cast %51 : vector<1x64x128xbf16> to vector<64x128xbf16>
    %cst_47 = arith.constant dense<0.000000e+00> : vector<256x128xf32>
    %53 = tpu.matmul %50, %52, %cst_47 {dimension_numbers = #tpu.dot_dimension_numbers<[1], [0], [0], [1], [0, 0, 1, 1], [], []>} : vector<256x64xbf16>, vector<64x128xbf16>, vector<256x128xf32> -> vector<256x128xf32>
    %54 = arith.addf %45, %53 : vector<256x128xf32>
    %c0_48 = arith.constant 0 : index
    %c2_49 = arith.constant 2 : index
    %c0_50 = arith.constant 0 : index
    %c0_51 = arith.constant 0 : index
    %55 = vector.load %arg1[%c0_48, %c2_49, %c0_50, %c0_51] : memref<1x18x18x64xbf16, #tpu.memory_space<vmem>>, vector<1x16x16x64xbf16>
    %56 = vector.shape_cast %55 : vector<1x16x16x64xbf16> to vector<16x16x64xbf16>
    %57 = vector.shape_cast %56 : vector<16x16x64xbf16> to vector<256x64xbf16>
    %cst_52 = arith.constant 0.000000e+00 : bf16
    %58 = vector.broadcast %cst_52 : bf16 to vector<256x64xbf16>
    %59 = arith.maximumf %57, %58 : vector<256x64xbf16>
    %c6 = arith.constant 6 : index
    %c0_53 = arith.constant 0 : index
    %c0_54 = arith.constant 0 : index
    %60 = vector.load %arg2[%c6, %c0_53, %c0_54] : memref<9x64x128xbf16, #tpu.memory_space<vmem>>, vector<1x64x128xbf16>
    %61 = vector.shape_cast %60 : vector<1x64x128xbf16> to vector<64x128xbf16>
    %cst_55 = arith.constant dense<0.000000e+00> : vector<256x128xf32>
    %62 = tpu.matmul %59, %61, %cst_55 {dimension_numbers = #tpu.dot_dimension_numbers<[1], [0], [0], [1], [0, 0, 1, 1], [], []>} : vector<256x64xbf16>, vector<64x128xbf16>, vector<256x128xf32> -> vector<256x128xf32>
    %63 = arith.addf %54, %62 : vector<256x128xf32>
    %c0_56 = arith.constant 0 : index
    %c2_57 = arith.constant 2 : index
    %c1_58 = arith.constant 1 : index
    %c0_59 = arith.constant 0 : index
    %64 = vector.load %arg1[%c0_56, %c2_57, %c1_58, %c0_59] : memref<1x18x18x64xbf16, #tpu.memory_space<vmem>>, vector<1x16x16x64xbf16>
    %65 = vector.shape_cast %64 : vector<1x16x16x64xbf16> to vector<16x16x64xbf16>
    %66 = vector.shape_cast %65 : vector<16x16x64xbf16> to vector<256x64xbf16>
    %cst_60 = arith.constant 0.000000e+00 : bf16
    %67 = vector.broadcast %cst_60 : bf16 to vector<256x64xbf16>
    %68 = arith.maximumf %66, %67 : vector<256x64xbf16>
    %c7 = arith.constant 7 : index
    %c0_61 = arith.constant 0 : index
    %c0_62 = arith.constant 0 : index
    %69 = vector.load %arg2[%c7, %c0_61, %c0_62] : memref<9x64x128xbf16, #tpu.memory_space<vmem>>, vector<1x64x128xbf16>
    %70 = vector.shape_cast %69 : vector<1x64x128xbf16> to vector<64x128xbf16>
    %cst_63 = arith.constant dense<0.000000e+00> : vector<256x128xf32>
    %71 = tpu.matmul %68, %70, %cst_63 {dimension_numbers = #tpu.dot_dimension_numbers<[1], [0], [0], [1], [0, 0, 1, 1], [], []>} : vector<256x64xbf16>, vector<64x128xbf16>, vector<256x128xf32> -> vector<256x128xf32>
    %72 = arith.addf %63, %71 : vector<256x128xf32>
    %c0_64 = arith.constant 0 : index
    %c2_65 = arith.constant 2 : index
    %c2_66 = arith.constant 2 : index
    %c0_67 = arith.constant 0 : index
    %73 = vector.load %arg1[%c0_64, %c2_65, %c2_66, %c0_67] : memref<1x18x18x64xbf16, #tpu.memory_space<vmem>>, vector<1x16x16x64xbf16>
    %74 = vector.shape_cast %73 : vector<1x16x16x64xbf16> to vector<16x16x64xbf16>
    %75 = vector.shape_cast %74 : vector<16x16x64xbf16> to vector<256x64xbf16>
    %cst_68 = arith.constant 0.000000e+00 : bf16
    %76 = vector.broadcast %cst_68 : bf16 to vector<256x64xbf16>
    %77 = arith.maximumf %75, %76 : vector<256x64xbf16>
    %c8 = arith.constant 8 : index
    %c0_69 = arith.constant 0 : index
    %c0_70 = arith.constant 0 : index
    %78 = vector.load %arg2[%c8, %c0_69, %c0_70] : memref<9x64x128xbf16, #tpu.memory_space<vmem>>, vector<1x64x128xbf16>
    %79 = vector.shape_cast %78 : vector<1x64x128xbf16> to vector<64x128xbf16>
    %cst_71 = arith.constant dense<0.000000e+00> : vector<256x128xf32>
    %80 = tpu.matmul %77, %79, %cst_71 {dimension_numbers = #tpu.dot_dimension_numbers<[1], [0], [0], [1], [0, 0, 1, 1], [], []>} : vector<256x64xbf16>, vector<64x128xbf16>, vector<256x128xf32> -> vector<256x128xf32>
    %81 = arith.addf %72, %80 : vector<256x128xf32>
    %c0_72 = arith.constant 0 : index
    %c0_73 = arith.constant 0 : index
    %82 = vector.load %arg3[%c0_72, %c0_73] : memref<1x128xf32, #tpu.memory_space<vmem>>, vector<1x128xf32>
    %83 = vector.broadcast %82 : vector<1x128xf32> to vector<256x128xf32>
    %84 = arith.addf %81, %83 : vector<256x128xf32>
    %cst_74 = arith.constant 0.000000e+00 : f32
    %85 = vector.broadcast %cst_74 : f32 to vector<256x128xf32>
    %86 = arith.maximumf %84, %85 : vector<256x128xf32>
    %87 = arith.truncf %86 : vector<256x128xf32> to vector<256x128xbf16>
    %cst_75 = arith.constant 0.000000e+00 : bf16
    %88 = vector.broadcast %cst_75 : bf16 to vector<18x18x128xbf16>
    %c0_76 = arith.constant 0 : index
    %c0_77 = arith.constant 0 : index
    %c0_78 = arith.constant 0 : index
    %89 = vector.load %arg9[%c0_76, %c0_77, %c0_78] : memref<18x18x128xbf16, #tpu.memory_space<vmem>>, vector<18x18x128xbf16>
    tpu.vector_store %arg9[%c0_76, %c0_77, %c0_78], %88 {strides = array<i32>} : memref<18x18x128xbf16, #tpu.memory_space<vmem>>, vector<18x18x128xbf16>,
    %90 = vector.shape_cast %87 : vector<256x128xbf16> to vector<16x16x128xbf16>
    %c1_79 = arith.constant 1 : index
    %c1_80 = arith.constant 1 : index
    %c0_81 = arith.constant 0 : index
    %91 = vector.load %arg9[%c1_79, %c1_80, %c0_81] : memref<18x18x128xbf16, #tpu.memory_space<vmem>>, vector<16x16x128xbf16>
    tpu.vector_store %arg9[%c1_79, %c1_80, %c0_81], %90 {strides = array<i32>} : memref<18x18x128xbf16, #tpu.memory_space<vmem>>, vector<16x16x128xbf16>,
    %c0_82 = arith.constant 0 : index
    %c0_83 = arith.constant 0 : index
    %92 = vector.load %arg5[%c0_82, %c0_83] : memref<1x128xf32, #tpu.memory_space<vmem>>, vector<1x128xf32>
    %c0_84 = arith.constant 0 : index
    %c0_85 = arith.constant 0 : index
    %93 = vector.load %arg7[%c0_84, %c0_85] : memref<1x128xf32, #tpu.memory_space<vmem>>, vector<1x128xf32>
    %94 = arith.addf %92, %93 : vector<1x128xf32>
    %cst_86 = arith.constant 0.000000e+00 : f32
    %95 = vector.broadcast %cst_86 : f32 to vector<256x128xf32>
    %96 = vector.broadcast %94 : vector<1x128xf32> to vector<256x128xf32>
    %97 = arith.addf %95, %96 : vector<256x128xf32>
    %c0_87 = arith.constant 0 : index
    %c0_88 = arith.constant 0 : index
    %c0_89 = arith.constant 0 : index
    %c0_90 = arith.constant 0 : index
    %98 = vector.load %arg1[%c0_87, %c0_88, %c0_89, %c0_90] : memref<1x18x18x64xbf16, #tpu.memory_space<vmem>>, vector<1x16x16x64xbf16>
    %99 = vector.shape_cast %98 : vector<1x16x16x64xbf16> to vector<16x16x64xbf16>
    %100 = vector.shape_cast %99 : vector<16x16x64xbf16> to vector<256x64xbf16>
    %c0_91 = arith.constant 0 : index
    %c0_92 = arith.constant 0 : index
    %c0_93 = arith.constant 0 : index
    %101 = vector.load %arg6[%c0_91, %c0_92, %c0_93] : memref<9x64x128xbf16, #tpu.memory_space<vmem>>, vector<1x64x128xbf16>
    %102 = vector.shape_cast %101 : vector<1x64x128xbf16> to vector<64x128xbf16>
    %cst_94 = arith.constant dense<0.000000e+00> : vector<256x128xf32>
    %103 = tpu.matmul %100, %102, %cst_94 {dimension_numbers = #tpu.dot_dimension_numbers<[1], [0], [0], [1], [0, 0, 1, 1], [], []>} : vector<256x64xbf16>, vector<64x128xbf16>, vector<256x128xf32> -> vector<256x128xf32>
    %104 = arith.addf %97, %103 : vector<256x128xf32>
    %c0_95 = arith.constant 0 : index
    %c0_96 = arith.constant 0 : index
    %c1_97 = arith.constant 1 : index
    %c0_98 = arith.constant 0 : index
    %105 = vector.load %arg1[%c0_95, %c0_96, %c1_97, %c0_98] : memref<1x18x18x64xbf16, #tpu.memory_space<vmem>>, vector<1x16x16x64xbf16>
    %106 = vector.shape_cast %105 : vector<1x16x16x64xbf16> to vector<16x16x64xbf16>
    %107 = vector.shape_cast %106 : vector<16x16x64xbf16> to vector<256x64xbf16>
    %c1_99 = arith.constant 1 : index
    %c0_100 = arith.constant 0 : index
    %c0_101 = arith.constant 0 : index
    %108 = vector.load %arg6[%c1_99, %c0_100, %c0_101] : memref<9x64x128xbf16, #tpu.memory_space<vmem>>, vector<1x64x128xbf16>
    %109 = vector.shape_cast %108 : vector<1x64x128xbf16> to vector<64x128xbf16>
    %cst_102 = arith.constant dense<0.000000e+00> : vector<256x128xf32>
    %110 = tpu.matmul %107, %109, %cst_102 {dimension_numbers = #tpu.dot_dimension_numbers<[1], [0], [0], [1], [0, 0, 1, 1], [], []>} : vector<256x64xbf16>, vector<64x128xbf16>, vector<256x128xf32> -> vector<256x128xf32>
    %111 = arith.addf %104, %110 : vector<256x128xf32>
    %c0_103 = arith.constant 0 : index
    %c0_104 = arith.constant 0 : index
    %c2_105 = arith.constant 2 : index
    %c0_106 = arith.constant 0 : index
    %112 = vector.load %arg1[%c0_103, %c0_104, %c2_105, %c0_106] : memref<1x18x18x64xbf16, #tpu.memory_space<vmem>>, vector<1x16x16x64xbf16>
    %113 = vector.shape_cast %112 : vector<1x16x16x64xbf16> to vector<16x16x64xbf16>
    %114 = vector.shape_cast %113 : vector<16x16x64xbf16> to vector<256x64xbf16>
    %c2_107 = arith.constant 2 : index
    %c0_108 = arith.constant 0 : index
    %c0_109 = arith.constant 0 : index
    %115 = vector.load %arg6[%c2_107, %c0_108, %c0_109] : memref<9x64x128xbf16, #tpu.memory_space<vmem>>, vector<1x64x128xbf16>
    %116 = vector.shape_cast %115 : vector<1x64x128xbf16> to vector<64x128xbf16>
    %cst_110 = arith.constant dense<0.000000e+00> : vector<256x128xf32>
    %117 = tpu.matmul %114, %116, %cst_110 {dimension_numbers = #tpu.dot_dimension_numbers<[1], [0], [0], [1], [0, 0, 1, 1], [], []>} : vector<256x64xbf16>, vector<64x128xbf16>, vector<256x128xf32> -> vector<256x128xf32>
    %118 = arith.addf %111, %117 : vector<256x128xf32>
    %c0_111 = arith.constant 0 : index
    %c1_112 = arith.constant 1 : index
    %c0_113 = arith.constant 0 : index
    %c0_114 = arith.constant 0 : index
    %119 = vector.load %arg1[%c0_111, %c1_112, %c0_113, %c0_114] : memref<1x18x18x64xbf16, #tpu.memory_space<vmem>>, vector<1x16x16x64xbf16>
    %120 = vector.shape_cast %119 : vector<1x16x16x64xbf16> to vector<16x16x64xbf16>
    %121 = vector.shape_cast %120 : vector<16x16x64xbf16> to vector<256x64xbf16>
    %c3_115 = arith.constant 3 : index
    %c0_116 = arith.constant 0 : index
    %c0_117 = arith.constant 0 : index
    %122 = vector.load %arg6[%c3_115, %c0_116, %c0_117] : memref<9x64x128xbf16, #tpu.memory_space<vmem>>, vector<1x64x128xbf16>
    %123 = vector.shape_cast %122 : vector<1x64x128xbf16> to vector<64x128xbf16>
    %cst_118 = arith.constant dense<0.000000e+00> : vector<256x128xf32>
    %124 = tpu.matmul %121, %123, %cst_118 {dimension_numbers = #tpu.dot_dimension_numbers<[1], [0], [0], [1], [0, 0, 1, 1], [], []>} : vector<256x64xbf16>, vector<64x128xbf16>, vector<256x128xf32> -> vector<256x128xf32>
    %125 = arith.addf %118, %124 : vector<256x128xf32>
    %c0_119 = arith.constant 0 : index
    %c1_120 = arith.constant 1 : index
    %c1_121 = arith.constant 1 : index
    %c0_122 = arith.constant 0 : index
    %126 = vector.load %arg1[%c0_119, %c1_120, %c1_121, %c0_122] : memref<1x18x18x64xbf16, #tpu.memory_space<vmem>>, vector<1x16x16x64xbf16>
    %127 = vector.shape_cast %126 : vector<1x16x16x64xbf16> to vector<16x16x64xbf16>
    %128 = vector.shape_cast %127 : vector<16x16x64xbf16> to vector<256x64xbf16>
    %c4_123 = arith.constant 4 : index
    %c0_124 = arith.constant 0 : index
    %c0_125 = arith.constant 0 : index
    %129 = vector.load %arg6[%c4_123, %c0_124, %c0_125] : memref<9x64x128xbf16, #tpu.memory_space<vmem>>, vector<1x64x128xbf16>
    %130 = vector.shape_cast %129 : vector<1x64x128xbf16> to vector<64x128xbf16>
    %cst_126 = arith.constant dense<0.000000e+00> : vector<256x128xf32>
    %131 = tpu.matmul %128, %130, %cst_126 {dimension_numbers = #tpu.dot_dimension_numbers<[1], [0], [0], [1], [0, 0, 1, 1], [], []>} : vector<256x64xbf16>, vector<64x128xbf16>, vector<256x128xf32> -> vector<256x128xf32>
    %132 = arith.addf %125, %131 : vector<256x128xf32>
    %c0_127 = arith.constant 0 : index
    %c1_128 = arith.constant 1 : index
    %c2_129 = arith.constant 2 : index
    %c0_130 = arith.constant 0 : index
    %133 = vector.load %arg1[%c0_127, %c1_128, %c2_129, %c0_130] : memref<1x18x18x64xbf16, #tpu.memory_space<vmem>>, vector<1x16x16x64xbf16>
    %134 = vector.shape_cast %133 : vector<1x16x16x64xbf16> to vector<16x16x64xbf16>
    %135 = vector.shape_cast %134 : vector<16x16x64xbf16> to vector<256x64xbf16>
    %c5_131 = arith.constant 5 : index
    %c0_132 = arith.constant 0 : index
    %c0_133 = arith.constant 0 : index
    %136 = vector.load %arg6[%c5_131, %c0_132, %c0_133] : memref<9x64x128xbf16, #tpu.memory_space<vmem>>, vector<1x64x128xbf16>
    %137 = vector.shape_cast %136 : vector<1x64x128xbf16> to vector<64x128xbf16>
    %cst_134 = arith.constant dense<0.000000e+00> : vector<256x128xf32>
    %138 = tpu.matmul %135, %137, %cst_134 {dimension_numbers = #tpu.dot_dimension_numbers<[1], [0], [0], [1], [0, 0, 1, 1], [], []>} : vector<256x64xbf16>, vector<64x128xbf16>, vector<256x128xf32> -> vector<256x128xf32>
    %139 = arith.addf %132, %138 : vector<256x128xf32>
    %c0_135 = arith.constant 0 : index
    %c2_136 = arith.constant 2 : index
    %c0_137 = arith.constant 0 : index
    %c0_138 = arith.constant 0 : index
    %140 = vector.load %arg1[%c0_135, %c2_136, %c0_137, %c0_138] : memref<1x18x18x64xbf16, #tpu.memory_space<vmem>>, vector<1x16x16x64xbf16>
    %141 = vector.shape_cast %140 : vector<1x16x16x64xbf16> to vector<16x16x64xbf16>
    %142 = vector.shape_cast %141 : vector<16x16x64xbf16> to vector<256x64xbf16>
    %c6_139 = arith.constant 6 : index
    %c0_140 = arith.constant 0 : index
    %c0_141 = arith.constant 0 : index
    %143 = vector.load %arg6[%c6_139, %c0_140, %c0_141] : memref<9x64x128xbf16, #tpu.memory_space<vmem>>, vector<1x64x128xbf16>
    %144 = vector.shape_cast %143 : vector<1x64x128xbf16> to vector<64x128xbf16>
    %cst_142 = arith.constant dense<0.000000e+00> : vector<256x128xf32>
    %145 = tpu.matmul %142, %144, %cst_142 {dimension_numbers = #tpu.dot_dimension_numbers<[1], [0], [0], [1], [0, 0, 1, 1], [], []>} : vector<256x64xbf16>, vector<64x128xbf16>, vector<256x128xf32> -> vector<256x128xf32>
    %146 = arith.addf %139, %145 : vector<256x128xf32>
    %c0_143 = arith.constant 0 : index
    %c2_144 = arith.constant 2 : index
    %c1_145 = arith.constant 1 : index
    %c0_146 = arith.constant 0 : index
    %147 = vector.load %arg1[%c0_143, %c2_144, %c1_145, %c0_146] : memref<1x18x18x64xbf16, #tpu.memory_space<vmem>>, vector<1x16x16x64xbf16>
    %148 = vector.shape_cast %147 : vector<1x16x16x64xbf16> to vector<16x16x64xbf16>
    %149 = vector.shape_cast %148 : vector<16x16x64xbf16> to vector<256x64xbf16>
    %c7_147 = arith.constant 7 : index
    %c0_148 = arith.constant 0 : index
    %c0_149 = arith.constant 0 : index
    %150 = vector.load %arg6[%c7_147, %c0_148, %c0_149] : memref<9x64x128xbf16, #tpu.memory_space<vmem>>, vector<1x64x128xbf16>
    %151 = vector.shape_cast %150 : vector<1x64x128xbf16> to vector<64x128xbf16>
    %cst_150 = arith.constant dense<0.000000e+00> : vector<256x128xf32>
    %152 = tpu.matmul %149, %151, %cst_150 {dimension_numbers = #tpu.dot_dimension_numbers<[1], [0], [0], [1], [0, 0, 1, 1], [], []>} : vector<256x64xbf16>, vector<64x128xbf16>, vector<256x128xf32> -> vector<256x128xf32>
    %153 = arith.addf %146, %152 : vector<256x128xf32>
    %c0_151 = arith.constant 0 : index
    %c2_152 = arith.constant 2 : index
    %c2_153 = arith.constant 2 : index
    %c0_154 = arith.constant 0 : index
    %154 = vector.load %arg1[%c0_151, %c2_152, %c2_153, %c0_154] : memref<1x18x18x64xbf16, #tpu.memory_space<vmem>>, vector<1x16x16x64xbf16>
    %155 = vector.shape_cast %154 : vector<1x16x16x64xbf16> to vector<16x16x64xbf16>
    %156 = vector.shape_cast %155 : vector<16x16x64xbf16> to vector<256x64xbf16>
    %c8_155 = arith.constant 8 : index
    %c0_156 = arith.constant 0 : index
    %c0_157 = arith.constant 0 : index
    %157 = vector.load %arg6[%c8_155, %c0_156, %c0_157] : memref<9x64x128xbf16, #tpu.memory_space<vmem>>, vector<1x64x128xbf16>
    %158 = vector.shape_cast %157 : vector<1x64x128xbf16> to vector<64x128xbf16>
    %cst_158 = arith.constant dense<0.000000e+00> : vector<256x128xf32>
    %159 = tpu.matmul %156, %158, %cst_158 {dimension_numbers = #tpu.dot_dimension_numbers<[1], [0], [0], [1], [0, 0, 1, 1], [], []>} : vector<256x64xbf16>, vector<64x128xbf16>, vector<256x128xf32> -> vector<256x128xf32>
    %160 = arith.addf %153, %159 : vector<256x128xf32>
    %c0_159 = arith.constant 0 : index
    %c0_160 = arith.constant 0 : index
    %c0_161 = arith.constant 0 : index
    %161 = vector.load %arg9[%c0_159, %c0_160, %c0_161] : memref<18x18x128xbf16, #tpu.memory_space<vmem>>, vector<16x16x128xbf16>
    %162 = vector.shape_cast %161 : vector<16x16x128xbf16> to vector<256x128xbf16>
    %c0_162 = arith.constant 0 : index
    %c0_163 = arith.constant 0 : index
    %c0_164 = arith.constant 0 : index
    %163 = vector.load %arg4[%c0_162, %c0_163, %c0_164] : memref<9x128x128xbf16, #tpu.memory_space<vmem>>, vector<1x128x128xbf16>
    %164 = vector.shape_cast %163 : vector<1x128x128xbf16> to vector<128x128xbf16>
    %cst_165 = arith.constant dense<0.000000e+00> : vector<256x128xf32>
    %165 = tpu.matmul %162, %164, %cst_165 {dimension_numbers = #tpu.dot_dimension_numbers<[1], [0], [0], [1], [0, 0, 1, 1], [], []>} : vector<256x128xbf16>, vector<128x128xbf16>, vector<256x128xf32> -> vector<256x128xf32>
    %166 = arith.addf %160, %165 : vector<256x128xf32>
    %c0_166 = arith.constant 0 : index
    %c1_167 = arith.constant 1 : index
    %c0_168 = arith.constant 0 : index
    %167 = vector.load %arg9[%c0_166, %c1_167, %c0_168] : memref<18x18x128xbf16, #tpu.memory_space<vmem>>, vector<16x16x128xbf16>
    %168 = vector.shape_cast %167 : vector<16x16x128xbf16> to vector<256x128xbf16>
    %c1_169 = arith.constant 1 : index
    %c0_170 = arith.constant 0 : index
    %c0_171 = arith.constant 0 : index
    %169 = vector.load %arg4[%c1_169, %c0_170, %c0_171] : memref<9x128x128xbf16, #tpu.memory_space<vmem>>, vector<1x128x128xbf16>
    %170 = vector.shape_cast %169 : vector<1x128x128xbf16> to vector<128x128xbf16>
    %cst_172 = arith.constant dense<0.000000e+00> : vector<256x128xf32>
    %171 = tpu.matmul %168, %170, %cst_172 {dimension_numbers = #tpu.dot_dimension_numbers<[1], [0], [0], [1], [0, 0, 1, 1], [], []>} : vector<256x128xbf16>, vector<128x128xbf16>, vector<256x128xf32> -> vector<256x128xf32>
    %172 = arith.addf %166, %171 : vector<256x128xf32>
    %c0_173 = arith.constant 0 : index
    %c2_174 = arith.constant 2 : index
    %c0_175 = arith.constant 0 : index
    %173 = vector.load %arg9[%c0_173, %c2_174, %c0_175] : memref<18x18x128xbf16, #tpu.memory_space<vmem>>, vector<16x16x128xbf16>
    %174 = vector.shape_cast %173 : vector<16x16x128xbf16> to vector<256x128xbf16>
    %c2_176 = arith.constant 2 : index
    %c0_177 = arith.constant 0 : index
    %c0_178 = arith.constant 0 : index
    %175 = vector.load %arg4[%c2_176, %c0_177, %c0_178] : memref<9x128x128xbf16, #tpu.memory_space<vmem>>, vector<1x128x128xbf16>
    %176 = vector.shape_cast %175 : vector<1x128x128xbf16> to vector<128x128xbf16>
    %cst_179 = arith.constant dense<0.000000e+00> : vector<256x128xf32>
    %177 = tpu.matmul %174, %176, %cst_179 {dimension_numbers = #tpu.dot_dimension_numbers<[1], [0], [0], [1], [0, 0, 1, 1], [], []>} : vector<256x128xbf16>, vector<128x128xbf16>, vector<256x128xf32> -> vector<256x128xf32>
    %178 = arith.addf %172, %177 : vector<256x128xf32>
    %c1_180 = arith.constant 1 : index
    %c0_181 = arith.constant 0 : index
    %c0_182 = arith.constant 0 : index
    %179 = vector.load %arg9[%c1_180, %c0_181, %c0_182] : memref<18x18x128xbf16, #tpu.memory_space<vmem>>, vector<16x16x128xbf16>
    %180 = vector.shape_cast %179 : vector<16x16x128xbf16> to vector<256x128xbf16>
    %c3_183 = arith.constant 3 : index
    %c0_184 = arith.constant 0 : index
    %c0_185 = arith.constant 0 : index
    %181 = vector.load %arg4[%c3_183, %c0_184, %c0_185] : memref<9x128x128xbf16, #tpu.memory_space<vmem>>, vector<1x128x128xbf16>
    %182 = vector.shape_cast %181 : vector<1x128x128xbf16> to vector<128x128xbf16>
    %cst_186 = arith.constant dense<0.000000e+00> : vector<256x128xf32>
    %183 = tpu.matmul %180, %182, %cst_186 {dimension_numbers = #tpu.dot_dimension_numbers<[1], [0], [0], [1], [0, 0, 1, 1], [], []>} : vector<256x128xbf16>, vector<128x128xbf16>, vector<256x128xf32> -> vector<256x128xf32>
    %184 = arith.addf %178, %183 : vector<256x128xf32>
    %c1_187 = arith.constant 1 : index
    %c1_188 = arith.constant 1 : index
    %c0_189 = arith.constant 0 : index
    %185 = vector.load %arg9[%c1_187, %c1_188, %c0_189] : memref<18x18x128xbf16, #tpu.memory_space<vmem>>, vector<16x16x128xbf16>
    %186 = vector.shape_cast %185 : vector<16x16x128xbf16> to vector<256x128xbf16>
    %c4_190 = arith.constant 4 : index
    %c0_191 = arith.constant 0 : index
    %c0_192 = arith.constant 0 : index
    %187 = vector.load %arg4[%c4_190, %c0_191, %c0_192] : memref<9x128x128xbf16, #tpu.memory_space<vmem>>, vector<1x128x128xbf16>
    %188 = vector.shape_cast %187 : vector<1x128x128xbf16> to vector<128x128xbf16>
    %cst_193 = arith.constant dense<0.000000e+00> : vector<256x128xf32>
    %189 = tpu.matmul %186, %188, %cst_193 {dimension_numbers = #tpu.dot_dimension_numbers<[1], [0], [0], [1], [0, 0, 1, 1], [], []>} : vector<256x128xbf16>, vector<128x128xbf16>, vector<256x128xf32> -> vector<256x128xf32>
    %190 = arith.addf %184, %189 : vector<256x128xf32>
    %c1_194 = arith.constant 1 : index
    %c2_195 = arith.constant 2 : index
    %c0_196 = arith.constant 0 : index
    %191 = vector.load %arg9[%c1_194, %c2_195, %c0_196] : memref<18x18x128xbf16, #tpu.memory_space<vmem>>, vector<16x16x128xbf16>
    %192 = vector.shape_cast %191 : vector<16x16x128xbf16> to vector<256x128xbf16>
    %c5_197 = arith.constant 5 : index
    %c0_198 = arith.constant 0 : index
    %c0_199 = arith.constant 0 : index
    %193 = vector.load %arg4[%c5_197, %c0_198, %c0_199] : memref<9x128x128xbf16, #tpu.memory_space<vmem>>, vector<1x128x128xbf16>
    %194 = vector.shape_cast %193 : vector<1x128x128xbf16> to vector<128x128xbf16>
    %cst_200 = arith.constant dense<0.000000e+00> : vector<256x128xf32>
    %195 = tpu.matmul %192, %194, %cst_200 {dimension_numbers = #tpu.dot_dimension_numbers<[1], [0], [0], [1], [0, 0, 1, 1], [], []>} : vector<256x128xbf16>, vector<128x128xbf16>, vector<256x128xf32> -> vector<256x128xf32>
    %196 = arith.addf %190, %195 : vector<256x128xf32>
    %c2_201 = arith.constant 2 : index
    %c0_202 = arith.constant 0 : index
    %c0_203 = arith.constant 0 : index
    %197 = vector.load %arg9[%c2_201, %c0_202, %c0_203] : memref<18x18x128xbf16, #tpu.memory_space<vmem>>, vector<16x16x128xbf16>
    %198 = vector.shape_cast %197 : vector<16x16x128xbf16> to vector<256x128xbf16>
    %c6_204 = arith.constant 6 : index
    %c0_205 = arith.constant 0 : index
    %c0_206 = arith.constant 0 : index
    %199 = vector.load %arg4[%c6_204, %c0_205, %c0_206] : memref<9x128x128xbf16, #tpu.memory_space<vmem>>, vector<1x128x128xbf16>
    %200 = vector.shape_cast %199 : vector<1x128x128xbf16> to vector<128x128xbf16>
    %cst_207 = arith.constant dense<0.000000e+00> : vector<256x128xf32>
    %201 = tpu.matmul %198, %200, %cst_207 {dimension_numbers = #tpu.dot_dimension_numbers<[1], [0], [0], [1], [0, 0, 1, 1], [], []>} : vector<256x128xbf16>, vector<128x128xbf16>, vector<256x128xf32> -> vector<256x128xf32>
    %202 = arith.addf %196, %201 : vector<256x128xf32>
    %c2_208 = arith.constant 2 : index
    %c1_209 = arith.constant 1 : index
    %c0_210 = arith.constant 0 : index
    %203 = vector.load %arg9[%c2_208, %c1_209, %c0_210] : memref<18x18x128xbf16, #tpu.memory_space<vmem>>, vector<16x16x128xbf16>
    %204 = vector.shape_cast %203 : vector<16x16x128xbf16> to vector<256x128xbf16>
    %c7_211 = arith.constant 7 : index
    %c0_212 = arith.constant 0 : index
    %c0_213 = arith.constant 0 : index
    %205 = vector.load %arg4[%c7_211, %c0_212, %c0_213] : memref<9x128x128xbf16, #tpu.memory_space<vmem>>, vector<1x128x128xbf16>
    %206 = vector.shape_cast %205 : vector<1x128x128xbf16> to vector<128x128xbf16>
    %cst_214 = arith.constant dense<0.000000e+00> : vector<256x128xf32>
    %207 = tpu.matmul %204, %206, %cst_214 {dimension_numbers = #tpu.dot_dimension_numbers<[1], [0], [0], [1], [0, 0, 1, 1], [], []>} : vector<256x128xbf16>, vector<128x128xbf16>, vector<256x128xf32> -> vector<256x128xf32>
    %208 = arith.addf %202, %207 : vector<256x128xf32>
    %c2_215 = arith.constant 2 : index
    %c2_216 = arith.constant 2 : index
    %c0_217 = arith.constant 0 : index
    %209 = vector.load %arg9[%c2_215, %c2_216, %c0_217] : memref<18x18x128xbf16, #tpu.memory_space<vmem>>, vector<16x16x128xbf16>
    %210 = vector.shape_cast %209 : vector<16x16x128xbf16> to vector<256x128xbf16>
    %c8_218 = arith.constant 8 : index
    %c0_219 = arith.constant 0 : index
    %c0_220 = arith.constant 0 : index
    %211 = vector.load %arg4[%c8_218, %c0_219, %c0_220] : memref<9x128x128xbf16, #tpu.memory_space<vmem>>, vector<1x128x128xbf16>
    %212 = vector.shape_cast %211 : vector<1x128x128xbf16> to vector<128x128xbf16>
    %cst_221 = arith.constant dense<0.000000e+00> : vector<256x128xf32>
    %213 = tpu.matmul %210, %212, %cst_221 {dimension_numbers = #tpu.dot_dimension_numbers<[1], [0], [0], [1], [0, 0, 1, 1], [], []>} : vector<256x128xbf16>, vector<128x128xbf16>, vector<256x128xf32> -> vector<256x128xf32>
    %214 = arith.addf %208, %213 : vector<256x128xf32>
    %215 = vector.shape_cast %214 : vector<256x128xf32> to vector<16x16x128xf32>
    %c0_222 = arith.constant 0 : index
    %c0_223 = arith.constant 0 : index
    %c0_224 = arith.constant 0 : index
    %c0_225 = arith.constant 0 : index
    %216 = vector.load %arg8[%c0_222, %c0_223, %c0_224, %c0_225] : memref<1x16x16x128xf32, #tpu.memory_space<vmem>>, vector<1x16x16x128xf32>
    %217 = vector.shape_cast %216 : vector<1x16x16x128xf32> to vector<16x16x128xf32>
    %218 = vector.shape_cast %215 : vector<16x16x128xf32> to vector<1x16x16x128xf32>
    tpu.vector_store %arg8[%c0_222, %c0_223, %c0_224, %c0_225], %218 {strides = array<i32>} : memref<1x16x16x128xf32, #tpu.memory_space<vmem>>, vector<1x16x16x128xf32>,
    return
  }
  func.func @transform_0(%arg0: i32) -> (i32, i32, i32, i32) {
    %c0_i32 = arith.constant 0 : i32
    %c0_i32_0 = arith.constant 0 : i32
    %c0_i32_1 = arith.constant 0 : i32
    %c0_i32_2 = arith.constant 0 : i32
    return %arg0, %c0_i32, %c0_i32_0, %c0_i32_1 : i32, i32, i32, i32
  }
  func.func @transform_1(%arg0: i32) -> (i32, i32, i32) {
    %c0_i32 = arith.constant 0 : i32
    %c0_i32_0 = arith.constant 0 : i32
    %c0_i32_1 = arith.constant 0 : i32
    %c0_i32_2 = arith.constant 0 : i32
    return %c0_i32, %c0_i32_0, %c0_i32_1 : i32, i32, i32
  }
  func.func @transform_2(%arg0: i32) -> (i32, i32) {
    %c0_i32 = arith.constant 0 : i32
    %c0_i32_0 = arith.constant 0 : i32
    %c0_i32_1 = arith.constant 0 : i32
    return %c0_i32, %c0_i32_0 : i32, i32
  }
  func.func @transform_3(%arg0: i32) -> (i32, i32, i32) {
    %c0_i32 = arith.constant 0 : i32
    %c0_i32_0 = arith.constant 0 : i32
    %c0_i32_1 = arith.constant 0 : i32
    %c0_i32_2 = arith.constant 0 : i32
    return %c0_i32, %c0_i32_0, %c0_i32_1 : i32, i32, i32
  }
  func.func @transform_4(%arg0: i32) -> (i32, i32) {
    %c0_i32 = arith.constant 0 : i32
    %c0_i32_0 = arith.constant 0 : i32
    %c0_i32_1 = arith.constant 0 : i32
    return %c0_i32, %c0_i32_0 : i32, i32
  }
  func.func @transform_5(%arg0: i32) -> (i32, i32, i32) {
    %c0_i32 = arith.constant 0 : i32
    %c0_i32_0 = arith.constant 0 : i32
    %c0_i32_1 = arith.constant 0 : i32
    %c0_i32_2 = arith.constant 0 : i32
    return %c0_i32, %c0_i32_0, %c0_i32_1 : i32, i32, i32
  }
  func.func @transform_6(%arg0: i32) -> (i32, i32) {
    %c0_i32 = arith.constant 0 : i32
    %c0_i32_0 = arith.constant 0 : i32
    %c0_i32_1 = arith.constant 0 : i32
    return %c0_i32, %c0_i32_0 : i32, i32
  }
  func.func @transform_7(%arg0: i32) -> (i32, i32, i32, i32) {
    %c0_i32 = arith.constant 0 : i32
    %c0_i32_0 = arith.constant 0 : i32
    %c0_i32_1 = arith.constant 0 : i32
    %c0_i32_2 = arith.constant 0 : i32
    return %arg0, %c0_i32, %c0_i32_0, %c0_i32_1 : i32, i32, i32, i32
  }
}

</mosaic_0001>

<bundles_post_ra>
// kernel: group_res_block_forward.1
= control target key start
LH: loop header
LB: loop body
LE: loop exit
PB: predicated region body
PF: predicated region fallthrough
CT: control target
= control target key end

     0   :  { %12 = vsyncpa [#allocation4], 0  ;;  %s27207_s0 = inlined_call_operand.vmem [shape: bf16[4,18,18,64], index: 0, kind: input, shape index: {}]   ;;  %s27208_s1 = inlined_call_operand.vmem [shape: bf16[9,64,128], index: 1, kind: input, shape index: {}]   ;;  %s27209_s2 = inlined_call_operand.vmem [shape: f32[1,128], index: 2, kind: input, shape index: {}]   ;;  %s27210_s3 = inlined_call_operand.vmem [shape: bf16[9,128,128], index: 3, kind: input, shape index: {}]   ;;  %s27211_s4 = inlined_call_operand.vmem [shape: f32[1,128], index: 4, kind: input, shape index: {}]   ;;  %s27212_s5 = inlined_call_operand.vmem [shape: bf16[9,64,128], index: 5, kind: input, shape index: {}]   ;;  %s27213_s6 = inlined_call_operand.vmem [shape: f32[1,128], index: 6, kind: input, shape index: {}]   ;;  %s27214_s7 = inlined_call_operand.hbm [shape: f32[4,16,16,128], index: 7, kind: output, shape index: {}]  }
   0x1   :  { %14 = vsyncpa [#allocation4 + $0x1], 0  ;;  %s21202_s24 = smov 0   ;;  %s21204_s25 = smov 0  }
   0x2   :  { %s21206_s26 = smov 0   ;;  %s21208_s27 = smov 0  }
   0x3 LB: > { %s21223_s28 = sadd.s32 4294967295, %s21156_s27   ;;  %s16383_s29 = sadd.s32 4294967294, %s21156_s27   ;;  %s21156_s27 = sphi %s21208_s27, %s27630_s27   ;;  %s21152_s26 = sphi %s21206_s26, %s27629_s26   ;;  %s21148_s25 = sphi %s21204_s25, %s27628_s25   ;;  %s21144_s24 = sphi %s21202_s24, %s27627_s24  }
   0x4   : > { %s21227_s30 = sadd.s32 1, %s21156_s27   ;;  %s179_s8 = sadd.s32 1, %s21152_s26 }
   0x5   : > { %s176_s9 = ssub.s32 %s21156_s27, %s21227_s30  ;;  %p189_p0 = scmp.ne.s32.totalorder %s21152_s26, %s21148_s25 }
   0x6   : > { %p177_p1 = scmp.eq.s32.totalorder %s176_s9, 0  ;;  %p190_p2 = scmp.eq.s32.totalorder %s21223_s28, 3 }
   0x7   : > { %p195_p3 = scmp.ne.s32.totalorder %s21148_s25, %s21144_s24  ;;  %p196_p4 = scmp.eq.s32.totalorder %s16383_s29, 3 }
   0x8   : > { %s21238_s10 = scalar_select %p177_p1, %s21152_s26, %s179_s8  }
   0x9   : > { %p21240_p5 = por %p190_p2, %p189_p0  ;;  %p21244_p6 = por %p196_p4, %p195_p3 }
   0xa   : > { %p16386_p7 = scmp.ge.s32.totalorder %s21156_s27, 1  ;;  %p240_p8 = scmp.lt.s32.totalorder %s21156_s27, 5 }
   0xc   : > { %p241_p9 = pnand %p16386_p7, %p240_p8 }
   0xe   : > { %244 = sbr.rel (%p241_p9) target bundleno = 1669 (0x685), region = 48 }
  0x15   : > { %v20719_v0 = vld [vmem:[%s27208_s1 + $0x20] sm:$0xff]   ;;  %p272_p10 = scmp.lt.s32.totalorder %s21223_s28, 3  ;;  %v21257_v1 = vld [vmem:[%s27208_s1 + $0x28] sm:$0xff]   ;;  %v27215_v2 = vmov 0   ;;  %v20721_v3 = vld [vmem:[%s27208_s1 + $0x30] sm:$0xff]   ;;  %vm930_vm3 = vcmask 523264  }
  0x16   : > { %18684 = vmatprep.subr.bf16.mxu0 %v20719_v0  ;;  %5863 = vst [vmem:[#allocation2] sm:$0xf] %v27215_v2  ;;  %5864 = vst [vmem:[#allocation2 + $0x4] sm:$0xf] %v27215_v2  ;;  %vm366_vm0 = vsmask.f32 3328 }
  0x17   : > { %s21260_s17 = scalar_select %p272_p10, %s21223_s28, 3  ;;  %5865 = vst [vmem:[#allocation2 + $0x8] sm:$0x1] %v27215_v2  ;;  %5866 = vst [vmem:[#allocation2 + $0xc] sm:$0xf] %v27215_v2  ;;  %18685 = vmatpush3.bf16.msra.mxu0 %v20719_v0  ;;  %v20722_v4 = vld [vmem:[%s27208_s1 + $0x38] sm:$0xff]  }
  0x18   : > { %5867 = vst [vmem:[#allocation2 + $0x10] sm:$0xf] %v27215_v2  ;;  %5868 = vst [vmem:[#allocation2 + $0x14] sm:$0x1] %v27215_v2  ;;  %18686 = vmatprep.subr.bf16.mxu0 %v21257_v1  ;;  %vm367_vm1 = vsmask.f32 7440 }
  0x19   : > { %5869 = vst [vmem:[#allocation2 + $0x18] sm:$0xf] %v27215_v2  ;;  %5870 = vst [vmem:[#allocation2 + $0x1c] sm:$0xf] %v27215_v2  ;;  %s20676_s20 = smul.u32 216, %s21260_s17  ;;  %v21354_v26 = vld [vmem:[%s27208_s1] sm:$0xff]  }
  0x1a   : > { %5871 = vst [vmem:[#allocation2 + $0x20] sm:$0x1] %v27215_v2  ;;  %5872 = vst [vmem:[#allocation2 + $0x24] sm:$0xf] %v27215_v2  ;;  %vm1517_vm4 = vcmask 1042432   ;;  %vm1518_vm5 = vcmask 1046532  }
  0x1b   : > { %5873 = vst [vmem:[#allocation2 + $0x28] sm:$0xf] %v27215_v2  ;;  %5874 = vst [vmem:[#allocation2 + $0x2c] sm:$0x1] %v27215_v2  ;;  %s21327_s8 = scalar_lea.vmem %s27207_s0, %s20676_s20  ;;  %18687 = vmatpush3.bf16.msra.mxu0 %v21257_v1  ;;  %vm6322_vm7 = vsmask.f32 7938 }
  0x1c   : > { %5875 = vst [vmem:[#allocation2 + $0x30] sm:$0xf] %v27215_v2  ;;  %5876 = vst [vmem:[#allocation2 + $0x34] sm:$0xf] %v27215_v2  ;;  %v21331_v5 = vld [vmem:[%s21327_s8] sm:$0xf]  ;;  %18688 = vmatprep.subr.bf16.mxu0 %v20721_v3 }
  0x1d   : > { %5877 = vst [vmem:[#allocation2 + $0x38] sm:$0x1] %v27215_v2  ;;  %5878 = vst [vmem:[#allocation2 + $0x3c] sm:$0xf] %v27215_v2  ;;  %v21334_v6 = vld [vmem:[%s21327_s8 + $0x4] sm:$0xf] }
  0x1e   : > { %5879 = vst [vmem:[#allocation2 + $0x40] sm:$0xf] %v27215_v2  ;;  %5880 = vst [vmem:[#allocation2 + $0x44] sm:$0x1] %v27215_v2  ;;  %v350_v7 = vld [vmem:[%s21327_s8 + $0x8] sm:$0x1] }
  0x1f   : > { %5881 = vst [vmem:[#allocation2 + $0x48] sm:$0xf] %v27215_v2  ;;  %5882 = vst [vmem:[#allocation2 + $0x4c] sm:$0xf] %v27215_v2  ;;  %v370_v8 = vshrl.u32 %v21331_v5, 16  ;;  %v373_v9 = vshll.u32 %v21331_v5, 16  ;;  %18689 = vmatpush3.bf16.msra.mxu0 %v20721_v3 }
  0x20   : > { %5883 = vst [vmem:[#allocation2 + $0x50] sm:$0x1] %v27215_v2  ;;  %5884 = vst [vmem:[#allocation2 + $0x54] sm:$0xf] %v27215_v2  ;;  %v379_v10 = vshll.u32 %v21334_v6, 16  ;;  %v383_v11 = vshrl.u32 %v21334_v6, 16  ;;  %18690 = vmatprep.subr.bf16.mxu0 %v20722_v4 }
  0x21   : > { %5885 = vst [vmem:[#allocation2 + $0x58] sm:$0xf] %v27215_v2  ;;  %5886 = vst [vmem:[#allocation2 + $0x5c] sm:$0x1] %v27215_v2  ;;  %v21342_v12 = vld [vmem:[%s21327_s8 + $0xc] sm:$0xf] }
  0x22   : > { %5887 = vst [vmem:[#allocation2 + $0x60] sm:$0xf] %v27215_v2  ;;  %5888 = vst [vmem:[#allocation2 + $0x64] sm:$0xf] %v27215_v2  ;;  %v389_v13 = vshll.u32 %v350_v7, 16  ;;  %v372_v16 = vrot.slane %v370_v8, 4 }
  0x23   : > { %5889 = vst [vmem:[#allocation2 + $0x68] sm:$0x1] %v27215_v2  ;;  %5890 = vst [vmem:[#allocation2 + $0x6c] sm:$0xf] %v27215_v2  ;;  %v21345_v14 = vld [vmem:[%s21327_s8 + $0x10] sm:$0xf]  ;;  %18691 = vmatpush3.bf16.msra.mxu0 %v20722_v4 }
  0x24   : > { %5891 = vst [vmem:[#allocation2 + $0x70] sm:$0xf] %v27215_v2  ;;  %5892 = vst [vmem:[#allocation2 + $0x74] sm:$0x1] %v27215_v2  ;;  %v351_v15 = vld [vmem:[%s21327_s8 + $0x14] sm:$0x1]  ;;  %18724 = vmatprep.subr.bf16.mxu0 %v21354_v26 }
  0x25   : > { %5893 = vst [vmem:[#allocation2 + $0x78] sm:$0xf] %v27215_v2  ;;  %5894 = vst [vmem:[#allocation2 + $0x7c] sm:$0xf] %v27215_v2  ;;  %v375_v17 = vrot.slane %v373_v9, 5  ;;  %v381_v18 = vrot.slane %v379_v10, 5 }
  0x26   : > { %5895 = vst [vmem:[#allocation2 + $0x80] sm:$0x1] %v27215_v2  ;;  %5896 = vst [vmem:[#allocation2 + $0x84] sm:$0xf] %v27215_v2  ;;  %v385_v19 = vrot.slane %v383_v11, 4  ;;  %v391_v20 = vrot.slane %v389_v13, 5 }
  0x27   : > { %5897 = vst [vmem:[#allocation2 + $0x88] sm:$0xf] %v27215_v2  ;;  %5898 = vst [vmem:[#allocation2 + $0x8c] sm:$0x1] %v27215_v2  ;;  %v394_v21 = vshrl.u32 %v21342_v12, 16  ;;  %v397_v22 = vshll.u32 %v21342_v12, 16  ;;  %v376_v24 = vor.u32 %v375_v17, %v372_v16 }
  0x28   : > { %5899 = vst [vmem:[#allocation2 + $0x90] sm:$0xf] %v27215_v2  ;;  %5900 = vst [vmem:[#allocation2 + $0x94] sm:$0xf] %v27215_v2  ;;  %v403_v23 = vshll.u32 %v21345_v14, 16  ;;  %v386_v25 = vor.u32 %v385_v19, %v381_v18  ;;  %v407_v27 = vshrl.u32 %v21345_v14, 16 }
  0x29   : > { %5901 = vst [vmem:[#allocation2 + $0x98] sm:$0x1] %v27215_v2  ;;  %5902 = vst [vmem:[#allocation2 + $0x9c] sm:$0xf] %v27215_v2  ;;  %v413_v28 = vshll.u32 %v351_v15, 16  ;;  %v396_v31 = vrot.slane %v394_v21, 4 }
  0x2a   : > { %5903 = vst [vmem:[#allocation2 + $0xa0] sm:$0xf] %v27215_v2  ;;  %5904 = vst [vmem:[#allocation2 + $0xa4] sm:$0x1] %v27215_v2  ;;  %v21358_v29 = vld [vmem:[%s21327_s8 + $0x18] sm:$0xf] }
  0x2b   : > { %5905 = vst [vmem:[#allocation2 + $0xa8] sm:$0xf] %v27215_v2  ;;  %5906 = vst [vmem:[#allocation2 + $0xac] sm:$0xf] %v27215_v2  ;;  %v399_v32 = vrot.slane %v397_v22, 5  ;;  %v405_v33 = vrot.slane %v403_v23, 5 }
  0x2c   : > { %5907 = vst [vmem:[#allocation2 + $0xb0] sm:$0x1] %v27215_v2  ;;  %5908 = vst [vmem:[#allocation2 + $0xb4] sm:$0xf] %v27215_v2  ;;  %v21367_v34 = vld [vmem:[%s21327_s8 + $0x1c] sm:$0xf] }
  0x2d   : > { %5909 = vst [vmem:[#allocation2 + $0xb8] sm:$0xf] %v27215_v2  ;;  %5910 = vst [vmem:[#allocation2 + $0xbc] sm:$0x1] %v27215_v2  ;;  %v377_v35 = vrot.slane %v376_v24, 4  ;;  %v387_v36 = vrot.slane %v386_v25, 4  ;;  %v400_v38 = vor.u32 %v399_v32, %v396_v31 }
  0x2e   : > { %5911 = vst [vmem:[#allocation2 + $0xc0] sm:$0xf] %v27215_v2  ;;  %5912 = vst [vmem:[#allocation2 + $0xc4] sm:$0xf] %v27215_v2  ;;  %v409_v37 = vrot.slane %v407_v27, 4  ;;  %v415_v39 = vrot.slane %v413_v28, 5 }
  0x2f   : > { %5913 = vst [vmem:[#allocation2 + $0xc8] sm:$0x1] %v27215_v2  ;;  %5914 = vst [vmem:[#allocation2 + $0xcc] sm:$0xf] %v27215_v2  ;;  %v418_v40 = vshrl.u32 %v21358_v29, 16  ;;  %v421_v41 = vshll.u32 %v21358_v29, 16 }
  0x30   : > { %5915 = vst [vmem:[#allocation2 + $0xd0] sm:$0xf] %v27215_v2  ;;  %5916 = vst [vmem:[#allocation2 + $0xd4] sm:$0x1] %v27215_v2  ;;  %v410_v44 = vor.u32 %v409_v37, %v405_v33  ;;  %v352_v45 = vld [vmem:[%s21327_s8 + $0x20] sm:$0x1] }
  0x31   : > { %vm21362_vm2 = vmor %vm366_vm0, %vm367_vm1  ;;  %v427_v46 = vshll.u32 %v21367_v34, 16  ;;  %v21379_v47 = vld [vmem:[%s21327_s8 + $0x24] sm:$0xf]  ;;  %v401_v50 = vrot.slane %v400_v38, 4  ;;  %v420_v51 = vrot.slane %v418_v40, 4  ;;  %v423_v53 = vrot.slane %v421_v41, 5 }
  0x32   : > { %v382_v42 = vsel %vm21362_vm2, %v377_v35, %v381_v18  ;;  %v392_v43 = vsel %vm21362_vm2, %v387_v36, %v391_v20  ;;  %v411_v52 = vrot.slane %v410_v44, 4  ;;  %v431_v55 = vshrl.u32 %v21367_v34, 16  ;;  %v21387_v59 = vld [vmem:[%s21327_s8 + $0x28] sm:$0xf]  ;;  %v353_v1 = vld [vmem:[%s21327_s8 + $0x2c] sm:$0x1]  ;;  %vm21791_vm6 = vmor %vm1517_vm4, %vm1518_vm5 }
  0x33   : > { %v785_v48 = vmax.bf16 %v27215_v2, %v382_v42  ;;  %v786_v49 = vmax.bf16 %v27215_v2, %v392_v43  ;;  %v429_v54 = vrot.slane %v427_v46, 5  ;;  %v406_v57 = vsel %vm21362_vm2, %v401_v50, %v405_v33  ;;  %v21395_v3 = vld [vmem:[%s21327_s8 + $0x30] sm:$0xf]  ;;  %v21403_v19 = vld [vmem:[%s21327_s8 + $0x34] sm:$0xf]  ;;  %v20724_v21 = vld [vmem:[%s27208_s1 + $0x8] sm:$0xff]  }
  0x34   : > { %v437_v58 = vshll.u32 %v352_v45, 16  ;;  %v442_v60 = vshrl.u32 %v21379_v47, 16  ;;  %v416_v61 = vsel %vm21362_vm2, %v411_v52, %v415_v39  ;;  %v787_v62 = vmax.bf16 %v27215_v2, %v406_v57  ;;  %v354_v27 = vld [vmem:[%s21327_s8 + $0x38] sm:$0x1]  ;;  %v21415_v35 = vld [vmem:[%s21327_s8 + $0x3c] sm:$0xf] }
  0x35   : > { %v16397_v56 = vcombine.low %v785_v48, %v786_v49  ;;  %v424_v63 = vor.u32 %v423_v53, %v420_v51  ;;  %v433_v0 = vrot.slane %v431_v55, 4  ;;  %v788_v4 = vmax.bf16 %v27215_v2, %v416_v61  ;;  %v21428_v48 = vld [vmem:[%s21327_s8 + $0x40] sm:$0xf]  ;;  %v21435_v55 = vld [vmem:[%s21327_s8 + $0x48] sm:$0xf]  ;;  %s269_s16 = sand.u32 1, %s21148_s25  }
  0x36   : > { %v439_v7 = vrot.slane %v437_v58, 5  ;;  %v444_v8 = vrot.slane %v442_v60, 4  ;;  %v445_v9 = vshll.u32 %v21379_v47, 16  ;;  %v451_v13 = vshll.u32 %v21387_v59, 16  ;;  %s16387_s17 = sshll.u32 %s269_s16, 8  ;;  %s18107_s19 = sshll.u32 %s21223_s28, 12 }
  0x37   : > { %18692 = vmatprep.mubr.msk.bf16.mxu0 %vm930_vm3, %v16397_v56  ;;  %v425_v10 = vrot.slane %v424_v63, 4  ;;  %v434_v11 = vor.u32 %v433_v0, %v429_v54  ;;  %v455_v15 = vshrl.u32 %v21387_v59, 16  ;;  %v16398_v16 = vcombine.low %v787_v62, %v788_v4  ;;  %s27069_s18 = scalar_lea.vmem [#allocation3], %s16387_s17  ;;  %s27157_s28 = scalar_lea.hbm %s27214_s7, %s18107_s19 }
  0x38   : > { %v447_v17 = vrot.slane %v445_v9, 5  ;;  %v461_v18 = vshll.u32 %v353_v1, 16  ;;  %v466_v20 = vshrl.u32 %v21395_v3, 16  ;;  %v453_v24 = vrot.slane %v451_v13, 5  ;;  %v20726_v1 = vld [vmem:[%s27208_s1 + $0x18] sm:$0xff]   ;;  %s16321_s20 = sshll.u32 %s27069_s18, 4  ;;  %s27159_s20 = int_to_ptr.vmem [resolvable:$true] %s16321_s20 }
  0x39   : > { %v430_v22 = vsel %vm21362_vm2, %v425_v10, %v429_v54  ;;  %v435_v23 = vrot.slane %v434_v11, 4  ;;  %v457_v25 = vrot.slane %v455_v15, 4  ;;  %18693 = vmatmul.mubr.msk.bf16.vlgmr.msra.gmra.mrb[0].mxu0 %vm930_vm3, %v16398_v16  ;;  %v469_v38 = vshll.u32 %v21395_v3, 16  ;;  %v355_v54 = vld [vmem:[%s21327_s8 + $0x44] sm:$0x1]  ;;  %s27166_s22 = scalar_lea.sflag [#allocation4], %s269_s16 }
  0x3a   : > { %v789_v28 = vmax.bf16 %v27215_v2, %v430_v22  ;;  %v448_v31 = vor.u32 %v447_v17, %v444_v8  ;;  %v463_v32 = vrot.slane %v461_v18, 5  ;;  %v468_v33 = vrot.slane %v466_v20, 4  ;;  %18725 = vmatpush3.bf16.msra.mxu0 %v21354_v26  ;;  %v20725_v26 = vld [vmem:[%s27208_s1 + $0x10] sm:$0xff]   ;;  %v21449_v9 = vld [vmem:[%s21327_s8 + $0x4c] sm:$0xf]  ;;  %s21094_s23 = scalar_lea.vmem %s27159_s20, 4096 }
  0x3b   : > { %v440_v36 = vsel %vm21362_vm2, %v435_v23, %v439_v7  ;;  %v458_v37 = vor.u32 %v457_v25, %v453_v24  ;;  %v475_v39 = vshll.u32 %v21403_v19, 16  ;;  %v479_v42 = vshrl.u32 %v21403_v19, 16  ;;  %18726 = vmatprep.subr.bf16.mxu0 %v20724_v21  ;;  %v356_v17 = vld [vmem:[%s21327_s8 + $0x50] sm:$0x1]  ;;  %v21456_v23 = vld [vmem:[%s21327_s8 + $0x54] sm:$0xf]  ;;  %p21095_p11 = scmp.ne.s32.totalorder %s27159_s20, %s21094_s23 }
  0x3c   : > { %v790_v40 = vmax.bf16 %v27215_v2, %v440_v36  ;;  %v449_v41 = vrot.slane %v448_v31, 4  ;;  %v485_v43 = vshll.u32 %v354_v27, 16  ;;  %v471_v45 = vrot.slane %v469_v38, 5  ;;  %v21466_v31 = vld [vmem:[%s27208_s1 + $0x40] sm:$0xff]   ;;  %s21159_s29 = smov [#allocation3]  }
  0x3d   : > { %v459_v44 = vrot.slane %v458_v37, 4  ;;  %v477_v46 = vrot.slane %v475_v39, 5  ;;  %v490_v49 = vshrl.u32 %v21415_v35, 16  ;;  %v481_v52 = vrot.slane %v479_v42, 4  ;;  %p21096_p12 = pnand %p21095_p11, %p21240_p5  ;;  %s21098_s9 = sshll.u32 %s21159_s29, 4  ;;  %s21099_s9 = int_to_ptr.vmem [resolvable:$false] %s21098_s9 }
  0x3e   : > { %v16399_v50 = vcombine.low %v789_v28, %v790_v40  ;;  %v454_v51 = vsel %vm21362_vm2, %v449_v41, %v453_v24  ;;  %v487_v53 = vrot.slane %v485_v43, 5  ;;  %v472_v58 = vor.u32 %v471_v45, %v468_v33  ;;  %18727 = vmatpush3.bf16.msra.mxu0 %v20724_v21  ;;  %v21473_v45 = vld [vmem:[%s21327_s8 + $0x58] sm:$0xf]  ;;  %s21100_s13 = scalar_lea.vmem %s21099_s9, 8192  ;;  %p21101_p0 = scmp.lt.s32.totalorder %s27159_s20, %s21099_s9 }
  0x3f   : > { %v464_v56 = vsel %vm21362_vm2, %v459_v44, %v463_v32  ;;  %v791_v57 = vmax.bf16 %v27215_v2, %v454_v51  ;;  %v492_v60 = vrot.slane %v490_v49, 4  ;;  %v482_v62 = vor.u32 %v481_v52, %v477_v46  ;;  %18728 = vmatprep.subr.bf16.mxu0 %v20725_v26  ;;  %v357_v51 = vld [vmem:[%s21327_s8 + $0x5c] sm:$0x1]  ;;  %p21097_p13 = pneg %p21096_p12  ;;  %p21102_p1 = scmp.lt.s32.totalorder %s21100_s13, %s21094_s23 }
  0x40   : > { %18696 = vmatprep.mubr.msk.bf16.mxu0 %vm930_vm3, %v16399_v50  ;;  %v792_v61 = vmax.bf16 %v27215_v2, %v464_v56  ;;  %v493_v63 = vshll.u32 %v21415_v35, 16  ;;  %v499_v0 = vshll.u32 %v21428_v48, 16  ;;  %v473_v4 = vrot.slane %v472_v58, 4 }
  0x41   : > { %v503_v7 = vshrl.u32 %v21428_v48, 16  ;;  %v509_v8 = vshll.u32 %v355_v54, 16  ;;  %v514_v10 = vshrl.u32 %v21435_v55, 16  ;;  %v483_v13 = vrot.slane %v482_v62, 4  ;;  %p21103_p2 = por %p21102_p1, %p21101_p0 }
  0x42   : > { %v16400_v11 = vcombine.low %v791_v57, %v792_v61  ;;  %v495_v15 = vrot.slane %v493_v63, 5  ;;  %v501_v16 = vrot.slane %v499_v0, 5  ;;  %v478_v18 = vsel %vm21362_vm2, %v473_v4, %v477_v46  ;;  %18729 = vmatpush3.bf16.msra.mxu0 %v20725_v26  ;;  %v21491_v0 = vld [vmem:[%s21327_s8 + $0x64] sm:$0xf] }
  0x43   : > { %v505_v20 = vrot.slane %v503_v7, 4  ;;  %v511_v21 = vrot.slane %v509_v8, 5  ;;  %v516_v22 = vrot.slane %v514_v10, 4  ;;  %v488_v24 = vsel %vm21362_vm2, %v483_v13, %v487_v53  ;;  %18730 = vmatprep.subr.bf16.mxu0 %v20726_v1  ;;  %v21479_v53 = vld [vmem:[%s21327_s8 + $0x60] sm:$0xf]  ;;  %p21104_p3 = pnand %p21103_p2, %p21097_p13 }
  0x44   : > { %18697 = vmatmul.mubr.msk.bf16.gmra.mrb[4].mxu0 %vm930_vm3, %v16400_v11  ;;  %v793_v25 = vmax.bf16 %v27215_v2, %v478_v18  ;;  %v496_v27 = vor.u32 %v495_v15, %v492_v60  ;;  %v517_v28 = vshll.u32 %v21435_v55, 16  ;;  %v794_v32 = vmax.bf16 %v27215_v2, %v488_v24  ;;  %v21496_v11 = vld [vmem:[%s21327_s8 + $0x6c] sm:$0xf] }
  0x45   : > { %v506_v33 = vor.u32 %v505_v20, %v501_v16  ;;  %v523_v36 = vshll.u32 %v21449_v9, 16  ;;  %v527_v37 = vshrl.u32 %v21449_v9, 16  ;;  %v533_v40 = vshll.u32 %v356_v17, 16 }
  0x46   : > { %v497_v38 = vrot.slane %v496_v27, 4  ;;  %v519_v39 = vrot.slane %v517_v28, 5  ;;  %v538_v41 = vshrl.u32 %v21456_v23, 16  ;;  %v16401_v42 = vcombine.low %v793_v25, %v794_v32  ;;  %18731 = vmatpush3.bf16.msra.mxu0 %v20726_v1  ;;  %v358_v1 = vld [vmem:[%s21327_s8 + $0x68] sm:$0x1] }
  0x47   : > { %v507_v43 = vrot.slane %v506_v33, 4  ;;  %v525_v26 = vrot.slane %v523_v36, 5  ;;  %v529_v44 = vrot.slane %v527_v37, 4  ;;  %v535_v50 = vrot.slane %v533_v40, 5  ;;  %18764 = vmatprep.subr.bf16.mxu0 %v21466_v31  ;;  %v21507_v32 = vld [vmem:[%s21327_s8 + $0x70] sm:$0xf] }
  0x48   : > { %v502_v46 = vsel %vm21362_vm2, %v497_v38, %v501_v16  ;;  %v520_v49 = vor.u32 %v519_v39, %v516_v22  ;;  %v540_v52 = vrot.slane %v538_v41, 4  ;;  %18700 = vmatprep.mubr.msk.bf16.mxu0 %vm930_vm3, %v16401_v42  ;;  %v541_v58 = vshll.u32 %v21456_v23, 16  ;;  %v359_v39 = vld [vmem:[%s21327_s8 + $0x74] sm:$0x1] }
  0x49   : > { %v512_v54 = vsel %vm21362_vm2, %v507_v43, %v511_v21  ;;  %v795_v56 = vmax.bf16 %v27215_v2, %v502_v46  ;;  %v530_v57 = vor.u32 %v529_v44, %v525_v26  ;;  %v547_v62 = vshll.u32 %v21473_v45, 16 }
  0x4a   : > { %v796_v60 = vmax.bf16 %v27215_v2, %v512_v54  ;;  %v521_v61 = vrot.slane %v520_v49, 4  ;;  %v551_v63 = vshrl.u32 %v21473_v45, 16  ;;  %v543_v7 = vrot.slane %v541_v58, 5 }
  0x4b   : > { %v531_v4 = vrot.slane %v530_v57, 4  ;;  %v557_v8 = vshll.u32 %v357_v51, 16  ;;  %v562_v10 = vshrl.u32 %v21479_v53, 16  ;;  %v549_v16 = vrot.slane %v547_v62, 5  ;;  %v21526_v62 = vld [vmem:[%s21327_s8 + $0x7c] sm:$0xf] }
  0x4c   : > { %v16402_v13 = vcombine.low %v795_v56, %v796_v60  ;;  %v526_v15 = vsel %vm21362_vm2, %v521_v61, %v525_v26  ;;  %v553_v17 = vrot.slane %v551_v63, 4  ;;  %v544_v21 = vor.u32 %v543_v7, %v540_v52  ;;  %v21514_v26 = vld [vmem:[%s21327_s8 + $0x78] sm:$0xf]  ;;  %v21530_v7 = vld [vmem:[%s21327_s8 + $0x80] sm:$0x1] }
  0x4d   : > { %v536_v18 = vsel %vm21362_vm2, %v531_v4, %v535_v50  ;;  %v797_v20 = vmax.bf16 %v27215_v2, %v526_v15  ;;  %v559_v22 = vrot.slane %v557_v8, 5  ;;  %v564_v27 = vrot.slane %v562_v10, 4  ;;  %v21534_v10 = vld [vmem:[%s21327_s8 + $0x84] sm:$0xf] }
  0x4e   : > { %18701 = vmatmul.mubr.msk.bf16.gmra.mrb[8].mxu0 %vm930_vm3, %v16402_v13  ;;  %v798_v24 = vmax.bf16 %v27215_v2, %v536_v18  ;;  %v554_v25 = vor.u32 %v553_v17, %v549_v16  ;;  %v565_v28 = vshll.u32 %v21479_v53, 16  ;;  %v545_v33 = vrot.slane %v544_v21, 4 }
  0x4f   : > { %v571_v36 = vshll.u32 %v21491_v0, 16  ;;  %v575_v37 = vshrl.u32 %v21491_v0, 16  ;;  %v581_v38 = vshll.u32 %v358_v1, 16  ;;  %v586_v43 = vshrl.u32 %v21496_v11, 16 }
  0x50   : > { %v16403_v40 = vcombine.low %v797_v20, %v798_v24  ;;  %v555_v41 = vrot.slane %v554_v25, 4  ;;  %v567_v42 = vrot.slane %v565_v28, 5  ;;  %v550_v44 = vsel %vm21362_vm2, %v545_v33, %v549_v16 }
  0x51   : > { %v573_v46 = vrot.slane %v571_v36, 5  ;;  %v577_v49 = vrot.slane %v575_v37, 4  ;;  %v583_v50 = vrot.slane %v581_v38, 5  ;;  %v799_v52 = vmax.bf16 %v27215_v2, %v550_v44 }
  0x52   : > { %18704 = vmatprep.mubr.msk.bf16.mxu0 %vm930_vm3, %v16403_v40  ;;  %v560_v51 = vsel %vm21362_vm2, %v555_v41, %v559_v22  ;;  %v568_v54 = vor.u32 %v567_v42, %v564_v27  ;;  %v588_v56 = vrot.slane %v586_v43, 4  ;;  %v589_v60 = vshll.u32 %v21496_v11, 16  ;;  %v21551_v43 = vld [vmem:[%s21327_s8 + $0x8c] sm:$0x1] }
  0x53   : > { %v800_v57 = vmax.bf16 %v27215_v2, %v560_v51  ;;  %v578_v58 = vor.u32 %v577_v49, %v573_v46  ;;  %v595_v61 = vshll.u32 %v21507_v32, 16  ;;  %v599_v1 = vshrl.u32 %v21507_v32, 16 }
  0x54   : > { %v569_v63 = vrot.slane %v568_v54, 4  ;;  %v605_v4 = vshll.u32 %v359_v39, 16  ;;  %v610_v8 = vshrl.u32 %v21514_v26, 16  ;;  %v591_v16 = vrot.slane %v589_v60, 5  ;;  %v21547_v39 = vld [vmem:[%s21327_s8 + $0x88] sm:$0xf] }
  0x55   : > { %v16404_v13 = vcombine.low %v799_v52, %v800_v57  ;;  %v579_v15 = vrot.slane %v578_v58, 4  ;;  %v597_v17 = vrot.slane %v595_v61, 5  ;;  %v601_v20 = vrot.slane %v599_v1, 4 }
  0x56   : > { %v574_v18 = vsel %vm21362_vm2, %v569_v63, %v573_v46  ;;  %v607_v21 = vrot.slane %v605_v4, 5  ;;  %v612_v22 = vrot.slane %v610_v8, 4  ;;  %v592_v27 = vor.u32 %v591_v16, %v588_v56  ;;  %v21555_v46 = vld [vmem:[%s21327_s8 + $0x90] sm:$0xf]  ;;  %v21568_v16 = vld [vmem:[%s21327_s8 + $0x94] sm:$0xf] }
  0x57   : > { %18705 = vmatmul.mubr.msk.bf16.gmra.mrb[12].mxu0 %vm930_vm3, %v16404_v13  ;;  %v584_v24 = vsel %vm21362_vm2, %v579_v15, %v583_v50  ;;  %v801_v25 = vmax.bf16 %v27215_v2, %v574_v18  ;;  %v613_v28 = vshll.u32 %v21514_v26, 16  ;;  %v602_v36 = vor.u32 %v601_v20, %v597_v17 }
  0x58   : > { %v802_v33 = vmax.bf16 %v27215_v2, %v584_v24  ;;  %v619_v37 = vshll.u32 %v21526_v62, 16  ;;  %v623_v38 = vshrl.u32 %v21526_v62, 16  ;;  %v593_v40 = vrot.slane %v592_v27, 4  ;;  %v21576_v24 = vld [vmem:[%s21327_s8 + $0x9c] sm:$0xf] }
  0x59   : > { %v615_v41 = vrot.slane %v613_v28, 5  ;;  %v629_v42 = vshll.u32 %v21530_v7, 16  ;;  %v634_v44 = vshrl.u32 %v21534_v10, 16  ;;  %v603_v50 = vrot.slane %v602_v36, 4 }
  0x5a   : > { %v16405_v49 = vcombine.low %v801_v25, %v802_v33  ;;  %v621_v51 = vrot.slane %v619_v37, 5  ;;  %v625_v52 = vrot.slane %v623_v38, 4  ;;  %v598_v54 = vsel %vm21362_vm2, %v593_v40, %v597_v17  ;;  %v21571_v17 = vld [vmem:[%s21327_s8 + $0x98] sm:$0x1] }
  0x5b   : > { %v616_v56 = vor.u32 %v615_v41, %v612_v22  ;;  %v631_v57 = vrot.slane %v629_v42, 5  ;;  %v636_v58 = vrot.slane %v634_v44, 4  ;;  %v608_v60 = vsel %vm21362_vm2, %v603_v50, %v607_v21  ;;  %v21587_v50 = vld [vmem:[%s21327_s8 + $0xa0] sm:$0xf] }
  0x5c   : > { %18708 = vmatprep.mubr.msk.bf16.mxu0 %vm930_vm3, %v16405_v49  ;;  %v803_v61 = vmax.bf16 %v27215_v2, %v598_v54  ;;  %v626_v63 = vor.u32 %v625_v52, %v621_v51  ;;  %v637_v1 = vshll.u32 %v21534_v10, 16  ;;  %v804_v4 = vmax.bf16 %v27215_v2, %v608_v60 }
  0x5d   : > { %v617_v8 = vrot.slane %v616_v56, 4  ;;  %v643_v13 = vshll.u32 %v21547_v39, 16  ;;  %v647_v15 = vshrl.u32 %v21547_v39, 16  ;;  %v653_v21 = vshll.u32 %v21551_v43, 16 }
  0x5e   : > { %v627_v18 = vrot.slane %v626_v63, 4  ;;  %v639_v20 = vrot.slane %v637_v1, 5  ;;  %v658_v22 = vshrl.u32 %v21555_v46, 16  ;;  %v16406_v25 = vcombine.low %v803_v61, %v804_v4 }
  0x5f   : > { %v622_v27 = vsel %vm21362_vm2, %v617_v8, %v621_v51  ;;  %v645_v28 = vrot.slane %v643_v13, 5  ;;  %v649_v33 = vrot.slane %v647_v15, 4  ;;  %v655_v40 = vrot.slane %v653_v21, 5  ;;  %v21599_v15 = vld [vmem:[%s21327_s8 + $0xa8] sm:$0xf] }
  0x60   : > { %v632_v36 = vsel %vm21362_vm2, %v627_v18, %v631_v57  ;;  %v805_v37 = vmax.bf16 %v27215_v2, %v622_v27  ;;  %v640_v38 = vor.u32 %v639_v20, %v636_v58  ;;  %18709 = vmatmul.mubr.msk.bf16.gmra.mrb[16].mxu0 %vm930_vm3, %v16406_v25  ;;  %v660_v44 = vrot.slane %v658_v22, 4  ;;  %v21593_v57 = vld [vmem:[%s21327_s8 + $0xa4] sm:$0x1] }
  0x61   : > { %v806_v41 = vmax.bf16 %v27215_v2, %v632_v36  ;;  %v650_v42 = vor.u32 %v649_v33, %v645_v28  ;;  %v661_v49 = vshll.u32 %v21555_v46, 16  ;;  %v667_v52 = vshll.u32 %v21568_v16, 16  ;;  %v21609_v36 = vld [vmem:[%s21327_s8 + $0xac] sm:$0xf] }
  0x62   : > { %v641_v51 = vrot.slane %v640_v38, 4  ;;  %v671_v54 = vshrl.u32 %v21568_v16, 16  ;;  %v677_v56 = vshll.u32 %v21571_v17, 16  ;;  %v682_v63 = vshrl.u32 %v21576_v24, 16 }
  0x63   : > { %v16407_v58 = vcombine.low %v805_v37, %v806_v41  ;;  %v651_v60 = vrot.slane %v650_v42, 4  ;;  %v663_v61 = vrot.slane %v661_v49, 5  ;;  %v669_v4 = vrot.slane %v667_v52, 5  ;;  %v21614_v42 = vld [vmem:[%s21327_s8 + $0xb0] sm:$0x1] }
  0x64   : > { %v646_v1 = vsel %vm21362_vm2, %v641_v51, %v645_v28  ;;  %v673_v8 = vrot.slane %v671_v54, 4  ;;  %v679_v13 = vrot.slane %v677_v56, 5  ;;  %v684_v22 = vrot.slane %v682_v63, 4 }
  0x65   : > { %18712 = vmatprep.mubr.msk.bf16.mxu0 %vm930_vm3, %v16407_v58  ;;  %v656_v18 = vsel %vm21362_vm2, %v651_v60, %v655_v40  ;;  %v807_v20 = vmax.bf16 %v27215_v2, %v646_v1  ;;  %v664_v21 = vor.u32 %v663_v61, %v660_v44  ;;  %v685_v28 = vshll.u32 %v21576_v24, 16  ;;  %v21618_v44 = vld [vmem:[%s21327_s8 + $0xb4] sm:$0xf] }
  0x66   : > { %v808_v25 = vmax.bf16 %v27215_v2, %v656_v18  ;;  %v674_v27 = vor.u32 %v673_v8, %v669_v4  ;;  %v691_v33 = vshll.u32 %v21587_v50, 16  ;;  %v695_v38 = vshrl.u32 %v21587_v50, 16 }
  0x67   : > { %v665_v37 = vrot.slane %v664_v21, 4  ;;  %v701_v41 = vshll.u32 %v21593_v57, 16  ;;  %v706_v40 = vshrl.u32 %v21599_v15, 16  ;;  %v687_v52 = vrot.slane %v685_v28, 5 }
  0x68   : > { %v16408_v49 = vcombine.low %v807_v20, %v808_v25  ;;  %v675_v51 = vrot.slane %v674_v27, 4  ;;  %v693_v54 = vrot.slane %v691_v33, 5  ;;  %v697_v58 = vrot.slane %v695_v38, 4 }
  0x69   : > { %v670_v56 = vsel %vm21362_vm2, %v665_v37, %v669_v4  ;;  %v703_v60 = vrot.slane %v701_v41, 5  ;;  %v708_v61 = vrot.slane %v706_v40, 4  ;;  %v688_v8 = vor.u32 %v687_v52, %v684_v22  ;;  %v21633_v40 = vld [vmem:[%s21327_s8 + $0xb8] sm:$0xf] }
  0x6a   : > { %18713 = vmatmul.mubr.msk.bf16.gmra.mrb[20].mxu0 %vm930_vm3, %v16408_v49  ;;  %v680_v63 = vsel %vm21362_vm2, %v675_v51, %v679_v13  ;;  %v809_v1 = vmax.bf16 %v27215_v2, %v670_v56  ;;  %v709_v18 = vshll.u32 %v21599_v15, 16  ;;  %v698_v21 = vor.u32 %v697_v58, %v693_v54  ;;  %v21638_v56 = vld [vmem:[%s21327_s8 + $0xbc] sm:$0x1] }
  0x6b   : > { %v810_v20 = vmax.bf16 %v27215_v2, %v680_v63  ;;  %v715_v4 = vshll.u32 %v21609_v36, 16  ;;  %v719_v25 = vshrl.u32 %v21609_v36, 16  ;;  %v689_v27 = vrot.slane %v688_v8, 4 }
  0x6c   : > { %v711_v28 = vrot.slane %v709_v18, 5  ;;  %v725_v33 = vshll.u32 %v21614_v42, 16  ;;  %v730_v13 = vshrl.u32 %v21618_v44, 16  ;;  %v699_v38 = vrot.slane %v698_v21, 4 }
  0x6d   : > { %v16409_v37 = vcombine.low %v809_v1, %v810_v20  ;;  %v717_v41 = vrot.slane %v715_v4, 5  ;;  %v721_v22 = vrot.slane %v719_v25, 4  ;;  %v694_v49 = vsel %vm21362_vm2, %v689_v27, %v693_v54 }
  0x6e   : > { %v712_v51 = vor.u32 %v711_v28, %v708_v61  ;;  %v727_v52 = vrot.slane %v725_v33, 5  ;;  %v732_v58 = vrot.slane %v730_v13, 4  ;;  %v704_v63 = vsel %vm21362_vm2, %v699_v38, %v703_v60 }
  0x6f   : > { %18716 = vmatprep.mubr.msk.bf16.mxu0 %vm930_vm3, %v16409_v37  ;;  %v811_v1 = vmax.bf16 %v27215_v2, %v694_v49  ;;  %v722_v8 = vor.u32 %v721_v22, %v717_v41  ;;  %v733_v18 = vshll.u32 %v21618_v44, 16  ;;  %v812_v20 = vmax.bf16 %v27215_v2, %v704_v63 }
  0x70   : > { %v713_v21 = vrot.slane %v712_v51, 4  ;;  %v739_v54 = vshll.u32 %v21633_v40, 16  ;;  %v743_v61 = vshrl.u32 %v21633_v40, 16  ;;  %v749_v27 = vshll.u32 %v21638_v56, 16 }
  0x71   : > { %v723_v4 = vrot.slane %v722_v8, 4  ;;  %v735_v25 = vrot.slane %v733_v18, 5  ;;  %v16410_v28 = vcombine.low %v811_v1, %v812_v20  ;;  %v311_v20 = vmax.bf16 %v27215_v2, %v21334_v6 }
  0x72   : > { %v718_v60 = vsel %vm21362_vm2, %v713_v21, %v717_v41  ;;  %v741_v33 = vrot.slane %v739_v54, 5  ;;  %v745_v13 = vrot.slane %v743_v61, 4  ;;  %v751_v63 = vrot.slane %v749_v27, 5 }
  0x73   : > { %v728_v37 = vsel %vm21362_vm2, %v723_v4, %v727_v52  ;;  %v813_v38 = vmax.bf16 %v27215_v2, %v718_v60  ;;  %v736_v22 = vor.u32 %v735_v25, %v732_v58  ;;  %18717 = vmatmul.mubr.msk.bf16.gmra.mrb[24].mxu0 %vm930_vm3, %v16410_v28  ;;  %v310_v41 = vmax.bf16 %v27215_v2, %v21331_v5 }
  0x74   : > { %v814_v49 = vmax.bf16 %v27215_v2, %v728_v37  ;;  %v746_v51 = vor.u32 %v745_v13, %v741_v33  ;;  %v312_v5 = vmax.bf16 %v27215_v2, %v21342_v12  ;;  %v313_v6 = vmax.bf16 %v27215_v2, %v21345_v14 }
  0x75   : > { %v737_v8 = vrot.slane %v736_v22, 4  ;;  %v16433_v61 = vcombine.low %v310_v41, %v311_v20  ;;  %v21673_v25 = vmax.bf16 %v27215_v2, %v21514_v26  ;;  %v314_v27 = vmax.bf16 %v27215_v2, %v21358_v29 }
  0x76   : > { %v16411_v18 = vcombine.low %v813_v38, %v814_v49  ;;  %v747_v1 = vrot.slane %v746_v51, 4  ;;  %v21680_v28 = vmax.bf16 %v27215_v2, %v21526_v62  ;;  %v21684_v60 = vmax.bf16 %v27215_v2, %v21534_v10 }
  0x77   : > { %v742_v52 = vsel %vm21362_vm2, %v737_v8, %v741_v33  ;;  %v21688_v12 = vmax.bf16 %v27215_v2, %v21547_v39  ;;  %v315_v14 = vmax.bf16 %v27215_v2, %v21367_v34  ;;  %v21695_v29 = vmax.bf16 %v27215_v2, %v21555_v46 }
  0x78   : > { %18720 = vmatprep.mubr.msk.bf16.mxu0 %vm930_vm3, %v16411_v18  ;;  %v752_v58 = vsel %vm21362_vm2, %v747_v1, %v751_v63  ;;  %v815_v21 = vmax.bf16 %v27215_v2, %v742_v52  ;;  %v21699_v26 = vmax.bf16 %v27215_v2, %v21568_v16  ;;  %v21703_v10 = vmax.bf16 %v27215_v2, %v21576_v24  ;;  %v20729_v52 = vld [vmem:[%s27208_s1 + $0x50] sm:$0xff]  }
  0x79   : > { %v816_v54 = vmax.bf16 %v27215_v2, %v752_v58  ;;  %v16443_v33 = vcombine.low %v21673_v25, %v21680_v28  ;;  %v16444_v13 = vcombine.low %v21684_v60, %v21688_v12  ;;  %v21711_v34 = vmax.bf16 %v27215_v2, %v21587_v50  ;;  %v20960_v28 = vld [vmem:[%s21327_s8 + $0x8] sm:$0x1]  ;;  %v20963_v12 = vld [vmem:[%s21327_s8 + $0x14] sm:$0x1] }
  0x7a   : > { %v21715_v46 = vmax.bf16 %v27215_v2, %v21599_v15  ;;  %v16445_v37 = vcombine.low %v21695_v29, %v21699_v26  ;;  %v21721_v24 = vmax.bf16 %v27215_v2, %v21609_v36  ;;  %v21725_v38 = vmax.bf16 %v27215_v2, %v21618_v44  ;;  %v20728_v44 = vld [vmem:[%s27208_s1 + $0x48] sm:$0xff]  }
  0x7b   : > { %v16412_v4 = vcombine.low %v815_v21, %v816_v54  ;;  %v21729_v22 = vmax.bf16 %v27215_v2, %v21633_v40  ;;  %v16434_v49 = vcombine.low %v312_v5, %v313_v6  ;;  %v16446_v15 = vcombine.low %v21703_v10, %v21711_v34  ;;  %v21770_v54 = vld [vmem:[%s27208_s1 + $0x60] sm:$0xff]  }
  0x7c   : > { %v16435_v51 = vcombine.low %v314_v27, %v315_v14  ;;  %v16447_v63 = vcombine.low %v21715_v46, %v21721_v24  ;;  %v316_v18 = vmax.bf16 %v27215_v2, %v21379_v47  ;;  %v317_v1 = vmax.bf16 %v27215_v2, %v21387_v59  ;;  %v20730_v59 = vld [vmem:[%s27208_s1 + $0x58] sm:$0xff]   ;;  %v1465_v14 = vld [vmem:[%s21327_s8 + $0x90] sm:$0xe]  ;;  %v1456_v24 = vld [vmem:[%s21327_s8 + $0x24] sm:$0xe] }
  0x7d   : > { %18721 = vmatmul.mubr.msk.bf16.gmra.mrb[28].mxu0 %vm930_vm3, %v16412_v4  ;;  %v16448_v8 = vcombine.low %v21725_v38, %v21729_v22  ;;  %v318_v41 = vmax.bf16 %v27215_v2, %v21395_v3  ;;  %v319_v20 = vmax.bf16 %v27215_v2, %v21403_v19  ;;  %v320_v3 = vmax.bf16 %v27215_v2, %v21415_v35  ;;  %v1464_v4 = vld [vmem:[%s21327_s8 + $0x84] sm:$0xe] }
  0x7e   : > { %18732 = vmatprep.mubr.msk.bf16.mxu0 %vm930_vm3, %v16433_v61  ;;  %v16436_v58 = vcombine.low %v316_v18, %v317_v1  ;;  %v321_v19 = vmax.bf16 %v27215_v2, %v21428_v48  ;;  %v323_v21 = vmax.bf16 %v27215_v2, %v21449_v9  ;;  %v1463_v48 = vld [vmem:[%s21327_s8 + $0x78] sm:$0xe]  ;;  %v325_v9 = vmax.bf16 %v27215_v2, %v21473_v45 }
  0x7f   : > { %v16437_v47 = vcombine.low %v318_v41, %v319_v20  ;;  %v326_v5 = vmax.bf16 %v27215_v2, %v21479_v53  ;;  %v327_v6 = vmax.bf16 %v27215_v2, %v21491_v0  ;;  %v16479_v27 = vrot.slane %v1463_v48, 9 }
  0x80   : > { %v16438_v61 = vcombine.low %v320_v3, %v321_v19  ;;  %v328_v45 = vmax.bf16 %v27215_v2, %v21496_v11  ;;  %v1595_v53 = vrot.slane %v21530_v7, 5  ;;  %v16480_v0 = vrot.slane %v1464_v4, 9 }
  0x81   : > { %v16441_v41 = vcombine.low %v326_v5, %v327_v6  ;;  %v1599_v11 = vrot.slane %v21547_v39, 5  ;;  %v16481_v7 = vrot.slane %v1465_v14, 9  ;;  %v1613_v4 = vrot.slane %v21587_v50, 5 }
  0x82   : > { %v1616_v6 = vrot.slane %v21593_v57, 5  ;;  %v1620_v50 = vrot.slane %v21609_v36, 5  ;;  %vm6321_vm8 = vcmask 1043456   ;;  %vm5997_vm9 = vsmask.f32 256 }
  0x83   : > { %v1601_v39 = vrot.slane %v1599_v11, 4  ;;  %vm5998_vm10 = vsmask.f32 4368  ;;  %vm6328_vm11 = vcmask 1040384   ;;  %vm25022_vm12 = vmand %vm6321_vm8, %vm6322_vm7 }
  0x84   : > { %v1622_v36 = vrot.slane %v1620_v50, 4  ;;  %vm25029_vm13 = vmor %vm5997_vm9, %vm5998_vm10 }
  0x85   : > { %18733 = vmatmul.mubr.msk.bf16.vlgmr.msra.gmra.mrb[0].mxu0 %vm930_vm3, %v16434_v49  ;;  %v329_v49 = vmax.bf16 %v27215_v2, %v21507_v32  ;;  %v1602_v32 = vrot.slane %v21551_v43, 5  ;;  %vm25035_vm14 = vmand %vm6328_vm11, %vm5997_vm9 }
  0x86   : > { %18765 = vmatpush3.bf16.msra.mxu0 %v21466_v31  ;;  %18736 = vmatprep.mubr.msk.bf16.mxu0 %vm930_vm3, %v16435_v51  ;;  %v322_v31 = vmax.bf16 %v27215_v2, %v21435_v55  ;;  %v324_v55 = vmax.bf16 %v27215_v2, %v21456_v23  ;;  %v1592_v23 = vrot.slane %v21526_v62, 5  ;;  %v27326_v51 = vmov 0 }
  0x87   : > { %18766 = vmatprep.subr.bf16.mxu0 %v20728_v44  ;;  %v27327_v51 = vsel %vm21791_vm6, 4294967295, %v27326_v51  ;;  %v16442_v3 = vcombine.low %v328_v45, %v329_v49  ;;  %v1615_v45 = vrot.slane %v1613_v4, 4 }
  0x88   : > { %v16439_v35 = vcombine.low %v322_v31, %v323_v21  ;;  %27328 = vst [vmem:[#allocation6_spill] sm:$0xff] %v27327_v51  ;;  %v16440_v18 = vcombine.low %v324_v55, %v325_v9  ;;  %v1593_v1 = vsel %vm21791_vm6, %v16479_v27, %v1592_v23  ;;  %v1594_v62 = vrot.slane %v1592_v23, 4  ;;  %v1468_v55 = vld [vmem:[%s21327_s8 + $0xb4] sm:$0xe] }
  0x89   : > { %v21800_v20 = vmax.bf16 %v27215_v2, %v1593_v1  ;;  %v1600_v31 = vsel %vm21791_vm6, %v16480_v0, %v1599_v11  ;;  %v1623_v0 = vrot.slane %v21614_v42, 5  ;;  %v1627_v42 = vrot.slane %v21633_v40, 5 }
  0x8a   : > { %18767 = vmatpush3.bf16.msra.mxu0 %v20728_v44  ;;  %v1466_v44 = vld [vmem:[%s21327_s8 + $0x9c] sm:$0xe]  ;;  %v21815_v43 = vmax.bf16 %v27215_v2, %v1600_v31  ;;  %v1630_v11 = vrot.slane %v21638_v56, 5  ;;  %v20959_v56 = vld [vmem:[%s21327_s8 + $0x4] sm:$0xf] }
  0x8b   : > { %18768 = vmatprep.subr.bf16.mxu0 %v20729_v52 }
  0x8d   : > { %18737 = vmatmul.mubr.msk.bf16.gmra.mrb[4].mxu0 %vm930_vm3, %v16436_v58  ;;  %v1596_v58 = vsel %vm21791_vm6, %v1594_v62, %v1595_v53 }
  0x8e   : > { %18740 = vmatprep.mubr.msk.bf16.mxu0 %vm930_vm3, %v16437_v47  ;;  %18769 = vmatpush3.bf16.msra.mxu0 %v20729_v52  ;;  %v1467_v52 = vld [vmem:[%s21327_s8 + $0xa8] sm:$0xe]  ;;  %v1606_v47 = vrot.slane %v21568_v16, 5  ;;  %v21810_v19 = vmax.bf16 %v27215_v2, %v1596_v58 }
  0x8f   : > { %18770 = vmatprep.subr.bf16.mxu0 %v20730_v59  ;;  %v16483_v27 = vrot.slane %v1467_v52, 9 }
  0x90   : > { %v1607_v21 = vsel %vm21791_vm6, %v16481_v7, %v1606_v47  ;;  %v16503_v16 = vcombine.low %v21800_v20, %v21810_v19 }
  0x91   : > { %v21825_v48 = vmax.bf16 %v27215_v2, %v1607_v21  ;;  %v1621_v1 = vsel %vm21791_vm6, %v16483_v27, %v1620_v50  ;;  %v1453_v21 = vld [vmem:[%s21327_s8] sm:$0xe]  ;;  %v1455_v27 = vld [vmem:[%s21327_s8 + $0x18] sm:$0xe] }
  0x92   : > { %18771 = vmatpush3.bf16.msra.mxu0 %v20730_v59  ;;  %v1609_v59 = vrot.slane %v21571_v17, 5  ;;  %v1603_v17 = vsel %vm21791_vm6, %v1601_v39, %v1602_v32  ;;  %v1624_v32 = vsel %vm21791_vm6, %v1622_v36, %v1623_v0  ;;  %v16471_v50 = vrot.slane %v1455_v27, 9 }
  0x93   : > { %18804 = vmatprep.subr.bf16.mxu0 %v21770_v54  ;;  %v21831_v9 = vmax.bf16 %v27215_v2, %v1603_v17  ;;  %v21867_v58 = vmax.bf16 %v27215_v2, %v1624_v32  ;;  %v16469_v17 = vrot.slane %v1453_v21, 9  ;;  %v1457_v32 = vld [vmem:[%s21327_s8 + $0x30] sm:$0xe] }
  0x94   : > { %v16473_v38 = vrot.slane %v1457_v32, 9  ;;  %v1460_v32 = vld [vmem:[%s21327_s8 + $0x54] sm:$0xe] }
  0x95   : > { %18741 = vmatmul.mubr.msk.bf16.gmra.mrb[8].mxu0 %vm930_vm3, %v16438_v61  ;;  %v1608_v61 = vrot.slane %v1606_v47, 4  ;;  %v16504_v49 = vcombine.low %v21815_v43, %v21831_v9  ;;  %v1629_v47 = vrot.slane %v1627_v42, 4  ;;  %v16529_v9 = vld [vmem:[%s21327_s8 + $0xc] sm:$0xf] }
  0x96   : > { %18744 = vmatprep.mubr.msk.bf16.mxu0 %vm930_vm3, %v16439_v35  ;;  %v16482_v35 = vrot.slane %v1466_v44, 9  ;;  %v16484_v44 = vrot.slane %v1468_v55, 9  ;;  %v20962_v55 = vld [vmem:[%s21327_s8 + $0x1c] sm:$0xf] }
  0x97   : > { %v1610_v5 = vsel %vm21791_vm6, %v1608_v61, %v1609_v59  ;;  %v1522_v59 = vrot.slane %v20959_v56, 5  ;;  %v1631_v39 = vsel %vm21791_vm6, %v1629_v47, %v1630_v11  ;;  %v20961_v61 = vld [vmem:[%s21327_s8 + $0x10] sm:$0xf]  ;;  %v16472_v56 = vrot.slane %v1456_v24, 9 }
  0x98   : > { %v21837_v23 = vmax.bf16 %v27215_v2, %v1610_v5  ;;  %v1614_v14 = vsel %vm21791_vm6, %v16482_v35, %v1613_v4  ;;  %v1628_v7 = vsel %vm21791_vm6, %v16484_v44, %v1627_v42  ;;  %v1529_v35 = vrot.slane %v20961_v61, 5  ;;  %v20964_v44 = vld [vmem:[%s21327_s8 + $0x20] sm:$0x1]  ;;  %v20966_v42 = vld [vmem:[%s21327_s8 + $0x34] sm:$0xf] }
  0x99   : > { %v21845_v53 = vmax.bf16 %v27215_v2, %v1614_v14  ;;  %v21873_v40 = vmax.bf16 %v27215_v2, %v1628_v7  ;;  %v1524_v4 = vrot.slane %v1522_v59, 4  ;;  %v1536_v5 = vrot.slane %v20962_v55, 5 }
  0x9a   : > { %v16505_v57 = vcombine.low %v21825_v48, %v21837_v23  ;;  %v1523_v14 = vsel %vm21791_vm6, %v16469_v17, %v1522_v59  ;;  %v1550_v11 = vrot.slane %v20966_v42, 5 }
  0x9b   : > { %v1664_v29 = vmax.bf16 %v27215_v2, %v1523_v14  ;;  %v1538_v0 = vrot.slane %v1536_v5, 4 }
  0x9c   : > { %v1552_v22 = vrot.slane %v1550_v11, 4  ;;  %v1551_v14 = vsel %vm21791_vm6, %v16473_v38, %v1550_v11 }
  0x9d   : > { %18745 = vmatmul.mubr.msk.bf16.gmra.mrb[12].mxu0 %vm930_vm3, %v16440_v18  ;;  %v1617_v18 = vsel %vm21791_vm6, %v1615_v45, %v1616_v6  ;;  %v1454_v6 = vld [vmem:[%s21327_s8 + $0xc] sm:$0xe]  ;;  %v1531_v45 = vrot.slane %v1529_v35, 4 }
  0x9e   : > { %18748 = vmatprep.mubr.msk.bf16.mxu0 %vm930_vm3, %v16441_v41  ;;  %v21855_v62 = vmax.bf16 %v27215_v2, %v1617_v18  ;;  %v21858_v41 = vmax.bf16 %v27215_v2, %v1621_v1  ;;  %v1539_v18 = vrot.slane %v20964_v44, 5  ;;  %v1537_v1 = vsel %vm21791_vm6, %v16471_v50, %v1536_v5  ;;  %v1458_v5 = vld [vmem:[%s21327_s8 + $0x3c] sm:$0xe] }
  0x9f   : > { %v1668_v59 = vmax.bf16 %v27215_v2, %v1537_v1  ;;  %v16474_v50 = vrot.slane %v1458_v5, 9 }
  0xa0   : > { %v16506_v52 = vcombine.low %v21845_v53, %v21855_v62  ;;  %v16507_v31 = vcombine.low %v21858_v41, %v21867_v58  ;;  %v1540_v36 = vsel %vm21791_vm6, %v1538_v0, %v1539_v18  ;;  %v1672_v0 = vmax.bf16 %v27215_v2, %v1551_v14 }
  0xa5   : > { %18749 = vmatmul.mubr.msk.bf16.gmra.mrb[16].mxu0 %vm930_vm3, %v16442_v3  ;;  %v21885_v3 = vmax.bf16 %v27215_v2, %v1631_v39  ;;  %v1669_v39 = vmax.bf16 %v27215_v2, %v1540_v36 }
  0xa6   : > { %18752 = vmatprep.mubr.msk.bf16.mxu0 %vm930_vm3, %v16443_v33  ;;  %v1525_v33 = vrot.slane %v20960_v28, 5  ;;  %v20967_v28 = vld [vmem:[%s21327_s8 + $0x2c] sm:$0x1] }
  0xa7   : > { %v16508_v25 = vcombine.low %v21873_v40, %v21885_v3  ;;  %v16495_v17 = vcombine.low %v1668_v59, %v1669_v39  ;;  %v20974_v39 = vld [vmem:[%s21327_s8 + $0x64] sm:$0xf]  ;;  %v16535_v40 = vld [vmem:[%s21327_s8 + $0x30] sm:$0xf] }
  0xa8   : > { %v1526_v60 = vsel %vm21791_vm6, %v1524_v4, %v1525_v33  ;;  %v1546_v33 = vrot.slane %v20967_v28, 5  ;;  %v20734_v28 = vld [vmem:[%s27208_s1 + $0x78] sm:$0xff]  }
  0xa9   : > { %v1665_v26 = vmax.bf16 %v27215_v2, %v1526_v60 }
  0xab   : > { %v16493_v10 = vcombine.low %v1664_v29, %v1665_v26  ;;  %v1459_v26 = vld [vmem:[%s21327_s8 + $0x48] sm:$0xe] }
  0xad   : > { %18753 = vmatmul.mubr.msk.bf16.gmra.mrb[20].mxu0 %vm930_vm3, %v16444_v13  ;;  %v1532_v13 = vrot.slane %v20963_v12, 5  ;;  %v20732_v12 = vld [vmem:[%s27208_s1 + $0x68] sm:$0xff]  }
  0xae   : > { %18756 = vmatprep.mubr.msk.bf16.mxu0 %vm930_vm3, %v16445_v37  ;;  %v16470_v37 = vrot.slane %v1454_v6, 9  ;;  %v20969_v6 = vld [vmem:[%s21327_s8 + $0x40] sm:$0xf] }
  0xaf   : > { %v1533_v46 = vsel %vm21791_vm6, %v1531_v45, %v1532_v13  ;;  %v1557_v27 = vrot.slane %v20969_v6, 5  ;;  %v20970_v13 = vld [vmem:[%s21327_s8 + $0x4c] sm:$0xf] }
  0xb0   : > { %v1530_v34 = vsel %vm21791_vm6, %v16470_v37, %v1529_v35  ;;  %v1667_v47 = vmax.bf16 %v27215_v2, %v1533_v46  ;;  %v1564_v29 = vrot.slane %v20970_v13, 5  ;;  %v16475_v46 = vrot.slane %v1459_v26, 9 }
  0xb1   : > { %v1666_v7 = vmax.bf16 %v27215_v2, %v1530_v34  ;;  %v1559_v18 = vrot.slane %v1557_v27, 4  ;;  %v1558_v42 = vsel %vm21791_vm6, %v16474_v50, %v1557_v27  ;;  %v20976_v27 = vld [vmem:[%s21327_s8 + $0x68] sm:$0x1] }
  0xb2   : > { %v1566_v24 = vrot.slane %v1564_v29, 4  ;;  %v1674_v38 = vmax.bf16 %v27215_v2, %v1558_v42  ;;  %v1581_v14 = vrot.slane %v20976_v27, 5 }
  0xb3   : > { %v16494_v35 = vcombine.low %v1666_v7, %v1667_v47  ;;  %v20973_v7 = vld [vmem:[%s21327_s8 + $0x58] sm:$0xf] }
  0xb4   : > { %v1571_v47 = vrot.slane %v20973_v7, 5 }
  0xb5   : > { %18757 = vmatmul.mubr.msk.bf16.gmra.mrb[24].mxu0 %vm930_vm3, %v16446_v15  ;;  %v20965_v15 = vld [vmem:[%s21327_s8 + $0x28] sm:$0xf] }
  0xb6   : > { %18760 = vmatprep.mubr.msk.bf16.mxu0 %vm930_vm3, %v16447_v63  ;;  %v1543_v63 = vrot.slane %v20965_v15, 5  ;;  %v20972_v15 = vld [vmem:[%s21327_s8 + $0x50] sm:$0x1] }
  0xb8   : > { %v1545_v21 = vrot.slane %v1543_v63, 4  ;;  %v1544_v4 = vsel %vm21791_vm6, %v16472_v56, %v1543_v63  ;;  %v1567_v63 = vrot.slane %v20972_v15, 5  ;;  %v1565_v56 = vsel %vm21791_vm6, %v16475_v46, %v1564_v29 }
  0xb9   : > { %v1670_v37 = vmax.bf16 %v27215_v2, %v1544_v4  ;;  %v20975_v4 = vld [vmem:[%s21327_s8 + $0x5c] sm:$0x1] }
  0xba   : > { %v1547_v55 = vsel %vm21791_vm6, %v1545_v21, %v1546_v33  ;;  %v1568_v59 = vsel %vm21791_vm6, %v1566_v24, %v1567_v63  ;;  %v1578_v21 = vrot.slane %v20974_v39, 5  ;;  %v1461_v33 = vld [vmem:[%s21327_s8 + $0x60] sm:$0xe]  ;;  %v20978_v63 = vld [vmem:[%s21327_s8 + $0x74] sm:$0x1] }
  0xbb   : > { %v1671_v45 = vmax.bf16 %v27215_v2, %v1547_v55  ;;  %v1574_v55 = vrot.slane %v20975_v4, 5  ;;  %v16477_v5 = vrot.slane %v1461_v33, 9  ;;  %v22044_v4 = vld [vmem:[%s21327_s8 + $0x20] sm:$0x1] }
  0xbc   : > { %v1580_v6 = vrot.slane %v1578_v21, 4 }
  0xbd   : > { %18761 = vmatmul.mubr.msk.bf16.gmra.mrb[28].mxu0 %vm930_vm3, %v16448_v8  ;;  %v20968_v8 = vld [vmem:[%s21327_s8 + $0x38] sm:$0x1]  ;;  %v16496_v1 = vcombine.low %v1670_v37, %v1671_v45  ;;  %v1462_v37 = vld [vmem:[%s21327_s8 + $0x6c] sm:$0xe]  ;;  %v20977_v45 = vld [vmem:[%s21327_s8 + $0x70] sm:$0xf] }
  0xbe   : > { %18772 = vmatprep.mubr.msk.bf16.mxu0 %vm930_vm3, %v16493_v10  ;;  %v1553_v61 = vrot.slane %v20968_v8, 5  ;;  %v20971_v10 = vld [vmem:[%s21327_s8 + $0x44] sm:$0x1]  ;;  %v16476_v8 = vrot.slane %v1460_v32, 9  ;;  %v1585_v50 = vrot.slane %v20977_v45, 5  ;;  %v2083_v45 = vmax.bf16 %v27215_v2, %v16529_v9 }
  0xbf   : > { %v1560_v34 = vrot.slane %v20971_v10, 5 }
  0xc0   : > { %v1554_v60 = vsel %vm21791_vm6, %v1552_v22, %v1553_v61  ;;  %v1676_v61 = vmax.bf16 %v27215_v2, %v1565_v56  ;;  %v1572_v29 = vsel %vm21791_vm6, %v16476_v8, %v1571_v47  ;;  %v1587_v15 = vrot.slane %v1585_v50, 4  ;;  %v16605_v56 = vld [vmem:[%s21327_s8 + $0xc] sm:$0xf] }
  0xc1   : > { %v1673_v44 = vmax.bf16 %v27215_v2, %v1554_v60  ;;  %v1561_v11 = vsel %vm21791_vm6, %v1559_v18, %v1560_v34  ;;  %v21995_v60 = vld [vmem:[%s27208_s1 + $0x80] sm:$0xff]   ;;  %v1678_v18 = vmax.bf16 %v27215_v2, %v1572_v29  ;;  %v16478_v34 = vrot.slane %v1462_v37, 9  ;;  %v16612_v37 = vld [vmem:[%s21327_s8 + $0x28] sm:$0xf] }
  0xc2   : > { %v1675_v22 = vmax.bf16 %v27215_v2, %v1561_v11  ;;  %v2521_v39 = vshll.u32 %v16605_v56, 16 }
  0xc3   : > { %v16497_v36 = vcombine.low %v1672_v0, %v1673_v44  ;;  %v1579_v0 = vsel %vm21791_vm6, %v16477_v5, %v1578_v21  ;;  %v1582_v44 = vsel %vm21791_vm6, %v1580_v6, %v1581_v14  ;;  %v1586_v42 = vsel %vm21791_vm6, %v16478_v34, %v1585_v50  ;;  %v16606_v21 = vld [vmem:[%s21327_s8 + $0x10] sm:$0xf] }
  0xc4   : > { %v1680_v46 = vmax.bf16 %v27215_v2, %v1579_v0  ;;  %v1681_v24 = vmax.bf16 %v27215_v2, %v1582_v44  ;;  %v1682_v32 = vmax.bf16 %v27215_v2, %v1586_v42  ;;  %v2527_v20 = vshll.u32 %v16606_v21, 16  ;;  %v16533_v0 = vld [vmem:[%s21327_s8 + $0x24] sm:$0xf]  ;;  %v16534_v44 = vld [vmem:[%s21327_s8 + $0x28] sm:$0xf] }
  0xc5   : > { %18773 = vmatmul.mubr.msk.bf16.vlgmr.msra.gmra.mrb[0].mxu0 %vm930_vm3, %v16494_v35  ;;  %v1677_v35 = vmax.bf16 %v27215_v2, %v1568_v59  ;;  %v2518_v59 = vshrl.u32 %v16605_v56, 16  ;;  %v2531_v19 = vshrl.u32 %v16606_v21, 16  ;;  %v2561_v14 = vshll.u32 %v22044_v4, 16 }
  0xc6   : > { %18805 = vmatpush3.bf16.msra.mxu0 %v21770_v54  ;;  %18776 = vmatprep.mubr.msk.bf16.mxu0 %vm930_vm3, %v16495_v17  ;;  %v20733_v54 = vld [vmem:[%s27208_s1 + $0x70] sm:$0xff]   ;;  %v1573_v17 = vrot.slane %v1571_v47, 4  ;;  %v22081_v41 = vmax.bf16 %v27215_v2, %v16533_v0  ;;  %v22084_v58 = vmax.bf16 %v27215_v2, %v16534_v44 }
  0xc7   : > { %18806 = vmatprep.subr.bf16.mxu0 %v20732_v12  ;;  %v16499_v13 = vcombine.low %v1676_v61, %v1677_v35  ;;  %v2520_v33 = vrot.slane %v2518_v59, 4  ;;  %v22041_v35 = vld [vmem:[%s21327_s8 + $0x14] sm:$0x1]  ;;  %v2533_v48 = vrot.slane %v2531_v19, 4 }
  0xc8   : > { %v1575_v26 = vsel %vm21791_vm6, %v1573_v17, %v1574_v55  ;;  %v22048_v55 = vrot.slane %v2527_v20, 5  ;;  %v2537_v5 = vshll.u32 %v22041_v35, 16 }
  0xc9   : > { %v1679_v10 = vmax.bf16 %v27215_v2, %v1575_v26 }
  0xca   : > { %18807 = vmatpush3.bf16.msra.mxu0 %v20732_v12  ;;  %v16498_v12 = vcombine.low %v1674_v38, %v1675_v22  ;;  %v2523_v38 = vrot.slane %v2521_v39, 5  ;;  %v16609_v22 = vld [vmem:[%s21327_s8 + $0x1c] sm:$0xf]  ;;  %v16618_v39 = vld [vmem:[%s21327_s8 + $0x40] sm:$0xf]  ;;  %v22101_v9 = vrot.slane %v2537_v5, 5 }
  0xcb   : > { %18808 = vmatprep.subr.bf16.mxu0 %v20733_v54  ;;  %v2551_v61 = vshll.u32 %v16609_v22, 16  ;;  %v2555_v43 = vshrl.u32 %v16609_v22, 16  ;;  %v16616_v22 = vld [vmem:[%s21327_s8 + $0x38] sm:$0x1]  ;;  %v2627_v4 = vshrl.u32 %v16618_v39, 16 }
  0xcc   : > { %v2524_v17 = vor.u32 %v2523_v38, %v2520_v33  ;;  %v16620_v5 = vld [vmem:[%s21327_s8 + $0x48] sm:$0xf] }
  0xcd   : > { %18777 = vmatmul.mubr.msk.bf16.gmra.mrb[4].mxu0 %vm930_vm3, %v16496_v1  ;;  %v16500_v1 = vcombine.low %v1678_v18, %v1679_v10  ;;  %v22052_v27 = vrot.slane %v2551_v61, 5  ;;  %v2557_v26 = vrot.slane %v2555_v43, 4  ;;  %v16614_v18 = vld [vmem:[%s21327_s8 + $0x30] sm:$0xf] }
  0xce   : > { %18780 = vmatprep.mubr.msk.bf16.mxu0 %vm930_vm3, %v16497_v36  ;;  %18809 = vmatpush3.bf16.msra.mxu0 %v20733_v54  ;;  %v1588_v54 = vrot.slane %v20978_v63, 5  ;;  %v16501_v36 = vcombine.low %v1680_v46, %v1681_v24  ;;  %v22057_v29 = vrot.slane %v2524_v17, 4  ;;  %v16615_v46 = vld [vmem:[%s21327_s8 + $0x34] sm:$0xf]  ;;  %v16613_v24 = vld [vmem:[%s21327_s8 + $0x2c] sm:$0x1] }
  0xcf   : > { %18810 = vmatprep.subr.bf16.mxu0 %v20734_v28  ;;  %v2579_v63 = vshrl.u32 %v16612_v37, 16  ;;  %v2593_v53 = vshll.u32 %v16614_v18, 16  ;;  %v2599_v42 = vshll.u32 %v16615_v46, 16  ;;  %v2558_v21 = vor.u32 %v2557_v26, %v22052_v27 }
  0xd0   : > { %v1589_v11 = vsel %vm21791_vm6, %v1587_v15, %v1588_v54  ;;  %v2575_v15 = vshll.u32 %v16612_v37, 16  ;;  %v16617_v54 = vld [vmem:[%s21327_s8 + $0x3c] sm:$0xf]  ;;  %v2585_v38 = vshll.u32 %v16613_v24, 16  ;;  %v2623_v17 = vshll.u32 %v16618_v39, 16 }
  0xd1   : > { %v1683_v7 = vmax.bf16 %v27215_v2, %v1589_v11  ;;  %v2603_v11 = vshrl.u32 %v16615_v46, 16  ;;  %v2581_v33 = vrot.slane %v2579_v63, 4  ;;  %v2595_v19 = vrot.slane %v2593_v53, 5  ;;  %v22137_v53 = vld [vmem:[%s21327_s8 + $0x4c] sm:$0xf] }
  0xd2   : > { %18811 = vmatpush3.bf16.msra.mxu0 %v20734_v28  ;;  %v16608_v28 = vld [vmem:[%s21327_s8 + $0x18] sm:$0xf]  ;;  %v2609_v37 = vshll.u32 %v16616_v22, 16  ;;  %v2638_v63 = vshrl.u32 %v16620_v5, 16  ;;  %v2641_v39 = vshll.u32 %v16620_v5, 16 }
  0xd3   : > { %18844 = vmatprep.subr.bf16.mxu0 %v21995_v60  ;;  %v16502_v47 = vcombine.low %v1682_v32, %v1683_v7  ;;  %v2542_v8 = vshrl.u32 %v16608_v28, 16  ;;  %v2617_v32 = vshll.u32 %v16617_v54, 16  ;;  %v2534_v7 = vor.u32 %v2533_v48, %v22048_v55  ;;  %v16542_v22 = vld [vmem:[%s21327_s8 + $0x58] sm:$0xf] }
  0xd5   : > { %18781 = vmatmul.mubr.msk.bf16.gmra.mrb[8].mxu0 %vm930_vm3, %v16498_v12  ;;  %v2544_v23 = vrot.slane %v2542_v8, 4  ;;  %v16611_v12 = vld [vmem:[%s21327_s8 + $0x24] sm:$0xf]  ;;  %v22092_v8 = vrot.slane %v2599_v42, 5  ;;  %v2619_v35 = vrot.slane %v2617_v32, 5  ;;  %v22099_v43 = vrot.slane %v2534_v7, 4 }
  0xd6   : > { %18784 = vmatprep.mubr.msk.bf16.mxu0 %vm930_vm3, %v16499_v13  ;;  %v16532_v13 = vld [vmem:[%s21327_s8 + $0x1c] sm:$0xf]  ;;  %v2566_v10 = vshrl.u32 %v16611_v12, 16  ;;  %v2569_v34 = vshll.u32 %v16611_v12, 16  ;;  %v16536_v12 = vld [vmem:[%s21327_s8 + $0x34] sm:$0xf] }
  0xd7   : > { %v20737_v42 = vld [vmem:[%s27208_s1 + $0x90] sm:$0xff]  }
  0xd8   : > { %v2568_v56 = vrot.slane %v2566_v10, 4  ;;  %v2571_v59 = vrot.slane %v2569_v34, 5  ;;  %v2629_v10 = vrot.slane %v2627_v4, 4  ;;  %v16571_v34 = vcombine.low %v22081_v41, %v22084_v58 }
  0xda   : > { %v2572_v48 = vor.u32 %v2571_v59, %v2568_v56  ;;  %v16540_v56 = vld [vmem:[%s21327_s8 + $0x4c] sm:$0xf] }
  0xdc   : > { %v22127_v46 = vrot.slane %v2572_v48, 4  ;;  %v2643_v48 = vrot.slane %v2641_v39, 5 }
  0xdd   : > { %18785 = vmatmul.mubr.msk.bf16.gmra.mrb[12].mxu0 %vm930_vm3, %v16500_v1 }
  0xde   : > { %18788 = vmatprep.mubr.msk.bf16.mxu0 %vm930_vm3, %v16501_v36  ;;  %v2590_v36 = vshrl.u32 %v16614_v18, 16  ;;  %v22123_v18 = vrot.slane %v2623_v17, 5  ;;  %v16624_v17 = vld [vmem:[%s21327_s8 + $0x58] sm:$0xf] }
  0xe0   : > { %v2592_v20 = vrot.slane %v2590_v36, 4  ;;  %v22134_v36 = vrot.slane %v2609_v37, 5  ;;  %v2630_v58 = vor.u32 %v2629_v10, %v22123_v18  ;;  %v22189_v10 = vld [vmem:[%s27208_s1 + $0xa0] sm:$0xff]  }
  0xe1   : > { %27329 = vst [vmem:[#allocation7_spill] sm:$0xff] %v22189_v10 }
  0xe2   : > { %v2596_v26 = vor.u32 %v2595_v19, %v2592_v20 }
  0xe5   : > { %18789 = vmatmul.mubr.msk.bf16.gmra.mrb[16].mxu0 %vm930_vm3, %v16502_v47 }
  0xe6   : > { %18792 = vmatprep.mubr.msk.bf16.mxu0 %vm930_vm3, %v16503_v16  ;;  %v2545_v16 = vshll.u32 %v16608_v28, 16  ;;  %v22089_v28 = vrot.slane %v2575_v15, 5 }
  0xe8   : > { %v2547_v6 = vrot.slane %v2545_v16, 5  ;;  %v2605_v16 = vrot.slane %v2603_v11, 4 }
  0xea   : > { %v2548_v47 = vor.u32 %v2547_v6, %v2544_v23  ;;  %v2582_v23 = vor.u32 %v2581_v33, %v22089_v28  ;;  %v2606_v0 = vor.u32 %v2605_v16, %v22092_v8  ;;  %v2647_v33 = vshll.u32 %v22137_v53, 16  ;;  %v20738_v16 = vld [vmem:[%s27208_s1 + $0x98] sm:$0xff]  }
  0xec   : > { %v22106_v3 = vrot.slane %v2548_v47, 4  ;;  %v22129_v15 = vrot.slane %v2582_v23, 4  ;;  %v22147_v11 = vrot.slane %v2606_v0, 4  ;;  %v16539_v47 = vld [vmem:[%s21327_s8 + $0x48] sm:$0xf]  ;;  %v22179_v37 = vrot.slane %v2647_v33, 5 }
  0xed   : > { %18793 = vmatmul.mubr.msk.bf16.gmra.mrb[20].mxu0 %vm930_vm3, %v16504_v49  ;;  %v16530_v49 = vld [vmem:[%s21327_s8 + $0x10] sm:$0xf]  ;;  %v22173_v23 = vld [vmem:[%s21327_s8 + $0x60] sm:$0xf]  ;;  %v2096_v0 = vmax.bf16 %v27215_v2, %v16542_v22 }
  0xee   : > { %18796 = vmatprep.mubr.msk.bf16.mxu0 %vm930_vm3, %v16505_v57  ;;  %v16531_v57 = vld [vmem:[%s21327_s8 + $0x18] sm:$0xf]  ;;  %v2084_v50 = vmax.bf16 %v27215_v2, %v16530_v49  ;;  %v22103_v49 = vrot.slane %v2561_v14, 5  ;;  %v16537_v14 = vld [vmem:[%s21327_s8 + $0x3c] sm:$0xf] }
  0xef   : > { %v22077_v1 = vmax.bf16 %v27215_v2, %v16531_v57  ;;  %v16619_v57 = vld [vmem:[%s21327_s8 + $0x44] sm:$0x1]  ;;  %v2091_v32 = vmax.bf16 %v27215_v2, %v16537_v14 }
  0xf0   : > { %v16569_v62 = vcombine.low %v2083_v45, %v2084_v50  ;;  %v16538_v45 = vld [vmem:[%s21327_s8 + $0x40] sm:$0xf]  ;;  %v20736_v50 = vld [vmem:[%s27208_s1 + $0x88] sm:$0xff]   ;;  %v2633_v24 = vshll.u32 %v16619_v57, 16  ;;  %v2093_v57 = vmax.bf16 %v27215_v2, %v16539_v47  ;;  %v2686_v47 = vshrl.u32 %v22173_v23, 16 }
  0xf1   : > { %v2092_v7 = vmax.bf16 %v27215_v2, %v16538_v45  ;;  %v3420_v45 = vrot.slane %v22137_v53, 5 }
  0xf2   : > { %v22159_v59 = vrot.slane %v2633_v24, 5  ;;  %v2675_v24 = vshrl.u32 %v16624_v17, 16 }
  0xf3   : > { %v16573_v4 = vcombine.low %v2091_v32, %v2092_v7  ;;  %v3422_v32 = vrot.slane %v3420_v45, 4 }
  0xf5   : > { %18797 = vmatmul.mubr.msk.bf16.gmra.mrb[24].mxu0 %vm930_vm3, %v16506_v52  ;;  %v2086_v52 = vmax.bf16 %v27215_v2, %v16532_v13  ;;  %v22114_v13 = vrot.slane %v2585_v38, 5  ;;  %v16541_v38 = vld [vmem:[%s21327_s8 + $0x54] sm:$0xf] }
  0xf6   : > { %18800 = vmatprep.mubr.msk.bf16.mxu0 %vm930_vm3, %v16507_v31  ;;  %v2614_v31 = vshrl.u32 %v16617_v54, 16  ;;  %v2089_v54 = vmax.bf16 %v27215_v2, %v16535_v40 }
  0xf7   : > { %v16570_v6 = vcombine.low %v22077_v1, %v2086_v52  ;;  %v22132_v1 = vrot.slane %v2596_v26, 4  ;;  %v2090_v52 = vmax.bf16 %v27215_v2, %v16536_v12  ;;  %v16625_v12 = vld [vmem:[%s21327_s8 + $0x5c] sm:$0x1]  ;;  %v16543_v26 = vld [vmem:[%s21327_s8 + $0x60] sm:$0xf] }
  0xf8   : > { %v2616_v61 = vrot.slane %v2614_v31, 4  ;;  %v16623_v31 = vld [vmem:[%s21327_s8 + $0x54] sm:$0xf] }
  0xf9   : > { %v2662_v20 = vshrl.u32 %v16623_v31, 16  ;;  %v16572_v19 = vcombine.low %v2089_v54, %v2090_v52  ;;  %v2665_v40 = vshll.u32 %v16623_v31, 16  ;;  %v16545_v54 = vld [vmem:[%s21327_s8 + $0x6c] sm:$0xf] }
  0xfa   : > { %v2620_v44 = vor.u32 %v2619_v35, %v2616_v61  ;;  %v22168_v61 = vrot.slane %v2630_v58, 4  ;;  %v2681_v58 = vshll.u32 %v16625_v12, 16 }
  0xfb   : > { %v2664_v14 = vrot.slane %v2662_v20, 4  ;;  %v2667_v52 = vrot.slane %v2665_v40, 5 }
  0xfc   : > { %v22149_v41 = vrot.slane %v2620_v44, 4  ;;  %v16544_v44 = vld [vmem:[%s21327_s8 + $0x64] sm:$0xf] }
  0xfd   : > { %18801 = vmatmul.mubr.msk.bf16.gmra.mrb[28].mxu0 %vm930_vm3, %v16508_v25  ;;  %v22108_v25 = vrot.slane %v2558_v21, 4  ;;  %v2640_v21 = vrot.slane %v2638_v63, 4  ;;  %v16702_v63 = vld [vmem:[%s21327_s8 + $0x48] sm:$0xe] }
  0xfe   : > { %18812 = vmatprep.mubr.msk.bf16.mxu0 %vm930_vm3, %v16569_v62  ;;  %v22140_v62 = vld [vmem:[%s21327_s8 + $0x50] sm:$0x1]  ;;  %v16718_v31 = vrot.slane %v16702_v63, 9 }
  0xff   : > { %v2657_v35 = vshll.u32 %v22140_v62, 16  ;;  %v2644_v7 = vor.u32 %v2643_v48, %v2640_v21 }
 0x100   : > { %v3421_v33 = vsel %vm21791_vm6, %v16718_v31, %v3420_v45 }
 0x101   : > { %v22207_v21 = vmax.bf16 %v27215_v2, %v3421_v33  ;;  %v22216_v40 = vrot.slane %v2644_v7, 4 }
 0x103   : > { %27330 = vst [vmem:[#allocation8_spill] sm:$0xff] %v22207_v21 }
 0x105   : > { %18813 = vmatmul.mubr.msk.bf16.vlgmr.msra.gmra.mrb[0].mxu0 %vm930_vm3, %v16570_v6  ;;  %v2094_v6 = vmax.bf16 %v27215_v2, %v16540_v56  ;;  %v3423_v56 = vrot.slane %v22140_v62, 5  ;;  %v2098_v62 = vmax.bf16 %v27215_v2, %v16544_v44  ;;  %v16704_v44 = vld [vmem:[%s21327_s8 + $0x60] sm:$0xe] }
 0x106   : > { %18845 = vmatpush3.bf16.msra.mxu0 %v21995_v60  ;;  %18816 = vmatprep.mubr.msk.bf16.mxu0 %vm930_vm3, %v16571_v34  ;;  %v2651_v60 = vshrl.u32 %v22137_v53, 16  ;;  %v2671_v34 = vshll.u32 %v16624_v17, 16  ;;  %v16546_v53 = vld [vmem:[%s21327_s8 + $0x70] sm:$0xf]  ;;  %v16720_v63 = vrot.slane %v16704_v44, 9 }
 0x107   : > { %18846 = vmatprep.subr.bf16.mxu0 %v20736_v50  ;;  %v16574_v39 = vcombine.low %v2093_v57, %v2094_v6  ;;  %v2100_v48 = vmax.bf16 %v27215_v2, %v16546_v53  ;;  %v22218_v57 = vrot.slane %v2657_v35, 5  ;;  %v22221_v6 = vld [vmem:[%s21327_s8 + $0x68] sm:$0x1]  ;;  %v22232_v35 = vrot.slane %v2681_v58, 5 }
 0x108   : > { %v2653_v5 = vrot.slane %v2651_v60, 4  ;;  %v3424_v60 = vsel %vm21791_vm6, %v3422_v32, %v3423_v56  ;;  %v22223_v12 = vrot.slane %v2671_v34, 5  ;;  %v16548_v34 = vld [vmem:[%s21327_s8 + $0x7c] sm:$0xf]  ;;  %v3437_v53 = vrot.slane %v22221_v6, 5 }
 0x109   : > { %v22211_v17 = vmax.bf16 %v27215_v2, %v3424_v60  ;;  %27332 = vst [vmem:[#allocation10_spill] sm:$0xff] %v22232_v35  ;;  %v16550_v58 = vld [vmem:[%s21327_s8 + $0x88] sm:$0xf]  ;;  %v22247_v32 = vld [vmem:[%s21327_s8 + $0x70] sm:$0xf] }
 0x10a   : > { %18847 = vmatpush3.bf16.msra.mxu0 %v20736_v50  ;;  %v2095_v50 = vmax.bf16 %v27215_v2, %v16541_v38  ;;  %v2097_v38 = vmax.bf16 %v27215_v2, %v16543_v26  ;;  %v2654_v22 = vor.u32 %v2653_v5, %v22179_v37  ;;  %v22254_v56 = vld [vmem:[%s21327_s8 + $0x7c] sm:$0xf]  ;;  %v22325_v35 = vld [vmem:[%s21327_s8 + $0x8c] sm:$0x1] }
 0x10b   : > { %18848 = vmatprep.subr.bf16.mxu0 %v20737_v42  ;;  %27331 = vst [vmem:[#allocation9_spill] sm:$0xff] %v22211_v17  ;;  %27344 = vst [vmem:[#allocation21_spill] sm:$0xff] %v22325_v35 }
 0x10c   : > { %v16575_v20 = vcombine.low %v2095_v50, %v2096_v0  ;;  %v22230_v45 = vrot.slane %v2654_v22, 4  ;;  %v22234_v50 = vrot.slane %v2686_v47, 4  ;;  %v2689_v0 = vshll.u32 %v22173_v23, 16 }
 0x10d   : > { %18817 = vmatmul.mubr.msk.bf16.gmra.mrb[4].mxu0 %vm930_vm3, %v16572_v19  ;;  %v2668_v19 = vor.u32 %v2667_v52, %v2664_v14  ;;  %v16547_v14 = vld [vmem:[%s21327_s8 + $0x78] sm:$0xf]  ;;  %v16549_v52 = vld [vmem:[%s21327_s8 + $0x84] sm:$0xf]  ;;  %v16576_v47 = vcombine.low %v2097_v38, %v2098_v62  ;;  %v22269_v38 = vld [vmem:[%s21327_s8 + $0x80] sm:$0x1] }
 0x10e   : > { %18820 = vmatprep.mubr.msk.bf16.mxu0 %vm930_vm3, %v16573_v4  ;;  %18849 = vmatpush3.bf16.msra.mxu0 %v20737_v42  ;;  %v22202_v42 = vld [vmem:[%s21327_s8 + $0x64] sm:$0xf]  ;;  %v2099_v4 = vmax.bf16 %v27215_v2, %v16545_v54  ;;  %v2101_v60 = vmax.bf16 %v27215_v2, %v16547_v14  ;;  %27335 = vst [vmem:[#allocation13_spill] sm:$0xff] %v22269_v38  ;;  %v16705_v14 = vld [vmem:[%s21327_s8 + $0x6c] sm:$0xe] }
 0x10f   : > { %18850 = vmatprep.subr.bf16.mxu0 %v20738_v16  ;;  %v3434_v5 = vrot.slane %v22202_v42, 5  ;;  %v2103_v44 = vmax.bf16 %v27215_v2, %v16549_v52 }
 0x110   : > { %v16577_v22 = vcombine.low %v2099_v4, %v2100_v48  ;;  %v2104_v4 = vmax.bf16 %v27215_v2, %v16550_v58  ;;  %v16552_v58 = vld [vmem:[%s21327_s8 + $0x94] sm:$0xf] }
 0x111   : > { %v3436_v54 = vrot.slane %v3434_v5, 4  ;;  %v3435_v23 = vsel %vm21791_vm6, %v16720_v63, %v3434_v5  ;;  %v3441_v5 = vrot.slane %v22247_v32, 5  ;;  %v16551_v63 = vld [vmem:[%s21327_s8 + $0x90] sm:$0xf] }
 0x112   : > { %18851 = vmatpush3.bf16.msra.mxu0 %v20738_v16  ;;  %v2677_v16 = vrot.slane %v2675_v24, 4  ;;  %v22240_v24 = vrot.slane %v2668_v19, 4  ;;  %v2102_v19 = vmax.bf16 %v27215_v2, %v16548_v34  ;;  %v3448_v34 = vrot.slane %v22254_v56, 5 }
 0x113   : > { %18884 = vmatprep.subr.bf16.mxu0 %v22189_v10  ;;  %v3438_v7 = vsel %vm21791_vm6, %v3436_v54, %v3437_v53  ;;  %v22282_v54 = vrot.slane %v2689_v0, 5  ;;  %v16721_v53 = vrot.slane %v16705_v14, 9  ;;  %v16554_v0 = vld [vmem:[%s21327_s8 + $0xa0] sm:$0xf]  ;;  %v16555_v10 = vld [vmem:[%s21327_s8 + $0xa8] sm:$0xf] }
 0x114   : > { %v2678_v31 = vor.u32 %v2677_v16, %v22223_v12  ;;  %v22260_v33 = vmax.bf16 %v27215_v2, %v3438_v7  ;;  %v2695_v16 = vshll.u32 %v22202_v42, 16  ;;  %v16706_v7 = vld [vmem:[%s21327_s8 + $0x78] sm:$0xe]  ;;  %v3450_v26 = vrot.slane %v3448_v34, 4 }
 0x115   : > { %18821 = vmatmul.mubr.msk.bf16.gmra.mrb[8].mxu0 %vm930_vm3, %v16574_v39  ;;  %v22257_v39 = vmax.bf16 %v27215_v2, %v3435_v23  ;;  %v3443_v23 = vrot.slane %v3441_v5, 4  ;;  %v16722_v62 = vrot.slane %v16706_v7, 9  ;;  %v16553_v2 = vld [vmem:[%s21327_s8 + $0x9c] sm:$0xf]  ;;  %v3442_v14 = vsel %vm21791_vm6, %v16721_v53, %v3441_v5 }
 0x116   : > { %18824 = vmatprep.mubr.msk.bf16.mxu0 %vm930_vm3, %v16575_v20  ;;  %27334 = vst [vmem:[#allocation12_spill] sm:$0xff] %v22260_v33  ;;  %v22264_v20 = vld [vmem:[%s21327_s8 + $0x74] sm:$0x1]  ;;  %v22276_v48 = vrot.slane %v2678_v31, 4  ;;  %v2699_v31 = vshrl.u32 %v22202_v42, 16  ;;  %v27338_v42 = vmov 0   ;;  %v16578_v53 = vcombine.low %v2101_v60, %v2102_v19 }
 0x117   : > { %27333 = vst [vmem:[#allocation11_spill] sm:$0xff] %v22257_v39  ;;  %v3444_v52 = vrot.slane %v22264_v20, 5  ;;  %v22300_v39 = vld [vmem:[%s21327_s8 + $0x88] sm:$0xf]  ;;  %v22303_v7 = vmax.bf16 %v27338_v42, %v3442_v14  ;;  %v3449_v21 = vsel %vm21791_vm6, %v16722_v62, %v3448_v34  ;;  %v16579_v14 = vcombine.low %v2103_v44, %v2104_v4 }
 0x118   : > { %27336 = vst [vmem:[#allocation14_spill] sm:$0xff] %v22276_v48  ;;  %27337 = vst [vmem:[#allocation15_spill] sm:$0xff] %v22300_v39  ;;  %v16556_v48 = vld [vmem:[%s21327_s8 + $0xac] sm:$0xf]  ;;  %v2106_v60 = vmax.bf16 %v27338_v42, %v16552_v58  ;;  %v22330_v19 = vrot.slane %v2695_v16, 5  ;;  %v3455_v44 = vrot.slane %v22300_v39, 5  ;;  %v2107_v4 = vmax.bf16 %v27338_v42, %v16553_v2 }
 0x119   : > { %v3445_v33 = vsel %vm21791_vm6, %v3443_v23, %v3444_v52  ;;  %27339 = vst [vmem:[#allocation16_spill] sm:$0xff] %v22303_v7  ;;  %v22316_v23 = vmax.bf16 %v27338_v42, %v3449_v21  ;;  %v22333_v21 = vld [vmem:[%s21327_s8 + $0x98] sm:$0x1]  ;;  %v2108_v34 = vmax.bf16 %v27338_v42, %v16554_v0  ;;  %v22348_v2 = vrot.slane %v2699_v31, 4  ;;  %v16560_v39 = vld [vmem:[%s21327_s8 + $0xc4] sm:$0xf] }
 0x11a   : > { %v22306_v17 = vmax.bf16 %v27338_v42, %v3445_v33  ;;  %v2105_v33 = vmax.bf16 %v27338_v42, %v16551_v63  ;;  %27345 = vst [vmem:[#allocation22_spill] sm:$0xff] %v22333_v21  ;;  %v2705_v63 = vshll.u32 %v22221_v6, 16  ;;  %v3457_v62 = vrot.slane %v3455_v44, 4  ;;  %v16558_v7 = vld [vmem:[%s21327_s8 + $0xb8] sm:$0xf] }
 0x11b   : > { %27342 = vst [vmem:[#allocation19_spill] sm:$0xff] %v22316_v23  ;;  %v3465_v23 = vrot.slane %v22333_v21, 5 }
 0x11c   : > { %27340 = vst [vmem:[#allocation17_spill] sm:$0xff] %v22306_v17  ;;  %v22352_v17 = vmax.bf16 %v27338_v42, %v16555_v10 }
 0x11d   : > { %18825 = vmatmul.mubr.msk.bf16.gmra.mrb[12].mxu0 %vm930_vm3, %v16576_v47  ;;  %v3451_v47 = vrot.slane %v22269_v38, 5  ;;  %v22313_v38 = vld [vmem:[%s21327_s8 + $0x94] sm:$0xf] }
 0x11e   : > { %18828 = vmatprep.mubr.msk.bf16.mxu0 %vm930_vm3, %v16577_v22  ;;  %v22297_v22 = vld [vmem:[%s21327_s8 + $0x6c] sm:$0xf]  ;;  %27341 = vst [vmem:[#allocation18_spill] sm:$0xff] %v22313_v38  ;;  %v3462_v58 = vrot.slane %v22313_v38, 5  ;;  %v16580_v38 = vcombine.low %v2105_v33, %v2106_v60  ;;  %v22399_v33 = vld [vmem:[%s21327_s8 + $0xb0] sm:$0x1] }
 0x11f   : > { %v3452_v5 = vsel %vm21791_vm6, %v3450_v26, %v3451_v47  ;;  %v16707_v47 = vld [vmem:[%s21327_s8 + $0x84] sm:$0xe]  ;;  %v2710_v16 = vshrl.u32 %v22297_v22, 16  ;;  %v3458_v26 = vrot.slane %v22325_v35, 5 }
 0x120   : > { %v22319_v52 = vmax.bf16 %v27338_v42, %v3452_v5  ;;  %v16723_v5 = vrot.slane %v16707_v47, 9  ;;  %v3464_v0 = vrot.slane %v3462_v58, 4  ;;  %v16557_v47 = vld [vmem:[%s21327_s8 + $0xb4] sm:$0xf] }
 0x122   : > { %27343 = vst [vmem:[#allocation20_spill] sm:$0xff] %v22319_v52  ;;  %v16708_v52 = vld [vmem:[%s21327_s8 + $0x90] sm:$0xe]  ;;  %v3456_v31 = vsel %vm21791_vm6, %v16723_v5, %v3455_v44  ;;  %v3466_v35 = vsel %vm21791_vm6, %v3464_v0, %v3465_v23  ;;  %v2692_v44 = vor.u32 %v22282_v54, %v22234_v50  ;;  %v22396_v54 = vrot.slane %v2705_v63, 5  ;;  %v16709_v0 = vld [vmem:[%s21327_s8 + $0x9c] sm:$0xe] }
 0x123   : > { %v16724_v6 = vrot.slane %v16708_v52, 9  ;;  %v3459_v52 = vsel %vm21791_vm6, %v3457_v62, %v3458_v26  ;;  %v22367_v21 = vmax.bf16 %v27338_v42, %v3456_v31  ;;  %v22379_v26 = vld [vmem:[%s21327_s8 + $0xac] sm:$0xf]  ;;  %v22385_v5 = vmax.bf16 %v27338_v42, %v3466_v35  ;;  %v16710_v23 = vld [vmem:[%s21327_s8 + $0xa8] sm:$0xe] }
 0x124   : > { %v22370_v10 = vmax.bf16 %v27338_v42, %v3459_v52  ;;  %v16581_v31 = vcombine.low %v2107_v4, %v2108_v34  ;;  %v16559_v52 = vld [vmem:[%s21327_s8 + $0xc0] sm:$0xf]  ;;  %v2111_v4 = vmax.bf16 %v27338_v42, %v16557_v47  ;;  %v2112_v34 = vmax.bf16 %v27338_v42, %v16558_v7 }
 0x125   : > { %18829 = vmatmul.mubr.msk.bf16.gmra.mrb[16].mxu0 %vm930_vm3, %v16578_v53  ;;  %v22355_v53 = vmax.bf16 %v27338_v42, %v16556_v48  ;;  %v3463_v48 = vsel %vm21791_vm6, %v16724_v6, %v3462_v58  ;;  %27347 = vst [vmem:[#allocation24_spill] sm:$0xff] %v22385_v5  ;;  %v22390_v58 = vld [vmem:[%s21327_s8 + $0xa4] sm:$0x1]  ;;  %v22406_v6 = vrot.slane %v2710_v16, 4  ;;  %v16725_v63 = vrot.slane %v16709_v0, 9 }
 0x126   : > { %18832 = vmatprep.mubr.msk.bf16.mxu0 %vm930_vm3, %v16579_v14  ;;  %v22364_v14 = vld [vmem:[%s21327_s8 + $0xa0] sm:$0xf]  ;;  %v22382_v62 = vmax.bf16 %v27338_v42, %v3463_v48  ;;  %v3476_v48 = vrot.slane %v22379_v26, 5  ;;  %v3472_v35 = vrot.slane %v22390_v58, 5  ;;  %v16726_v16 = vrot.slane %v16710_v23, 9 }
 0x127   : > { %v16582_v50 = vcombine.low %v22352_v17, %v22355_v53  ;;  %v3469_v60 = vrot.slane %v22364_v14, 5  ;;  %v22411_v17 = vrot.slane %v2692_v44, 4  ;;  %v3479_v5 = vrot.slane %v22399_v33, 5 }
 0x128   : > { %27346 = vst [vmem:[#allocation23_spill] sm:$0xff] %v22382_v62  ;;  %v3478_v47 = vrot.slane %v3476_v48, 4  ;;  %v2113_v62 = vmax.bf16 %v27338_v42, %v16559_v52  ;;  %v3477_v52 = vsel %vm21791_vm6, %v16726_v16, %v3476_v48  ;;  %v16583_v16 = vcombine.low %v2111_v4, %v2112_v34 }
 0x129   : > { %v3471_v53 = vrot.slane %v3469_v60, 4  ;;  %v3470_v44 = vsel %vm21791_vm6, %v16725_v63, %v3469_v60  ;;  %v2540_v60 = vsel %vm21362_vm2, %v22099_v43, %v22101_v9  ;;  %v22446_v63 = vld [vmem:[%s21327_s8 + $0x78] sm:$0xf]  ;;  %v22452_v48 = vmax.bf16 %v27338_v42, %v3477_v52  ;;  %v22464_v9 = vld [vmem:[%s21327_s8 + $0xc8] sm:$0x1] }
 0x12a   : > { %v22428_v7 = vmax.bf16 %v27338_v42, %v3470_v44  ;;  %v2719_v43 = vshll.u32 %v22247_v32, 16  ;;  %v2934_v4 = vmax.bf16 %v27338_v42, %v2540_v60  ;;  %v2723_v34 = vshrl.u32 %v22247_v32, 16  ;;  %v16712_v44 = vld [vmem:[%s21327_s8 + $0xc0] sm:$0xe] }
 0x12b   : > { %v3473_v0 = vsel %vm21791_vm6, %v3471_v53, %v3472_v35  ;;  %v2530_v35 = vsel %vm21362_vm2, %v22057_v29, %v22048_v55  ;;  %v22449_v53 = vld [vmem:[%s21327_s8 + $0xc4] sm:$0xf]  ;;  %27350 = vst [vmem:[#allocation27_spill] sm:$0xff] %v22452_v48  ;;  %v16728_v60 = vrot.slane %v16712_v44, 9  ;;  %v3493_v32 = vrot.slane %v22464_v9, 5 }
 0x12c   : > { %27348 = vst [vmem:[#allocation25_spill] sm:$0xff] %v22428_v7  ;;  %v22431_v23 = vmax.bf16 %v27338_v42, %v3473_v0  ;;  %v2933_v52 = vmax.bf16 %v27338_v42, %v2530_v35  ;;  %v3490_v55 = vrot.slane %v22449_v53, 5  ;;  %v2734_v35 = vshrl.u32 %v22446_v63, 16 }
 0x12d   : > { %18833 = vmatmul.mubr.msk.bf16.gmra.mrb[20].mxu0 %vm930_vm3, %v16580_v38  ;;  %v2114_v38 = vmax.bf16 %v27338_v42, %v16560_v39  ;;  %v3480_v39 = vsel %vm21791_vm6, %v3478_v47, %v3479_v5  ;;  %v22458_v47 = vld [vmem:[%s21327_s8 + $0xbc] sm:$0x1] }
 0x12e   : > { %18836 = vmatprep.mubr.msk.bf16.mxu0 %vm930_vm3, %v16581_v31  ;;  %v22425_v31 = vld [vmem:[%s21327_s8 + $0xb8] sm:$0xf]  ;;  %27349 = vst [vmem:[#allocation26_spill] sm:$0xff] %v22431_v23  ;;  %v22455_v5 = vmax.bf16 %v27338_v42, %v3480_v39  ;;  %v16711_v39 = vld [vmem:[%s21327_s8 + $0xb4] sm:$0xe]  ;;  %v3486_v7 = vrot.slane %v22458_v47, 5 }
 0x12f   : > { %v16584_v29 = vcombine.low %v2113_v62, %v2114_v38  ;;  %v3483_v0 = vrot.slane %v22425_v31, 5  ;;  %v16727_v38 = vrot.slane %v16711_v39, 9  ;;  %v2564_v39 = vsel %vm21362_vm2, %v22108_v25, %v22103_v49 }
 0x130   : > { %27351 = vst [vmem:[#allocation28_spill] sm:$0xff] %v22455_v5  ;;  %v3492_v5 = vrot.slane %v3490_v55, 4  ;;  %v2578_v49 = vsel %vm21362_vm2, %v22127_v46, %v22089_v28  ;;  %v2588_v25 = vsel %vm21362_vm2, %v22129_v15, %v22114_v13 }
 0x131   : > { %v3485_v23 = vrot.slane %v3483_v0, 4  ;;  %v3484_v62 = vsel %vm21791_vm6, %v16727_v38, %v3483_v0  ;;  %v16661_v0 = vcombine.low %v2933_v52, %v2934_v4  ;;  %v2937_v13 = vmax.bf16 %v27338_v42, %v2578_v49 }
 0x132   : > { %v22494_v44 = vmax.bf16 %v27338_v42, %v3484_v62  ;;  %v2936_v62 = vmax.bf16 %v27338_v42, %v2564_v39  ;;  %v2938_v15 = vmax.bf16 %v27338_v42, %v2588_v25  ;;  %v27352_v38 = vshll.u32 %v22297_v22, 16 }
 0x133   : > { %v22531_v52 = vrot.slane %v2719_v43, 5  ;;  %v2725_v4 = vrot.slane %v2723_v34, 4  ;;  %v2743_v39 = vshll.u32 %v22254_v56, 16  ;;  %v2602_v22 = vsel %vm21362_vm2, %v22132_v1, %v22092_v8  ;;  %v20740_v8 = vld [vmem:[%s27208_s1 + $0xa8] sm:$0xff]  }
 0x134   : > { %v2612_v43 = vsel %vm21362_vm2, %v22147_v11, %v22134_v36  ;;  %v16663_v1 = vcombine.low %v2937_v13, %v2938_v15  ;;  %v2939_v34 = vmax.bf16 %v27338_v42, %v2602_v22 }
 0x135   : > { %18837 = vmatmul.mubr.msk.bf16.gmra.mrb[24].mxu0 %vm930_vm3, %v16582_v50  ;;  %v2554_v50 = vsel %vm21362_vm2, %v22106_v3, %v22052_v27  ;;  %v3491_v27 = vsel %vm21791_vm6, %v16728_v60, %v3490_v55  ;;  %v3494_v3 = vsel %vm21791_vm6, %v3492_v5, %v3493_v32  ;;  %v2715_v60 = vrot.slane %v27352_v38, 5 }
 0x136   : > { %18840 = vmatprep.mubr.msk.bf16.mxu0 %vm930_vm3, %v16583_v16  ;;  %v3487_v16 = vsel %vm21791_vm6, %v3485_v23, %v3486_v7  ;;  %v22512_v7 = vld [vmem:[%s21327_s8 + $0x84] sm:$0xf]  ;;  %v22515_v23 = vmax.bf16 %v27338_v42, %v3491_v27  ;;  %v22518_v55 = vmax.bf16 %v27338_v42, %v3494_v3  ;;  %v2935_v46 = vmax.bf16 %v27338_v42, %v2554_v50  ;;  %v27354_v3 = vld [vmem:[#allocation14_spill] sm:$0xff] }
 0x137   : > { %v22497_v48 = vmax.bf16 %v27338_v42, %v3487_v16  ;;  %v22533_v32 = vrot.slane %v2734_v35, 4  ;;  %v2737_v50 = vshll.u32 %v22446_v63, 16  ;;  %v2747_v16 = vshrl.u32 %v22254_v56, 16 }
 0x138   : > { %v2758_v27 = vshrl.u32 %v22512_v7, 16  ;;  %v2626_v63 = vsel %vm21362_vm2, %v22149_v41, %v22123_v18  ;;  %v2636_v56 = vsel %vm21362_vm2, %v22168_v61, %v22159_v59  ;;  %v2940_v35 = vmax.bf16 %v27338_v42, %v2612_v43  ;;  %v27353_v61 = vld [vmem:[#allocation10_spill] sm:$0xff] }
 0x139   : > { %v2941_v36 = vmax.bf16 %v27338_v42, %v2626_v63  ;;  %v2942_v11 = vmax.bf16 %v27338_v42, %v2636_v56  ;;  %v2650_v18 = vsel %vm21362_vm2, %v22216_v40, %v22179_v37  ;;  %v2660_v41 = vsel %vm21362_vm2, %v22230_v45, %v22218_v57  ;;  %v27355_v40 = vld [vmem:[#allocation7_spill] sm:$0xff]  ;;  %v20741_v57 = vld [vmem:[%s27208_s1 + $0xb0] sm:$0xff]  }
 0x13a   : > { %v2674_v59 = vsel %vm21362_vm2, %v22240_v24, %v22223_v12  ;;  %v2684_v49 = vsel %vm21362_vm2, %v27354_v3, %v27353_v61  ;;  %v2702_v37 = vor.u32 %v22348_v2, %v22330_v19  ;;  %v2739_v45 = vrot.slane %v2737_v50, 5  ;;  %v27356_v2 = vld [vmem:[#allocation15_spill] sm:$0xff] }
 0x13b   : > { %v22587_v25 = vrot.slane %v2743_v39, 5  ;;  %v2749_v12 = vrot.slane %v2747_v16, 4  ;;  %v2761_v24 = vshll.u32 %v22512_v7, 16  ;;  %v2771_v13 = vshrl.u32 %v27356_v2, 16 }
 0x13c   : > { %v2943_v15 = vmax.bf16 %v27338_v42, %v2650_v18  ;;  %v2944_v38 = vmax.bf16 %v27338_v42, %v2660_v41  ;;  %v16664_v22 = vcombine.low %v2939_v34, %v2940_v35  ;;  %v16665_v50 = vcombine.low %v2941_v36, %v2942_v11  ;;  %v16638_v11 = vld [vmem:[%s21327_s8 + $0x90] sm:$0xf] }
 0x13d   : > { %18841 = vmatmul.mubr.msk.bf16.gmra.mrb[28].mxu0 %vm930_vm3, %v16584_v29  ;;  %v16662_v29 = vcombine.low %v2935_v46, %v2936_v62  ;;  %v2726_v46 = vor.u32 %v2725_v4, %v22531_v52  ;;  %v2767_v62 = vshll.u32 %v27356_v2, 16  ;;  %v2945_v39 = vmax.bf16 %v27338_v42, %v2674_v59  ;;  %v27360_v2 = vld [vmem:[#allocation21_spill] sm:$0xff] }
 0x13e   : > { %18852 = vmatprep.mubr.msk.bf16.mxu0 %vm930_vm3, %v16661_v0  ;;  %v2716_v0 = vor.u32 %v2715_v60, %v22406_v6  ;;  %v2946_v16 = vmax.bf16 %v27338_v42, %v2684_v49  ;;  %v2698_v6 = vsel %vm21362_vm2, %v22411_v17, %v22330_v19  ;;  %v2703_v7 = vrot.slane %v2702_v37, 4  ;;  %v16641_v37 = vld [vmem:[%s21327_s8 + $0x9c] sm:$0xf] }
 0x13f   : > { %v27357_v60 = vshll.u32 %v22264_v20, 16  ;;  %v2727_v56 = vrot.slane %v2726_v46, 4  ;;  %v2750_v34 = vor.u32 %v2749_v12, %v22587_v25  ;;  %v16666_v35 = vcombine.low %v2943_v15, %v2944_v38  ;;  %v27359_v12 = vld [vmem:[#allocation18_spill] sm:$0xff] }
 0x140   : > { %v2717_v63 = vrot.slane %v2716_v0, 4  ;;  %v2760_v19 = vrot.slane %v2758_v27, 4  ;;  %v2763_v20 = vrot.slane %v2761_v24, 5  ;;  %v22611_v17 = vrot.slane %v2767_v62, 5 }
 0x141   : > { %v2731_v4 = vrot.slane %v27357_v60, 5  ;;  %v2773_v36 = vrot.slane %v2771_v13, 4  ;;  %v16667_v18 = vcombine.low %v2945_v39, %v2946_v16  ;;  %v22619_v41 = vmax.bf16 %v27338_v42, %v2698_v6 }
 0x142   : > { %v2722_v27 = vsel %vm21362_vm2, %v2717_v63, %v22531_v52  ;;  %v2751_v49 = vrot.slane %v2750_v34, 4  ;;  %v2795_v24 = vshrl.u32 %v27359_v12, 16  ;;  %v2764_v0 = vor.u32 %v2763_v20, %v2760_v19  ;;  %v16644_v34 = vld [vmem:[%s21327_s8 + $0xa8] sm:$0xf] }
 0x143   : > { %v2732_v61 = vsel %vm21362_vm2, %v2727_v56, %v2731_v4  ;;  %v2774_v46 = vor.u32 %v2773_v36, %v22611_v17  ;;  %v2777_v62 = vshll.u32 %v27360_v2, 16  ;;  %v2806_v13 = vshrl.u32 %v16641_v37, 16  ;;  %v27361_v56 = vld [vmem:[#allocation22_spill] sm:$0xff] }
 0x144   : > { %v2809_v15 = vshll.u32 %v16641_v37, 16  ;;  %v2815_v38 = vshll.u32 %v22364_v14, 16  ;;  %v2950_v39 = vmax.bf16 %v27338_v42, %v2732_v61  ;;  %v2830_v61 = vshrl.u32 %v16644_v34, 16 }
 0x145   : > { %18853 = vmatmul.mubr.msk.bf16.vlgmr.msra.gmra.mrb[0].mxu0 %vm930_vm3, %v16662_v29  ;;  %v27358_v29 = vld [vmem:[#allocation13_spill] sm:$0xff]  ;;  %v2779_v63 = vrot.slane %v2777_v62, 5 }
 0x146   : > { %18885 = vmatpush3.bf16.msra.mxu0 %v27355_v40  ;;  %18856 = vmatprep.mubr.msk.bf16.mxu0 %vm930_vm3, %v16663_v1  ;;  %v2753_v43 = vshll.u32 %v27358_v29, 16  ;;  %v2740_v1 = vor.u32 %v2739_v45, %v22533_v32  ;;  %v2708_v32 = vsel %vm21362_vm2, %v2703_v7, %v22396_v54  ;;  %v22630_v54 = vld [vmem:[%s27208_s1 + $0xc0] sm:$0xff]   ;;  %v2782_v40 = vshrl.u32 %v16638_v11, 16 }
 0x147   : > { %18886 = vmatprep.subr.bf16.mxu0 %v20740_v8  ;;  %v2785_v45 = vshll.u32 %v16638_v11, 16  ;;  %v2948_v52 = vmax.bf16 %v27338_v42, %v2708_v32  ;;  %v2765_v29 = vrot.slane %v2764_v0, 4  ;;  %v22653_v19 = vrot.slane %v2815_v38, 5 }
 0x148   : > { %v2755_v59 = vrot.slane %v2753_v43, 5  ;;  %v2741_v3 = vrot.slane %v2740_v1, 4  ;;  %v2784_v7 = vrot.slane %v2782_v40, 4  ;;  %v2775_v43 = vrot.slane %v2774_v46, 4 }
 0x149   : > { %v2787_v60 = vrot.slane %v2785_v45, 5  ;;  %v2801_v1 = vshll.u32 %v27361_v56, 16  ;;  %v16668_v36 = vcombine.low %v22619_v41, %v2948_v52  ;;  %v2825_v41 = vshll.u32 %v22390_v58, 16 }
 0x14a   : > { %18887 = vmatpush3.bf16.msra.mxu0 %v20740_v8  ;;  %v20742_v8 = vld [vmem:[%s27208_s1 + $0xb8] sm:$0xff]   ;;  %v2746_v16 = vsel %vm21362_vm2, %v2741_v3, %v22587_v25  ;;  %v2756_v6 = vsel %vm21362_vm2, %v2751_v49, %v2755_v59  ;;  %v2808_v25 = vrot.slane %v2806_v13, 4  ;;  %v2833_v3 = vshll.u32 %v16644_v34, 16  ;;  %v16647_v49 = vld [vmem:[%s21327_s8 + $0xb4] sm:$0xf] }
 0x14b   : > { %18888 = vmatprep.subr.bf16.mxu0 %v20741_v57  ;;  %v2951_v32 = vmax.bf16 %v27338_v42, %v2746_v16  ;;  %v2788_v59 = vor.u32 %v2787_v60, %v2784_v7  ;;  %v2780_v37 = vsel %vm21362_vm2, %v2775_v43, %v2779_v63  ;;  %v2803_v40 = vrot.slane %v2801_v1, 5 }
 0x14c   : > { %v2854_v52 = vshrl.u32 %v16647_v49, 16  ;;  %v2857_v0 = vshll.u32 %v16647_v49, 16  ;;  %v2863_v46 = vshll.u32 %v22425_v31, 16  ;;  %v2832_v13 = vrot.slane %v2830_v61, 4 }
 0x14d   : > { %18857 = vmatmul.mubr.msk.bf16.gmra.mrb[4].mxu0 %vm930_vm3, %v16664_v22  ;;  %v2819_v22 = vshrl.u32 %v22364_v14, 16  ;;  %v2797_v14 = vrot.slane %v2795_v24, 4  ;;  %v2843_v24 = vshrl.u32 %v22379_v26, 16  ;;  %v2789_v2 = vrot.slane %v2788_v59, 4 }
 0x14e   : > { %18860 = vmatprep.mubr.msk.bf16.mxu0 %vm930_vm3, %v16665_v50  ;;  %18889 = vmatpush3.bf16.msra.mxu0 %v20741_v57  ;;  %v2791_v57 = vshll.u32 %v27359_v12, 16  ;;  %v2949_v50 = vmax.bf16 %v27338_v42, %v2722_v27  ;;  %v2954_v38 = vmax.bf16 %v27338_v42, %v2780_v37  ;;  %v2856_v7 = vrot.slane %v2854_v52, 4  ;;  %v20979_v52 = vld [vmem:[%s21327_s8 + $0x10] sm:$0xf] }
 0x14f   : > { %18890 = vmatprep.subr.bf16.mxu0 %v20742_v8  ;;  %v2821_v20 = vrot.slane %v2819_v22, 4  ;;  %v2827_v22 = vrot.slane %v2825_v41, 5  ;;  %v2845_v16 = vrot.slane %v2843_v24, 4  ;;  %v2865_v60 = vrot.slane %v2863_v46, 5 }
 0x150   : > { %v22647_v4 = vrot.slane %v2791_v57, 5  ;;  %v16669_v11 = vcombine.low %v2949_v50, %v2950_v39  ;;  %v2839_v57 = vshll.u32 %v22379_v26, 16 }
 0x151   : > { %v2822_v12 = vor.u32 %v2821_v20, %v22653_v19 }
 0x152   : > { %18891 = vmatpush3.bf16.msra.mxu0 %v20742_v8  ;;  %v2811_v8 = vrot.slane %v2809_v15, 5  ;;  %v2798_v27 = vor.u32 %v2797_v14, %v22647_v4  ;;  %v2835_v15 = vrot.slane %v2833_v3, 5  ;;  %v2841_v39 = vrot.slane %v2839_v57, 5 }
 0x153   : > { %18924 = vmatprep.subr.bf16.mxu0 %v22630_v54  ;;  %v2823_v50 = vrot.slane %v2822_v12, 4  ;;  %v2794_v43 = vsel %vm21362_vm2, %v2789_v2, %v22647_v4 }
 0x154   : > { %v2812_v45 = vor.u32 %v2811_v8, %v2808_v25  ;;  %v2799_v62 = vrot.slane %v2798_v27, 4  ;;  %v2836_v56 = vor.u32 %v2835_v15, %v2832_v13  ;;  %v2887_v25 = vshll.u32 %v22449_v53, 16  ;;  %v16697_v13 = vld [vmem:[%s21327_s8 + $0xc] sm:$0xe] }
 0x155   : > { %18861 = vmatmul.mubr.msk.bf16.gmra.mrb[8].mxu0 %vm930_vm3, %v16666_v35  ;;  %v2952_v35 = vmax.bf16 %v27338_v42, %v2756_v6  ;;  %v16650_v6 = vld [vmem:[%s21327_s8 + $0xc0] sm:$0xf]  ;;  %v2891_v8 = vshrl.u32 %v22449_v53, 16  ;;  %v2828_v4 = vsel %vm21362_vm2, %v2823_v50, %v2827_v22  ;;  %v2873_v27 = vshll.u32 %v22458_v47, 16 }
 0x156   : > { %18864 = vmatprep.mubr.msk.bf16.mxu0 %vm930_vm3, %v16667_v18  ;;  %v2770_v18 = vsel %vm21362_vm2, %v2765_v29, %v22611_v17  ;;  %v2867_v17 = vshrl.u32 %v22425_v31, 16  ;;  %v2813_v26 = vrot.slane %v2812_v45, 4  ;;  %v2859_v31 = vrot.slane %v2857_v0, 5 }
 0x157   : > { %v2953_v58 = vmax.bf16 %v27338_v42, %v2770_v18  ;;  %v16670_v29 = vcombine.low %v2951_v32, %v2952_v35  ;;  %v2804_v63 = vsel %vm21362_vm2, %v2799_v62, %v2803_v40  ;;  %v2878_v1 = vshrl.u32 %v16650_v6, 16 }
 0x158   : > { %v2869_v14 = vrot.slane %v2867_v17, 4  ;;  %v2881_v34 = vshll.u32 %v16650_v6, 16  ;;  %v2849_v32 = vshll.u32 %v22399_v33, 16  ;;  %v2860_v35 = vor.u32 %v2859_v31, %v2856_v7  ;;  %v16698_v7 = vld [vmem:[%s21327_s8 + $0x18] sm:$0xe] }
 0x159   : > { %v16671_v20 = vcombine.low %v2953_v58, %v2954_v38  ;;  %v2955_v61 = vmax.bf16 %v27338_v42, %v2794_v43  ;;  %v2956_v3 = vmax.bf16 %v27338_v42, %v2804_v63  ;;  %v2837_v53 = vrot.slane %v2836_v56, 4 }
 0x15a   : > { %v2870_v59 = vor.u32 %v2869_v14, %v2865_v60  ;;  %v2880_v49 = vrot.slane %v2878_v1, 4  ;;  %v22693_v18 = vrot.slane %v2887_v25, 5  ;;  %v2893_v33 = vrot.slane %v2891_v8, 4 }
 0x15b   : > { %v2958_v47 = vmax.bf16 %v27338_v42, %v2828_v4  ;;  %v2851_v41 = vrot.slane %v2849_v32, 5  ;;  %v2861_v45 = vrot.slane %v2860_v35, 4  ;;  %v2875_v57 = vrot.slane %v2873_v27, 5  ;;  %v16699_v35 = vld [vmem:[%s21327_s8 + $0x24] sm:$0xe] }
 0x15c   : > { %v2871_v12 = vrot.slane %v2870_v59, 4  ;;  %v2842_v24 = vsel %vm21362_vm2, %v2837_v53, %v2841_v39  ;;  %v3385_v0 = vrot.slane %v20979_v52, 5  ;;  %v16672_v46 = vcombine.low %v2955_v61, %v2956_v3  ;;  %v20983_v59 = vld [vmem:[%s21327_s8 + $0x28] sm:$0xf]  ;;  %v16700_v3 = vld [vmem:[%s21327_s8 + $0x30] sm:$0xe] }
 0x15d   : > { %18865 = vmatmul.mubr.msk.bf16.gmra.mrb[12].mxu0 %vm930_vm3, %v16668_v36  ;;  %v2818_v36 = vsel %vm21362_vm2, %v2813_v26, %v22653_v19  ;;  %v2883_v19 = vrot.slane %v2881_v34, 5  ;;  %v2894_v2 = vor.u32 %v2893_v33, %v22693_v18  ;;  %v2897_v62 = vshll.u32 %v22464_v9, 16  ;;  %v20981_v9 = vld [vmem:[%s21327_s8 + $0x1c] sm:$0xf]  ;;  %v20984_v53 = vld [vmem:[%s21327_s8 + $0x34] sm:$0xf] }
 0x15e   : > { %18868 = vmatprep.mubr.msk.bf16.mxu0 %vm930_vm3, %v16669_v11  ;;  %v2846_v11 = vor.u32 %v2845_v16, %v2841_v39  ;;  %v2957_v37 = vmax.bf16 %v27338_v42, %v2818_v36  ;;  %v2959_v38 = vmax.bf16 %v27338_v42, %v2842_v24  ;;  %v2866_v22 = vsel %vm21362_vm2, %v2861_v45, %v2865_v60  ;;  %v20980_v16 = vld [vmem:[%s21327_s8 + $0x14] sm:$0x1] }
 0x15f   : > { %v2884_v17 = vor.u32 %v2883_v19, %v2880_v49  ;;  %v2876_v26 = vsel %vm21362_vm2, %v2871_v12, %v2875_v57  ;;  %v16713_v50 = vrot.slane %v16697_v13, 9  ;;  %v3387_v39 = vrot.slane %v3385_v0, 4  ;;  %v20985_v19 = vld [vmem:[%s21327_s8 + $0x40] sm:$0xf]  ;;  %v20988_v13 = vld [vmem:[%s21327_s8 + $0x38] sm:$0x1] }
 0x160   : > { %v2847_v40 = vrot.slane %v2846_v11, 4  ;;  %v16673_v15 = vcombine.low %v2957_v37, %v2958_v47  ;;  %v3388_v6 = vrot.slane %v20980_v16, 5  ;;  %v3392_v31 = vrot.slane %v20981_v9, 5 }
 0x161   : > { %v2895_v43 = vrot.slane %v2894_v2, 4  ;;  %v2899_v60 = vrot.slane %v2897_v62, 5  ;;  %v2961_v63 = vmax.bf16 %v27338_v42, %v2866_v22  ;;  %v2962_v56 = vmax.bf16 %v27338_v42, %v2876_v26  ;;  %v20989_v26 = vld [vmem:[%s21327_s8 + $0x44] sm:$0x1] }
 0x162   : > { %v2852_v58 = vsel %vm21362_vm2, %v2847_v40, %v2851_v41  ;;  %v16714_v1 = vrot.slane %v16698_v7, 9  ;;  %v3386_v34 = vsel %vm21791_vm6, %v16713_v50, %v3385_v0  ;;  %v3389_v25 = vsel %vm21791_vm6, %v3387_v39, %v3388_v6  ;;  %v16701_v40 = vld [vmem:[%s21327_s8 + $0x3c] sm:$0xe]  ;;  %v20986_v41 = vld [vmem:[%s21327_s8 + $0x58] sm:$0xf] }
 0x163   : > { %v2960_v14 = vmax.bf16 %v27338_v42, %v2852_v58  ;;  %v3394_v8 = vrot.slane %v3392_v31, 4  ;;  %v2900_v4 = vsel %vm21362_vm2, %v2895_v43, %v2899_v60  ;;  %v3399_v27 = vrot.slane %v20983_v59, 5  ;;  %v16703_v0 = vld [vmem:[%s21327_s8 + $0x54] sm:$0xe]  ;;  %v20990_v6 = vld [vmem:[%s21327_s8 + $0x5c] sm:$0x1] }
 0x164   : > { %v16675_v61 = vcombine.low %v2961_v63, %v2962_v56  ;;  %v3406_v49 = vrot.slane %v20984_v53, 5  ;;  %v3413_v33 = vrot.slane %v20985_v19, 5  ;;  %v3527_v37 = vmax.bf16 %v27338_v42, %v3386_v34  ;;  %v16780_v53 = vld [vmem:[%s21327_s8 + $0x40] sm:$0xf] }
 0x165   : > { %18869 = vmatmul.mubr.msk.bf16.gmra.mrb[16].mxu0 %vm930_vm3, %v16670_v29  ;;  %v2885_v29 = vrot.slane %v2884_v17, 4  ;;  %v16674_v11 = vcombine.low %v2959_v38, %v2960_v14  ;;  %v3528_v47 = vmax.bf16 %v27338_v42, %v3389_v25  ;;  %v3427_v45 = vrot.slane %v20986_v41, 5  ;;  %v20987_v17 = vld [vmem:[%s21327_s8 + $0x2c] sm:$0x1]  ;;  %v16773_v25 = vld [vmem:[%s21327_s8 + $0x18] sm:$0xf] }
 0x166   : > { %18872 = vmatprep.mubr.msk.bf16.mxu0 %vm930_vm3, %v16671_v20  ;;  %v20982_v20 = vld [vmem:[%s21327_s8 + $0x20] sm:$0x1]  ;;  %v2964_v57 = vmax.bf16 %v27338_v42, %v2900_v4  ;;  %v16715_v52 = vrot.slane %v16699_v35, 9  ;;  %v3402_v2 = vrot.slane %v20987_v17, 5  ;;  %v16716_v62 = vrot.slane %v16700_v3, 9 }
 0x167   : > { %v3395_v36 = vrot.slane %v20982_v20, 5  ;;  %v2890_v32 = vsel %vm21362_vm2, %v2885_v29, %v22693_v18  ;;  %v3393_v18 = vsel %vm21791_vm6, %v16714_v1, %v3392_v31  ;;  %v3408_v58 = vrot.slane %v3406_v49, 4  ;;  %v16775_v20 = vld [vmem:[%s21327_s8 + $0x24] sm:$0xf]  ;;  %v16777_v4 = vld [vmem:[%s21327_s8 + $0x30] sm:$0xf] }
 0x168   : > { %v2963_v12 = vmax.bf16 %v27338_v42, %v2890_v32  ;;  %v16717_v38 = vrot.slane %v16701_v40, 9  ;;  %v3415_v22 = vrot.slane %v3413_v33, 4  ;;  %v3416_v50 = vrot.slane %v20989_v26, 5  ;;  %v16776_v32 = vld [vmem:[%s21327_s8 + $0x28] sm:$0xf]  ;;  %v20751_v41 = vld [vmem:[%s27212_s5 + $0x80] sm:$0xff]  }
 0x169   : > { %v3396_v24 = vsel %vm21791_vm6, %v3394_v8, %v3395_v36  ;;  %v16719_v39 = vrot.slane %v16703_v0, 9  ;;  %v3429_v16 = vrot.slane %v3427_v45, 4  ;;  %v3430_v7 = vrot.slane %v20990_v6, 5  ;;  %v16774_v8 = vld [vmem:[%s21327_s8 + $0x1c] sm:$0xf]  ;;  %19836 = vmatprep.subr.bf16.mxu1 %v20751_v41 }
 0x16a   : > { %v22752_v9 = vmax.bf16 %v27338_v42, %v3393_v18  ;;  %v22755_v31 = vmax.bf16 %v27338_v42, %v3396_v24  ;;  %v16676_v14 = vcombine.low %v2963_v12, %v2964_v57  ;;  %v16737_v29 = vcombine.low %v3527_v37, %v3528_v47  ;;  %v16778_v35 = vld [vmem:[%s21327_s8 + $0x34] sm:$0xf]  ;;  %v16779_v3 = vld [vmem:[%s21327_s8 + $0x3c] sm:$0xf]  ;;  %v16782_v18 = vld [vmem:[%s21327_s8 + $0x4c] sm:$0xf]  ;;  %19840 = vmatpush3.bf16.msra.mxu1 %v20751_v41 }
 0x16b   : > { %v3400_v43 = vsel %vm21791_vm6, %v16715_v52, %v3399_v27  ;;  %v3407_v60 = vsel %vm21791_vm6, %v16716_v62, %v3406_v49  ;;  %v3414_v1 = vsel %vm21791_vm6, %v16717_v38, %v3413_v33  ;;  %v3417_v34 = vsel %vm21791_vm6, %v3415_v22, %v3416_v50  ;;  %v16781_v49 = vld [vmem:[%s21327_s8 + $0x48] sm:$0xf]  ;;  %v16783_v40 = vld [vmem:[%s21327_s8 + $0x54] sm:$0xf]  ;;  %v16784_v52 = vld [vmem:[%s21327_s8 + $0x58] sm:$0xf] }
 0x16c   : > { %v3428_v36 = vsel %vm21791_vm6, %v16719_v39, %v3427_v45  ;;  %v16738_v59 = vcombine.low %v22752_v9, %v22755_v31  ;;  %v22796_v37 = vmax.bf16 %v27338_v42, %v3414_v1  ;;  %v22799_v47 = vmax.bf16 %v27338_v42, %v3417_v34  ;;  %v16785_v0 = vld [vmem:[%s21327_s8 + $0x60] sm:$0xf]  ;;  %v16787_v26 = vld [vmem:[%s21327_s8 + $0x6c] sm:$0xf]  ;;  %v16789_v9 = vld [vmem:[%s21327_s8 + $0x78] sm:$0xf] }
 0x16d   : > { %18873 = vmatmul.mubr.msk.bf16.gmra.mrb[20].mxu0 %vm930_vm3, %v16672_v46  ;;  %v3401_v46 = vrot.slane %v3399_v27, 4  ;;  %v22782_v27 = vmax.bf16 %v27338_v42, %v3400_v43  ;;  %v22808_v45 = vmax.bf16 %v27338_v42, %v3428_v36  ;;  %v22814_v57 = vmax.bf16 %v27338_v42, %v16773_v25  ;;  %v16790_v31 = vld [vmem:[%s21327_s8 + $0x7c] sm:$0xf]  ;;  %v16794_v36 = vld [vmem:[%s21327_s8 + $0x94] sm:$0xf] }
 0x16e   : > { %18876 = vmatprep.mubr.msk.bf16.mxu0 %vm930_vm3, %v16673_v15  ;;  %v3409_v15 = vrot.slane %v20988_v13, 5  ;;  %v22817_v24 = vmax.bf16 %v27338_v42, %v16774_v8  ;;  %v22823_v17 = vmax.bf16 %v27338_v42, %v16775_v20  ;;  %v22829_v62 = vmax.bf16 %v27338_v42, %v16777_v4  ;;  %v16792_v8 = vld [vmem:[%s21327_s8 + $0x88] sm:$0xf]  ;;  %v16793_v20 = vld [vmem:[%s21327_s8 + $0x90] sm:$0xf] }
 0x16f   : > { %v3403_v63 = vsel %vm21791_vm6, %v3401_v46, %v3402_v2  ;;  %v16786_v46 = vld [vmem:[%s21327_s8 + $0x64] sm:$0xf]  ;;  %v22826_v2 = vmax.bf16 %v27338_v42, %v16776_v32  ;;  %v22832_v13 = vmax.bf16 %v27338_v42, %v16778_v35  ;;  %v22841_v38 = vmax.bf16 %v27338_v42, %v16781_v49  ;;  %v16797_v41 = vld [vmem:[%s21327_s8 + $0xa8] sm:$0xf] }
 0x170   : > { %v3410_v56 = vsel %vm21791_vm6, %v3408_v58, %v3409_v15  ;;  %v3532_v19 = vmax.bf16 %v27338_v42, %v3403_v63  ;;  %v22835_v15 = vmax.bf16 %v27338_v42, %v16779_v3  ;;  %v22838_v58 = vmax.bf16 %v27338_v42, %v16780_v53  ;;  %v16791_v63 = vld [vmem:[%s21327_s8 + $0x84] sm:$0xf]  ;;  %v16796_v3 = vld [vmem:[%s21327_s8 + $0xa0] sm:$0xf]  ;;  %v20753_v53 = vld [vmem:[%s27212_s5 + $0x88] sm:$0xff]  }
 0x171   : > { %v22793_v33 = vmax.bf16 %v27338_v42, %v3410_v56  ;;  %v22844_v22 = vmax.bf16 %v27338_v42, %v16782_v18  ;;  %v22848_v50 = vmax.bf16 %v27338_v42, %v16783_v40  ;;  %v22851_v39 = vmax.bf16 %v27338_v42, %v16784_v52  ;;  %v16798_v52 = vld [vmem:[%s21327_s8 + $0xac] sm:$0xf]  ;;  %19837 = vmatprep.subr.bf16.mxu1 %v20753_v53  ;;  %v22941_v40 = vld [vmem:[%s21327_s8 + $0x70] sm:$0xf]  ;;  %v20755_v56 = vld [vmem:[%s27212_s5 + $0x98] sm:$0xff]  }
 0x172   : > { %v22857_v6 = vmax.bf16 %v27338_v42, %v16786_v46  ;;  %v22889_v4 = vmax.bf16 %v27338_v42, %v16789_v9  ;;  %v22892_v35 = vmax.bf16 %v27338_v42, %v16790_v31  ;;  %v22917_v46 = vmax.bf16 %v27338_v42, %v16792_v8  ;;  %v16800_v9 = vld [vmem:[%s21327_s8 + $0xb8] sm:$0xf]  ;;  %v20754_v31 = vld [vmem:[%s27212_s5 + $0x90] sm:$0xff]   ;;  %19841 = vmatpush3.bf16.msra.mxu1 %v20753_v53 }
 0x173   : > { %27362 = vst [vmem:[#allocation10_spill] sm:$0xff] %v22844_v22  ;;  %27363 = vst [vmem:[#allocation14_spill] sm:$0xff] %v22848_v50  ;;  %v22937_v8 = vmax.bf16 %v27338_v42, %v16796_v3  ;;  %v22948_v49 = vmax.bf16 %v27338_v42, %v16797_v41  ;;  %v22951_v3 = vmax.bf16 %v27338_v42, %v16798_v52  ;;  %19838 = vmatprep.subr.bf16.mxu1 %v20754_v31  ;;  %v16850_v41 = vld [vmem:[%s21327_s8 + $0x1c] sm:$0xf]  ;;  %v16857_v50 = vld [vmem:[%s21327_s8 + $0x38] sm:$0x1] }
 0x174   : > { %27364 = vst [vmem:[#allocation7_spill] sm:$0xff] %v22851_v39  ;;  %27366 = vst [vmem:[#allocation13_spill] sm:$0xff] %v22857_v6  ;;  %v22957_v34 = vmax.bf16 %v27338_v42, %v16800_v9  ;;  %v8721_v28 = vshll.u32 %v22941_v40, 16  ;;  %v8725_v53 = vshrl.u32 %v22941_v40, 16 }
 0x175   : > { %18877 = vmatmul.mubr.msk.bf16.gmra.mrb[24].mxu0 %vm930_vm3, %v16674_v11  ;;  %v3431_v11 = vsel %vm21791_vm6, %v3429_v16, %v3430_v7  ;;  %v22854_v16 = vmax.bf16 %v27338_v42, %v16785_v0  ;;  %v16788_v7 = vld [vmem:[%s21327_s8 + $0x70] sm:$0xf]  ;;  %27369 = vst [vmem:[#allocation22_spill] sm:$0xff] %v22889_v4  ;;  %27370 = vst [vmem:[#allocation29_spill] sm:$0xff] %v22892_v35  ;;  %v17290_v0 = vld [vmem:[%s21327_s8 + $0x6c] sm:$0xf] }
 0x176   : > { %18880 = vmatprep.mubr.msk.bf16.mxu0 %vm930_vm3, %v16675_v61  ;;  %v22785_v61 = vmax.bf16 %v27338_v42, %v3407_v60  ;;  %v22811_v12 = vmax.bf16 %v27338_v42, %v3431_v11  ;;  %v20744_v60 = vld [vmem:[%s27208_s1 + $0xc8] sm:$0xff]   ;;  %v22883_v11 = vmax.bf16 %v27338_v42, %v16787_v26  ;;  %v22886_v32 = vmax.bf16 %v27338_v42, %v16788_v7  ;;  %v16799_v7 = vld [vmem:[%s21327_s8 + $0xb4] sm:$0xf] }
 0x177   : > { %27365 = vst [vmem:[#allocation15_spill] sm:$0xff] %v22854_v16  ;;  %27372 = vst [vmem:[#allocation31_spill] sm:$0xff] %v22917_v46  ;;  %v22920_v26 = vmax.bf16 %v27338_v42, %v16793_v20  ;;  %v16849_v20 = vld [vmem:[%s21327_s8 + $0x18] sm:$0xf]  ;;  %v8712_v18 = vshrl.u32 %v17290_v0, 16  ;;  %v22954_v25 = vmax.bf16 %v27338_v42, %v16799_v7  ;;  %19842 = vmatpush3.bf16.msra.mxu1 %v20754_v31  ;;  %v4390_v31 = vshll.u32 %v16850_v41, 16 }
 0x178   : > { %27367 = vst [vmem:[#allocation18_spill] sm:$0xff] %v22883_v11  ;;  %27368 = vst [vmem:[#allocation21_spill] sm:$0xff] %v22886_v32  ;;  %v20746_v7 = vld [vmem:[%s27208_s1 + $0xd8] sm:$0xff]   ;;  %v4384_v5 = vshll.u32 %v16849_v20, 16  ;;  %19839 = vmatprep.subr.bf16.mxu1 %v20755_v56 }
 0x179   : > { %27373 = vst [vmem:[#allocation32_spill] sm:$0xff] %v22920_v26  ;;  %27376 = vst [vmem:[#allocation35_spill] sm:$0xff] %v22937_v8  ;;  %v8714_v1 = vrot.slane %v8712_v18, 4  ;;  %v27381_v18 = vcombine.low %v22785_v61, %v22793_v33  ;;  %v27382_v61 = vcombine.low %v22796_v37, %v22799_v47  ;;  %v23007_v8 = vld [vmem:[%s27208_s1 + $0xe0] sm:$0xff]  }
 0x17a   : > { %27377 = vst [vmem:[#allocation36_spill] sm:$0xff] %v22948_v49  ;;  %27378 = vst [vmem:[#allocation37_spill] sm:$0xff] %v22951_v3  ;;  %v16853_v3 = vld [vmem:[%s21327_s8 + $0x28] sm:$0xf] }
 0x17b   : > { %27379 = vst [vmem:[#allocation38_spill] sm:$0xff] %v22954_v25  ;;  %27380 = vst [vmem:[#allocation39_spill] sm:$0xff] %v22957_v34  ;;  %19843 = vmatpush3.bf16.msra.mxu1 %v20755_v56  ;;  %v4414_v26 = vshll.u32 %v16853_v3, 16 }
 0x17d   : > { %18881 = vmatmul.mubr.msk.bf16.gmra.mrb[28].mxu0 %vm930_vm3, %v16676_v14  ;;  %v16739_v14 = vcombine.low %v22782_v27, %v3532_v19  ;;  %v16795_v27 = vld [vmem:[%s21327_s8 + $0x9c] sm:$0xf]  ;;  %v22960_v19 = vld [vmem:[%s21327_s8 + $0x74] sm:$0x1] }
 0x17e   : > { %18892 = vmatprep.mubr.msk.bf16.mxu0 %vm930_vm3, %v16737_v29  ;;  %v8723_v29 = vrot.slane %v8721_v28, 5  ;;  %v17294_v28 = vld [vmem:[%s21327_s8 + $0x7c] sm:$0xf] }
 0x17f   : > { %v8749_v25 = vshrl.u32 %v17294_v28, 16 }
 0x185   : > { %18893 = vmatmul.mubr.msk.bf16.vlgmr.msra.gmra.mrb[0].mxu0 %vm930_vm3, %v16738_v59  ;;  %v22914_v59 = vmax.bf16 %v27338_v42, %v16791_v63  ;;  %v22934_v63 = vmax.bf16 %v27338_v42, %v16795_v27  ;;  %v8715_v27 = vshll.u32 %v17290_v0, 16  ;;  %v4381_v0 = vshrl.u32 %v16849_v20, 16  ;;  %v17295_v20 = vld [vmem:[%s21327_s8 + $0x80] sm:$0x1] }
 0x186   : > { %18925 = vmatpush3.bf16.msra.mxu0 %v22630_v54  ;;  %18896 = vmatprep.mubr.msk.bf16.mxu0 %vm930_vm3, %v16739_v14  ;;  %v20745_v54 = vld [vmem:[%s27208_s1 + $0xd0] sm:$0xff]   ;;  %v22931_v14 = vmax.bf16 %v27338_v42, %v16794_v36  ;;  %v17293_v36 = vld [vmem:[%s21327_s8 + $0x78] sm:$0xf] }
 0x187   : > { %27371 = vst [vmem:[#allocation30_spill] sm:$0xff] %v22914_v59  ;;  %18926 = vmatprep.subr.bf16.mxu0 %v20744_v60  ;;  %27375 = vst [vmem:[#allocation34_spill] sm:$0xff] %v22934_v63  ;;  %v8717_v52 = vrot.slane %v8715_v27, 5  ;;  %v8731_v27 = vshll.u32 %v22960_v19, 16  ;;  %v8736_v9 = vshrl.u32 %v17293_v36, 16  ;;  %v8727_v63 = vrot.slane %v8725_v53, 4 }
 0x188   : > { %27374 = vst [vmem:[#allocation33_spill] sm:$0xff] %v22931_v14  ;;  %v23000_v33 = vrot.slane %v4381_v0, 4  ;;  %v16801_v0 = vld [vmem:[%s21327_s8 + $0xc0] sm:$0xf]  ;;  %v27384_v59 = vld [vmem:[#allocation9_spill] sm:$0xff] }
 0x189   : > { %v8718_v43 = vor.u32 %v8717_v52, %v8714_v1  ;;  %v22993_v1 = vld [vmem:[%s27212_s5 + $0xa0] sm:$0xff]   ;;  %v4394_v52 = vshrl.u32 %v16850_v41, 16  ;;  %v8728_v34 = vor.u32 %v8727_v63, %v8723_v29  ;;  %v8733_v37 = vrot.slane %v8731_v27, 5 }
 0x18a   : > { %18927 = vmatpush3.bf16.msra.mxu0 %v20744_v60  ;;  %v22975_v60 = vld [vmem:[%s21327_s8 + $0x24] sm:$0xf]  ;;  %v8738_v47 = vrot.slane %v8736_v9, 4  ;;  %19244 = vmatprep.subr.bf16.mxu1 %v22993_v1  ;;  %v8755_v9 = vshll.u32 %v17295_v20, 16  ;;  %v8751_v27 = vrot.slane %v8749_v25, 4  ;;  %v27383_v25 = vld [vmem:[#allocation8_spill] sm:$0xff] }
 0x18b   : > { %18928 = vmatprep.subr.bf16.mxu0 %v20745_v54  ;;  %v8719_v53 = vrot.slane %v8718_v43, 4  ;;  %v4408_v41 = vshll.u32 %v22975_v60, 16  ;;  %v8745_v43 = vshll.u32 %v17294_v28, 16  ;;  %v8729_v14 = vrot.slane %v8728_v34, 4  ;;  %v16802_v28 = vld [vmem:[%s21327_s8 + $0xc4] sm:$0xf] }
 0x18c   : > { %v4396_v56 = vrot.slane %v4394_v52, 4  ;;  %v16803_v34 = vld [vmem:[%s21327_s8 + $0xcc] sm:$0xf]  ;;  %v27385_v35 = vcombine.low %v27383_v25, %v27384_v59 }
 0x18d   : > { %18897 = vmatmul.mubr.msk.bf16.gmra.mrb[4].mxu0 %vm930_vm3, %v27381_v18  ;;  %v4405_v18 = vshrl.u32 %v22975_v60, 16  ;;  %v8724_v49 = vsel %vm21362_vm2, %v8719_v53, %v8723_v29  ;;  %v8747_v60 = vrot.slane %v8745_v43, 5  ;;  %v23021_v29 = vmax.bf16 %v27338_v42, %v16801_v0 }
 0x18e   : > { %18900 = vmatprep.mubr.msk.bf16.mxu0 %vm930_vm3, %v27382_v61  ;;  %18929 = vmatpush3.bf16.msra.mxu0 %v20745_v54  ;;  %v8739_v54 = vshll.u32 %v17293_v36, 16  ;;  %v4386_v61 = vrot.slane %v4384_v5, 5  ;;  %v16851_v5 = vld [vmem:[%s21327_s8 + $0x20] sm:$0x1]  ;;  %v23016_v36 = vrot.slane %v4390_v31, 5  ;;  %v8734_v20 = vsel %vm21362_vm2, %v8729_v14, %v8733_v37 }
 0x18f   : > { %18930 = vmatprep.subr.bf16.mxu0 %v20746_v7  ;;  %v4407_v53 = vrot.slane %v4405_v18, 4  ;;  %v16855_v31 = vld [vmem:[%s21327_s8 + $0x30] sm:$0xf]  ;;  %v17330_v46 = vcombine.low %v8724_v49, %v8734_v20  ;;  %v8752_v52 = vor.u32 %v8751_v27, %v8747_v60  ;;  %v8757_v43 = vrot.slane %v8755_v9, 5  ;;  %v16854_v18 = vld [vmem:[%s21327_s8 + $0x2c] sm:$0x1] }
 0x190   : > { %v8741_v63 = vrot.slane %v8739_v54, 5  ;;  %v4387_v0 = vor.u32 %v4386_v61, %v23000_v33  ;;  %v4400_v4 = vshll.u32 %v16851_v5, 16  ;;  %v4410_v32 = vrot.slane %v4408_v41, 5  ;;  %v16856_v5 = vld [vmem:[%s21327_s8 + $0x34] sm:$0xf] }
 0x191   : > { %v27386_v37 = vcombine.low %v22808_v45, %v22811_v12  ;;  %v23039_v49 = vmax.bf16 %v27338_v42, %v16802_v28  ;;  %v4397_v59 = vor.u32 %v4396_v56, %v23016_v36  ;;  %19228 = vmatprep.mubr.msk.bf16.mxu1 %vm930_vm3, %v17330_v46  ;;  %v23044_v33 = vmax.bf16 %v27338_v42, %v16803_v34  ;;  %v17296_v12 = vld [vmem:[%s21327_s8 + $0x84] sm:$0xf]  ;;  %v17297_v20 = vld [vmem:[%s21327_s8 + $0x88] sm:$0xf] }
 0x192   : > { %18931 = vmatpush3.bf16.msra.mxu0 %v20746_v7  ;;  %v8742_v54 = vor.u32 %v8741_v63, %v8738_v47  ;;  %v16804_v7 = vld [vmem:[%s21327_s8 + $0xd0] sm:$0xf]  ;;  %v4418_v47 = vshrl.u32 %v16853_v3, 16  ;;  %v4429_v61 = vshrl.u32 %v16855_v31, 16  ;;  %v4432_v41 = vshll.u32 %v16855_v31, 16 }
 0x193   : > { %18964 = vmatprep.subr.bf16.mxu0 %v23007_v8  ;;  %v23050_v63 = vmax.bf16 %v27338_v42, %v16804_v7  ;;  %v23052_v9 = vrot.slane %v4414_v26, 5  ;;  %v4424_v3 = vshll.u32 %v16854_v18, 16  ;;  %v23057_v56 = vrot.slane %v4387_v0, 4  ;;  %v17298_v7 = vld [vmem:[%s21327_s8 + $0x8c] sm:$0x1] }
 0x194   : > { %v8743_v14 = vrot.slane %v8742_v54, 4  ;;  %v23059_v27 = vrot.slane %v4400_v4, 5  ;;  %v4411_v28 = vor.u32 %v4410_v32, %v4407_v53  ;;  %v23065_v54 = vrot.slane %v4397_v59, 4  ;;  %v16858_v53 = vld [vmem:[%s21327_s8 + $0x3c] sm:$0xf]  ;;  %v27387_v59 = vld [vmem:[#allocation11_spill] sm:$0xff] }
 0x195   : > { %18901 = vmatmul.mubr.msk.bf16.gmra.mrb[8].mxu0 %vm930_vm3, %v27385_v35  ;;  %v8753_v35 = vrot.slane %v8752_v52, 4  ;;  %v23067_v26 = vrot.slane %v4418_v47, 4  ;;  %v8760_v31 = vshrl.u32 %v17296_v12, 16  ;;  %v8763_v52 = vshll.u32 %v17296_v12, 16  ;;  %v27388_v47 = vld [vmem:[#allocation12_spill] sm:$0xff] }
 0x196   : > { %18904 = vmatprep.mubr.msk.bf16.mxu0 %vm930_vm3, %v27386_v37  ;;  %v8748_v45 = vsel %vm21362_vm2, %v8743_v14, %v8747_v60  ;;  %v20758_v60 = vld [vmem:[%s27212_s5 + $0xa8] sm:$0xff]   ;;  %v23072_v25 = vrot.slane %v4432_v41, 5  ;;  %v4438_v4 = vshll.u32 %v16856_v5, 16  ;;  %v4442_v32 = vshrl.u32 %v16856_v5, 16 }
 0x197   : > { %v8758_v46 = vsel %vm21362_vm2, %v8753_v35, %v8757_v43  ;;  %v23070_v43 = vrot.slane %v4429_v61, 4  ;;  %v23076_v0 = vrot.slane %v4424_v3, 5  ;;  %v8762_v18 = vrot.slane %v8760_v31, 4  ;;  %v20759_v3 = vld [vmem:[%s27212_s5 + $0xb0] sm:$0xff]   ;;  %v27390_v5 = vld [vmem:[#allocation16_spill] sm:$0xff] }
 0x198   : > { %v17331_v34 = vcombine.low %v8748_v45, %v8758_v46  ;;  %v8765_v14 = vrot.slane %v8763_v52, 5  ;;  %v8769_v37 = vshll.u32 %v17297_v20, 16  ;;  %v27389_v35 = vcombine.low %v27387_v59, %v27388_v47  ;;  %v27391_v46 = vld [vmem:[#allocation17_spill] sm:$0xff] }
 0x199   : > { %v23087_v41 = vrot.slane %v4411_v28, 4  ;;  %v8773_v45 = vshrl.u32 %v17297_v20, 16  ;;  %v8779_v12 = vshll.u32 %v17298_v7, 16  ;;  %v4421_v31 = vor.u32 %v23067_v26, %v23052_v9  ;;  %v17300_v7 = vld [vmem:[%s21327_s8 + $0x94] sm:$0xf] }
 0x19a   : > { %19229 = vmatmul.mubr.msk.bf16.vlgmr.msra.gmra.mrb[0].mxu1 %vm930_vm3, %v17331_v34  ;;  %v27392_v34 = vcombine.low %v27390_v5, %v27391_v46  ;;  %v4453_v28 = vshrl.u32 %v16858_v53, 16  ;;  %v8766_v52 = vor.u32 %v8765_v14, %v8762_v18  ;;  %v8771_v20 = vrot.slane %v8769_v37, 5  ;;  %v17301_v46 = vld [vmem:[%s21327_s8 + $0x98] sm:$0x1]  ;;  %v16859_v26 = vld [vmem:[%s21327_s8 + $0x40] sm:$0xf] }
 0x19b   : > { %19245 = vmatpush3.bf16.msra.mxu1 %v22993_v1  ;;  %v17299_v1 = vld [vmem:[%s21327_s8 + $0x90] sm:$0xf]  ;;  %v4435_v59 = vor.u32 %v23072_v25, %v23070_v43  ;;  %v23102_v47 = vrot.slane %v4438_v4, 5  ;;  %v8775_v61 = vrot.slane %v8773_v45, 4  ;;  %v4456_v11 = vshll.u32 %v16858_v53, 16 }
 0x19c   : > { %19246 = vmatprep.subr.bf16.mxu1 %v20758_v60  ;;  %v8767_v5 = vrot.slane %v8766_v52, 4  ;;  %v8787_v6 = vshll.u32 %v17299_v1, 16  ;;  %v8781_v18 = vrot.slane %v8779_v12, 5  ;;  %v8793_v14 = vshll.u32 %v17300_v7, 16  ;;  %v27394_v12 = vld [vmem:[#allocation20_spill] sm:$0xff] }
 0x19d   : > { %18905 = vmatmul.mubr.msk.bf16.gmra.mrb[12].mxu0 %vm930_vm3, %v27389_v35  ;;  %v23104_v35 = vrot.slane %v4442_v32, 4  ;;  %v8776_v16 = vor.u32 %v8775_v61, %v8771_v20  ;;  %v8797_v37 = vshrl.u32 %v17300_v7, 16  ;;  %v4455_v39 = vrot.slane %v4453_v28, 4  ;;  %v27393_v61 = vld [vmem:[#allocation19_spill] sm:$0xff] }
 0x19e   : > { %18908 = vmatprep.mubr.msk.bf16.mxu0 %vm930_vm3, %v27392_v34  ;;  %v8784_v34 = vshrl.u32 %v17299_v1, 16  ;;  %v8772_v43 = vsel %vm21362_vm2, %v8767_v5, %v8771_v20  ;;  %v8789_v4 = vrot.slane %v8787_v6, 5  ;;  %v8795_v53 = vrot.slane %v8793_v14, 5 }
 0x19f   : > { %19247 = vmatpush3.bf16.msra.mxu1 %v20758_v60  ;;  %v8777_v32 = vrot.slane %v8776_v16, 4  ;;  %v8799_v45 = vrot.slane %v8797_v37, 4  ;;  %v8803_v52 = vshll.u32 %v17301_v46, 16  ;;  %v4458_v1 = vrot.slane %v4456_v11, 5 }
 0x1a0   : > { %19248 = vmatprep.subr.bf16.mxu1 %v20759_v3  ;;  %v8786_v25 = vrot.slane %v8784_v34, 4  ;;  %v4462_v51 = vshll.u32 %v16859_v26, 16  ;;  %v4466_v60 = vshrl.u32 %v16859_v26, 16  ;;  %v27395_v7 = vcombine.low %v27393_v61, %v27394_v12  ;;  %v17304_v61 = vld [vmem:[%s21327_s8 + $0xa4] sm:$0x1] }
 0x1a1   : > { %v4403_v16 = vsel %vm21362_vm2, %v23065_v54, %v23059_v27  ;;  %v8782_v6 = vsel %vm21362_vm2, %v8777_v32, %v8781_v18  ;;  %v8800_v28 = vor.u32 %v8799_v45, %v8795_v53  ;;  %v8805_v11 = vrot.slane %v8803_v52, 5 }
 0x1a2   : > { %v8790_v22 = vor.u32 %v8789_v4, %v8786_v25  ;;  %v27396_v20 = vcombine.low %v22367_v21, %v22370_v10  ;;  %v4417_v5 = vsel %vm21362_vm2, %v23087_v41, %v23052_v9  ;;  %v4422_v27 = vrot.slane %v4421_v31, 4  ;;  %v16860_v21 = vld [vmem:[%s21327_s8 + $0x44] sm:$0x1]  ;;  %v17302_v31 = vld [vmem:[%s21327_s8 + $0x9c] sm:$0xf] }
 0x1a3   : > { %19249 = vmatpush3.bf16.msra.mxu1 %v20759_v3  ;;  %v20761_v3 = vld [vmem:[%s27212_s5 + $0xb8] sm:$0xff]   ;;  %v17332_v54 = vcombine.low %v8772_v43, %v8782_v6  ;;  %v4436_v34 = vrot.slane %v4435_v59, 4  ;;  %v4445_v26 = vor.u32 %v23104_v35, %v23102_v47  ;;  %v4448_v18 = vshll.u32 %v16857_v50, 16  ;;  %v16861_v4 = vld [vmem:[%s21327_s8 + $0x48] sm:$0xf] }
 0x1a4   : > { %v8791_v46 = vrot.slane %v8790_v22, 4  ;;  %v8801_v14 = vrot.slane %v8800_v28, 4  ;;  %19250 = vmatprep.subr.bf16.mxu1 %v20761_v3  ;;  %v4459_v10 = vor.u32 %v4458_v1, %v4455_v39  ;;  %v23135_v37 = vrot.slane %v4462_v51, 5  ;;  %v17303_v1 = vld [vmem:[%s21327_s8 + $0xa0] sm:$0xf]  ;;  %v27399_v6 = vld [vmem:[#allocation24_spill] sm:$0xff] }
 0x1a5   : > { %18909 = vmatmul.mubr.msk.bf16.gmra.mrb[16].mxu0 %vm930_vm3, %v27395_v7  ;;  %v4468_v25 = vrot.slane %v4466_v60, 4  ;;  %19232 = vmatprep.mubr.msk.bf16.mxu1 %vm930_vm3, %v17332_v54  ;;  %v27397_v51 = vsel %vm21362_vm2, %v23057_v56, %v23016_v36  ;;  %v23156_v59 = vmax.bf16 %v27338_v42, %v4403_v16  ;;  %v4427_v35 = vsel %vm21362_vm2, %v4422_v27, %v23076_v0  ;;  %v16862_v36 = vld [vmem:[%s21327_s8 + $0x4c] sm:$0xf]  ;;  %v27398_v16 = vld [vmem:[#allocation23_spill] sm:$0xff]  ;;  %v27401_v27 = vld [vmem:[#allocation25_spill] sm:$0xff] }
 0x1a6   : > { %18912 = vmatprep.mubr.msk.bf16.mxu0 %vm930_vm3, %v27396_v20  ;;  %v8796_v22 = vsel %vm21362_vm2, %v8791_v46, %v8795_v53  ;;  %v23150_v39 = vmax.bf16 %v27338_v42, %v27397_v51  ;;  %v8806_v41 = vsel %vm21362_vm2, %v8801_v14, %v8805_v11  ;;  %v23162_v43 = vmax.bf16 %v27338_v42, %v4417_v5  ;;  %v23189_v5 = vld [vmem:[%s27212_s5 + $0xc0] sm:$0xff]   ;;  %v27402_v54 = vld [vmem:[#allocation26_spill] sm:$0xff]  ;;  %v17305_v51 = vld [vmem:[%s21327_s8 + $0xa8] sm:$0xf] }
 0x1a7   : > { %19251 = vmatpush3.bf16.msra.mxu1 %v20761_v3  ;;  %v17333_v56 = vcombine.low %v8796_v22, %v8806_v41  ;;  %v4441_v32 = vsel %vm21362_vm2, %v4436_v34, %v23102_v47  ;;  %v23169_v53 = vrot.slane %v4445_v26, 4  ;;  %v23171_v45 = vrot.slane %v4448_v18, 5  ;;  %v17276_v9 = vld [vmem:[%s21327_s8 + $0x34] sm:$0xf] }
 0x1a8   : > { %v4472_v52 = vshll.u32 %v16860_v21, 16  ;;  %v23174_v60 = vrot.slane %v4459_v10, 4  ;;  %v4469_v0 = vor.u32 %v4468_v25, %v23135_v37  ;;  %v8808_v12 = vshrl.u32 %v17302_v31, 16  ;;  %19284 = vmatprep.subr.bf16.mxu1 %v23189_v5 }
 0x1a9   : > { %19233 = vmatmul.mubr.msk.bf16.gmra.mrb[4].mxu1 %vm930_vm3, %v17333_v56  ;;  %v8811_v7 = vshll.u32 %v17302_v31, 16  ;;  %v27400_v28 = vcombine.low %v27398_v16, %v27399_v6  ;;  %v23184_v47 = vmax.bf16 %v27338_v42, %v4427_v35  ;;  %v4477_v11 = vshrl.u32 %v16861_v4, 16  ;;  %v17306_v56 = vld [vmem:[%s21327_s8 + $0xac] sm:$0xf] }
 0x1aa   : > { %v4480_v3 = vshll.u32 %v16861_v4, 16  ;;  %v4486_v20 = vshll.u32 %v16862_v36, 16  ;;  %v27403_v46 = vcombine.low %v27401_v27, %v27402_v54  ;;  %v23196_v34 = vmax.bf16 %v27338_v42, %v4441_v32 }
 0x1ab   : > { %v8810_v26 = vrot.slane %v8808_v12, 4  ;;  %v8813_v18 = vrot.slane %v8811_v7, 5  ;;  %v8817_v14 = vshll.u32 %v17303_v1, 16  ;;  %v4451_v21 = vsel %vm21362_vm2, %v23169_v53, %v23171_v45  ;;  %v16864_v45 = vld [vmem:[%s21327_s8 + $0x54] sm:$0xf] }
 0x1ac   : > { %v4474_v10 = vrot.slane %v4472_v52, 5  ;;  %v8821_v25 = vshrl.u32 %v17303_v1, 16  ;;  %v8827_v22 = vshll.u32 %v17304_v61, 16  ;;  %v4465_v41 = vsel %vm21362_vm2, %v23174_v60, %v23135_v37  ;;  %v17307_v7 = vld [vmem:[%s21327_s8 + $0xb0] sm:$0x1] }
 0x1ad   : > { %18913 = vmatmul.mubr.msk.bf16.gmra.mrb[20].mxu0 %vm930_vm3, %v27400_v28  ;;  %v4470_v31 = vrot.slane %v4469_v0, 4  ;;  %v8814_v35 = vor.u32 %v8813_v18, %v8810_v26  ;;  %v8819_v4 = vrot.slane %v8817_v14, 5  ;;  %v4479_v32 = vrot.slane %v4477_v11, 4  ;;  %v16865_v28 = vld [vmem:[%s21327_s8 + $0x58] sm:$0xf]  ;;  %v27405_v26 = vld [vmem:[#allocation28_spill] sm:$0xff] }
 0x1ae   : > { %18916 = vmatprep.mubr.msk.bf16.mxu0 %vm930_vm3, %v27403_v46  ;;  %v4482_v12 = vrot.slane %v4480_v3, 5  ;;  %v23209_v53 = vrot.slane %v4486_v20, 5  ;;  %v8823_v52 = vrot.slane %v8821_v25, 4  ;;  %v4490_v1 = vshrl.u32 %v16862_v36, 16  ;;  %v27404_v46 = vld [vmem:[#allocation27_spill] sm:$0xff] }
 0x1af   : > { %v8815_v61 = vrot.slane %v8814_v35, 4  ;;  %v8832_v16 = vshrl.u32 %v17305_v51, 16  ;;  %v8835_v6 = vshll.u32 %v17305_v51, 16  ;;  %v8829_v54 = vrot.slane %v8827_v22, 5  ;;  %v16863_v35 = vld [vmem:[%s21327_s8 + $0x50] sm:$0x1] }
 0x1b0   : > { %v8824_v27 = vor.u32 %v8823_v52, %v8819_v4  ;;  %v8841_v37 = vshll.u32 %v17306_v56, 16  ;;  %v8845_v60 = vshrl.u32 %v17306_v56, 16  ;;  %v4501_v0 = vshrl.u32 %v16864_v45, 16 }
 0x1b1   : > { %v8820_v11 = vsel %vm21362_vm2, %v8815_v61, %v8819_v4  ;;  %v8834_v3 = vrot.slane %v8832_v16, 4  ;;  %v8837_v20 = vrot.slane %v8835_v6, 5  ;;  %v27406_v18 = vcombine.low %v27404_v46, %v27405_v26 }
 0x1b2   : > { %v8825_v36 = vrot.slane %v8824_v27, 4  ;;  %v8843_v14 = vrot.slane %v8841_v37, 5  ;;  %v8847_v25 = vrot.slane %v8845_v60, 4  ;;  %v8851_v51 = vshll.u32 %v17307_v7, 16 }
 0x1b3   : > { %v27407_v22 = vcombine.low %v22494_v44, %v22497_v48  ;;  %v4492_v56 = vrot.slane %v4490_v1, 4  ;;  %v4504_v52 = vshll.u32 %v16864_v45, 16  ;;  %v4510_v4 = vshll.u32 %v16865_v28, 16 }
 0x1b4   : > { %v8838_v61 = vor.u32 %v8837_v20, %v8834_v3  ;;  %v4514_v16 = vshrl.u32 %v16865_v28, 16  ;;  %v8830_v6 = vsel %vm21362_vm2, %v8825_v36, %v8829_v54  ;;  %v8848_v46 = vor.u32 %v8847_v25, %v8843_v14  ;;  %v16866_v3 = vld [vmem:[%s21327_s8 + $0x5c] sm:$0x1]  ;;  %v16867_v36 = vld [vmem:[%s21327_s8 + $0x60] sm:$0xf] }
 0x1b5   : > { %18917 = vmatmul.mubr.msk.bf16.gmra.mrb[24].mxu0 %vm930_vm3, %v27406_v18  ;;  %v8853_v27 = vrot.slane %v8851_v51, 5  ;;  %v23228_v37 = vmax.bf16 %v27338_v42, %v4451_v21  ;;  %v4475_v48 = vsel %vm21362_vm2, %v4470_v31, %v4474_v10  ;;  %v17334_v44 = vcombine.low %v8820_v11, %v8830_v6  ;;  %v23307_v18 = vld [vmem:[%s21327_s8 + $0xc8] sm:$0x1] }
 0x1b6   : > { %18920 = vmatprep.mubr.msk.bf16.mxu0 %vm930_vm3, %v27407_v22  ;;  %v8839_v7 = vrot.slane %v8838_v61, 4  ;;  %v23233_v45 = vmax.bf16 %v27338_v42, %v4465_v41  ;;  %v4483_v1 = vor.u32 %v4482_v12, %v4479_v32  ;;  %v4496_v60 = vshll.u32 %v16863_v35, 16  ;;  %v17308_v12 = vld [vmem:[%s21327_s8 + $0xb4] sm:$0xf]  ;;  %27410 = vst [vmem:[#allocation8_spill] sm:$0xff] %v23307_v18 }
 0x1b7   : > { %v8849_v28 = vrot.slane %v8848_v46, 4  ;;  %v4493_v54 = vor.u32 %v4492_v56, %v23209_v53  ;;  %v4503_v20 = vrot.slane %v4501_v0, 4  ;;  %v4506_v26 = vrot.slane %v4504_v52, 5  ;;  %19236 = vmatprep.mubr.msk.bf16.mxu1 %vm930_vm3, %v17334_v44  ;;  %v23265_v52 = vld [vmem:[%s21327_s8 + $0xb8] sm:$0xf]  ;;  %v27421_v0 = vld [vmem:[#allocation7_spill] sm:$0xff] }
 0x1b8   : > { %v8844_v21 = vsel %vm21362_vm2, %v8839_v7, %v8843_v14  ;;  %v23241_v10 = vmax.bf16 %v27338_v42, %v4475_v48  ;;  %v23243_v41 = vrot.slane %v4510_v4, 5  ;;  %v4516_v31 = vrot.slane %v4514_v16, 4  ;;  %v23328_v11 = vld [vmem:[%s21327_s8 + $0x68] sm:$0x1] }
 0x1b9   : > { %v8854_v32 = vsel %vm21362_vm2, %v8849_v28, %v8853_v27  ;;  %v27408_v25 = vcombine.low %v22515_v23, %v22518_v55  ;;  %v23260_v22 = vrot.slane %v4483_v1, 4  ;;  %v23262_v35 = vrot.slane %v4496_v60, 5  ;;  %v23275_v55 = vld [vmem:[%s21327_s8 + $0xbc] sm:$0x1]  ;;  %27413 = vst [vmem:[#allocation9_spill] sm:$0xff] %v23328_v11 }
 0x1ba   : > { %v17335_v14 = vcombine.low %v8844_v21, %v8854_v32  ;;  %v4520_v56 = vshll.u32 %v16866_v3, 16  ;;  %v27409_v4 = vcombine.low %v22814_v57, %v22817_v24  ;;  %v23271_v61 = vrot.slane %v4493_v54, 4  ;;  %v16868_v24 = vld [vmem:[%s21327_s8 + $0x64] sm:$0xf] }
 0x1bb   : > { %v4507_v23 = vor.u32 %v4506_v26, %v4503_v20  ;;  %v8856_v16 = vshrl.u32 %v17308_v12, 16  ;;  %v8859_v6 = vshll.u32 %v17308_v12, 16  ;;  %v4517_v48 = vor.u32 %v4516_v31, %v23243_v41  ;;  %v17311_v26 = vld [vmem:[%s21327_s8 + $0xc0] sm:$0xf] }
 0x1bc   : > { %19237 = vmatmul.mubr.msk.bf16.gmra.mrb[8].mxu1 %vm930_vm3, %v17335_v14  ;;  %v4525_v57 = vshrl.u32 %v16867_v36, 16  ;;  %v4528_v44 = vshll.u32 %v16867_v36, 16  ;;  %v8865_v60 = vshll.u32 %v23265_v52, 16  ;;  %v4489_v28 = vsel %vm21362_vm2, %v23260_v22, %v23209_v53  ;;  %v23299_v36 = vld [vmem:[%s21327_s8 + $0xc4] sm:$0xf]  ;;  %v20748_v14 = vld [vmem:[%s27208_s1 + $0xe8] sm:$0xff]  }
 0x1bd   : > { %18921 = vmatmul.mubr.msk.bf16.gmra.mrb[28].mxu0 %vm930_vm3, %v27408_v25  ;;  %v8858_v7 = vrot.slane %v8856_v16, 4  ;;  %v8861_v1 = vrot.slane %v8859_v6, 5  ;;  %v23287_v54 = vrot.slane %v4520_v56, 5  ;;  %v8869_v3 = vshrl.u32 %v23265_v52, 16 }
 0x1be   : > { %18932 = vmatprep.mubr.msk.bf16.mxu0 %vm930_vm3, %v27409_v4  ;;  %v8875_v20 = vshll.u32 %v23275_v55, 16  ;;  %v4499_v21 = vsel %vm21362_vm2, %v23271_v61, %v23262_v35  ;;  %v23296_v31 = vrot.slane %v4507_v23, 4  ;;  %v8867_v12 = vrot.slane %v8865_v60, 5 }
 0x1bf   : > { %v8862_v32 = vor.u32 %v8861_v1, %v8858_v7  ;;  %v23304_v25 = vrot.slane %v4517_v48, 4  ;;  %v4527_v56 = vrot.slane %v4525_v57, 4  ;;  %v4534_v4 = vshll.u32 %v16868_v24, 16  ;;  %v16870_v7 = vld [vmem:[%s21327_s8 + $0x6c] sm:$0xf] }
 0x1c0   : > { %v8871_v16 = vrot.slane %v8869_v3, 4  ;;  %v4530_v6 = vrot.slane %v4528_v44, 5  ;;  %v8880_v35 = vshrl.u32 %v17311_v26, 16  ;;  %v8883_v61 = vshll.u32 %v17311_v26, 16 }
 0x1c1   : > { %v8863_v46 = vrot.slane %v8862_v32, 4  ;;  %v27411_v23 = vcombine.low %v22823_v17, %v22826_v2  ;;  %v8877_v60 = vrot.slane %v8875_v20, 5  ;;  %v8889_v48 = vshll.u32 %v23299_v36, 16  ;;  %v20749_v20 = vld [vmem:[%s27208_s1 + $0xf0] sm:$0xff]  }
 0x1c2   : > { %v8872_v1 = vor.u32 %v8871_v16, %v8867_v12  ;;  %v8893_v57 = vshrl.u32 %v23299_v36, 16  ;;  %v27412_v44 = vcombine.low %v22829_v62, %v22832_v13  ;;  %v4538_v3 = vshrl.u32 %v16868_v24, 16  ;;  %v16871_v13 = vld [vmem:[%s21327_s8 + $0x70] sm:$0xf] }
 0x1c3   : > { %v8868_v17 = vsel %vm21362_vm2, %v8863_v46, %v8867_v12  ;;  %v8882_v2 = vrot.slane %v8880_v35, 4  ;;  %v8885_v26 = vrot.slane %v8883_v61, 5  ;;  %v8891_v16 = vrot.slane %v8889_v48, 5 }
 0x1c4   : > { %v8873_v32 = vrot.slane %v8872_v1, 4  ;;  %v4531_v62 = vor.u32 %v4530_v6, %v4527_v56  ;;  %v4549_v24 = vshrl.u32 %v16870_v7, 16  ;;  %v4513_v46 = vsel %vm21362_vm2, %v23296_v31, %v23243_v41  ;;  %v20750_v41 = vld [vmem:[%s27208_s1 + $0xf8] sm:$0xff]  }
 0x1c5   : > { %18933 = vmatmul.mubr.msk.bf16.vlgmr.msra.gmra.mrb[0].mxu0 %vm930_vm3, %v27411_v23  ;;  %v8895_v23 = vrot.slane %v8893_v57, 4  ;;  %v8886_v27 = vor.u32 %v8885_v26, %v8882_v2  ;;  %v4523_v56 = vsel %vm21362_vm2, %v23304_v25, %v23287_v54  ;;  %v23341_v6 = vrot.slane %v4534_v4, 5  ;;  %v23350_v2 = vld [vmem:[%s21327_s8 + $0x74] sm:$0x1] }
 0x1c6   : > { %18965 = vmatpush3.bf16.msra.mxu0 %v23007_v8  ;;  %18936 = vmatprep.mubr.msk.bf16.mxu0 %vm930_vm3, %v27412_v44  ;;  %v8899_v8 = vshll.u32 %v23307_v18, 16  ;;  %v4552_v44 = vshll.u32 %v16870_v7, 16  ;;  %v8878_v12 = vsel %vm21362_vm2, %v8873_v32, %v8877_v60  ;;  %v4540_v31 = vrot.slane %v4538_v3, 4 }
 0x1c7   : > { %18966 = vmatprep.subr.bf16.mxu0 %v20748_v14  ;;  %v8896_v35 = vor.u32 %v8895_v23, %v8891_v16  ;;  %v17336_v7 = vcombine.low %v8868_v17, %v8878_v12  ;;  %v8887_v1 = vrot.slane %v8886_v27, 4  ;;  %v4544_v60 = vshll.u32 %v23328_v11, 16  ;;  %v23510_v11 = vld [vmem:[%s21327_s8 + $0xa0] sm:$0xf] }
 0x1c8   : > { %v8901_v61 = vrot.slane %v8899_v8, 5  ;;  %v23347_v57 = vrot.slane %v4531_v62, 4  ;;  %v4551_v54 = vrot.slane %v4549_v24, 4  ;;  %v4554_v27 = vrot.slane %v4552_v44, 5  ;;  %v16876_v8 = vld [vmem:[%s21327_s8 + $0x84] sm:$0xf] }
 0x1c9   : > { %v8897_v48 = vrot.slane %v8896_v35, 4  ;;  %19240 = vmatprep.mubr.msk.bf16.mxu1 %vm930_vm3, %v17336_v7  ;;  %v8892_v25 = vsel %vm21362_vm2, %v8887_v1, %v8891_v16  ;;  %v27414_v4 = vcombine.low %v22835_v15, %v22838_v58  ;;  %v23365_v3 = vmax.bf16 %v27338_v42, %v4489_v28  ;;  %v17267_v16 = vld [vmem:[%s21327_s8 + $0x10] sm:$0xf]  ;;  %v17358_v15 = vld [vmem:[%s21327_s8 + $0xc] sm:$0xe]  ;;  %v27415_v58 = vld [vmem:[#allocation10_spill] sm:$0xff] }
 0x1ca   : > { %18967 = vmatpush3.bf16.msra.mxu0 %v20748_v14  ;;  %v4558_v14 = vshll.u32 %v16871_v13, 16  ;;  %v23368_v17 = vmax.bf16 %v27338_v42, %v4499_v21  ;;  %v4562_v26 = vshrl.u32 %v16871_v13, 16  ;;  %v27416_v23 = vcombine.low %v22841_v38, %v27415_v58  ;;  %v16873_v28 = vld [vmem:[%s21327_s8 + $0x78] sm:$0xf]  ;;  %v23386_v21 = vld [vmem:[%s21327_s8 + $0x7c] sm:$0xf] }
 0x1cb   : > { %18968 = vmatprep.subr.bf16.mxu0 %v20749_v20  ;;  %v8902_v32 = vsel %vm21362_vm2, %v8897_v48, %v8901_v61  ;;  %v23379_v53 = vmax.bf16 %v27338_v42, %v4513_v46  ;;  %v23382_v22 = vmax.bf16 %v27338_v42, %v4523_v56  ;;  %27417 = vst [vmem:[#allocation11_spill] sm:$0xff] %v23386_v21  ;;  %v23392_v38 = vld [vmem:[%s27208_s1 + $0x100] sm:$0xff]   ;;  %v23395_v13 = vrot.slane %v4544_v60, 5  ;;  %v17268_v46 = vld [vmem:[%s21327_s8 + $0x14] sm:$0x1] }
 0x1cc   : > { %v17337_v62 = vcombine.low %v8892_v25, %v8902_v32  ;;  %v23397_v24 = vrot.slane %v4558_v14, 5  ;;  %v4568_v44 = vshll.u32 %v23350_v2, 16  ;;  %v4537_v12 = vsel %vm21362_vm2, %v23347_v57, %v23341_v6  ;;  %v17270_v7 = vld [vmem:[%s21327_s8 + $0x1c] sm:$0xf]  ;;  %v17359_v1 = vld [vmem:[%s21327_s8 + $0x18] sm:$0xe] }
 0x1cd   : > { %18937 = vmatmul.mubr.msk.bf16.gmra.mrb[4].mxu0 %vm930_vm3, %v27414_v4  ;;  %v4555_v35 = vor.u32 %v4554_v27, %v4551_v54  ;;  %v17374_v61 = vrot.slane %v17358_v15, 9  ;;  %v9291_v56 = vrot.slane %v17267_v16, 5  ;;  %v4573_v60 = vshrl.u32 %v16873_v28, 16  ;;  %v17271_v2 = vld [vmem:[%s21327_s8 + $0x20] sm:$0x1]  ;;  %27435 = vst [vmem:[#allocation20_spill] sm:$0xff] %v23510_v11 }
 0x1ce   : > { %18940 = vmatprep.mubr.msk.bf16.mxu0 %vm930_vm3, %v27416_v23  ;;  %18969 = vmatpush3.bf16.msra.mxu0 %v20749_v20  ;;  %v4541_v20 = vor.u32 %v4540_v31, %v23341_v6  ;;  %v4564_v31 = vrot.slane %v4562_v26, 4  ;;  %v4576_v14 = vshll.u32 %v16873_v28, 16  ;;  %v4582_v48 = vshll.u32 %v23386_v21, 16  ;;  %v23415_v27 = vld [vmem:[%s21327_s8 + $0x88] sm:$0xf] }
 0x1cf   : > { %18970 = vmatprep.subr.bf16.mxu0 %v20750_v41  ;;  %19241 = vmatmul.mubr.msk.bf16.gmra.mrb[12].mxu1 %vm930_vm3, %v17337_v62  ;;  %v4586_v25 = vshrl.u32 %v23386_v21, 16  ;;  %v9292_v6 = vsel %vm21791_vm6, %v17374_v61, %v9291_v56  ;;  %v9293_v57 = vrot.slane %v9291_v56, 4  ;;  %v9294_v54 = vrot.slane %v17268_v46, 5  ;;  %27419 = vst [vmem:[#allocation12_spill] sm:$0xff] %v23415_v27  ;;  %v27420_v62 = vld [vmem:[#allocation14_spill] sm:$0xff] }
 0x1d0   : > { %v4597_v32 = vshrl.u32 %v16876_v8, 16  ;;  %v4600_v26 = vshll.u32 %v16876_v8, 16  ;;  %v17375_v16 = vrot.slane %v17359_v1, 9  ;;  %v9298_v15 = vrot.slane %v17270_v7, 5  ;;  %v27423_v8 = vld [vmem:[#allocation15_spill] sm:$0xff]  ;;  %v27424_v1 = vld [vmem:[#allocation13_spill] sm:$0xff] }
 0x1d1   : > { %v4542_v58 = vrot.slane %v4541_v20, 4  ;;  %v4556_v23 = vrot.slane %v4555_v35, 4  ;;  %v9301_v28 = vrot.slane %v17271_v2, 5  ;;  %v27422_v61 = vcombine.low %v27420_v62, %v27421_v0  ;;  %v23429_v20 = vld [vmem:[%s21327_s8 + $0x80] sm:$0x1] }
 0x1d2   : > { %18971 = vmatpush3.bf16.msra.mxu0 %v20750_v41  ;;  %v9295_v41 = vsel %vm21791_vm6, %v9293_v57, %v9294_v54  ;;  %v4565_v46 = vor.u32 %v4564_v31, %v23397_v24  ;;  %v4575_v56 = vrot.slane %v4573_v60, 4  ;;  %v4578_v50 = vrot.slane %v4576_v14, 5  ;;  %27426 = vst [vmem:[#allocation16_spill] sm:$0xff] %v23429_v20 }
 0x1d3   : > { %19004 = vmatprep.subr.bf16.mxu0 %v23392_v38  ;;  %v17398_v51 = vcombine.low %v9292_v6, %v9295_v41  ;;  %v27425_v7 = vcombine.low %v27423_v8, %v27424_v1  ;;  %v4606_v35 = vshll.u32 %v23415_v27, 16  ;;  %v4610_v0 = vshrl.u32 %v23415_v27, 16  ;;  %v17273_v1 = vld [vmem:[%s21327_s8 + $0x28] sm:$0xf]  ;;  %v17277_v27 = vld [vmem:[%s21327_s8 + $0x38] sm:$0x1] }
 0x1d4   : > { %v9299_v2 = vsel %vm21791_vm6, %v17375_v16, %v9298_v15  ;;  %v9300_v31 = vrot.slane %v9298_v15, 4  ;;  %v23435_v60 = vrot.slane %v4582_v48, 5  ;;  %v4588_v14 = vrot.slane %v4586_v25, 4  ;;  %v23447_v16 = vld [vmem:[%s21327_s8 + $0x8c] sm:$0x1] }
 0x1d5   : > { %18941 = vmatmul.mubr.msk.bf16.gmra.mrb[8].mxu0 %vm930_vm3, %v27422_v61  ;;  %v4599_v6 = vrot.slane %v4597_v32, 4  ;;  %v4602_v57 = vrot.slane %v4600_v26, 5  ;;  %19252 = vmatprep.mubr.msk.bf16.mxu1 %vm930_vm3, %v17398_v51  ;;  %v4547_v54 = vsel %vm21362_vm2, %v4542_v58, %v23395_v13  ;;  %v4561_v41 = vsel %vm21362_vm2, %v4556_v23, %v23397_v24  ;;  %27427 = vst [vmem:[#allocation17_spill] sm:$0xff] %v23447_v16  ;;  %v16879_v48 = vld [vmem:[%s21327_s8 + $0x90] sm:$0xf]  ;;  %v20764_v24 = vld [vmem:[%s27212_s5 + $0xc8] sm:$0xff]  }
 0x1d6   : > { %18944 = vmatprep.mubr.msk.bf16.mxu0 %vm930_vm3, %v27425_v7  ;;  %v23444_v62 = vrot.slane %v4568_v44, 5  ;;  %v9302_v25 = vsel %vm21791_vm6, %v9300_v31, %v9301_v28  ;;  %v23452_v32 = vrot.slane %v4565_v46, 4  ;;  %v4579_v51 = vor.u32 %v4578_v50, %v4575_v56  ;;  %v17360_v15 = vld [vmem:[%s21327_s8 + $0x24] sm:$0xe]  ;;  %v23466_v50 = vld [vmem:[%s21327_s8 + $0x94] sm:$0xf] }
 0x1d7   : > { %v4592_v13 = vshll.u32 %v23429_v20, 16  ;;  %v17399_v26 = vcombine.low %v9299_v2, %v9302_v25  ;;  %v23463_v23 = vrot.slane %v4606_v35, 5  ;;  %v4612_v28 = vrot.slane %v4610_v0, 4  ;;  %27428 = vst [vmem:[#allocation19_spill] sm:$0xff] %v23466_v50  ;;  %v17274_v7 = vld [vmem:[%s21327_s8 + $0x2c] sm:$0x1] }
 0x1d8   : > { %v23469_v61 = vmax.bf16 %v27338_v42, %v4537_v12  ;;  %v4589_v46 = vor.u32 %v4588_v14, %v23435_v60  ;;  %v4603_v56 = vor.u32 %v4602_v57, %v4599_v6  ;;  %v4616_v8 = vshll.u32 %v23447_v16, 16  ;;  %v16882_v31 = vld [vmem:[%s21327_s8 + $0x9c] sm:$0xf]  ;;  %v27430_v6 = vld [vmem:[#allocation21_spill] sm:$0xff] }
 0x1d9   : > { %19253 = vmatmul.mubr.msk.bf16.vlgmr.msra.gmra.mrb[16].mxu1 %vm930_vm3, %v17399_v26  ;;  %v23477_v2 = vmax.bf16 %v27338_v42, %v4547_v54  ;;  %v23480_v35 = vmax.bf16 %v27338_v42, %v4561_v41  ;;  %v4621_v0 = vshrl.u32 %v16879_v48, 16  ;;  %v17376_v12 = vrot.slane %v17360_v15, 9  ;;  %v27429_v14 = vld [vmem:[#allocation18_spill] sm:$0xff]  ;;  %v17361_v58 = vld [vmem:[%s21327_s8 + $0x30] sm:$0xe] }
 0x1da   : > { %19285 = vmatpush3.bf16.msra.mxu1 %v23189_v5  ;;  %v27431_v57 = vcombine.low %v27429_v14, %v27430_v6  ;;  %v23492_v25 = vrot.slane %v4579_v51, 4  ;;  %v23494_v41 = vrot.slane %v4592_v13, 5  ;;  %v4624_v26 = vshll.u32 %v16879_v48, 16  ;;  %v20765_v5 = vld [vmem:[%s27212_s5 + $0xd0] sm:$0xff]   ;;  %v27432_v15 = vld [vmem:[#allocation22_spill] sm:$0xff] }
 0x1db   : > { %19286 = vmatprep.subr.bf16.mxu1 %v20764_v24  ;;  %v27433_v14 = vld [vmem:[#allocation29_spill] sm:$0xff]  ;;  %v4630_v51 = vshll.u32 %v23466_v50, 16  ;;  %v9305_v44 = vrot.slane %v17273_v1, 5  ;;  %v9308_v13 = vrot.slane %v17274_v7, 5  ;;  %v4590_v48 = vrot.slane %v4589_v46, 4 }
 0x1dc   : > { %v27434_v6 = vcombine.low %v27432_v15, %v27433_v14  ;;  %v4604_v54 = vrot.slane %v4603_v56, 4  ;;  %v4618_v16 = vrot.slane %v4616_v8, 5  ;;  %v4634_v20 = vshrl.u32 %v23466_v50, 16  ;;  %v20766_v50 = vld [vmem:[%s27212_s5 + $0xd8] sm:$0xff]  }
 0x1dd   : > { %18945 = vmatmul.mubr.msk.bf16.gmra.mrb[12].mxu0 %vm930_vm3, %v27431_v57  ;;  %v4613_v57 = vor.u32 %v4612_v28, %v23463_v23  ;;  %v4623_v21 = vrot.slane %v4621_v0, 4  ;;  %v9306_v15 = vsel %vm21791_vm6, %v17376_v12, %v9305_v44  ;;  %v9307_v14 = vrot.slane %v9305_v44, 4  ;;  %v23522_v12 = vld [vmem:[%s21327_s8 + $0x98] sm:$0x1] }
 0x1de   : > { %18948 = vmatprep.mubr.msk.bf16.mxu0 %vm930_vm3, %v27434_v6  ;;  %v17377_v28 = vrot.slane %v17361_v58, 9  ;;  %19287 = vmatpush3.bf16.msra.mxu1 %v20764_v24  ;;  %v4626_v6 = vrot.slane %v4624_v26, 5  ;;  %v4645_v1 = vshrl.u32 %v16882_v31, 16  ;;  %v4648_v7 = vshll.u32 %v16882_v31, 16  ;;  %27436 = vst [vmem:[#allocation23_spill] sm:$0xff] %v23522_v12 }
 0x1df   : > { %v9312_v18 = vrot.slane %v17276_v9, 5  ;;  %19288 = vmatprep.subr.bf16.mxu1 %v20765_v5  ;;  %v4614_v46 = vrot.slane %v4613_v57, 4  ;;  %v23514_v56 = vrot.slane %v4630_v51, 5  ;;  %v9309_v8 = vsel %vm21791_vm6, %v9307_v14, %v9308_v13  ;;  %v27438_v51 = vld [vmem:[#allocation31_spill] sm:$0xff] }
 0x1e0   : > { %v9315_v0 = vrot.slane %v17277_v27, 5  ;;  %v4636_v44 = vrot.slane %v4634_v20, 4  ;;  %v4654_v24 = vshll.u32 %v23510_v11, 16  ;;  %v4658_v58 = vshrl.u32 %v23510_v11, 16  ;;  %v27437_v20 = vld [vmem:[#allocation30_spill] sm:$0xff] }
 0x1e1   : > { %v17400_v9 = vcombine.low %v9306_v15, %v9309_v8  ;;  %v4585_v31 = vsel %vm21362_vm2, %v23492_v25, %v23435_v60  ;;  %v4595_v27 = vsel %vm21362_vm2, %v4590_v48, %v23494_v41  ;;  %v9313_v26 = vsel %vm21791_vm6, %v17377_v28, %v9312_v18  ;;  %v27440_v41 = vld [vmem:[#allocation32_spill] sm:$0xff]  ;;  %v27441_v48 = vld [vmem:[#allocation33_spill] sm:$0xff]  ;;  %v17365_v11 = vld [vmem:[%s21327_s8 + $0x60] sm:$0xe] }
 0x1e2   : > { %v9314_v57 = vrot.slane %v9312_v18, 4  ;;  %19289 = vmatpush3.bf16.msra.mxu1 %v20765_v5  ;;  %v27439_v13 = vcombine.low %v27437_v20, %v27438_v51  ;;  %v4609_v60 = vsel %vm21362_vm2, %v4604_v54, %v23463_v23  ;;  %v4627_v25 = vor.u32 %v4626_v6, %v4623_v21  ;;  %v17362_v54 = vld [vmem:[%s21327_s8 + $0x3c] sm:$0xe]  ;;  %v16885_v8 = vld [vmem:[%s21327_s8 + $0xa8] sm:$0xf] }
 0x1e3   : > { %v4647_v15 = vrot.slane %v4645_v1, 4  ;;  %v4650_v14 = vrot.slane %v4648_v7, 5  ;;  %19256 = vmatprep.mubr.msk.bf16.mxu1 %vm930_vm3, %v17400_v9  ;;  %v27442_v18 = vcombine.low %v27440_v41, %v27441_v48  ;;  %v4619_v28 = vsel %vm21362_vm2, %v4614_v46, %v4618_v16  ;;  %19290 = vmatprep.subr.bf16.mxu1 %v20766_v50  ;;  %v17279_v20 = vld [vmem:[%s21327_s8 + $0x40] sm:$0xf]  ;;  %v17282_v51 = vld [vmem:[%s21327_s8 + $0x4c] sm:$0xf] }
 0x1e4   : > { %v4640_v21 = vshll.u32 %v23522_v12, 16  ;;  %v9316_v23 = vsel %vm21791_vm6, %v9314_v57, %v9315_v0  ;;  %v4637_v6 = vor.u32 %v4636_v44, %v23514_v56  ;;  %v23556_v1 = vrot.slane %v4654_v24, 5  ;;  %v17283_v5 = vld [vmem:[%s21327_s8 + $0x50] sm:$0x1] }
 0x1e5   : > { %18949 = vmatmul.mubr.msk.bf16.gmra.mrb[16].mxu0 %vm930_vm3, %v27439_v13  ;;  %v4660_v7 = vrot.slane %v4658_v58, 4  ;;  %v17401_v9 = vcombine.low %v9313_v26, %v9316_v23  ;;  %v27443_v16 = vsel %vm21362_vm2, %v23452_v32, %v23444_v62  ;;  %v23569_v0 = vmax.bf16 %v27338_v42, %v4585_v31  ;;  %v23578_v58 = vld [vmem:[%s21327_s8 + $0xa4] sm:$0x1]  ;;  %v23581_v26 = vld [vmem:[%s21327_s8 + $0xac] sm:$0xf] }
 0x1e6   : > { %18952 = vmatprep.mubr.msk.bf16.mxu0 %vm930_vm3, %v27442_v18  ;;  %v23566_v46 = vmax.bf16 %v27338_v42, %v27443_v16  ;;  %v23572_v44 = vmax.bf16 %v27338_v42, %v4595_v27  ;;  %v23575_v24 = vmax.bf16 %v27338_v42, %v4609_v60  ;;  %27444 = vst [vmem:[#allocation24_spill] sm:$0xff] %v23578_v58  ;;  %27445 = vst [vmem:[#allocation25_spill] sm:$0xff] %v23581_v26  ;;  %v17280_v31 = vld [vmem:[%s21327_s8 + $0x44] sm:$0x1]  ;;  %v17363_v18 = vld [vmem:[%s21327_s8 + $0x48] sm:$0xe] }
 0x1e7   : > { %19291 = vmatpush3.bf16.msra.mxu1 %v20766_v50  ;;  %v23584_v62 = vmax.bf16 %v27338_v42, %v4619_v28  ;;  %v4628_v32 = vrot.slane %v4627_v25, 4  ;;  %v4651_v57 = vor.u32 %v4650_v14, %v4647_v15  ;;  %v17378_v27 = vrot.slane %v17362_v54, 9  ;;  %v27447_v54 = vld [vmem:[#allocation34_spill] sm:$0xff] }
 0x1e8   : > { %19257 = vmatmul.mubr.msk.bf16.gmra.mrb[20].mxu1 %vm930_vm3, %v17401_v9  ;;  %v4642_v13 = vrot.slane %v4640_v21, 5  ;;  %v4669_v41 = vshrl.u32 %v16885_v8, 16  ;;  %v4672_v60 = vshll.u32 %v16885_v8, 16  ;;  %v9319_v48 = vrot.slane %v17279_v20, 5  ;;  %v27448_v8 = vld [vmem:[#allocation35_spill] sm:$0xff] }
 0x1e9   : > { %27446 = vst [vmem:[#allocation26_spill] sm:$0xff] %v23584_v62  ;;  %v4638_v23 = vrot.slane %v4637_v6, 4  ;;  %v4661_v16 = vor.u32 %v4660_v7, %v23556_v1  ;;  %v4664_v50 = vshll.u32 %v23578_v58, 16  ;;  %v4678_v28 = vshll.u32 %v23581_v26, 16 }
 0x1ea   : > { %v4682_v25 = vshrl.u32 %v23581_v26, 16  ;;  %v9320_v15 = vsel %vm21791_vm6, %v17378_v27, %v9319_v48  ;;  %v9321_v14 = vrot.slane %v9319_v48, 4  ;;  %v9322_v21 = vrot.slane %v17280_v31, 5  ;;  %v23609_v27 = vld [vmem:[%s27212_s5 + $0xe0] sm:$0xff]   ;;  %v27451_v31 = vld [vmem:[#allocation36_spill] sm:$0xff]  ;;  %v27452_v48 = vld [vmem:[#allocation37_spill] sm:$0xff] }
 0x1eb   : > { %v27449_v9 = vcombine.low %v27447_v54, %v27448_v8  ;;  %v4633_v6 = vsel %vm21362_vm2, %v4628_v32, %v23514_v56  ;;  %v23604_v7 = vrot.slane %v4651_v57, 4  ;;  %v17379_v20 = vrot.slane %v17363_v18, 9  ;;  %27450 = vst [vmem:[#allocation27_spill] sm:$0xff] %v23609_v27  ;;  %19324 = vmatprep.subr.bf16.mxu1 %v23609_v27 }
 0x1ec   : > { %v9326_v58 = vrot.slane %v17282_v51, 5  ;;  %v27453_v12 = vcombine.low %v27451_v31, %v27452_v48  ;;  %v4671_v54 = vrot.slane %v4669_v41, 4  ;;  %v4674_v8 = vrot.slane %v4672_v60, 5  ;;  %v16888_v60 = vld [vmem:[%s21327_s8 + $0xb4] sm:$0xf] }
 0x1ed   : > { %18953 = vmatmul.mubr.msk.bf16.gmra.mrb[20].mxu0 %vm930_vm3, %v27449_v9  ;;  %v9323_v56 = vsel %vm21791_vm6, %v9321_v14, %v9322_v21  ;;  %v9329_v32 = vrot.slane %v17283_v5, 5  ;;  %v4643_v57 = vsel %vm21362_vm2, %v4638_v23, %v4642_v13  ;;  %v4662_v51 = vrot.slane %v4661_v16, 4  ;;  %v23620_v9 = vld [vmem:[%s21327_s8 + $0xb0] sm:$0x1]  ;;  %v17286_v31 = vld [vmem:[%s21327_s8 + $0x5c] sm:$0x1] }
 0x1ee   : > { %18956 = vmatprep.mubr.msk.bf16.mxu0 %vm930_vm3, %v27453_v12  ;;  %v4666_v18 = vrot.slane %v4664_v50, 5  ;;  %27454 = vst [vmem:[#allocation28_spill] sm:$0xff] %v23620_v9  ;;  %v17402_v26 = vcombine.low %v9320_v15, %v9323_v56  ;;  %v23623_v12 = vrot.slane %v4678_v28, 5  ;;  %v4684_v41 = vrot.slane %v4682_v25, 4  ;;  %v23638_v25 = vld [vmem:[%s21327_s8 + $0xb8] sm:$0xf] }
 0x1ef   : > { %v9327_v5 = vsel %vm21791_vm6, %v17379_v20, %v9326_v58  ;;  %v9328_v13 = vrot.slane %v9326_v58, 4  ;;  %v23635_v28 = vmax.bf16 %v27338_v42, %v4633_v6  ;;  %v23641_v15 = vld [vmem:[%s21327_s8 + $0xbc] sm:$0x1]  ;;  %v17285_v58 = vld [vmem:[%s21327_s8 + $0x58] sm:$0xf]  ;;  %v23646_v14 = vmax.bf16 %v27338_v42, %v4643_v57 }
 0x1f0   : > { %19260 = vmatprep.mubr.msk.bf16.mxu1 %vm930_vm3, %v17402_v26  ;;  %v4657_v21 = vsel %vm21362_vm2, %v23604_v7, %v23556_v1  ;;  %v4675_v20 = vor.u32 %v4674_v8, %v4671_v54  ;;  %v17364_v48 = vld [vmem:[%s21327_s8 + $0x54] sm:$0xe]  ;;  %v17288_v56 = vld [vmem:[%s21327_s8 + $0x64] sm:$0xf]  ;;  %v4667_v50 = vsel %vm21362_vm2, %v4662_v51, %v4666_v18  ;;  %v4693_v26 = vshrl.u32 %v16888_v60, 16  ;;  %v27455_v54 = vld [vmem:[#allocation38_spill] sm:$0xff] }
 0x1f1   : > { %v9330_v6 = vsel %vm21791_vm6, %v9328_v13, %v9329_v32  ;;  %v4696_v16 = vshll.u32 %v16888_v60, 16  ;;  %v17289_v57 = vld [vmem:[%s21327_s8 + $0x68] sm:$0x1]  ;;  %v4685_v27 = vor.u32 %v4684_v41, %v23623_v12  ;;  %v4688_v62 = vshll.u32 %v23620_v9, 16  ;;  %v27456_v8 = vld [vmem:[#allocation39_spill] sm:$0xff] }
 0x1f2   : > { %v17403_v23 = vcombine.low %v9327_v5, %v9330_v6  ;;  %v4702_v1 = vshll.u32 %v23638_v25, 16  ;;  %v4706_v7 = vshrl.u32 %v23638_v25, 16  ;;  %v27457_v32 = vcombine.low %v27455_v54, %v27456_v8 }
 0x1f3   : > { %v4712_v51 = vshll.u32 %v23641_v15, 16  ;;  %v17380_v18 = vrot.slane %v17364_v48, 9  ;;  %v9333_v60 = vrot.slane %v17285_v58, 5  ;;  %v9336_v5 = vrot.slane %v17286_v31, 5 }
 0x1f4   : > { %19261 = vmatmul.mubr.msk.bf16.gmra.mrb[24].mxu1 %vm930_vm3, %v17403_v23  ;;  %v27458_v41 = vcombine.low %v23021_v29, %v23039_v49  ;;  %v4676_v13 = vrot.slane %v4675_v20, 4  ;;  %v17381_v6 = vrot.slane %v17365_v11, 9  ;;  %v9340_v9 = vrot.slane %v17288_v56, 5 }
 0x1f5   : > { %18957 = vmatmul.mubr.msk.bf16.gmra.mrb[24].mxu0 %vm930_vm3, %v27457_v32  ;;  %v9343_v54 = vrot.slane %v17289_v57, 5  ;;  %v4695_v8 = vrot.slane %v4693_v26, 4  ;;  %v4698_v32 = vrot.slane %v4696_v16, 5  ;;  %v9334_v23 = vsel %vm21791_vm6, %v17380_v18, %v9333_v60  ;;  %v17366_v26 = vld [vmem:[%s21327_s8 + $0x6c] sm:$0xe] }
 0x1f6   : > { %18960 = vmatprep.mubr.msk.bf16.mxu0 %vm930_vm3, %v27458_v41  ;;  %v9335_v58 = vrot.slane %v9333_v60, 4  ;;  %v4686_v31 = vrot.slane %v4685_v27, 4  ;;  %v4690_v48 = vrot.slane %v4688_v62, 5  ;;  %v9341_v29 = vsel %vm21791_vm6, %v17381_v6, %v9340_v9  ;;  %v17367_v27 = vld [vmem:[%s21327_s8 + $0x78] sm:$0xe] }
 0x1f7   : > { %v9342_v49 = vrot.slane %v9340_v9, 4  ;;  %v23682_v20 = vmax.bf16 %v27338_v42, %v4657_v21  ;;  %v23685_v16 = vmax.bf16 %v27338_v42, %v4667_v50  ;;  %v23691_v62 = vrot.slane %v4702_v1, 5  ;;  %v16891_v18 = vld [vmem:[%s21327_s8 + $0xc0] sm:$0xf]  ;;  %v23695_v9 = vld [vmem:[%s21327_s8 + $0xc4] sm:$0xf] }
 0x1f8   : > { %v9337_v56 = vsel %vm21791_vm6, %v9335_v58, %v9336_v5  ;;  %v4708_v57 = vrot.slane %v4706_v7, 4  ;;  %v4681_v50 = vsel %vm21362_vm2, %v4676_v13, %v23623_v12  ;;  %v4699_v41 = vor.u32 %v4698_v32, %v4695_v8  ;;  %v16894_v7 = vld [vmem:[%s21327_s8 + $0xcc] sm:$0xf]  ;;  %v23716_v32 = vld [vmem:[%s21327_s8 + $0xd0] sm:$0xf] }
 0x1f9   : > { %v17404_v60 = vcombine.low %v9334_v23, %v9337_v56  ;;  %v9344_v21 = vsel %vm21791_vm6, %v9342_v49, %v9343_v54  ;;  %v23702_v5 = vrot.slane %v4712_v51, 5  ;;  %v4691_v1 = vsel %vm21362_vm2, %v4686_v31, %v4690_v48  ;;  %v20991_v31 = vld [vmem:[%s21327_s8 + $0x7c] sm:$0xf] }
 0x1fa   : > { %v17405_v6 = vcombine.low %v9341_v29, %v9344_v21  ;;  %v17382_v23 = vrot.slane %v17366_v26, 9  ;;  %v27459_v58 = vrot.slane %v22941_v40, 5  ;;  %v17383_v49 = vrot.slane %v17367_v27, 9 }
 0x1fb   : > { %19264 = vmatprep.mubr.msk.bf16.mxu1 %vm930_vm3, %v17404_v60  ;;  %v27460_v12 = vcombine.low %v23044_v33, %v23050_v63  ;;  %v4717_v51 = vshrl.u32 %v16891_v18, 16  ;;  %v4720_v13 = vshll.u32 %v16891_v18, 16  ;;  %v4726_v8 = vshll.u32 %v23695_v9, 16  ;;  %v20992_v18 = vld [vmem:[%s21327_s8 + $0x80] sm:$0x1] }
 0x1fc   : > { %v9349_v54 = vrot.slane %v27459_v58, 4  ;;  %19265 = vmatmul.mubr.msk.bf16.gmra.mrb[28].mxu1 %vm930_vm3, %v17405_v6  ;;  %v9354_v48 = vrot.slane %v20991_v31, 5  ;;  %v27461_v29 = vcombine.low %v23150_v39, %v23156_v59  ;;  %v4730_v33 = vshrl.u32 %v23695_v9, 16 }
 0x1fd   : > { %18961 = vmatmul.mubr.msk.bf16.gmra.mrb[28].mxu0 %vm930_vm3, %v27460_v12  ;;  %v27462_v63 = vmov %v27459_v58  ;;  %v27463_v26 = vrot.slane %v22960_v19, 5  ;;  %v9357_v60 = vrot.slane %v20992_v18, 5  ;;  %v4709_v39 = vor.u32 %v4708_v57, %v23691_v62  ;;  %v23746_v57 = vld [vmem:[%s21327_s8 + $0xc8] sm:$0x1]  ;;  %v23759_v18 = vld [vmem:[%s21327_s8 + $0xd4] sm:$0x1] }
 0x1fe   : > { %18972 = vmatprep.mubr.msk.bf16.mxu0 %vm930_vm3, %v27461_v29  ;;  %v9348_v56 = vsel %vm21791_vm6, %v17382_v23, %v27462_v63  ;;  %v4741_v59 = vshrl.u32 %v16894_v7, 16  ;;  %v4744_v21 = vshll.u32 %v16894_v7, 16  ;;  %v4750_v58 = vshll.u32 %v23716_v32, 16  ;;  %v17368_v29 = vld [vmem:[%s21327_s8 + $0x84] sm:$0xe] }
 0x1ff   : > { %v9351_v27 = vsel %vm21791_vm6, %v9349_v54, %v27463_v26  ;;  %v4754_v40 = vshrl.u32 %v23716_v32, 16  ;;  %v9355_v23 = vsel %vm21791_vm6, %v17383_v49, %v9354_v48  ;;  %v9356_v19 = vrot.slane %v9354_v48, 4  ;;  %v17369_v48 = vld [vmem:[%s21327_s8 + $0x90] sm:$0xe] }
 0x200   : > { %v17406_v6 = vcombine.low %v9348_v56, %v9351_v27  ;;  %v23740_v12 = vmax.bf16 %v27338_v42, %v4681_v50  ;;  %v23743_v54 = vmax.bf16 %v27338_v42, %v4691_v1  ;;  %v4719_v7 = vrot.slane %v4717_v51, 4  ;;  %v20757_v1 = vld [vmem:[%s27208_s1 + $0x108] sm:$0xff]  }
 0x201   : > { %v4722_v31 = vrot.slane %v4720_v13, 5  ;;  %v4700_v63 = vrot.slane %v4699_v41, 4  ;;  %v23750_v56 = vrot.slane %v4726_v8, 5  ;;  %v4732_v49 = vrot.slane %v4730_v33, 4  ;;  %v20993_v33 = vld [vmem:[%s21327_s8 + $0x88] sm:$0xf] }
 0x202   : > { %19268 = vmatprep.mubr.msk.bf16.mxu1 %vm930_vm3, %v17406_v6  ;;  %v9358_v50 = vsel %vm21791_vm6, %v9356_v19, %v9357_v60  ;;  %v4710_v26 = vrot.slane %v4709_v39, 4  ;;  %v4743_v51 = vrot.slane %v4741_v59, 4  ;;  %v4746_v13 = vrot.slane %v4744_v21, 5  ;;  %v20994_v59 = vld [vmem:[%s21327_s8 + $0x8c] sm:$0x1] }
 0x203   : > { %v17407_v27 = vcombine.low %v9355_v23, %v9358_v50  ;;  %v23761_v6 = vrot.slane %v4750_v58, 5  ;;  %v4756_v41 = vrot.slane %v4754_v40, 4  ;;  %v17384_v8 = vrot.slane %v17368_v29, 9  ;;  %v20760_v29 = vld [vmem:[%s27208_s1 + $0x110] sm:$0xff]  }
 0x204   : > { %v9361_v11 = vrot.slane %v20993_v33, 5  ;;  %v27464_v60 = vcombine.low %v23162_v43, %v23184_v47  ;;  %v4723_v19 = vor.u32 %v4722_v31, %v4719_v7  ;;  %v4736_v39 = vshll.u32 %v23746_v57, 16  ;;  %v20995_v7 = vld [vmem:[%s21327_s8 + $0x94] sm:$0xf]  ;;  %v17370_v33 = vld [vmem:[%s21327_s8 + $0x9c] sm:$0xe] }
 0x205   : > { %19269 = vmatmul.mubr.msk.bf16.gmra.mrb[0].mxu1 %vm930_vm3, %v17407_v27  ;;  %v9364_v21 = vrot.slane %v20994_v59, 5  ;;  %v17385_v58 = vrot.slane %v17369_v48, 9  ;;  %v27465_v40 = vcombine.low %v23196_v34, %v23228_v37  ;;  %v4733_v43 = vor.u32 %v4732_v49, %v23750_v56  ;;  %v20996_v49 = vld [vmem:[%s21327_s8 + $0x98] sm:$0x1] }
 0x206   : > { %18973 = vmatmul.mubr.msk.bf16.vlgmr.msra.gmra.mrb[0].mxu0 %vm930_vm3, %v27464_v60  ;;  %v9362_v47 = vsel %vm21791_vm6, %v17384_v8, %v9361_v11  ;;  %v9363_v23 = vrot.slane %v9361_v11, 4  ;;  %v9368_v31 = vrot.slane %v20995_v7, 5  ;;  %v4705_v34 = vsel %vm21362_vm2, %v4700_v63, %v23691_v62 }
 0x207   : > { %19005 = vmatpush3.bf16.msra.mxu0 %v23392_v38  ;;  %18976 = vmatprep.mubr.msk.bf16.mxu0 %vm930_vm3, %v27465_v40  ;;  %v4747_v37 = vor.u32 %v4746_v13, %v4743_v51  ;;  %v4760_v38 = vshll.u32 %v23759_v18, 16  ;;  %v9371_v50 = vrot.slane %v20996_v49, 5  ;;  %v4757_v48 = vor.u32 %v4756_v41, %v23761_v6  ;;  %v20763_v40 = vld [vmem:[%s27208_s1 + $0x118] sm:$0xff]  }
 0x208   : > { %19006 = vmatprep.subr.bf16.mxu0 %v20757_v1  ;;  %v9365_v11 = vsel %vm21791_vm6, %v9363_v23, %v9364_v21  ;;  %v9369_v27 = vsel %vm21791_vm6, %v17385_v58, %v9368_v31  ;;  %v9370_v8 = vrot.slane %v9368_v31, 4  ;;  %v16916_v60 = vcombine.low %v23682_v20, %v23685_v16  ;;  %v17371_v58 = vld [vmem:[%s21327_s8 + $0xa8] sm:$0xe]  ;;  %v20997_v23 = vld [vmem:[%s21327_s8 + $0xa0] sm:$0xf] }
 0x209   : > { %v16917_v62 = vcombine.low %v23740_v12, %v23743_v54  ;;  %v4715_v63 = vsel %vm21362_vm2, %v4710_v26, %v23702_v5  ;;  %v17408_v51 = vcombine.low %v9362_v47, %v9365_v11  ;;  %v4724_v13 = vrot.slane %v4723_v19, 4  ;;  %v20998_v49 = vld [vmem:[%s21327_s8 + $0x1c] sm:$0xf] }
 0x20a   : > { %v4734_v41 = vrot.slane %v4733_v43, 4  ;;  %v4738_v59 = vrot.slane %v4736_v39, 5  ;;  %v9372_v21 = vsel %vm21791_vm6, %v9370_v8, %v9371_v50  ;;  %v23808_v5 = vmax.bf16 %v27338_v42, %v4705_v34  ;;  %v16941_v34 = vld [vmem:[%s21327_s8 + $0x18] sm:$0xe]  ;;  %v20999_v50 = vld [vmem:[%s21327_s8 + $0xa4] sm:$0x1] }
 0x20b   : > { %19007 = vmatpush3.bf16.msra.mxu0 %v20757_v1  ;;  %v4748_v1 = vrot.slane %v4747_v37, 4  ;;  %19272 = vmatprep.mubr.msk.bf16.mxu1 %vm930_vm3, %v17408_v51  ;;  %v17409_v26 = vcombine.low %v9369_v27, %v9372_v21  ;;  %v17386_v19 = vrot.slane %v17370_v33, 9  ;;  %v23812_v39 = vmax.bf16 %v27338_v42, %v4715_v63  ;;  %v21000_v8 = vld [vmem:[%s21327_s8 + $0xac] sm:$0xf]  ;;  %v21001_v51 = vld [vmem:[%s21327_s8 + $0xb0] sm:$0x1] }
 0x20c   : > { %19008 = vmatprep.subr.bf16.mxu0 %v20760_v29  ;;  %v4758_v43 = vrot.slane %v4757_v48, 4  ;;  %v4762_v47 = vrot.slane %v4760_v38, 5  ;;  %v9375_v7 = vrot.slane %v20997_v23, 5  ;;  %v27466_v31 = vcombine.low %v23233_v45, %v23241_v10  ;;  %v21002_v21 = vld [vmem:[%s21327_s8 + $0x28] sm:$0xf] }
 0x20d   : > { %v5248_v37 = vrot.slane %v20998_v49, 5  ;;  %19273 = vmatmul.mubr.msk.bf16.gmra.mrb[4].mxu1 %vm930_vm3, %v17409_v26  ;;  %v9378_v11 = vrot.slane %v20999_v50, 5  ;;  %v17387_v27 = vrot.slane %v17371_v58, 9  ;;  %v9382_v48 = vrot.slane %v21000_v8, 5  ;;  %v16943_v49 = vld [vmem:[%s21327_s8 + $0x30] sm:$0xe] }
 0x20e   : > { %18977 = vmatmul.mubr.msk.bf16.gmra.mrb[4].mxu0 %vm930_vm3, %v27466_v31  ;;  %v27467_v38 = vcombine.low %v23365_v3, %v23368_v17  ;;  %v4729_v45 = vsel %vm21362_vm2, %v4724_v13, %v23750_v56  ;;  %v4739_v10 = vsel %vm21362_vm2, %v4734_v41, %v4738_v59  ;;  %v9376_v33 = vsel %vm21791_vm6, %v17386_v19, %v9375_v7  ;;  %v16942_v59 = vld [vmem:[%s21327_s8 + $0x24] sm:$0xe]  ;;  %v17372_v19 = vld [vmem:[%s21327_s8 + $0xb4] sm:$0xe] }
 0x20f   : > { %19009 = vmatpush3.bf16.msra.mxu0 %v20760_v29  ;;  %v9377_v63 = vrot.slane %v9375_v7, 4  ;;  %v4753_v3 = vsel %vm21362_vm2, %v4748_v1, %v23761_v6  ;;  %v9383_v17 = vsel %vm21791_vm6, %v17387_v27, %v9382_v48  ;;  %v9384_v29 = vrot.slane %v9382_v48, 4  ;;  %v21003_v1 = vld [vmem:[%s21327_s8 + $0x20] sm:$0x1]  ;;  %v21004_v27 = vld [vmem:[%s21327_s8 + $0x34] sm:$0xf] }
 0x210   : > { %18980 = vmatprep.mubr.msk.bf16.mxu0 %vm930_vm3, %v27467_v38  ;;  %19010 = vmatprep.subr.bf16.mxu0 %v20763_v40  ;;  %v9385_v56 = vrot.slane %v21001_v51, 5  ;;  %v4763_v13 = vsel %vm21362_vm2, %v4758_v43, %v4762_v47  ;;  %v16957_v41 = vrot.slane %v16941_v34, 9  ;;  %v5255_v58 = vrot.slane %v21002_v21, 5  ;;  %v17373_v38 = vld [vmem:[%s21327_s8 + $0xc0] sm:$0xe] }
 0x211   : > { %v9379_v26 = vsel %vm21791_vm6, %v9377_v63, %v9378_v11  ;;  %v5250_v6 = vrot.slane %v5248_v37, 4  ;;  %v5251_v23 = vrot.slane %v21003_v1, 5  ;;  %v23852_v43 = vmax.bf16 %v27338_v42, %v4729_v45  ;;  %v16944_v51 = vld [vmem:[%s21327_s8 + $0x3c] sm:$0xe] }
 0x212   : > { %v17410_v7 = vcombine.low %v9376_v33, %v9379_v26  ;;  %v9386_v31 = vsel %vm21791_vm6, %v9384_v29, %v9385_v56  ;;  %v23855_v47 = vmax.bf16 %v27338_v42, %v4739_v10  ;;  %v23858_v34 = vmax.bf16 %v27338_v42, %v4753_v3  ;;  %v21006_v26 = vld [vmem:[%s21327_s8 + $0x38] sm:$0x1] }
 0x213   : > { %19011 = vmatpush3.bf16.msra.mxu0 %v20763_v40  ;;  %v17411_v50 = vcombine.low %v9383_v17, %v9386_v31  ;;  %v16958_v11 = vrot.slane %v16942_v59, 9  ;;  %v5262_v8 = vrot.slane %v21004_v27, 5  ;;  %v17388_v48 = vrot.slane %v17372_v19, 9  ;;  %v21005_v17 = vld [vmem:[%s21327_s8 + $0x2c] sm:$0x1] }
 0x214   : > { %19276 = vmatprep.mubr.msk.bf16.mxu1 %vm930_vm3, %v17410_v7  ;;  %v9389_v40 = vrot.slane %v23265_v52, 5  ;;  %v23866_v45 = vmax.bf16 %v27338_v42, %v4763_v13  ;;  %v5249_v10 = vsel %vm21791_vm6, %v16957_v41, %v5248_v37  ;;  %v5257_v33 = vrot.slane %v5255_v58, 4  ;;  %v27470_v41 = vld [vmem:[#allocation8_spill] sm:$0xff] }
 0x215   : > { %v9392_v63 = vrot.slane %v23275_v55, 5  ;;  %v27468_v3 = vcombine.low %v23379_v53, %v23382_v22  ;;  %v5252_v52 = vsel %vm21791_vm6, %v5250_v6, %v5251_v23  ;;  %v5258_v29 = vrot.slane %v21005_v17, 5  ;;  %19277 = vmatmul.mubr.msk.bf16.gmra.mrb[8].mxu1 %vm930_vm3, %v17411_v50  ;;  %v21007_v6 = vld [vmem:[%s21327_s8 + $0x40] sm:$0xf] }
 0x216   : > { %v9390_v37 = vsel %vm21791_vm6, %v17388_v48, %v9389_v40  ;;  %v9391_v56 = vrot.slane %v9389_v40, 4  ;;  %v27469_v55 = vcombine.low %v23469_v61, %v23477_v2  ;;  %v16959_v53 = vrot.slane %v16943_v49, 9  ;;  %v16945_v48 = vld [vmem:[%s21327_s8 + $0x48] sm:$0xe] }
 0x217   : > { %18981 = vmatmul.mubr.msk.bf16.gmra.mrb[8].mxu0 %vm930_vm3, %v27468_v3  ;;  %v17389_v22 = vrot.slane %v17373_v38, 9  ;;  %v9396_v13 = vrot.slane %v23299_v36, 5  ;;  %v9399_v59 = vrot.slane %v27470_v41, 5  ;;  %v5264_v21 = vrot.slane %v5262_v8, 4  ;;  %v16946_v3 = vld [vmem:[%s21327_s8 + $0x54] sm:$0xe] }
 0x218   : > { %18984 = vmatprep.mubr.msk.bf16.mxu0 %vm930_vm3, %v27469_v55  ;;  %v5265_v19 = vrot.slane %v21006_v26, 5  ;;  %v5269_v1 = vrot.slane %v21007_v6, 5  ;;  %v9393_v23 = vsel %vm21791_vm6, %v9391_v56, %v9392_v63  ;;  %v16960_v61 = vrot.slane %v16944_v51, 9  ;;  %v21009_v56 = vld [vmem:[%s21327_s8 + $0x4c] sm:$0xf] }
 0x219   : > { %v17412_v2 = vcombine.low %v9390_v37, %v9393_v23  ;;  %v9397_v7 = vsel %vm21791_vm6, %v17389_v22, %v9396_v13  ;;  %v9398_v36 = vrot.slane %v9396_v13, 4  ;;  %v16918_v31 = vcombine.low %v23808_v5, %v23812_v39  ;;  %v21011_v23 = vld [vmem:[%s21327_s8 + $0x64] sm:$0xf] }
 0x21a   : > { %v16919_v49 = vcombine.low %v23852_v43, %v23855_v47  ;;  %v23899_v50 = vmax.bf16 %v27338_v42, %v5249_v10  ;;  %v23902_v27 = vmax.bf16 %v27338_v42, %v5252_v52  ;;  %v5256_v40 = vsel %vm21791_vm6, %v16958_v11, %v5255_v58  ;;  %v20767_v52 = vld [vmem:[%s21327_s8 + $0x18] sm:$0xff]   ;;  %v21008_v58 = vld [vmem:[%s21327_s8 + $0x44] sm:$0x1] }
 0x21b   : > { %v5259_v38 = vsel %vm21791_vm6, %v5257_v33, %v5258_v29  ;;  %v5263_v63 = vsel %vm21791_vm6, %v16959_v53, %v5262_v8  ;;  %19280 = vmatprep.mubr.msk.bf16.mxu1 %vm930_vm3, %v17412_v2  ;;  %v9400_v10 = vsel %vm21791_vm6, %v9398_v36, %v9399_v59  ;;  %v5266_v17 = vsel %vm21791_vm6, %v5264_v21, %v5265_v19  ;;  %v16955_v53 = vld [vmem:[%s21327_s8 + $0xc0] sm:$0xe]  ;;  %v21010_v21 = vld [vmem:[%s21327_s8 + $0x58] sm:$0xf]  ;;  %v20779_v43 = vld [vmem:[%s21327_s8 + $0x84] sm:$0xff]  }
 0x21c   : > { %v5271_v51 = vrot.slane %v5269_v1, 4  ;;  %v5272_v11 = vrot.slane %v21008_v58, 5  ;;  %v17413_v37 = vcombine.low %v9397_v7, %v9400_v10  ;;  %v16920_v33 = vcombine.low %v23858_v34, %v23866_v45  ;;  %v16956_v7 = vld [vmem:[%s21327_s8 + $0xcc] sm:$0xe] }
 0x21d   : > { %v5270_v8 = vsel %vm21791_vm6, %v16960_v61, %v5269_v1  ;;  %v16961_v29 = vrot.slane %v16945_v48, 9  ;;  %v5276_v55 = vrot.slane %v21009_v56, 5  ;;  %v27471_v22 = vcombine.low %v23480_v35, %v23566_v46 }
 0x21e   : > { %v16981_v13 = vcombine.low %v23899_v50, %v23902_v27  ;;  %v23932_v41 = vmax.bf16 %v27338_v42, %v5256_v40  ;;  %v16962_v59 = vrot.slane %v16946_v3, 9  ;;  %v5283_v26 = vrot.slane %v21010_v21, 5  ;;  %19281 = vmatmul.mubr.msk.bf16.gmra.mrb[12].mxu1 %vm930_vm3, %v17413_v37  ;;  %v21012_v40 = vld [vmem:[%s21327_s8 + $0x50] sm:$0x1]  ;;  %v16948_v37 = vld [vmem:[%s21327_s8 + $0x6c] sm:$0xe] }
 0x21f   : > { %18985 = vmatmul.mubr.msk.bf16.gmra.mrb[12].mxu0 %vm930_vm3, %v27471_v22  ;;  %v27472_v19 = vcombine.low %v23569_v0, %v23572_v44  ;;  %v23941_v35 = vmax.bf16 %v27338_v42, %v5259_v38  ;;  %v23944_v46 = vmax.bf16 %v27338_v42, %v5263_v63  ;;  %v23947_v6 = vmax.bf16 %v27338_v42, %v5266_v17  ;;  %v16947_v44 = vld [vmem:[%s21327_s8 + $0x60] sm:$0xe]  ;;  %v21013_v63 = vld [vmem:[%s21327_s8 + $0x5c] sm:$0x1]  ;;  %v20769_v17 = vld [vmem:[%s21327_s8 + $0x24] sm:$0xff]  }
 0x220   : > { %19292 = vmatprep.mubr.msk.bf16.mxu1 %vm930_vm3, %v20767_v52  ;;  %v5273_v1 = vsel %vm21791_vm6, %v5271_v51, %v5272_v11  ;;  %v23953_v0 = vmax.bf16 %v27338_v42, %v5270_v8  ;;  %v5290_v61 = vrot.slane %v21011_v23, 5  ;;  %v16971_v2 = vrot.slane %v16955_v53, 9  ;;  %v27473_v53 = vld [vmem:[#allocation9_spill] sm:$0xff]  ;;  %v24230_v27 = vld [vmem:[%s21327_s8 + $0x4c] sm:$0xf] }
 0x221   : > { %18988 = vmatprep.mubr.msk.bf16.mxu0 %vm930_vm3, %v27472_v19  ;;  %v5277_v36 = vsel %vm21791_vm6, %v16961_v29, %v5276_v55  ;;  %v5278_v48 = vrot.slane %v5276_v55, 4  ;;  %v5279_v38 = vrot.slane %v21012_v40, 5  ;;  %v5286_v3 = vrot.slane %v21013_v63, 5  ;;  %v20770_v21 = vld [vmem:[%s21327_s8 + $0x30] sm:$0xff]   ;;  %v27479_v63 = vld [vmem:[#allocation27_spill] sm:$0xff]  ;;  %27498 = vst [vmem:[#allocation31_spill] sm:$0xff] %v24230_v27 }
 0x222   : > { %v5284_v10 = vsel %vm21791_vm6, %v16962_v59, %v5283_v26  ;;  %v5285_v52 = vrot.slane %v5283_v26, 4  ;;  %v5346_v51 = vrot.slane %v23695_v9, 5  ;;  %v5349_v58 = vrot.slane %v23746_v57, 5  ;;  %v20773_v9 = vld [vmem:[%s27212_s5 + $0xe8] sm:$0xff]  }
 0x223   : > { %v16963_v11 = vrot.slane %v16947_v44, 9  ;;  %v16972_v8 = vrot.slane %v16956_v7, 9  ;;  %v5353_v29 = vrot.slane %v23716_v32, 5  ;;  %v5356_v56 = vrot.slane %v23759_v18, 5  ;;  %v27475_v44 = vld [vmem:[#allocation26_spill] sm:$0xff] }
 0x224   : > { %v5292_v55 = vrot.slane %v5290_v61, 4  ;;  %v5293_v22 = vrot.slane %v27473_v53, 5  ;;  %v5347_v59 = vsel %vm21791_vm6, %v16971_v2, %v5346_v51  ;;  %v5348_v26 = vrot.slane %v5346_v51, 4  ;;  %v27481_v51 = vld [vmem:[#allocation11_spill] sm:$0xff]  ;;  %v27488_v53 = vld [vmem:[#allocation25_spill] sm:$0xff] }
 0x225   : > { %v5280_v57 = vsel %vm21791_vm6, %v5278_v48, %v5279_v38  ;;  %v23980_v32 = vmax.bf16 %v27338_v42, %v5347_v59  ;;  %v5354_v18 = vsel %vm21791_vm6, %v16972_v8, %v5353_v29  ;;  %v5355_v19 = vrot.slane %v5353_v29, 4  ;;  %v16949_v29 = vld [vmem:[%s21327_s8 + $0x78] sm:$0xe] }
 0x226   : > { %v27476_v23 = vcombine.low %v23575_v24, %v27475_v44  ;;  %v5287_v2 = vsel %vm21791_vm6, %v5285_v52, %v5286_v3  ;;  %19293 = vmatmul.mubr.msk.bf16.vlgmr.msra.gmra.mrb[16].mxu1 %vm930_vm3, %v20769_v17  ;;  %v5350_v7 = vsel %vm21791_vm6, %v5348_v26, %v5349_v58  ;;  %v23994_v48 = vmax.bf16 %v27338_v42, %v5354_v18  ;;  %v20771_v26 = vld [vmem:[%s21327_s8 + $0x3c] sm:$0xff]   ;;  %v21015_v44 = vld [vmem:[%s21327_s8 + $0x74] sm:$0x1] }
 0x227   : > { %27474 = vst [vmem:[#allocation10_spill] sm:$0xff] %v23980_v32  ;;  %v27478_v40 = vcombine.low %v23635_v28, %v23646_v14  ;;  %v5291_v24 = vsel %vm21791_vm6, %v16963_v11, %v5290_v61  ;;  %v16964_v38 = vrot.slane %v16948_v37, 9  ;;  %19325 = vmatpush3.bf16.msra.mxu1 %v27479_v63  ;;  %v24004_v3 = vmax.bf16 %v27338_v42, %v5350_v7  ;;  %v21014_v28 = vld [vmem:[%s21327_s8 + $0x70] sm:$0xf]  ;;  %v27484_v63 = vld [vmem:[#allocation16_spill] sm:$0xff] }
 0x228   : > { %18989 = vmatmul.mubr.msk.bf16.gmra.mrb[16].mxu0 %vm930_vm3, %v27476_v23  ;;  %27477 = vst [vmem:[#allocation14_spill] sm:$0xff] %v23994_v48  ;;  %v5357_v52 = vsel %vm21791_vm6, %v5355_v19, %v5356_v56  ;;  %v5294_v17 = vsel %vm21791_vm6, %v5292_v55, %v5293_v22  ;;  %v5297_v14 = vrot.slane %v21014_v28, 5  ;;  %v5304_v58 = vrot.slane %v27481_v51, 5  ;;  %19296 = vmatprep.mubr.msk.bf16.mxu1 %vm930_vm3, %v20770_v21  ;;  %v20778_v11 = vld [vmem:[%s27212_s5 + $0xf0] sm:$0xff]   ;;  %v27483_v56 = vld [vmem:[#allocation12_spill] sm:$0xff] }
 0x229   : > { %18992 = vmatprep.mubr.msk.bf16.mxu0 %vm930_vm3, %v27478_v40  ;;  %27480 = vst [vmem:[#allocation7_spill] sm:$0xff] %v24004_v3  ;;  %v24014_v61 = vmax.bf16 %v27338_v42, %v5357_v52  ;;  %19326 = vmatprep.subr.bf16.mxu1 %v20773_v9  ;;  %v24020_v37 = vmax.bf16 %v27338_v42, %v5273_v1  ;;  %v5311_v55 = vrot.slane %v27483_v56, 5  ;;  %v16950_v1 = vld [vmem:[%s21327_s8 + $0x84] sm:$0xe]  ;;  %v20772_v23 = vld [vmem:[%s21327_s8 + $0x48] sm:$0xff]   ;;  %v16965_v7 = vrot.slane %v16949_v29, 9 }
 0x22a   : > { %v24023_v8 = vmax.bf16 %v27338_v42, %v5277_v36  ;;  %v24030_v22 = vmax.bf16 %v27338_v42, %v5280_v57  ;;  %v24033_v21 = vmax.bf16 %v27338_v42, %v5284_v10  ;;  %v24036_v59 = vmax.bf16 %v27338_v42, %v5287_v2  ;;  %v27485_v51 = vld [vmem:[#allocation17_spill] sm:$0xff] }
 0x22b   : > { %27482 = vst [vmem:[#allocation15_spill] sm:$0xff] %v24014_v61  ;;  %v24043_v18 = vmax.bf16 %v27338_v42, %v5291_v24  ;;  %v24046_v19 = vmax.bf16 %v27338_v42, %v5294_v17  ;;  %v5298_v57 = vsel %vm21791_vm6, %v16964_v38, %v5297_v14  ;;  %v5300_v10 = vrot.slane %v21015_v44, 5  ;;  %19327 = vmatpush3.bf16.msra.mxu1 %v20773_v9  ;;  %v20783_v38 = vld [vmem:[%s27212_s5 + $0xf8] sm:$0xff]   ;;  %v27486_v44 = vld [vmem:[#allocation19_spill] sm:$0xff]  ;;  %v20780_v48 = vld [vmem:[%s21327_s8 + $0x90] sm:$0xff]  }
 0x22c   : > { %v5299_v2 = vrot.slane %v5297_v14, 4  ;;  %v5306_v40 = vrot.slane %v5304_v58, 4  ;;  %v5307_v52 = vrot.slane %v27484_v63, 5  ;;  %19328 = vmatprep.subr.bf16.mxu1 %v20778_v11  ;;  %v16966_v17 = vrot.slane %v16950_v1, 9  ;;  %v16951_v1 = vld [vmem:[%s21327_s8 + $0x90] sm:$0xe] }
 0x22d   : > { %v5313_v28 = vrot.slane %v5311_v55, 4  ;;  %v5314_v56 = vrot.slane %v27485_v51, 5  ;;  %v5318_v63 = vrot.slane %v27486_v44, 5  ;;  %v24079_v16 = vmax.bf16 %v27338_v42, %v5298_v57  ;;  %v27487_v51 = vld [vmem:[#allocation20_spill] sm:$0xff] }
 0x22e   : > { %19297 = vmatmul.mubr.msk.bf16.gmra.mrb[20].mxu1 %vm930_vm3, %v20771_v26  ;;  %v5325_v36 = vrot.slane %v27487_v51, 5  ;;  %v5332_v29 = vrot.slane %v27488_v53, 5  ;;  %v5301_v12 = vsel %vm21791_vm6, %v5299_v2, %v5300_v10  ;;  %v5305_v54 = vsel %vm21791_vm6, %v16965_v7, %v5304_v58  ;;  %v16953_v57 = vld [vmem:[%s21327_s8 + $0xa8] sm:$0xe]  ;;  %v16954_v51 = vld [vmem:[%s21327_s8 + $0xb4] sm:$0xe] }
 0x22f   : > { %19300 = vmatprep.mubr.msk.bf16.mxu1 %vm930_vm3, %v20772_v23  ;;  %19329 = vmatpush3.bf16.msra.mxu1 %v20778_v11  ;;  %v5312_v53 = vsel %vm21791_vm6, %v16966_v17, %v5311_v55  ;;  %v5315_v23 = vsel %vm21791_vm6, %v5313_v28, %v5314_v56  ;;  %v16967_v44 = vrot.slane %v16951_v1, 9  ;;  %v5339_v10 = vrot.slane %v23638_v25, 5  ;;  %v24103_v58 = vld [vmem:[%s27212_s5 + $0x100] sm:$0xff]   ;;  %v20774_v17 = vld [vmem:[%s21327_s8 + $0x54] sm:$0xff]   ;;  %v27491_v1 = vld [vmem:[#allocation28_spill] sm:$0xff] }
 0x230   : > { %18993 = vmatmul.mubr.msk.bf16.gmra.mrb[20].mxu0 %vm930_vm3, %v16916_v60  ;;  %v16952_v60 = vld [vmem:[%s21327_s8 + $0x9c] sm:$0xe]  ;;  %19330 = vmatprep.subr.bf16.mxu1 %v20783_v38  ;;  %v5320_v2 = vrot.slane %v5318_v63, 4  ;;  %v27489_v7 = vld [vmem:[#allocation23_spill] sm:$0xff]  ;;  %v5327_v26 = vrot.slane %v5325_v36, 4  ;;  %v16969_v28 = vrot.slane %v16953_v57, 9  ;;  %v24111_v14 = vmax.bf16 %v27338_v42, %v5301_v12 }
 0x231   : > { %18996 = vmatprep.mubr.msk.bf16.mxu0 %vm930_vm3, %v16917_v62  ;;  %v5308_v62 = vsel %vm21791_vm6, %v5306_v40, %v5307_v52  ;;  %v5321_v11 = vrot.slane %v27489_v7, 5  ;;  %v16968_v40 = vrot.slane %v16952_v60, 9  ;;  %v27490_v52 = vld [vmem:[#allocation24_spill] sm:$0xff]  ;;  %v5334_v56 = vrot.slane %v5332_v29, 4  ;;  %v20775_v25 = vld [vmem:[%s21327_s8 + $0x60] sm:$0xff]  }
 0x232   : > { %v5328_v55 = vrot.slane %v27490_v52, 5  ;;  %v5335_v20 = vrot.slane %v27491_v1, 5  ;;  %v24114_v9 = vmax.bf16 %v27338_v42, %v5305_v54  ;;  %v24117_v24 = vmax.bf16 %v27338_v42, %v5308_v62  ;;  %v17510_v12 = vld [vmem:[%s21327_s8 + $0x18] sm:$0xf] }
 0x233   : > { %v16970_v60 = vrot.slane %v16954_v51, 9  ;;  %19331 = vmatpush3.bf16.msra.mxu1 %v20783_v38  ;;  %v24120_v7 = vmax.bf16 %v27338_v42, %v5312_v53  ;;  %v24123_v57 = vmax.bf16 %v27338_v42, %v5315_v23  ;;  %v5341_v52 = vrot.slane %v5339_v10, 4  ;;  %v20776_v53 = vld [vmem:[%s21327_s8 + $0x6c] sm:$0xff]   ;;  %v17513_v23 = vld [vmem:[%s21327_s8 + $0x24] sm:$0xf] }
 0x234   : > { %v5342_v1 = vrot.slane %v23641_v15, 5  ;;  %19364 = vmatprep.subr.bf16.mxu1 %v24103_v58  ;;  %v5319_v38 = vsel %vm21791_vm6, %v16967_v44, %v5318_v63  ;;  %v5322_v54 = vsel %vm21791_vm6, %v5320_v2, %v5321_v11  ;;  %v5326_v62 = vsel %vm21791_vm6, %v16968_v40, %v5325_v36  ;;  %v24184_v11 = vld [vmem:[%s21327_s8 + $0x28] sm:$0xf]  ;;  %v17516_v40 = vld [vmem:[%s21327_s8 + $0x30] sm:$0xf] }
 0x235   : > { %v5329_v15 = vsel %vm21791_vm6, %v5327_v26, %v5328_v55  ;;  %v5333_v5 = vsel %vm21791_vm6, %v16969_v28, %v5332_v29  ;;  %v5336_v39 = vsel %vm21791_vm6, %v5334_v56, %v5335_v20  ;;  %v5340_v47 = vsel %vm21791_vm6, %v16970_v60, %v5339_v10  ;;  %27493 = vst [vmem:[#allocation18_spill] sm:$0xff] %v24184_v11  ;;  %v24188_v55 = vld [vmem:[%s21327_s8 + $0x34] sm:$0xf]  ;;  %v20777_v28 = vld [vmem:[%s21327_s8 + $0x78] sm:$0xff]   ;;  %v24208_v29 = vld [vmem:[%s21327_s8 + $0x40] sm:$0xf] }
 0x236   : > { %19301 = vmatmul.mubr.msk.bf16.gmra.mrb[24].mxu1 %vm930_vm3, %v20774_v17  ;;  %v10158_v36 = vshrl.u32 %v17510_v12, 16  ;;  %v24162_v63 = vmax.bf16 %v27338_v42, %v5319_v38  ;;  %v24165_v20 = vmax.bf16 %v27338_v42, %v5326_v62  ;;  %v5343_v26 = vsel %vm21791_vm6, %v5341_v52, %v5342_v1  ;;  %v17519_v52 = vld [vmem:[%s21327_s8 + $0x3c] sm:$0xf]  ;;  %v24201_v38 = vld [vmem:[%s21327_s8 + $0x20] sm:$0x1]  ;;  %27497 = vst [vmem:[#allocation30_spill] sm:$0xff] %v24208_v29 }
 0x237   : > { %19304 = vmatprep.mubr.msk.bf16.mxu1 %vm930_vm3, %v20775_v25  ;;  %v24172_v44 = vmax.bf16 %v27338_v42, %v5322_v54  ;;  %v24175_v51 = vmax.bf16 %v27338_v42, %v5329_v15  ;;  %v24178_v10 = vmax.bf16 %v27338_v42, %v5333_v5  ;;  %v24181_v2 = vmax.bf16 %v27338_v42, %v5336_v39 }
 0x238   : > { %18997 = vmatmul.mubr.msk.bf16.gmra.mrb[24].mxu0 %vm930_vm3, %v16918_v31  ;;  %v24191_v17 = vmax.bf16 %v27338_v42, %v5340_v47  ;;  %v10161_v56 = vshll.u32 %v17510_v12, 16  ;;  %v24198_v1 = vmax.bf16 %v27338_v42, %v5343_v26  ;;  %27496 = vst [vmem:[#allocation29_spill] sm:$0xff] %v24201_v38  ;;  %v24203_v54 = vrot.slane %v10158_v36, 4 }
 0x239   : > { %19000 = vmatprep.mubr.msk.bf16.mxu0 %vm930_vm3, %v16919_v49  ;;  %v24157_v49 = vld [vmem:[%s21327_s8 + $0x1c] sm:$0xf]  ;;  %v10182_v62 = vshrl.u32 %v17513_v23, 16  ;;  %v10185_v15 = vshll.u32 %v17513_v23, 16  ;;  %v10191_v5 = vshll.u32 %v24184_v11, 16  ;;  %v10195_v39 = vshrl.u32 %v24184_v11, 16 }
 0x23a   : > { %27492 = vst [vmem:[#allocation13_spill] sm:$0xff] %v24157_v49  ;;  %27494 = vst [vmem:[#allocation21_spill] sm:$0xff] %v24191_v17  ;;  %v10167_v25 = vshll.u32 %v24157_v49, 16  ;;  %v10171_v60 = vshrl.u32 %v24157_v49, 16  ;;  %v10206_v12 = vshrl.u32 %v17516_v40, 16  ;;  %v10209_v47 = vshll.u32 %v17516_v40, 16 }
 0x23b   : > { %27495 = vst [vmem:[#allocation22_spill] sm:$0xff] %v24198_v1  ;;  %v10215_v42 = vshll.u32 %v24188_v55, 16  ;;  %v10219_v36 = vshrl.u32 %v24188_v55, 16  ;;  %v10230_v26 = vshrl.u32 %v17519_v52, 16  ;;  %v10233_v23 = vshll.u32 %v17519_v52, 16 }
 0x23c   : > { %v10163_v34 = vrot.slane %v10161_v56, 5  ;;  %v24222_v45 = vrot.slane %v10167_v25, 5  ;;  %v17522_v40 = vld [vmem:[%s21327_s8 + $0x48] sm:$0xf]  ;;  %v10184_v31 = vrot.slane %v10182_v62, 4  ;;  %v10187_v11 = vrot.slane %v10185_v15, 5 }
 0x23d   : > { %v10239_v52 = vshll.u32 %v24208_v29, 16  ;;  %v10243_v50 = vshrl.u32 %v24208_v29, 16  ;;  %v10197_v56 = vrot.slane %v10195_v39, 4  ;;  %v10208_v25 = vrot.slane %v10206_v12, 4  ;;  %v24238_v49 = vld [vmem:[%s21327_s8 + $0x38] sm:$0x1] }
 0x23e   : > { %19305 = vmatmul.mubr.msk.bf16.gmra.mrb[28].mxu1 %vm930_vm3, %v20776_v53  ;;  %v10177_v53 = vshll.u32 %v24201_v38, 16  ;;  %v24240_v38 = vrot.slane %v10215_v42, 5  ;;  %v10221_v61 = vrot.slane %v10219_v36, 4  ;;  %v10232_v62 = vrot.slane %v10230_v26, 4 }
 0x23f   : > { %19308 = vmatprep.mubr.msk.bf16.mxu1 %vm930_vm3, %v20777_v28  ;;  %v24235_v28 = vrot.slane %v10191_v5, 5  ;;  %v10235_v15 = vrot.slane %v10233_v23, 5  ;;  %v10254_v3 = vshrl.u32 %v17522_v40, 16  ;;  %v10257_v32 = vshll.u32 %v17522_v40, 16  ;;  %v24253_v40 = vld [vmem:[%s21327_s8 + $0x44] sm:$0x1] }
 0x240   : > { %19001 = vmatmul.mubr.msk.bf16.gmra.mrb[28].mxu0 %vm930_vm3, %v16920_v33  ;;  %v10173_v33 = vrot.slane %v10171_v60, 4  ;;  %v10211_v60 = vrot.slane %v10209_v47, 5  ;;  %v10263_v29 = vshll.u32 %v24230_v27, 16  ;;  %v10267_v4 = vshrl.u32 %v24230_v27, 16 }
 0x241   : > { %19012 = vmatprep.mubr.msk.bf16.mxu0 %vm930_vm3, %v16981_v13  ;;  %v24233_v13 = vld [vmem:[%s21327_s8 + $0x2c] sm:$0x1]  ;;  %v10164_v5 = vor.u32 %v10163_v34, %v24203_v54  ;;  %v24247_v12 = vrot.slane %v10239_v52, 5  ;;  %v10245_v47 = vrot.slane %v10243_v50, 4  ;;  %v10188_v42 = vor.u32 %v10187_v11, %v10184_v31 }
 0x242   : > { %27499 = vst [vmem:[#allocation32_spill] sm:$0xff] %v24233_v13  ;;  %v10174_v39 = vor.u32 %v10173_v33, %v24222_v45  ;;  %v10198_v36 = vor.u32 %v10197_v56, %v24235_v28  ;;  %v10201_v26 = vshll.u32 %v24233_v13, 16  ;;  %v10225_v23 = vshll.u32 %v24238_v49, 16 }
 0x243   : > { %v27500_v27 = vcombine.low %v23932_v41, %v23941_v35  ;;  %v24260_v54 = vrot.slane %v10177_v53, 5  ;;  %v10212_v34 = vor.u32 %v10211_v60, %v10208_v25  ;;  %v10222_v31 = vor.u32 %v10221_v61, %v24240_v38  ;;  %v24269_v41 = vld [vmem:[%s21327_s8 + $0x50] sm:$0x1] }
 0x244   : > { %v10236_v11 = vor.u32 %v10235_v15, %v10232_v62  ;;  %v27501_v33 = vcombine.low %v23944_v46, %v23947_v6  ;;  %v10256_v35 = vrot.slane %v10254_v3, 4  ;;  %v24271_v52 = vrot.slane %v10263_v29, 5  ;;  %v17525_v6 = vld [vmem:[%s21327_s8 + $0x54] sm:$0xf]  ;;  %v24277_v62 = vld [vmem:[%s21327_s8 + $0x58] sm:$0xf] }
 0x245   : > { %v10269_v53 = vrot.slane %v10267_v4, 4  ;;  %v10165_v50 = vrot.slane %v10164_v5, 4  ;;  %v10175_v61 = vrot.slane %v10174_v39, 4  ;;  %v10249_v46 = vshll.u32 %v24253_v40, 16  ;;  %v20781_v15 = vld [vmem:[%s21327_s8 + $0x9c] sm:$0xff]   ;;  %v20782_v5 = vld [vmem:[%s21327_s8 + $0xa8] sm:$0xff]  }
 0x246   : > { %19309 = vmatmul.mubr.msk.bf16.gmra.mrb[0].mxu1 %vm930_vm3, %v20779_v43  ;;  %v10259_v43 = vrot.slane %v10257_v32, 5  ;;  %v10189_v56 = vrot.slane %v10188_v42, 4  ;;  %v10199_v25 = vrot.slane %v10198_v36, 4  ;;  %v10203_v60 = vrot.slane %v10201_v26, 5 }
 0x247   : > { %19312 = vmatprep.mubr.msk.bf16.mxu1 %vm930_vm3, %v20780_v48  ;;  %v10227_v48 = vrot.slane %v10225_v23, 5  ;;  %v10213_v3 = vrot.slane %v10212_v34, 4  ;;  %v10223_v32 = vrot.slane %v10222_v31, 4  ;;  %v10237_v29 = vrot.slane %v10236_v11, 4 }
 0x248   : > { %19013 = vmatmul.mubr.msk.bf16.vlgmr.msra.gmra.mrb[0].mxu0 %vm930_vm3, %v27500_v27  ;;  %v10246_v27 = vor.u32 %v10245_v47, %v24247_v12  ;;  %v10273_v4 = vshll.u32 %v24269_v41, 16  ;;  %v10260_v39 = vor.u32 %v10259_v43, %v10256_v35  ;;  %v10270_v47 = vor.u32 %v10269_v53, %v24271_v52  ;;  %v24297_v43 = vld [vmem:[%s21327_s8 + $0x5c] sm:$0x1] }
 0x249   : > { %19016 = vmatprep.mubr.msk.bf16.mxu0 %vm930_vm3, %v27501_v33  ;;  %v10278_v33 = vshrl.u32 %v17525_v6, 16  ;;  %v10281_v13 = vshll.u32 %v17525_v6, 16  ;;  %v10251_v36 = vrot.slane %v10249_v46, 5  ;;  %v10287_v26 = vshll.u32 %v24277_v62, 16 }
 0x24a   : > { %v10247_v42 = vrot.slane %v10246_v27, 4  ;;  %v10291_v23 = vshrl.u32 %v24277_v62, 16  ;;  %v10170_v34 = vsel %vm21362_vm2, %v10165_v50, %v24222_v45  ;;  %v10180_v31 = vsel %vm21362_vm2, %v10175_v61, %v24260_v54  ;;  %v17528_v61 = vld [vmem:[%s21327_s8 + $0x60] sm:$0xf] }
 0x24b   : > { %v10194_v11 = vsel %vm21362_vm2, %v10189_v56, %v24235_v28  ;;  %v10204_v35 = vsel %vm21362_vm2, %v10199_v25, %v10203_v60  ;;  %v27502_v53 = vcombine.low %v23953_v0, %v24020_v37  ;;  %v10218_v45 = vsel %vm21362_vm2, %v10213_v3, %v24240_v38  ;;  %v24342_v60 = vld [vmem:[%s21327_s8 + $0x64] sm:$0xf]  ;;  %v20784_v3 = vld [vmem:[%s21327_s8 + $0xb4] sm:$0xff]  }
 0x24c   : > { %v10228_v54 = vsel %vm21362_vm2, %v10223_v32, %v10227_v48  ;;  %v10242_v28 = vsel %vm21362_vm2, %v10237_v29, %v24247_v12  ;;  %v24312_v50 = vrot.slane %v10273_v4, 5  ;;  %v27503_v0 = vcombine.low %v24023_v8, %v24030_v22  ;;  %27504 = vst [vmem:[#allocation33_spill] sm:$0xff] %v24342_v60  ;;  %v20785_v32 = vld [vmem:[%s21327_s8 + $0xc0] sm:$0xff]  }
 0x24d   : > { %v24320_v37 = vrot.slane %v10260_v39, 4  ;;  %v24322_v38 = vrot.slane %v10270_v47, 4  ;;  %v24324_v27 = vrot.slane %v10278_v33, 4  ;;  %v24326_v12 = vrot.slane %v10281_v13, 5  ;;  %v17531_v39 = vld [vmem:[%s21327_s8 + $0x6c] sm:$0xf] }
 0x24e   : > { %19313 = vmatmul.mubr.msk.bf16.gmra.mrb[4].mxu1 %vm930_vm3, %v20781_v15  ;;  %v10252_v46 = vsel %vm21362_vm2, %v10247_v42, %v10251_v36  ;;  %v24330_v6 = vrot.slane %v10287_v26, 5  ;;  %v24332_v8 = vrot.slane %v10291_v23, 4  ;;  %v10297_v22 = vshll.u32 %v24297_v43, 16  ;;  %v24368_v26 = vld [vmem:[%s21327_s8 + $0x70] sm:$0xf] }
 0x24f   : > { %19316 = vmatprep.mubr.msk.bf16.mxu1 %vm930_vm3, %v20782_v5  ;;  %v10302_v48 = vshrl.u32 %v17528_v61, 16  ;;  %v24348_v29 = vcombine.low %v10170_v34, %v10180_v31  ;;  %v24350_v4 = vcombine.low %v10194_v11, %v10204_v35  ;;  %v24352_v5 = vcombine.low %v10218_v45, %v10228_v54  ;;  %27505 = vst [vmem:[#allocation34_spill] sm:$0xff] %v24368_v26  ;;  %v17534_v23 = vld [vmem:[%s21327_s8 + $0x78] sm:$0xf]  ;;  %v24372_v34 = vld [vmem:[%s21327_s8 + $0x7c] sm:$0xf] }
 0x250   : > { %19017 = vmatmul.mubr.msk.bf16.gmra.mrb[4].mxu0 %vm930_vm3, %v27502_v53  ;;  %v24355_v47 = vcombine.low %v10242_v28, %v10252_v46  ;;  %v10284_v36 = vor.u32 %v24326_v12, %v24324_v27  ;;  %27506 = vst [vmem:[#allocation35_spill] sm:$0xff] %v24372_v34  ;;  %v10294_v31 = vor.u32 %v24332_v8, %v24330_v6  ;;  %v24376_v11 = vrot.slane %v10297_v22, 5  ;;  %v17537_v45 = vld [vmem:[%s21327_s8 + $0x84] sm:$0xf]  ;;  %v24384_v12 = vld [vmem:[%s21327_s8 + $0x88] sm:$0xf] }
 0x251   : > { %19020 = vmatprep.mubr.msk.bf16.mxu0 %vm930_vm3, %v27503_v0  ;;  %v10305_v35 = vshll.u32 %v17528_v61, 16  ;;  %v10311_v53 = vshll.u32 %v24342_v60, 16  ;;  %v24380_v54 = vrot.slane %v10302_v48, 4  ;;  %v10315_v28 = vshrl.u32 %v24342_v60, 16  ;;  %27507 = vst [vmem:[#allocation36_spill] sm:$0xff] %v24384_v12 }
 0x252   : > { %v10326_v0 = vshrl.u32 %v17531_v39, 16  ;;  %v10329_v27 = vshll.u32 %v17531_v39, 16  ;;  %v27508_v46 = vcombine.low %v24033_v21, %v24036_v59  ;;  %v24392_v61 = vld [vmem:[%s21327_s8 + $0x68] sm:$0x1]  ;;  %v10335_v8 = vshll.u32 %v24368_v26, 16 }
 0x253   : > { %27509 = vst [vmem:[#allocation37_spill] sm:$0xff] %v24392_v61  ;;  %v10339_v22 = vshrl.u32 %v24368_v26, 16  ;;  %v10350_v48 = vshrl.u32 %v17534_v23, 16  ;;  %v10353_v15 = vshll.u32 %v17534_v23, 16  ;;  %v27510_v39 = vcombine.low %v24043_v18, %v24046_v19  ;;  %v20786_v18 = vld [vmem:[%s21327_s8 + $0xcc] sm:$0xff]  }
 0x254   : > { %v10359_v21 = vshll.u32 %v24372_v34, 16  ;;  %v10363_v59 = vshrl.u32 %v24372_v34, 16  ;;  %v10307_v13 = vrot.slane %v10305_v35, 5  ;;  %v24403_v25 = vrot.slane %v10311_v53, 5  ;;  %v17540_v53 = vld [vmem:[%s21327_s8 + $0x90] sm:$0xf] }
 0x255   : > { %v10383_v23 = vshll.u32 %v24384_v12, 16  ;;  %v10387_v33 = vshrl.u32 %v24384_v12, 16  ;;  %v10317_v19 = vrot.slane %v10315_v28, 4  ;;  %v10331_v42 = vrot.slane %v10329_v27, 5 }
 0x256   : > { %19317 = vmatmul.mubr.msk.bf16.gmra.mrb[8].mxu1 %vm930_vm3, %v20784_v3  ;;  %v10374_v3 = vshrl.u32 %v17537_v45, 16  ;;  %v24409_v56 = vrot.slane %v10335_v8, 5  ;;  %v10341_v34 = vrot.slane %v10339_v22, 4  ;;  %v10352_v26 = vrot.slane %v10350_v48, 4  ;;  %v24429_v48 = vld [vmem:[%s21327_s8 + $0x8c] sm:$0x1] }
 0x257   : > { %19320 = vmatprep.mubr.msk.bf16.mxu1 %vm930_vm3, %v20785_v32  ;;  %v10321_v32 = vshll.u32 %v24392_v61, 16  ;;  %v10355_v35 = vrot.slane %v10353_v15, 5  ;;  %v24415_v1 = vrot.slane %v10359_v21, 5  ;;  %v10365_v12 = vrot.slane %v10363_v59, 4  ;;  %v24432_v21 = vld [vmem:[%s21327_s8 + $0x94] sm:$0xf] }
 0x258   : > { %19021 = vmatmul.mubr.msk.bf16.gmra.mrb[8].mxu0 %vm930_vm3, %v27508_v46  ;;  %v10377_v46 = vshll.u32 %v17537_v45, 16  ;;  %v24413_v45 = vld [vmem:[%s21327_s8 + $0x74] sm:$0x1]  ;;  %v10376_v17 = vrot.slane %v10374_v3, 4  ;;  %v24417_v60 = vrot.slane %v10284_v36, 4  ;;  %v24419_v61 = vrot.slane %v10294_v31, 4 }
 0x259   : > { %19024 = vmatprep.mubr.msk.bf16.mxu0 %vm930_vm3, %v27510_v39  ;;  %v10328_v39 = vrot.slane %v10326_v0, 4  ;;  %v24422_v0 = vld [vmem:[%s21327_s8 + $0x80] sm:$0x1]  ;;  %v24424_v27 = vrot.slane %v10383_v23, 5  ;;  %v10389_v8 = vrot.slane %v10387_v33, 4  ;;  %v10308_v22 = vor.u32 %v10307_v13, %v24380_v54  ;;  %27511 = vst [vmem:[#allocation38_spill] sm:$0xff] %v24432_v21 }
 0x25a   : > { %v10379_v28 = vrot.slane %v10377_v46, 5  ;;  %v10318_v15 = vor.u32 %v10317_v19, %v24403_v25  ;;  %v10398_v59 = vshrl.u32 %v17540_v53, 16  ;;  %v10401_v3 = vshll.u32 %v17540_v53, 16 }
 0x25b   : > { %v27512_v36 = vcombine.low %v24079_v16, %v24111_v14  ;;  %v10323_v31 = vrot.slane %v10321_v32, 5  ;;  %v10332_v46 = vor.u32 %v10331_v42, %v10328_v39  ;;  %v10342_v33 = vor.u32 %v10341_v34, %v24409_v56 }
 0x25c   : > { %v10345_v13 = vshll.u32 %v24413_v45, 16  ;;  %v27513_v54 = vcombine.low %v24114_v9, %v24117_v24  ;;  %v10356_v23 = vor.u32 %v10355_v35, %v10352_v26  ;;  %v10366_v14 = vor.u32 %v10365_v12, %v24415_v1 }
 0x25d   : > { %v10369_v16 = vshll.u32 %v24422_v0, 16  ;;  %v10390_v42 = vor.u32 %v10389_v8, %v24424_v27  ;;  %v10393_v34 = vshll.u32 %v24429_v48, 16  ;;  %v10407_v19 = vshll.u32 %v24432_v21, 16 }
 0x25e   : > { %19321 = vmatmul.mubr.msk.bf16.gmra.mrb[12].mxu1 %vm930_vm3, %v20786_v18  ;;  %v10380_v18 = vor.u32 %v10379_v28, %v10376_v17  ;;  %v10411_v24 = vshrl.u32 %v24432_v21, 16  ;;  %v10309_v9 = vrot.slane %v10308_v22, 4  ;;  %v10319_v32 = vrot.slane %v10318_v15, 4  ;;  %v20788_v22 = vld [vmem:[%s27212_s5 + $0x108] sm:$0xff]  }
 0x25f   : > { %19332 = vmatprep.mubr.msk.bf16.mxu1 %vm930_vm3, %v24348_v29  ;;  %v10400_v39 = vrot.slane %v10398_v59, 4  ;;  %v10403_v53 = vrot.slane %v10401_v3, 5  ;;  %v10290_v29 = vsel %vm21362_vm2, %v24417_v60, %v24330_v6  ;;  %v10333_v26 = vrot.slane %v10332_v46, 4 }
 0x260   : > { %19025 = vmatmul.mubr.msk.bf16.gmra.mrb[12].mxu0 %vm930_vm3, %v27512_v36  ;;  %v10343_v17 = vrot.slane %v10342_v33, 4  ;;  %v10347_v12 = vrot.slane %v10345_v13, 5  ;;  %v10357_v35 = vrot.slane %v10356_v23, 4  ;;  %v10367_v28 = vrot.slane %v10366_v14, 4  ;;  %v24473_v33 = vld [vmem:[%s21327_s8 + $0x98] sm:$0x1] }
 0x261   : > { %19028 = vmatprep.mubr.msk.bf16.mxu0 %vm930_vm3, %v27513_v54  ;;  %v10371_v8 = vrot.slane %v10369_v16, 5  ;;  %v10381_v36 = vrot.slane %v10380_v18, 4  ;;  %v17543_v54 = vld [vmem:[%s21327_s8 + $0x9c] sm:$0xf]  ;;  %v10391_v15 = vrot.slane %v10390_v42, 4  ;;  %v10395_v59 = vrot.slane %v10393_v34, 5 }
 0x262   : > { %v24461_v3 = vrot.slane %v10407_v19, 5  ;;  %v10413_v21 = vrot.slane %v10411_v24, 4  ;;  %v10300_v6 = vsel %vm21362_vm2, %v24419_v61, %v24376_v11  ;;  %v10314_v60 = vsel %vm21362_vm2, %v10309_v9, %v24403_v25  ;;  %v24476_v23 = vld [vmem:[%s21327_s8 + $0xa0] sm:$0xf]  ;;  %v24530_v24 = vld [vmem:[%s21327_s8 + $0xa4] sm:$0x1] }
 0x263   : > { %v10324_v46 = vsel %vm21362_vm2, %v10319_v32, %v10323_v31  ;;  %v10404_v13 = vor.u32 %v10403_v53, %v10400_v39  ;;  %v27514_v14 = vcombine.low %v24120_v7, %v24123_v57  ;;  %v10338_v25 = vsel %vm21362_vm2, %v10333_v26, %v24409_v56  ;;  %v24533_v9 = vld [vmem:[%s21327_s8 + $0xac] sm:$0xf]  ;;  %v17604_v53 = vld [vmem:[%s21327_s8 + $0x30] sm:$0xe] }
 0x264   : > { %v10348_v11 = vsel %vm21362_vm2, %v10343_v17, %v10347_v12  ;;  %v10422_v61 = vshrl.u32 %v17543_v54, 16  ;;  %v10425_v31 = vshll.u32 %v17543_v54, 16  ;;  %v27515_v16 = vcombine.low %v24162_v63, %v24172_v44 }
 0x265   : > { %v10362_v7 = vsel %vm21362_vm2, %v10357_v35, %v24415_v1  ;;  %v10372_v57 = vsel %vm21362_vm2, %v10367_v28, %v10371_v8  ;;  %v10386_v56 = vsel %vm21362_vm2, %v10381_v36, %v24424_v27  ;;  %v10396_v63 = vsel %vm21362_vm2, %v10391_v15, %v10395_v59  ;;  %v20790_v8 = vld [vmem:[%s27212_s5 + $0x118] sm:$0xff]  }
 0x266   : > { %19333 = vmatmul.mubr.msk.bf16.vlgmr.msra.gmra.mrb[16].mxu1 %vm930_vm3, %v24350_v4  ;;  %v17546_v4 = vld [vmem:[%s21327_s8 + $0xa8] sm:$0xf]  ;;  %v10414_v44 = vor.u32 %v10413_v21, %v24461_v3  ;;  %v10417_v1 = vshll.u32 %v24473_v33, 16  ;;  %v10431_v18 = vshll.u32 %v24476_v23, 16  ;;  %v27517_v27 = vsel %vm21362_vm2, %v24320_v37, %v24271_v52  ;;  %v17605_v59 = vld [vmem:[%s21327_s8 + $0x3c] sm:$0xe] }
 0x267   : > { %19365 = vmatpush3.bf16.msra.mxu1 %v24103_v58  ;;  %19336 = vmatprep.mubr.msk.bf16.mxu1 %vm930_vm3, %v24352_v5  ;;  %v20789_v58 = vld [vmem:[%s27212_s5 + $0x110] sm:$0xff]   ;;  %v27516_v5 = vsel %vm21362_vm2, %v24322_v38, %v24312_v50  ;;  %v24523_v34 = vcombine.low %v10290_v29, %v10300_v6  ;;  %v24525_v19 = vcombine.low %v10314_v60, %v10324_v46  ;;  %v24527_v21 = vrot.slane %v10404_v13, 4 }
 0x268   : > { %19029 = vmatmul.mubr.msk.bf16.gmra.mrb[16].mxu0 %vm930_vm3, %v27514_v14  ;;  %19366 = vmatprep.subr.bf16.mxu1 %v20788_v22  ;;  %v17570_v42 = vcombine.low %v27517_v27, %v27516_v5  ;;  %v24535_v32 = vrot.slane %v10422_v61, 4  ;;  %v24537_v39 = vrot.slane %v10425_v31, 5  ;;  %v10435_v50 = vshrl.u32 %v24476_v23, 16  ;;  %v17606_v14 = vld [vmem:[%s21327_s8 + $0x48] sm:$0xe] }
 0x269   : > { %19032 = vmatprep.mubr.msk.bf16.mxu0 %vm930_vm3, %v27515_v16  ;;  %v10446_v38 = vshrl.u32 %v17546_v4, 16  ;;  %v24541_v52 = vcombine.low %v10338_v25, %v10348_v11  ;;  %v24543_v37 = vcombine.low %v10362_v7, %v10372_v57  ;;  %v24545_v29 = vcombine.low %v10386_v56, %v10396_v63  ;;  %v27521_v7 = vld [vmem:[#allocation30_spill] sm:$0xff]  ;;  %v17607_v57 = vld [vmem:[%s21327_s8 + $0x54] sm:$0xe]  ;;  %v27522_v63 = vld [vmem:[#allocation31_spill] sm:$0xff] }
 0x26a   : > { %v10449_v26 = vshll.u32 %v17546_v4, 16  ;;  %v24547_v17 = vrot.slane %v10414_v44, 4  ;;  %v24549_v12 = vrot.slane %v10417_v1, 5  ;;  %v24551_v35 = vrot.slane %v10431_v18, 5  ;;  %v24600_v4 = vld [vmem:[%s27210_s3] sm:$0xff]  }
 0x26b   : > { %19367 = vmatpush3.bf16.msra.mxu1 %v20788_v22  ;;  %v10455_v28 = vshll.u32 %v24533_v9, 16  ;;  %v10441_v36 = vshll.u32 %v24530_v24, 16  ;;  %v10459_v54 = vshrl.u32 %v24533_v9, 16  ;;  %v17620_v22 = vrot.slane %v17604_v53, 9  ;;  %v17608_v1 = vld [vmem:[%s21327_s8 + $0x60] sm:$0xe] }
 0x26c   : > { %19368 = vmatprep.subr.bf16.mxu1 %v20789_v58  ;;  %v10943_v15 = vrot.slane %v24188_v55, 5  ;;  %v27518_v6 = vcombine.low %v24165_v20, %v24175_v51  ;;  %v10410_v60 = vsel %vm21362_vm2, %v24527_v21, %v24461_v3  ;;  %v10428_v46 = vor.u32 %v24537_v39, %v24535_v32  ;;  %v24747_v39 = vld [vmem:[%s21327_s8 + $0xbc] sm:$0x1] }
 0x26d   : > { %v24573_v13 = vrot.slane %v10435_v50, 4  ;;  %v24575_v55 = vrot.slane %v10446_v38, 4  ;;  %v27519_v20 = vcombine.low %v24178_v10, %v24181_v2  ;;  %v24583_v51 = vrot.slane %v10449_v26, 5 }
 0x26e   : > { %19337 = vmatmul.mubr.msk.bf16.gmra.mrb[20].mxu1 %vm930_vm3, %v24355_v47  ;;  %v24587_v25 = vsel %vm21791_vm6, %v17620_v22, %v10943_v15  ;;  %v10945_v11 = vrot.slane %v10943_v15, 4  ;;  %v10946_v61 = vrot.slane %v24238_v49, 5  ;;  %v24590_v31 = vrot.slane %v10455_v28, 5  ;;  %v27523_v22 = vld [vmem:[#allocation33_spill] sm:$0xff] }
 0x26f   : > { %19340 = vmatprep.mubr.msk.bf16.mxu1 %vm930_vm3, %v17570_v42  ;;  %19369 = vmatpush3.bf16.msra.mxu1 %v20789_v58  ;;  %v17621_v16 = vrot.slane %v17605_v59, 9  ;;  %v10950_v10 = vrot.slane %v27521_v7, 5  ;;  %v10953_v2 = vrot.slane %v24253_v40, 5  ;;  %v24595_v56 = vrot.slane %v10459_v54, 4 }
 0x270   : > { %19033 = vmatmul.mubr.msk.bf16.gmra.mrb[20].mxu0 %vm930_vm3, %v27518_v6  ;;  %19370 = vmatprep.subr.bf16.mxu1 %v20790_v8  ;;  %v24604_v49 = vsel %vm21791_vm6, %v10945_v11, %v10946_v61  ;;  %v17622_v58 = vrot.slane %v17606_v14, 9  ;;  %v10957_v44 = vrot.slane %v27522_v63, 5  ;;  %v10960_v27 = vrot.slane %v24269_v41, 5  ;;  %v17609_v41 = vld [vmem:[%s21327_s8 + $0x6c] sm:$0xe]  ;;  %v27524_v14 = vld [vmem:[#allocation21_spill] sm:$0xff] }
 0x271   : > { %19036 = vmatprep.mubr.msk.bf16.mxu0 %vm930_vm3, %v27519_v20  ;;  %v17644_v40 = vcombine.low %v24587_v25, %v24604_v49  ;;  %v24612_v18 = vsel %vm21791_vm6, %v17621_v16, %v10950_v10  ;;  %v10952_v5 = vrot.slane %v10950_v10, 4  ;;  %v17623_v38 = vrot.slane %v17607_v57, 9  ;;  %v27525_v20 = vld [vmem:[#allocation22_spill] sm:$0xff]  ;;  %v27527_v10 = vld [vmem:[#allocation37_spill] sm:$0xff]  ;;  %v20795_v25 = vld [vmem:[%s27210_s3 + $0x20] sm:$0xff]  }
 0x272   : > { %v24617_v42 = vsel %vm21791_vm6, %v17622_v58, %v10957_v44  ;;  %v10959_v50 = vrot.slane %v10957_v44, 4  ;;  %v10964_v53 = vrot.slane %v24277_v62, 5  ;;  %v10967_v28 = vrot.slane %v24297_v43, 5  ;;  %v27528_v57 = vld [vmem:[#allocation10_spill] sm:$0xff]  ;;  %v27529_v58 = vld [vmem:[#allocation7_spill] sm:$0xff] }
 0x273   : > { %19371 = vmatpush3.bf16.msra.mxu1 %v20790_v8  ;;  %v24622_v26 = vsel %vm21791_vm6, %v10952_v5, %v10953_v2  ;;  %v17624_v54 = vrot.slane %v17608_v1, 9  ;;  %v10971_v15 = vrot.slane %v27523_v22, 5  ;;  %v17610_v8 = vld [vmem:[%s21327_s8 + $0x78] sm:$0xe]  ;;  %v27526_v11 = vcombine.low %v27524_v14, %v27525_v20  ;;  %v27532_v22 = vld [vmem:[#allocation35_spill] sm:$0xff] }
 0x274   : > { %19404 = vmatprep.subr.bf16.mxu1 %v24600_v4  ;;  %v17645_v59 = vcombine.low %v24612_v18, %v24622_v26  ;;  %v24632_v6 = vsel %vm21791_vm6, %v10959_v50, %v10960_v27  ;;  %v24636_v62 = vsel %vm21791_vm6, %v17623_v38, %v10964_v53  ;;  %v10966_v43 = vrot.slane %v10964_v53, 4  ;;  %v27531_v1 = vld [vmem:[#allocation34_spill] sm:$0xff]  ;;  %v17611_v50 = vld [vmem:[%s21327_s8 + $0x84] sm:$0xe]  ;;  %v24666_v38 = vld [vmem:[%s21327_s8 + $0xb0] sm:$0x1] }
 0x275   : > { %v17646_v61 = vcombine.low %v24617_v42, %v24632_v6  ;;  %v24649_v16 = vsel %vm21791_vm6, %v17624_v54, %v10971_v15  ;;  %v10973_v7 = vrot.slane %v10971_v15, 4  ;;  %v10974_v2 = vrot.slane %v27527_v10, 5  ;;  %v17549_v14 = vld [vmem:[%s21327_s8 + $0xb4] sm:$0xf]  ;;  %v27543_v18 = vld [vmem:[#allocation38_spill] sm:$0xff] }
 0x276   : > { %19341 = vmatmul.mubr.msk.bf16.gmra.mrb[24].mxu1 %vm930_vm3, %v24523_v34  ;;  %v27530_v63 = vcombine.low %v27528_v57, %v27529_v58  ;;  %v24660_v34 = vsel %vm21791_vm6, %v10966_v43, %v10967_v28  ;;  %v17625_v44 = vrot.slane %v17609_v41, 9  ;;  %v10978_v5 = vrot.slane %v27531_v1, 5  ;;  %v24692_v58 = vld [vmem:[%s21327_s8 + $0xb8] sm:$0xf]  ;;  %v24779_v53 = vld [vmem:[%s21327_s8 + $0xd4] sm:$0x1] }
 0x277   : > { %19344 = vmatprep.mubr.msk.bf16.mxu1 %vm930_vm3, %v24525_v19  ;;  %v10981_v27 = vrot.slane %v24413_v45, 5  ;;  %v24672_v54 = vsel %vm21791_vm6, %v10973_v7, %v10974_v2  ;;  %v17626_v19 = vrot.slane %v17610_v8, 9  ;;  %v10985_v28 = vrot.slane %v27532_v22, 5  ;;  %v27533_v7 = vld [vmem:[#allocation36_spill] sm:$0xff]  ;;  %v17552_v22 = vld [vmem:[%s21327_s8 + $0xc0] sm:$0xf] }
 0x278   : > { %19037 = vmatmul.mubr.msk.bf16.gmra.mrb[24].mxu0 %vm930_vm3, %v27526_v11  ;;  %v24679_v45 = vsel %vm21791_vm6, %v17625_v44, %v10978_v5  ;;  %v10980_v41 = vrot.slane %v10978_v5, 4  ;;  %v10988_v43 = vrot.slane %v24422_v0, 5  ;;  %v17627_v8 = vrot.slane %v17611_v50, 9  ;;  %v20797_v26 = vld [vmem:[%s27210_s3 + $0x30] sm:$0xff]  }
 0x279   : > { %19040 = vmatprep.mubr.msk.bf16.mxu0 %vm930_vm3, %v27530_v63  ;;  %v24685_v20 = vsel %vm21791_vm6, %v17626_v19, %v10985_v28  ;;  %v10987_v11 = vrot.slane %v10985_v28, 4  ;;  %v10992_v10 = vrot.slane %v27533_v7, 5  ;;  %v10438_v2 = vor.u32 %v24573_v13, %v24551_v35  ;;  %v24713_v28 = vld [vmem:[%s21327_s8 + $0xc4] sm:$0xf] }
 0x27a   : > { %v10465_v57 = vshll.u32 %v24666_v38, 16  ;;  %v24696_v0 = vsel %vm21791_vm6, %v10980_v41, %v10981_v27  ;;  %v10995_v63 = vrot.slane %v24429_v48, 5  ;;  %v10452_v50 = vor.u32 %v24583_v51, %v24575_v55  ;;  %v27534_v41 = vld [vmem:[#allocation14_spill] sm:$0xff]  ;;  %v27535_v7 = vld [vmem:[#allocation15_spill] sm:$0xff] }
 0x27b   : > { %v24703_v1 = vsel %vm21791_vm6, %v10987_v11, %v10988_v43  ;;  %v24707_v13 = vsel %vm21791_vm6, %v17627_v8, %v10992_v10  ;;  %v10994_v5 = vrot.slane %v10992_v10, 4  ;;  %v10470_v19 = vshrl.u32 %v17549_v14, 16  ;;  %v17555_v10 = vld [vmem:[%s21327_s8 + $0xcc] sm:$0xf] }
 0x27c   : > { %v10473_v27 = vshll.u32 %v17549_v14, 16  ;;  %v27536_v43 = vcombine.low %v27534_v41, %v27535_v7  ;;  %v10462_v11 = vor.u32 %v24595_v56, %v24590_v31  ;;  %v10479_v55 = vshll.u32 %v24692_v58, 16 }
 0x27d   : > { %v10483_v51 = vshrl.u32 %v24692_v58, 16  ;;  %v24729_v14 = vsel %vm21791_vm6, %v10994_v5, %v10995_v63  ;;  %v10429_v56 = vrot.slane %v10428_v46, 4  ;;  %v10443_v8 = vrot.slane %v10441_v36, 5 }
 0x27e   : > { %19345 = vmatmul.mubr.msk.bf16.gmra.mrb[28].mxu1 %vm930_vm3, %v24541_v52  ;;  %v10420_v52 = vsel %vm21362_vm2, %v24547_v17, %v24549_v12  ;;  %v10494_v63 = vshrl.u32 %v17552_v22, 16  ;;  %v10497_v5 = vshll.u32 %v17552_v22, 16  ;;  %v10507_v41 = vshrl.u32 %v24713_v28, 16 }
 0x27f   : > { %19348 = vmatprep.mubr.msk.bf16.mxu1 %vm930_vm3, %v24543_v37  ;;  %v10503_v37 = vshll.u32 %v24713_v28, 16  ;;  %v10439_v7 = vrot.slane %v10438_v2, 4  ;;  %v10453_v17 = vrot.slane %v10452_v50, 4  ;;  %v10467_v12 = vrot.slane %v10465_v57, 5  ;;  %v24756_v57 = vld [vmem:[%s21327_s8 + $0xd0] sm:$0xf] }
 0x280   : > { %19041 = vmatmul.mubr.msk.bf16.gmra.mrb[28].mxu0 %vm930_vm3, %v27536_v43  ;;  %v10472_v43 = vrot.slane %v10470_v19, 4  ;;  %v10463_v32 = vrot.slane %v10462_v11, 4  ;;  %v10475_v36 = vrot.slane %v10473_v27, 5  ;;  %v10481_v46 = vrot.slane %v10479_v55, 5  ;;  %v24765_v55 = vld [vmem:[%s21327_s8 + $0xc8] sm:$0x1] }
 0x281   : > { %v10485_v48 = vrot.slane %v10483_v51, 4  ;;  %v17576_v22 = vcombine.low %v10410_v60, %v10420_v52  ;;  %v10496_v44 = vrot.slane %v10494_v63, 4  ;;  %v10499_v15 = vrot.slane %v10497_v5, 5 }
 0x282   : > { %v10505_v2 = vrot.slane %v10503_v37, 5  ;;  %v10509_v50 = vrot.slane %v10507_v41, 4  ;;  %v10434_v19 = vsel %vm21362_vm2, %v10429_v56, %v24551_v35  ;;  %v10444_v27 = vsel %vm21362_vm2, %v10439_v7, %v10443_v8 }
 0x283   : > { %v10489_v11 = vshll.u32 %v24747_v39, 16  ;;  %v10458_v3 = vsel %vm21362_vm2, %v10453_v17, %v24590_v31  ;;  %v10468_v21 = vsel %vm21362_vm2, %v10463_v32, %v10467_v12  ;;  %v10476_v60 = vor.u32 %v10475_v36, %v10472_v43 }
 0x284   : > { %v10486_v51 = vor.u32 %v10485_v48, %v10481_v46  ;;  %v10518_v35 = vshrl.u32 %v17555_v10, 16  ;;  %v10521_v52 = vshll.u32 %v17555_v10, 16  ;;  %v10527_v56 = vshll.u32 %v24756_v57, 16 }
 0x285   : > { %v10531_v8 = vshrl.u32 %v24756_v57, 16  ;;  %v10500_v63 = vor.u32 %v10499_v15, %v10496_v44  ;;  %v10513_v5 = vshll.u32 %v24765_v55, 16  ;;  %v17577_v37 = vcombine.low %v10434_v19, %v10444_v27 }
 0x286   : > { %19349 = vmatmul.mubr.msk.bf16.gmra.mrb[0].mxu1 %vm930_vm3, %v24545_v29  ;;  %v10510_v29 = vor.u32 %v10509_v50, %v10505_v2  ;;  %v17578_v31 = vcombine.low %v10458_v3, %v10468_v21  ;;  %v10477_v41 = vrot.slane %v10476_v60, 4  ;;  %v10487_v7 = vrot.slane %v10486_v51, 4  ;;  %v27537_v21 = vld [vmem:[#allocation13_spill] sm:$0xff]  ;;  %v17602_v51 = vld [vmem:[%s21327_s8 + $0x18] sm:$0xe] }
 0x287   : > { %19352 = vmatprep.mubr.msk.bf16.mxu1 %vm930_vm3, %v17576_v22  ;;  %v10491_v17 = vrot.slane %v10489_v11, 5  ;;  %v10520_v12 = vrot.slane %v10518_v35, 4  ;;  %v10523_v48 = vrot.slane %v10521_v52, 5  ;;  %v10529_v43 = vrot.slane %v10527_v56, 5 }
 0x288   : > { %v10533_v32 = vrot.slane %v10531_v8, 4  ;;  %v10501_v10 = vrot.slane %v10500_v63, 4  ;;  %v10511_v36 = vrot.slane %v10510_v29, 4  ;;  %v10515_v22 = vrot.slane %v10513_v5, 5  ;;  %v27538_v5 = vld [vmem:[#allocation29_spill] sm:$0xff] }
 0x289   : > { %v10482_v15 = vsel %vm21362_vm2, %v10477_v41, %v10481_v46  ;;  %v10492_v44 = vsel %vm21362_vm2, %v10487_v7, %v10491_v17  ;;  %v10524_v50 = vor.u32 %v10523_v48, %v10520_v12  ;;  %v10537_v27 = vshll.u32 %v24779_v53, 16  ;;  %v17613_v41 = vld [vmem:[%s21327_s8 + $0x9c] sm:$0xe] }
 0x28a   : > { %v10534_v19 = vor.u32 %v10533_v32, %v10529_v43  ;;  %v10506_v11 = vsel %vm21362_vm2, %v10501_v10, %v10505_v2  ;;  %v10516_v3 = vsel %vm21362_vm2, %v10511_v36, %v10515_v22  ;;  %v10929_v60 = vrot.slane %v27537_v21, 5  ;;  %v27539_v32 = vld [vmem:[#allocation18_spill] sm:$0xff]  ;;  %v17603_v22 = vld [vmem:[%s21327_s8 + $0x24] sm:$0xe] }
 0x28b   : > { %v17579_v46 = vcombine.low %v10482_v15, %v10492_v44  ;;  %v17580_v35 = vcombine.low %v10506_v11, %v10516_v3  ;;  %v10525_v52 = vrot.slane %v10524_v50, 4  ;;  %v10539_v8 = vrot.slane %v10537_v27, 5  ;;  %v27540_v11 = vld [vmem:[#allocation32_spill] sm:$0xff] }
 0x28c   : > { %v10535_v56 = vrot.slane %v10534_v19, 4  ;;  %v17618_v63 = vrot.slane %v17602_v51, 9  ;;  %v10931_v29 = vrot.slane %v10929_v60, 4  ;;  %v17629_v2 = vrot.slane %v17613_v41, 9 }
 0x28d   : > { %v11009_v17 = vrot.slane %v24530_v24, 5  ;;  %v10530_v12 = vsel %vm21362_vm2, %v10525_v52, %v10529_v43  ;;  %v10936_v10 = vrot.slane %v27539_v32, 5  ;;  %v17619_v19 = vrot.slane %v17603_v22, 9  ;;  %v20794_v52 = vld [vmem:[%s27210_s3 + $0x18] sm:$0xff]  }
 0x28e   : > { %19353 = vmatmul.mubr.msk.bf16.gmra.mrb[4].mxu1 %vm930_vm3, %v17577_v37  ;;  %v10932_v37 = vrot.slane %v27538_v5, 5  ;;  %v10540_v48 = vsel %vm21362_vm2, %v10535_v56, %v10539_v8  ;;  %v10939_v3 = vrot.slane %v27540_v11, 5  ;;  %v27541_v49 = vcombine.low %v24636_v62, %v24660_v34 }
 0x28f   : > { %19356 = vmatprep.mubr.msk.bf16.mxu1 %vm930_vm3, %v17578_v31  ;;  %v11006_v31 = vrot.slane %v24476_v23, 5  ;;  %v10930_v23 = vsel %vm21791_vm6, %v17618_v63, %v10929_v60  ;;  %v17581_v44 = vcombine.low %v10530_v12, %v10540_v48  ;;  %v10938_v27 = vrot.slane %v10936_v10, 4 }
 0x290   : > { %v10933_v36 = vsel %vm21791_vm6, %v10931_v29, %v10932_v37  ;;  %v10937_v21 = vsel %vm21791_vm6, %v17619_v19, %v10936_v10  ;;  %v10999_v42 = vrot.slane %v27543_v18, 5  ;;  %v27544_v34 = vcombine.low %v24679_v45, %v24696_v0  ;;  %v17614_v45 = vld [vmem:[%s21327_s8 + $0xa8] sm:$0xe]  ;;  %v20812_v19 = vld [vmem:[%s27212_s5 + $0x18] sm:$0xff]  }
 0x291   : > { %v11008_v7 = vrot.slane %v11006_v31, 4  ;;  %v24812_v24 = vsel %vm21791_vm6, %v17629_v2, %v11006_v31  ;;  %v17642_v50 = vcombine.low %v10930_v23, %v10933_v36  ;;  %v10940_v60 = vsel %vm21791_vm6, %v10938_v27, %v10939_v3  ;;  %v20816_v27 = vld [vmem:[%s21327_s8] sm:$0xff]   ;;  %v20817_v3 = vld [vmem:[%s21327_s8 + $0xc] sm:$0xff]   ;;  %v20838_v18 = vld [vmem:[%s21327_s8 + $0x78] sm:$0xff]  }
 0x292   : > { %v17643_v51 = vcombine.low %v10937_v21, %v10940_v60  ;;  %v11001_v62 = vrot.slane %v10999_v42, 4  ;;  %v11013_v8 = vrot.slane %v24533_v9, 5  ;;  %v17630_v63 = vrot.slane %v17614_v45, 9  ;;  %v20806_v9 = vld [vmem:[%s27212_s5] sm:$0xff]   ;;  %19052 = vmatprep.mubr.msk.bf16.mxu0 %vm930_vm3, %v20816_v27 }
 0x293   : > { %v24816_v15 = vsel %vm21791_vm6, %v11008_v7, %v11009_v17  ;;  %v11020_v5 = vrot.slane %v24692_v58, 5  ;;  %v11027_v41 = vrot.slane %v24713_v28, 5  ;;  %19044 = vmatprep.subr.bf16.mxu0 %v20806_v9  ;;  %v11023_v17 = vrot.slane %v24747_v39, 5  ;;  %v20807_v28 = vld [vmem:[%s27212_s5 + $0x8] sm:$0xff]   ;;  %v20799_v60 = vld [vmem:[#allocation2] sm:$0xff]  }
 0x294   : > { %v17653_v43 = vcombine.low %v24812_v24, %v24816_v15  ;;  %v11015_v29 = vrot.slane %v11013_v8, 4  ;;  %v11014_v37 = vsel %vm21791_vm6, %v17630_v63, %v11013_v8  ;;  %19045 = vmatpush3.bf16.msra.mxu0 %v20806_v9  ;;  %v11030_v32 = vrot.slane %v24765_v55, 5  ;;  %v20811_v55 = vld [vmem:[%s27212_s5 + $0x10] sm:$0xff]   ;;  %v17617_v24 = vld [vmem:[%s21327_s8 + $0xcc] sm:$0xe] }
 0x295   : > { %v11022_v7 = vrot.slane %v11020_v5, 4  ;;  %v11029_v48 = vrot.slane %v11027_v41, 4  ;;  %19046 = vmatprep.subr.bf16.mxu0 %v20807_v28  ;;  %v11034_v23 = vrot.slane %v24756_v57, 5  ;;  %v11037_v57 = vrot.slane %v24779_v53, 5  ;;  %v20846_v9 = vld [vmem:[%s21327_s8 + $0xa8] sm:$0xff]  }
 0x296   : > { %19357 = vmatmul.mubr.msk.bf16.gmra.mrb[8].mxu1 %vm930_vm3, %v17579_v46  ;;  %v20792_v46 = vld [vmem:[%s27210_s3 + $0x8] sm:$0xff]  }
 0x297   : > { %19360 = vmatprep.mubr.msk.bf16.mxu1 %vm930_vm3, %v17580_v35  ;;  %v20793_v35 = vld [vmem:[%s27210_s3 + $0x10] sm:$0xff]   ;;  %v11024_v10 = vsel %vm21791_vm6, %v11022_v7, %v11023_v17  ;;  %v11031_v22 = vsel %vm21791_vm6, %v11029_v48, %v11030_v32  ;;  %v6834_v48 = vld [vmem:[%s21327_s8 + $0x4] sm:$0xf] }
 0x298   : > { %19047 = vmatpush3.bf16.msra.mxu0 %v20807_v28 }
 0x299   : > { %19048 = vmatprep.subr.bf16.mxu0 %v20811_v55 }
 0x29c   : > { %19049 = vmatpush3.bf16.msra.mxu0 %v20811_v55 }
 0x29d   : > { %19050 = vmatprep.subr.bf16.mxu0 %v20812_v19 }
 0x29e   : > { %19361 = vmatmul.mubr.msk.bf16.gmra.mrb[12].mxu1 %vm930_vm3, %v17581_v44  ;;  %v17633_v44 = vrot.slane %v17617_v24, 9 }
 0x29f   : > { %19372 = vmatprep.mubr.msk.bf16.mxu1 %vm930_vm3, %v17642_v50  ;;  %v11036_v50 = vrot.slane %v11034_v23, 4 }
 0x2a0   : > { %19051 = vmatpush3.bf16.msra.mxu0 %v20812_v19  ;;  %v11035_v11 = vsel %vm21791_vm6, %v17633_v44, %v11034_v23 }
 0x2a1   : > { %v11038_v53 = vsel %vm21791_vm6, %v11036_v50, %v11037_v57 }
 0x2a2   : > { %v17657_v21 = vcombine.low %v11035_v11, %v11038_v53  ;;  %v25006_v53 = vld [vmem:[%s21327_s8 + $0xc] sm:$0xf] }
 0x2a3   : > { %19053 = vmatmul.mubr.msk.bf16.vlgmr.msra.gmra.mrb[32].mxu0 %vm930_vm3, %v20817_v3 }
 0x2a6   : > { %19373 = vmatmul.mubr.msk.bf16.vlgmr.msra.gmra.mrb[16].mxu1 %vm930_vm3, %v17643_v51  ;;  %v20821_v51 = vld [vmem:[%s21327_s8 + $0x18] sm:$0xff]  }
 0x2a7   : > { %19405 = vmatpush3.bf16.msra.mxu1 %v24600_v4  ;;  %19376 = vmatprep.mubr.msk.bf16.mxu1 %vm930_vm3, %v17644_v40  ;;  %v20796_v4 = vld [vmem:[%s27210_s3 + $0x28] sm:$0xff]   ;;  %v27542_v40 = vcombine.low %v24649_v16, %v24672_v54  ;;  %v20798_v16 = vld [vmem:[%s27210_s3 + $0x38] sm:$0xff]   ;;  %v27545_v54 = vcombine.low %v24685_v20, %v24703_v1  ;;  %v11016_v20 = vrot.slane %v24666_v38, 5  ;;  %v27546_v1 = vcombine.low %v24707_v13, %v24729_v14  ;;  %v17615_v38 = vld [vmem:[%s21327_s8 + $0xb4] sm:$0xe] }
 0x2a8   : > { %19406 = vmatprep.subr.bf16.mxu1 %v20792_v46  ;;  %v24906_v13 = vld [vmem:[%s27210_s3 + $0x40] sm:$0xff]   ;;  %v17631_v2 = vrot.slane %v17615_v38, 9  ;;  %19056 = vmatprep.mubr.msk.bf16.mxu0 %vm930_vm3, %v20821_v51  ;;  %v20849_v38 = vld [vmem:[%s27212_s5 + $0x38] sm:$0xff]  }
 0x2a9   : > { %v11017_v31 = vsel %vm21791_vm6, %v11015_v29, %v11016_v20  ;;  %v17616_v14 = vld [vmem:[%s21327_s8 + $0xc0] sm:$0xe]  ;;  %v11748_v29 = vld [vmem:[#allocation2 + $0x8] sm:$0x1] }
 0x2aa   : > { %v17654_v58 = vcombine.low %v11014_v37, %v11017_v31  ;;  %v17632_v12 = vrot.slane %v17616_v14, 9  ;;  %v11021_v39 = vsel %vm21791_vm6, %v17631_v2, %v11020_v5  ;;  %v11814_v5 = vshll.u32 %v11748_v29, 16  ;;  %v20847_v37 = vld [vmem:[%s21327_s8 + $0xb4] sm:$0xff]   ;;  %v24991_v2 = vld [vmem:[%s27209_s2] ss:$0 sm:$0xff] }
 0x2ab   : > { %19407 = vmatpush3.bf16.msra.mxu1 %v20792_v46  ;;  %v17655_v15 = vcombine.low %v11021_v39, %v11024_v10  ;;  %v20822_v46 = vld [vmem:[%s21327_s8 + $0x24] sm:$0xff]   ;;  %v20848_v31 = vld [vmem:[%s27212_s5 + $0x30] sm:$0xff]   ;;  %v6333_v29 = vld [vmem:[#allocation2 + $0x18] sm:$0xf] }
 0x2ac   : > { %19408 = vmatprep.subr.bf16.mxu1 %v20793_v35  ;;  %v11028_v36 = vsel %vm21791_vm6, %v17632_v12, %v11027_v41  ;;  %19057 = vmatmul.mubr.msk.bf16.gmra.mrb[36].mxu0 %vm930_vm3, %v20822_v46  ;;  %v6833_v12 = vld [vmem:[%s21327_s8] sm:$0xf]  ;;  %v6835_v10 = vld [vmem:[%s21327_s8 + $0x8] sm:$0x1] }
 0x2ad   : > { %v6882_v23 = vshrl.u32 %v6833_v12, 16  ;;  %v6885_v55 = vshll.u32 %v6833_v12, 16  ;;  %v6901_v44 = vshll.u32 %v6835_v10, 16 }
 0x2ae   : > { %19377 = vmatmul.mubr.msk.bf16.gmra.mrb[20].mxu1 %vm930_vm3, %v17645_v59  ;;  %v17612_v59 = vld [vmem:[%s21327_s8 + $0x90] sm:$0xe] }
 0x2af   : > { %19380 = vmatprep.mubr.msk.bf16.mxu1 %vm930_vm3, %v17646_v61  ;;  %19409 = vmatpush3.bf16.msra.mxu1 %v20793_v35  ;;  %v17628_v6 = vrot.slane %v17612_v59, 9  ;;  %v11002_v61 = vrot.slane %v24473_v33, 5  ;;  %v20826_v35 = vld [vmem:[%s21327_s8 + $0x30] sm:$0xff]   ;;  %v11747_v59 = vld [vmem:[#allocation2 + $0x4] sm:$0xf]  ;;  %v6884_v27 = vrot.slane %v6882_v23, 4 }
 0x2b0   : > { %19410 = vmatprep.subr.bf16.mxu1 %v20794_v52  ;;  %19060 = vmatprep.mubr.msk.bf16.mxu0 %vm930_vm3, %v20826_v35  ;;  %v6887_v11 = vrot.slane %v6885_v55, 5 }
 0x2b1   : > { %v11000_v56 = vsel %vm21791_vm6, %v17628_v6, %v10999_v42  ;;  %v11003_v33 = vsel %vm21791_vm6, %v11001_v62, %v11002_v61  ;;  %v20839_v42 = vld [vmem:[%s21327_s8 + $0x84] sm:$0xff]   ;;  %v11804_v61 = vshll.u32 %v11747_v59, 16 }
 0x2b2   : > { %v17652_v0 = vcombine.low %v11000_v56, %v11003_v33  ;;  %v20843_v56 = vld [vmem:[%s27212_s5 + $0x20] sm:$0xff]   ;;  %v20844_v33 = vld [vmem:[%s27212_s5 + $0x28] sm:$0xff]  }
 0x2b3   : > { %19411 = vmatpush3.bf16.msra.mxu1 %v20794_v52  ;;  %v20827_v52 = vld [vmem:[%s21327_s8 + $0x3c] sm:$0xff]   ;;  %19084 = vmatprep.subr.bf16.mxu0 %v20843_v56 }
 0x2b4   : > { %19412 = vmatprep.subr.bf16.mxu1 %v20795_v25  ;;  %19061 = vmatmul.mubr.msk.bf16.gmra.mrb[40].mxu0 %vm930_vm3, %v20827_v52  ;;  %v6888_v52 = vor.u32 %v6887_v11, %v6884_v27 }
 0x2b5   : > { %19085 = vmatpush3.bf16.msra.mxu0 %v20843_v56 }
 0x2b6   : > { %19381 = vmatmul.mubr.msk.bf16.gmra.mrb[24].mxu1 %vm930_vm3, %v27541_v49  ;;  %v20835_v49 = vld [vmem:[%s21327_s8 + $0x60] sm:$0xff]   ;;  %19086 = vmatprep.subr.bf16.mxu0 %v20844_v33 }
 0x2b7   : > { %19384 = vmatprep.mubr.msk.bf16.mxu1 %vm930_vm3, %v27542_v40  ;;  %19413 = vmatpush3.bf16.msra.mxu1 %v20795_v25  ;;  %v20831_v25 = vld [vmem:[%s21327_s8 + $0x48] sm:$0xff]  }
 0x2b8   : > { %19414 = vmatprep.subr.bf16.mxu1 %v20796_v4  ;;  %19064 = vmatprep.mubr.msk.bf16.mxu0 %vm930_vm3, %v20831_v25  ;;  %v20836_v40 = vld [vmem:[%s21327_s8 + $0x6c] sm:$0xff]   ;;  %v25011_v25 = vrot.slane %v6901_v44, 5 }
 0x2b9   : > { %19087 = vmatpush3.bf16.msra.mxu0 %v20844_v33 }
 0x2ba   : > { %19088 = vmatprep.subr.bf16.mxu0 %v20848_v31 }
 0x2bb   : > { %19415 = vmatpush3.bf16.msra.mxu1 %v20796_v4  ;;  %v20832_v4 = vld [vmem:[%s21327_s8 + $0x54] sm:$0xff]  }
 0x2bc   : > { %19416 = vmatprep.subr.bf16.mxu1 %v20797_v26  ;;  %19065 = vmatmul.mubr.msk.bf16.gmra.mrb[44].mxu0 %vm930_vm3, %v20832_v4 }
 0x2bd   : > { %19068 = vmatprep.mubr.msk.bf16.mxu0 %vm930_vm3, %v20835_v49  ;;  %19089 = vmatpush3.bf16.msra.mxu0 %v20848_v31 }
 0x2be   : > { %19385 = vmatmul.mubr.msk.bf16.gmra.mrb[28].mxu1 %vm930_vm3, %v27544_v34  ;;  %v20841_v34 = vld [vmem:[%s21327_s8 + $0x90] sm:$0xff]   ;;  %19090 = vmatprep.subr.bf16.mxu0 %v20849_v38 }
 0x2bf   : > { %19388 = vmatprep.mubr.msk.bf16.mxu1 %vm930_vm3, %v27545_v54  ;;  %19417 = vmatpush3.bf16.msra.mxu1 %v20797_v26  ;;  %v11746_v26 = vld [vmem:[#allocation2] sm:$0xf] }
 0x2c0   : > { %19418 = vmatprep.subr.bf16.mxu1 %v20798_v16  ;;  %v11795_v6 = vshrl.u32 %v11746_v26, 16  ;;  %v11798_v62 = vshll.u32 %v11746_v26, 16  ;;  %v20842_v54 = vld [vmem:[%s21327_s8 + $0x9c] sm:$0xff]  }
 0x2c1   : > { %19091 = vmatpush3.bf16.msra.mxu0 %v20849_v38 }
 0x2c2   : > { %v11797_v8 = vrot.slane %v11795_v6, 4  ;;  %v11800_v45 = vrot.slane %v11798_v62, 5  ;;  %v25015_v6 = vrot.slane %v6888_v52, 4 }
 0x2c3   : > { %19419 = vmatpush3.bf16.msra.mxu1 %v20798_v16  ;;  %v11808_v16 = vshrl.u32 %v11747_v59, 16 }
 0x2c4   : > { %19452 = vmatprep.subr.bf16.mxu1 %v24906_v13  ;;  %19069 = vmatmul.mubr.msk.bf16.gmra.mrb[48].mxu0 %vm930_vm3, %v20836_v40  ;;  %v11801_v20 = vor.u32 %v11800_v45, %v11797_v8 }
 0x2c5   : > { %19072 = vmatprep.mubr.msk.bf16.mxu0 %vm930_vm3, %v20838_v18  ;;  %v11810_v63 = vrot.slane %v11808_v16, 4  ;;  %v6906_v18 = vshrl.u32 %v25006_v53, 16 }
 0x2c6   : > { %19389 = vmatmul.mubr.msk.bf16.gmra.mrb[0].mxu1 %vm930_vm3, %v27546_v1  ;;  %v11802_v41 = vrot.slane %v11801_v20, 4 }
 0x2c7   : > { %19392 = vmatprep.mubr.msk.bf16.mxu1 %vm930_vm3, %v17652_v0  ;;  %v11806_v0 = vrot.slane %v11804_v61, 5 }
 0x2c9   : > { %v11811_v1 = vor.u32 %v11810_v63, %v11806_v0  ;;  %v11807_v7 = vsel %vm21362_vm2, %v11802_v41, %v11806_v0  ;;  %v6324_v41 = vld [vmem:[#allocation2 + $0xc] sm:$0xf] }
 0x2cb   : > { %v11812_v14 = vrot.slane %v11811_v1, 4 }
 0x2cc   : > { %19073 = vmatmul.mubr.msk.bf16.gmra.mrb[52].mxu0 %vm930_vm3, %v20839_v42 }
 0x2cd   : > { %19076 = vmatprep.mubr.msk.bf16.mxu0 %vm930_vm3, %v20841_v34 }
 0x2ce   : > { %19393 = vmatmul.mubr.msk.bf16.gmra.mrb[4].mxu1 %vm930_vm3, %v17653_v43  ;;  %v17656_v43 = vcombine.low %v11028_v36, %v11031_v22  ;;  %v6891_v36 = vshll.u32 %v6834_v48, 16 }
 0x2cf   : > { %19396 = vmatprep.mubr.msk.bf16.mxu1 %vm930_vm3, %v17654_v58  ;;  %v11816_v58 = vrot.slane %v11814_v5, 5 }
 0x2d1   : > { %v11817_v17 = vsel %vm21362_vm2, %v11812_v14, %v11816_v58 }
 0x2d4   : > { %19077 = vmatmul.mubr.msk.bf16.gmra.mrb[56].mxu0 %vm930_vm3, %v20842_v54 }
 0x2d5   : > { %19080 = vmatprep.mubr.msk.bf16.mxu0 %vm930_vm3, %v20846_v9 }
 0x2d6   : > { %19397 = vmatmul.mubr.msk.bf16.gmra.mrb[8].mxu1 %vm930_vm3, %v17655_v15  ;;  %v25002_v15 = vcombine.low %v11807_v7, %v11817_v17 }
 0x2d7   : > { %19400 = vmatprep.mubr.msk.bf16.mxu1 %vm930_vm3, %v17656_v43  ;;  %v6895_v43 = vshrl.u32 %v6834_v48, 16  ;;  %v25246_v48 = vld [vmem:[%s27212_s5 + $0x40] sm:$0xff]  }
 0x2d8   : > { %19124 = vmatprep.subr.bf16.mxu0 %v25246_v48 }
 0x2d9   : > { %v6897_v51 = vrot.slane %v6895_v43, 4 }
 0x2dc   : > { %19081 = vmatmul.mubr.msk.bf16.gmra.mrb[60].mxu0 %vm930_vm3, %v20847_v37 }
 0x2de   : > { %19401 = vmatmul.mubr.msk.bf16.gmra.mrb[12].mxu1 %vm930_vm3, %v17657_v21 }
 0x2df   : > { %19420 = vmatprep.mubr.bf16.mxu1 %v20799_v60  ;;  %v25009_v60 = vrot.slane %v6891_v36, 5 }
 0x2e1   : > { %v6898_v40 = vor.u32 %v6897_v51, %v25009_v60 }
 0x2e3   : > { %v25017_v54 = vrot.slane %v6898_v40, 4 }
 0x31b   : > { %v19014_v28 = vpop.f32.mrb[0].mxu0 }
 0x31c   : > { %v5785_v32 = vadd.f32 %v19014_v28, %v24991_v2  ;;  %v5617_v39 = vpop.f32.mrb[1].mxu0 }
 0x31d   : > { %v5783_v22 = vadd.f32 %v24991_v2, %v5617_v39  ;;  %v19015_v24 = vpop.f32.mrb[2].mxu0 }
 0x31e   : > { %v5817_v50 = vmax.f32 %v5785_v32, 0.0  ;;  %v5786_v57 = vadd.f32 %v19015_v24, %v24991_v2  ;;  %v5620_v19 = vpop.f32.mrb[3].mxu0  ;;  %v6337_v32 = vld [vmem:[#allocation2 + $0x20] sm:$0x1] }
 0x31f   : > { %v5815_v3 = vmax.f32 %v5783_v22, 0.0  ;;  %v5784_v21 = vadd.f32 %v24991_v2, %v5620_v19  ;;  %v6330_v22 = vld [vmem:[#allocation2 + $0x14] sm:$0x1] }
 0x320   : > { %v18077_v46 = vpack.c.bf16 %v5817_v50, %v5817_v50  ;;  %v5818_v35 = vmax.f32 %v5786_v57, 0.0 }
 0x321   : > { %v18075_v4 = vpack.c.bf16 %v5815_v3, %v5815_v3  ;;  %v5816_v49 = vmax.f32 %v5784_v21, 0.0 }
 0x322   : > { %v6018_v42 = vshrl.u32 %v18077_v46, 16  ;;  %v6021_v26 = vshll.u32 %v18077_v46, 16  ;;  %v18078_v59 = vpack.c.bf16 %v5818_v35, %v5818_v35 }
 0x323   : > { %v6001_v62 = vshrl.u32 %v18075_v4, 16  ;;  %v6004_v61 = vshll.u32 %v18075_v4, 16  ;;  %v18076_v16 = vpack.c.bf16 %v5816_v49, %v5816_v49  ;;  %v19018_v34 = vpop.f32.mrb[4].mxu0 }
 0x324   : > { %v6020_v56 = vrot.slane %v6018_v42, 7  ;;  %v6026_v33 = vshrl.u32 %v18078_v59, 16  ;;  %v6029_v8 = vshll.u32 %v18078_v59, 16  ;;  %v5789_v45 = vadd.f32 %v19018_v34, %v24991_v2  ;;  %v5633_v0 = vpop.f32.mrb[5].mxu0  ;;  %v6347_v59 = vld [vmem:[#allocation2 + $0x30] sm:$0xf] }
 0x325   : > { %v6003_v20 = vrot.slane %v6001_v62, 7  ;;  %v6009_v1 = vshrl.u32 %v18076_v16, 16  ;;  %v6012_v5 = vshll.u32 %v18076_v16, 16  ;;  %v5787_v9 = vadd.f32 %v24991_v2, %v5633_v0  ;;  %v19019_v37 = vpop.f32.mrb[6].mxu0 }
 0x326   : > { %v6023_v31 = vor.u32 %v6021_v26, %v6020_v56  ;;  %v6024_v38 = vrot.slane %v6020_v56, 4  ;;  %v6028_v58 = vrot.slane %v6026_v33, 7  ;;  %v5821_v7 = vmax.f32 %v5789_v45, 0.0  ;;  %v5636_v17 = vpop.f32.mrb[7].mxu0  ;;  %v6340_v45 = vld [vmem:[#allocation2 + $0x24] sm:$0xf] }
 0x327   : > { %v6006_v28 = vor.u32 %v6004_v61, %v6003_v20  ;;  %v6007_v12 = vrot.slane %v6003_v20, 4  ;;  %v6011_v39 = vrot.slane %v6009_v1, 7  ;;  %v5819_v10 = vmax.f32 %v5787_v9, 0.0 }
 0x328   : > { %v6334_v23 = vsel %vm25022_vm12, %v6023_v31, %v6333_v29  ;;  %v6031_v55 = vor.u32 %v6029_v8, %v6028_v58  ;;  %v6033_v36 = vrot.slane %v6028_v58, 4  ;;  %v18081_v24 = vpack.c.bf16 %v5821_v7, %v5821_v7 }
 0x329   : > { %6335 = vst [vmem:[#allocation2 + $0x18] sm:$0xf] %v6334_v23  ;;  %v6325_v43 = vsel %vm25022_vm12, %v6006_v28, %v6324_v41  ;;  %v6014_v44 = vor.u32 %v6012_v5, %v6011_v39  ;;  %v6016_v50 = vrot.slane %v6011_v39, 4  ;;  %v18079_v57 = vpack.c.bf16 %v5819_v10, %v5819_v10 }
 0x32a   : > { %6326 = vst [vmem:[#allocation2 + $0xc] sm:$0xf] %v6325_v43  ;;  %v6032_v19 = vsel %vm25029_vm13, %v6024_v38, %v6031_v55  ;;  %v6338_v27 = vsel %vm25035_vm14, %v6033_v36, %v6337_v32  ;;  %v6052_v11 = vshrl.u32 %v18081_v24, 16  ;;  %v6055_v3 = vshll.u32 %v18081_v24, 16  ;;  %v20803_v32 = vld [vmem:[%s27210_s3 + $0x48] sm:$0xff]  }
 0x32b   : > { %6336 = vst [vmem:[#allocation2 + $0x1c] sm:$0xf] %v6032_v19  ;;  %6339 = vst [vmem:[#allocation2 + $0x20] sm:$0x1] %v6338_v27  ;;  %v6015_v21 = vsel %vm25029_vm13, %v6007_v12, %v6014_v44  ;;  %v6331_v51 = vsel %vm25035_vm14, %v6016_v50, %v6330_v22  ;;  %v6035_v46 = vshrl.u32 %v18079_v57, 16  ;;  %v6038_v35 = vshll.u32 %v18079_v57, 16 }
 0x32c   : > { %v19022_v52 = vpop.f32.mrb[8].mxu0  ;;  %6327 = vst [vmem:[#allocation2 + $0x10] sm:$0xf] %v6015_v21  ;;  %6332 = vst [vmem:[#allocation2 + $0x14] sm:$0x1] %v6331_v51  ;;  %v25051_v4 = vrot.slane %v6052_v11, 7  ;;  %v5790_v49 = vadd.f32 %v19019_v37, %v24991_v2  ;;  %v5788_v40 = vadd.f32 %v24991_v2, %v5636_v17  ;;  %v6894_v34 = vsel %vm21362_vm2, %v25015_v6, %v25009_v60 }
 0x32d   : > { %v5793_v42 = vadd.f32 %v19022_v52, %v24991_v2  ;;  %v5649_v26 = vpop.f32.mrb[9].mxu0  ;;  %v25056_v62 = vrot.slane %v6035_v46, 7  ;;  %v6904_v56 = vsel %vm21362_vm2, %v25017_v54, %v25011_v25  ;;  %v6351_v36 = vld [vmem:[#allocation2 + $0x38] sm:$0x1]  ;;  %v6344_v22 = vld [vmem:[#allocation2 + $0x2c] sm:$0x1] }
 0x32e   : > { %v5791_v61 = vadd.f32 %v24991_v2, %v5649_v26  ;;  %v19023_v16 = vpop.f32.mrb[10].mxu0  ;;  %v6057_v33 = vor.u32 %v6055_v3, %v25051_v4  ;;  %v6058_v8 = vrot.slane %v25051_v4, 4  ;;  %v5822_v0 = vmax.f32 %v5790_v49, 0.0  ;;  %v6361_v3 = vld [vmem:[#allocation2 + $0x48] sm:$0xf] }
 0x32f   : > { %v5820_v29 = vmax.f32 %v5788_v40, 0.0  ;;  %v5652_v20 = vpop.f32.mrb[11].mxu0  ;;  %v6040_v1 = vor.u32 %v6038_v35, %v25056_v62  ;;  %v6041_v5 = vrot.slane %v25056_v62, 4  ;;  %v5825_v9 = vmax.f32 %v5793_v42, 0.0 }
 0x330   : > { %v5823_v37 = vmax.f32 %v5791_v61, 0.0  ;;  %v6348_v31 = vsel %vm25022_vm12, %v6057_v33, %v6347_v59  ;;  %v18082_v38 = vpack.c.bf16 %v5822_v0, %v5822_v0  ;;  %v5794_v58 = vadd.f32 %v19023_v16, %v24991_v2  ;;  %v6354_v16 = vld [vmem:[#allocation2 + $0x3c] sm:$0xf] }
 0x331   : > { %v18080_v41 = vpack.c.bf16 %v5820_v29, %v5820_v29  ;;  %6349 = vst [vmem:[#allocation2 + $0x30] sm:$0xf] %v6348_v31  ;;  %v6341_v7 = vsel %vm25022_vm12, %v6040_v1, %v6340_v45  ;;  %v18085_v17 = vpack.c.bf16 %v5825_v9, %v5825_v9  ;;  %v5792_v12 = vadd.f32 %v24991_v2, %v5652_v20  ;;  %v20808_v1 = vld [vmem:[%s27210_s3 + $0x50] sm:$0xff]  }
 0x332   : > { %v18083_v28 = vpack.c.bf16 %v5823_v37, %v5823_v37  ;;  %6342 = vst [vmem:[#allocation2 + $0x24] sm:$0xf] %v6341_v7  ;;  %v6060_v39 = vshrl.u32 %v18082_v38, 16  ;;  %v6063_v10 = vshll.u32 %v18082_v38, 16  ;;  %v5826_v21 = vmax.f32 %v5794_v58, 0.0  ;;  %v20802_v35 = vld [vmem:[#allocation2 + $0x18] sm:$0xff]  }
 0x333   : > { %v6043_v23 = vshrl.u32 %v18080_v41, 16  ;;  %v6046_v55 = vshll.u32 %v18080_v41, 16  ;;  %v6086_v24 = vshrl.u32 %v18085_v17, 16  ;;  %v6089_v43 = vshll.u32 %v18085_v17, 16  ;;  %v19026_v57 = vpop.f32.mrb[12].mxu0  ;;  %v20801_v19 = vld [vmem:[#allocation2 + $0xc] sm:$0xff]  }
 0x334   : > { %v6069_v44 = vshrl.u32 %v18083_v28, 16  ;;  %v6072_v50 = vshll.u32 %v18083_v28, 16  ;;  %v6062_v27 = vrot.slane %v6060_v39, 7  ;;  %v5824_v51 = vmax.f32 %v5792_v12, 0.0  ;;  %v5665_v46 = vpop.f32.mrb[13].mxu0  ;;  %19421 = vmatmul.mubr.bf16.vlgmr.msra.gmra.mrb[16].mxu1 %v20801_v19 }
 0x335   : > { %v6045_v11 = vrot.slane %v6043_v23, 7  ;;  %v25080_v52 = vrot.slane %v6086_v24, 7  ;;  %v5797_v49 = vadd.f32 %v19026_v57, %v24991_v2  ;;  %v5795_v40 = vadd.f32 %v24991_v2, %v5665_v46  ;;  %v19027_v42 = vpop.f32.mrb[14].mxu0  ;;  %19453 = vmatpush3.bf16.msra.mxu1 %v24906_v13  ;;  %19424 = vmatprep.mubr.bf16.mxu1 %v20802_v35 }
 0x336   : > { %v25082_v4 = vrot.slane %v6069_v44, 7  ;;  %v6065_v26 = vor.u32 %v6063_v10, %v6062_v27  ;;  %v6067_v59 = vrot.slane %v6062_v27, 4  ;;  %v5668_v33 = vpop.f32.mrb[15].mxu0  ;;  %19454 = vmatprep.subr.bf16.mxu1 %v20803_v32  ;;  %v18084_v58 = vpack.c.bf16 %v5824_v51, %v5824_v51 }
 0x337   : > { %v6048_v62 = vor.u32 %v6046_v55, %v6045_v11  ;;  %v6050_v61 = vrot.slane %v6045_v11, 4  ;;  %v6091_v45 = vor.u32 %v6089_v43, %v25080_v52  ;;  %v6092_v0 = vrot.slane %v25080_v52, 4  ;;  %v6358_v11 = vld [vmem:[#allocation2 + $0x44] sm:$0x1] }
 0x338   : > { %v6074_v29 = vor.u32 %v6072_v50, %v25082_v4  ;;  %v6075_v20 = vrot.slane %v25082_v4, 4  ;;  %v6066_v9 = vsel %vm25029_vm13, %v6058_v8, %v6065_v26  ;;  %v6352_v13 = vsel %vm25035_vm14, %v6067_v59, %v6351_v36  ;;  %v20813_v36 = vld [vmem:[%s27210_s3 + $0x58] sm:$0xff]  }
 0x339   : > { %v6049_v37 = vsel %vm25029_vm13, %v6041_v5, %v6048_v62  ;;  %v6345_v31 = vsel %vm25035_vm14, %v6050_v61, %v6344_v22  ;;  %6350 = vst [vmem:[#allocation2 + $0x34] sm:$0xf] %v6066_v9  ;;  %6353 = vst [vmem:[#allocation2 + $0x38] sm:$0x1] %v6352_v13  ;;  %v6362_v38 = vsel %vm25022_vm12, %v6091_v45, %v6361_v3  ;;  %v5829_v7 = vmax.f32 %v5797_v49, 0.0 }
 0x33a   : > { %6343 = vst [vmem:[#allocation2 + $0x28] sm:$0xf] %v6049_v37  ;;  %6346 = vst [vmem:[#allocation2 + $0x2c] sm:$0x1] %v6345_v31  ;;  %v6355_v41 = vsel %vm25022_vm12, %v6074_v29, %v6354_v16  ;;  %v18086_v8 = vpack.c.bf16 %v5826_v21, %v5826_v21  ;;  %v5827_v17 = vmax.f32 %v5795_v40, 0.0  ;;  %v5798_v5 = vadd.f32 %v19027_v42, %v24991_v2 }
 0x33b   : > { %6363 = vst [vmem:[#allocation2 + $0x48] sm:$0xf] %v6362_v38  ;;  %6356 = vst [vmem:[#allocation2 + $0x3c] sm:$0xf] %v6355_v41  ;;  %v5796_v28 = vadd.f32 %v24991_v2, %v5668_v33  ;;  %19455 = vmatpush3.bf16.msra.mxu1 %v20803_v32  ;;  %v6077_v10 = vshrl.u32 %v18084_v58, 16  ;;  %v6080_v23 = vshll.u32 %v18084_v58, 16  ;;  %v18089_v24 = vpack.c.bf16 %v5829_v7, %v5829_v7 }
 0x33c   : > { %v6094_v12 = vshrl.u32 %v18086_v8, 16  ;;  %v6097_v39 = vshll.u32 %v18086_v8, 16  ;;  %v19030_v55 = vpop.f32.mrb[16].mxu0  ;;  %19456 = vmatprep.subr.bf16.mxu1 %v20808_v1  ;;  %v6365_v22 = vld [vmem:[#allocation2 + $0x50] sm:$0x1]  ;;  %v18087_v43 = vpack.c.bf16 %v5827_v17, %v5827_v17  ;;  %v5830_v44 = vmax.f32 %v5798_v5, 0.0 }
 0x33d   : > { %v5828_v50 = vmax.f32 %v5796_v28, 0.0  ;;  %v5681_v57 = vpop.f32.mrb[17].mxu0  ;;  %v6079_v27 = vrot.slane %v6077_v10, 7  ;;  %v5801_v32 = vadd.f32 %v19030_v55, %v24991_v2  ;;  %v6120_v51 = vshrl.u32 %v18089_v24, 16  ;;  %v6375_v61 = vld [vmem:[#allocation2 + $0x60] sm:$0xf] }
 0x33e   : > { %v6096_v19 = vrot.slane %v6094_v12, 7  ;;  %v5799_v3 = vadd.f32 %v24991_v2, %v5681_v57  ;;  %v19031_v21 = vpop.f32.mrb[18].mxu0  ;;  %v6123_v46 = vshll.u32 %v18089_v24, 16  ;;  %v6103_v35 = vshrl.u32 %v18087_v43, 16  ;;  %v6368_v16 = vld [vmem:[#allocation2 + $0x54] sm:$0xf] }
 0x33f   : > { %v6106_v49 = vshll.u32 %v18087_v43, 16  ;;  %v5684_v40 = vpop.f32.mrb[19].mxu0  ;;  %19457 = vmatpush3.bf16.msra.mxu1 %v20808_v1  ;;  %v6082_v59 = vor.u32 %v6080_v23, %v6079_v27  ;;  %v6084_v62 = vrot.slane %v6079_v27, 4  ;;  %v20818_v33 = vld [vmem:[%s27210_s3 + $0x60] sm:$0xff]   ;;  %v6122_v45 = vrot.slane %v6120_v51, 7 }
 0x340   : > { %v6099_v42 = vor.u32 %v6097_v39, %v6096_v19  ;;  %v6101_v26 = vrot.slane %v6096_v19, 4  ;;  %19458 = vmatprep.subr.bf16.mxu1 %v20813_v36  ;;  %v6105_v29 = vrot.slane %v6103_v35, 7  ;;  %v18090_v9 = vpack.c.bf16 %v5830_v44, %v5830_v44  ;;  %v20805_v31 = vld [vmem:[#allocation2 + $0x30] sm:$0xff]   ;;  %v6379_v57 = vld [vmem:[#allocation2 + $0x68] sm:$0x1] }
 0x341   : > { %v18088_v13 = vpack.c.bf16 %v5828_v50, %v5828_v50  ;;  %v20804_v37 = vld [vmem:[#allocation2 + $0x24] sm:$0xff]   ;;  %v6083_v41 = vsel %vm25029_vm13, %v6075_v20, %v6082_v59  ;;  %v6359_v8 = vsel %vm25035_vm14, %v6084_v62, %v6358_v11  ;;  %v6125_v58 = vor.u32 %v6123_v46, %v6122_v45  ;;  %v6372_v19 = vld [vmem:[#allocation2 + $0x5c] sm:$0x1] }
 0x342   : > { %v6100_v1 = vsel %vm25029_vm13, %v6092_v0, %v6099_v42  ;;  %v6366_v38 = vsel %vm25035_vm14, %v6101_v26, %v6365_v22  ;;  %6357 = vst [vmem:[#allocation2 + $0x40] sm:$0xf] %v6083_v41  ;;  %6360 = vst [vmem:[#allocation2 + $0x44] sm:$0x1] %v6359_v8  ;;  %v6126_v52 = vrot.slane %v6122_v45, 4  ;;  %v6108_v7 = vor.u32 %v6106_v49, %v6105_v29  ;;  %v20823_v22 = vld [vmem:[%s27210_s3 + $0x68] sm:$0xff]  }
 0x343   : > { %6364 = vst [vmem:[#allocation2 + $0x4c] sm:$0xf] %v6100_v1  ;;  %6367 = vst [vmem:[#allocation2 + $0x50] sm:$0x1] %v6366_v38  ;;  %v6109_v17 = vrot.slane %v6105_v29, 4  ;;  %19425 = vmatmul.mubr.bf16.gmra.mrb[20].mxu1 %v20804_v37  ;;  %v6128_v0 = vshrl.u32 %v18090_v9, 16  ;;  %v6376_v20 = vsel %vm25022_vm12, %v6125_v58, %v6375_v61  ;;  %v5800_v44 = vadd.f32 %v24991_v2, %v5684_v40 }
 0x344   : > { %v6131_v5 = vshll.u32 %v18090_v9, 16  ;;  %v6111_v28 = vshrl.u32 %v18088_v13, 16  ;;  %v6114_v12 = vshll.u32 %v18088_v13, 16  ;;  %19428 = vmatprep.mubr.bf16.mxu1 %v20805_v31  ;;  %v19034_v4 = vpop.f32.mrb[20].mxu0  ;;  %19459 = vmatpush3.bf16.msra.mxu1 %v20813_v36  ;;  %v6369_v39 = vsel %vm25022_vm12, %v6108_v7, %v6368_v16  ;;  %6377 = vst [vmem:[#allocation2 + $0x60] sm:$0xf] %v6376_v20 }
 0x345   : > { %v5833_v10 = vmax.f32 %v5801_v32, 0.0  ;;  %v5831_v23 = vmax.f32 %v5799_v3, 0.0  ;;  %v5697_v55 = vpop.f32.mrb[21].mxu0  ;;  %19460 = vmatprep.subr.bf16.mxu1 %v20818_v33  ;;  %6370 = vst [vmem:[#allocation2 + $0x54] sm:$0xf] %v6369_v39  ;;  %v6130_v24 = vrot.slane %v6128_v0, 7  ;;  %v5802_v36 = vadd.f32 %v19031_v21, %v24991_v2 }
 0x346   : > { %v6113_v43 = vrot.slane %v6111_v28, 7  ;;  %v19035_v50 = vpop.f32.mrb[22].mxu0  ;;  %v5805_v32 = vadd.f32 %v19034_v4, %v24991_v2  ;;  %v5803_v3 = vadd.f32 %v24991_v2, %v5697_v55  ;;  %v20828_v40 = vld [vmem:[%s27210_s3 + $0x70] sm:$0xff]   ;;  %v6389_v29 = vld [vmem:[#allocation2 + $0x78] sm:$0xf]  ;;  %v5832_v1 = vmax.f32 %v5800_v44, 0.0 }
 0x347   : > { %v18093_v27 = vpack.c.bf16 %v5833_v10, %v5833_v10  ;;  %v18091_v11 = vpack.c.bf16 %v5831_v23, %v5831_v23  ;;  %v5700_v51 = vpop.f32.mrb[23].mxu0  ;;  %v6133_v46 = vor.u32 %v6131_v5, %v6130_v24  ;;  %v6135_v35 = vrot.slane %v6130_v24, 4  ;;  %v6382_v41 = vld [vmem:[#allocation2 + $0x6c] sm:$0xf]  ;;  %v20833_v24 = vld [vmem:[%s27210_s3 + $0x78] sm:$0xff]  }
 0x348   : > { %v6116_v49 = vor.u32 %v6114_v12, %v6113_v43  ;;  %v6118_v42 = vrot.slane %v6113_v43, 4  ;;  %19461 = vmatpush3.bf16.msra.mxu1 %v20818_v33  ;;  %v5834_v31 = vmax.f32 %v5802_v36, 0.0  ;;  %v5837_v8 = vmax.f32 %v5805_v32, 0.0  ;;  %v6393_v32 = vld [vmem:[#allocation2 + $0x80] sm:$0x1] }
 0x349   : > { %v6154_v26 = vshrl.u32 %v18093_v27, 16  ;;  %v6157_v59 = vshll.u32 %v18093_v27, 16  ;;  %v6137_v21 = vshrl.u32 %v18091_v11, 16  ;;  %v6140_v62 = vshll.u32 %v18091_v11, 16  ;;  %19462 = vmatprep.subr.bf16.mxu1 %v20823_v22  ;;  %v20809_v9 = vld [vmem:[#allocation2 + $0x3c] sm:$0xff]  }
 0x34a   : > { %v6134_v61 = vsel %vm25029_vm13, %v6126_v52, %v6133_v46  ;;  %v6380_v16 = vsel %vm25035_vm14, %v6135_v35, %v6379_v57  ;;  %v6117_v45 = vsel %vm25029_vm13, %v6109_v17, %v6116_v49  ;;  %v6373_v33 = vsel %vm25035_vm14, %v6118_v42, %v6372_v19  ;;  %v20810_v38 = vld [vmem:[#allocation2 + $0x48] sm:$0xff]  }
 0x34b   : > { %6378 = vst [vmem:[#allocation2 + $0x64] sm:$0xf] %v6134_v61  ;;  %6381 = vst [vmem:[#allocation2 + $0x68] sm:$0x1] %v6380_v16  ;;  %v25150_v13 = vrot.slane %v6154_v26, 7  ;;  %v25152_v37 = vrot.slane %v6137_v21, 7  ;;  %v5806_v52 = vadd.f32 %v19035_v50, %v24991_v2  ;;  %v5804_v7 = vadd.f32 %v24991_v2, %v5700_v51  ;;  %19429 = vmatmul.mubr.bf16.gmra.mrb[24].mxu1 %v20809_v9 }
 0x34c   : > { %6371 = vst [vmem:[#allocation2 + $0x58] sm:$0xf] %v6117_v45  ;;  %6374 = vst [vmem:[#allocation2 + $0x5c] sm:$0x1] %v6373_v33  ;;  %v5835_v58 = vmax.f32 %v5803_v3, 0.0  ;;  %v19038_v17 = vpop.f32.mrb[24].mxu0  ;;  %19432 = vmatprep.mubr.bf16.mxu1 %v20810_v38  ;;  %19463 = vmatpush3.bf16.msra.mxu1 %v20823_v22  ;;  %v18094_v20 = vpack.c.bf16 %v5834_v31, %v5834_v31  ;;  %v18092_v39 = vpack.c.bf16 %v5832_v1, %v5832_v1 }
 0x34d   : > { %v6159_v0 = vor.u32 %v6157_v59, %v25150_v13  ;;  %v6160_v5 = vrot.slane %v25150_v13, 4  ;;  %v6142_v28 = vor.u32 %v6140_v62, %v25152_v37  ;;  %v6143_v12 = vrot.slane %v25152_v37, 4  ;;  %v5713_v4 = vpop.f32.mrb[25].mxu0  ;;  %19464 = vmatprep.subr.bf16.mxu1 %v20828_v40  ;;  %v6386_v3 = vld [vmem:[#allocation2 + $0x74] sm:$0x1]  ;;  %v25174_v16 = vld [vmem:[%s27210_s3 + $0x80] sm:$0xff]  }
 0x34e   : > { %v18097_v10 = vpack.c.bf16 %v5837_v8, %v5837_v8  ;;  %v18095_v23 = vpack.c.bf16 %v5835_v58, %v5835_v58  ;;  %v25160_v55 = vpop.f32.mrb[26].mxu0  ;;  %v5838_v44 = vmax.f32 %v5806_v52, 0.0  ;;  %v5836_v50 = vmax.f32 %v5804_v7, 0.0  ;;  %v6403_v59 = vld [vmem:[#allocation2 + $0x90] sm:$0xf] }
 0x34f   : > { %v6390_v43 = vsel %vm25022_vm12, %v6159_v0, %v6389_v29  ;;  %v6383_v36 = vsel %vm25022_vm12, %v6142_v28, %v6382_v41  ;;  %v25169_v22 = vpop.f32.mrb[27].mxu0  ;;  %v6162_v57 = vshrl.u32 %v18094_v20, 16  ;;  %v6165_v19 = vshll.u32 %v18094_v20, 16  ;;  %v6396_v38 = vld [vmem:[#allocation2 + $0x84] sm:$0xf] }
 0x350   : > { %6391 = vst [vmem:[#allocation2 + $0x78] sm:$0xf] %v6390_v43  ;;  %6384 = vst [vmem:[#allocation2 + $0x6c] sm:$0xf] %v6383_v36  ;;  %v6145_v27 = vshrl.u32 %v18092_v39, 16  ;;  %v6148_v11 = vshll.u32 %v18092_v39, 16  ;;  %19465 = vmatpush3.bf16.msra.mxu1 %v20828_v40  ;;  %v18098_v21 = vpack.c.bf16 %v5838_v44, %v5838_v44  ;;  %v18096_v62 = vpack.c.bf16 %v5836_v50, %v5836_v50 }
 0x351   : > { %v6188_v51 = vshrl.u32 %v18097_v10, 16  ;;  %v6191_v46 = vshll.u32 %v18097_v10, 16  ;;  %v6171_v35 = vshrl.u32 %v18095_v23, 16  ;;  %v6174_v49 = vshll.u32 %v18095_v23, 16  ;;  %19466 = vmatprep.subr.bf16.mxu1 %v20833_v24 }
 0x352   : > { %v6164_v42 = vrot.slane %v6162_v57, 7  ;;  %v6147_v26 = vrot.slane %v6145_v27, 7  ;;  %v5809_v29 = vadd.f32 %v19038_v17, %v24991_v2  ;;  %v5807_v9 = vadd.f32 %v24991_v2, %v5713_v4  ;;  %v20815_v40 = vld [vmem:[#allocation2 + $0x60] sm:$0xff]  }
 0x353   : > { %v20814_v61 = vld [vmem:[#allocation2 + $0x54] sm:$0xff]   ;;  %v6190_v45 = vrot.slane %v6188_v51, 7  ;;  %v25176_v33 = vrot.slane %v6171_v35, 7  ;;  %v19042_v41 = vpop.f32.mrb[28].mxu0  ;;  %v6196_v23 = vshrl.u32 %v18098_v21, 16  ;;  %v6179_v43 = vshrl.u32 %v18096_v62, 16 }
 0x354   : > { %v6167_v13 = vor.u32 %v6165_v19, %v6164_v42  ;;  %v6169_v37 = vrot.slane %v6164_v42, 4  ;;  %v6150_v31 = vor.u32 %v6148_v11, %v6147_v26  ;;  %v6152_v1 = vrot.slane %v6147_v26, 4  ;;  %19433 = vmatmul.mubr.bf16.gmra.mrb[28].mxu1 %v20814_v61  ;;  %v5729_v0 = vpop.f32.mrb[29].mxu0  ;;  %v6400_v26 = vld [vmem:[#allocation2 + $0x8c] sm:$0x1] }
 0x355   : > { %v6193_v8 = vor.u32 %v6191_v46, %v6190_v45  ;;  %v6194_v58 = vrot.slane %v6190_v45, 4  ;;  %v6176_v52 = vor.u32 %v6174_v49, %v25176_v33  ;;  %v6177_v7 = vrot.slane %v25176_v33, 4  ;;  %19436 = vmatprep.mubr.bf16.mxu1 %v20815_v40  ;;  %19467 = vmatpush3.bf16.msra.mxu1 %v20833_v24  ;;  %v25190_v39 = vpop.f32.mrb[30].mxu0 }
 0x356   : > { %v6168_v17 = vsel %vm25029_vm13, %v6160_v5, %v6167_v13  ;;  %v6394_v28 = vsel %vm25035_vm14, %v6169_v37, %v6393_v32  ;;  %v6151_v4 = vsel %vm25029_vm13, %v6143_v12, %v6150_v31  ;;  %v6387_v20 = vsel %vm25035_vm14, %v6152_v1, %v6386_v3  ;;  %19500 = vmatprep.subr.bf16.mxu1 %v25174_v16  ;;  %v25197_v12 = vpop.f32.mrb[31].mxu0  ;;  %v6407_v32 = vld [vmem:[#allocation2 + $0x98] sm:$0x1]  ;;  %v6410_v1 = vld [vmem:[#allocation2 + $0x9c] sm:$0xf] }
 0x357   : > { %6392 = vst [vmem:[#allocation2 + $0x7c] sm:$0xf] %v6168_v17  ;;  %6395 = vst [vmem:[#allocation2 + $0x80] sm:$0x1] %v6394_v28  ;;  %v6404_v5 = vsel %vm25022_vm12, %v6193_v8, %v6403_v59  ;;  %v6397_v10 = vsel %vm25022_vm12, %v6176_v52, %v6396_v38  ;;  %v6199_v24 = vshll.u32 %v18098_v21, 16  ;;  %v6182_v36 = vshll.u32 %v18096_v62, 16 }
 0x358   : > { %6385 = vst [vmem:[#allocation2 + $0x70] sm:$0xf] %v6151_v4  ;;  %6388 = vst [vmem:[#allocation2 + $0x74] sm:$0x1] %v6387_v20  ;;  %v5841_v44 = vmax.f32 %v5809_v29, 0.0  ;;  %v5839_v50 = vmax.f32 %v5807_v9, 0.0  ;;  %v5810_v19 = vadd.f32 %v25160_v55, %v24991_v2  ;;  %v5808_v27 = vadd.f32 %v24991_v2, %v25169_v22 }
 0x359   : > { %6405 = vst [vmem:[#allocation2 + $0x90] sm:$0xf] %v6404_v5  ;;  %6398 = vst [vmem:[#allocation2 + $0x84] sm:$0xf] %v6397_v10  ;;  %v6198_v57 = vrot.slane %v6196_v23, 7  ;;  %v5813_v11 = vadd.f32 %v19042_v41, %v24991_v2  ;;  %v6181_v3 = vrot.slane %v6179_v43, 7  ;;  %v5811_v35 = vadd.f32 %v24991_v2, %v5729_v0 }
 0x35a   : > { %v18101_v51 = vpack.c.bf16 %v5841_v44, %v5841_v44  ;;  %v18099_v46 = vpack.c.bf16 %v5839_v50, %v5839_v50  ;;  %v5842_v59 = vmax.f32 %v5810_v19, 0.0  ;;  %v5840_v21 = vmax.f32 %v5808_v27, 0.0  ;;  %v6417_v29 = vld [vmem:[#allocation2 + $0xa8] sm:$0xf]  ;;  %v6421_v19 = vld [vmem:[#allocation2 + $0xb0] sm:$0x1] }
 0x35b   : > { %v6201_v49 = vor.u32 %v6199_v24, %v6198_v57  ;;  %v6203_v42 = vrot.slane %v6198_v57, 4  ;;  %v6184_v62 = vor.u32 %v6182_v36, %v6181_v3  ;;  %v6186_v61 = vrot.slane %v6181_v3, 4 }
 0x35c   : > { %v6222_v45 = vshrl.u32 %v18101_v51, 16  ;;  %v6225_v55 = vshll.u32 %v18101_v51, 16  ;;  %v6205_v9 = vshrl.u32 %v18099_v46, 16  ;;  %v6208_v40 = vshll.u32 %v18099_v46, 16 }
 0x35d   : > { %v6202_v22 = vsel %vm25029_vm13, %v6194_v58, %v6201_v49  ;;  %v6408_v33 = vsel %vm25035_vm14, %v6203_v42, %v6407_v32  ;;  %v6185_v13 = vsel %vm25029_vm13, %v6177_v7, %v6184_v62  ;;  %v6401_v37 = vsel %vm25035_vm14, %v6186_v61, %v6400_v26  ;;  %v11749_v42 = vld [vmem:[#allocation2 + $0xc] sm:$0xf] }
 0x35e   : > { %6406 = vst [vmem:[#allocation2 + $0x94] sm:$0xf] %v6202_v22  ;;  %6409 = vst [vmem:[#allocation2 + $0x98] sm:$0x1] %v6408_v33  ;;  %v6224_v31 = vrot.slane %v6222_v45, 7  ;;  %v18102_v38 = vpack.c.bf16 %v5842_v59, %v5842_v59  ;;  %v6207_v8 = vrot.slane %v6205_v9, 7  ;;  %v18100_v58 = vpack.c.bf16 %v5840_v21, %v5840_v21 }
 0x35f   : > { %v20819_v41 = vld [vmem:[#allocation2 + $0x6c] sm:$0xff]   ;;  %6399 = vst [vmem:[#allocation2 + $0x88] sm:$0xf] %v6185_v13  ;;  %6402 = vst [vmem:[#allocation2 + $0x8c] sm:$0x1] %v6401_v37  ;;  %v5845_v52 = vmax.f32 %v5813_v11, 0.0  ;;  %v5814_v32 = vadd.f32 %v25190_v39, %v24991_v2  ;;  %v5812_v3 = vadd.f32 %v24991_v2, %v25197_v12 }
 0x360   : > { %v5843_v0 = vmax.f32 %v5811_v35, 0.0  ;;  %v20820_v17 = vld [vmem:[#allocation2 + $0x78] sm:$0xff]   ;;  %v6227_v28 = vor.u32 %v6225_v55, %v6224_v31  ;;  %v6228_v4 = vrot.slane %v6224_v31, 4  ;;  %v6230_v20 = vshrl.u32 %v18102_v38, 16  ;;  %19437 = vmatmul.mubr.bf16.gmra.mrb[0].mxu1 %v20819_v41  ;;  %v6414_v11 = vld [vmem:[#allocation2 + $0xa4] sm:$0x1] }
 0x361   : > { %v6233_v5 = vshll.u32 %v18102_v38, 16  ;;  %v6210_v7 = vor.u32 %v6208_v40, %v6207_v8  ;;  %v6211_v10 = vrot.slane %v6207_v8, 4  ;;  %v6213_v23 = vshrl.u32 %v18100_v58, 16  ;;  %19440 = vmatprep.mubr.bf16.mxu1 %v20820_v17  ;;  %v6431_v33 = vld [vmem:[#allocation2 + $0xc0] sm:$0xf] }
 0x362   : > { %v6216_v24 = vshll.u32 %v18100_v58, 16  ;;  %v6418_v43 = vsel %vm25022_vm12, %v6227_v28, %v6417_v29  ;;  %v6232_v36 = vrot.slane %v6230_v20, 7  ;;  %v18105_v44 = vpack.c.bf16 %v5845_v52, %v5845_v52  ;;  %v6424_v31 = vld [vmem:[#allocation2 + $0xb4] sm:$0xf]  ;;  %v11752_v41 = vld [vmem:[#allocation2 + $0x18] sm:$0xf] }
 0x363   : > { %v18103_v50 = vpack.c.bf16 %v5843_v0, %v5843_v0  ;;  %6419 = vst [vmem:[#allocation2 + $0xa8] sm:$0xf] %v6418_v43  ;;  %v6411_v57 = vsel %vm25022_vm12, %v6210_v7, %v6410_v1  ;;  %v6215_v27 = vrot.slane %v6213_v23, 7  ;;  %v5846_v55 = vmax.f32 %v5814_v32, 0.0  ;;  %v11750_v0 = vld [vmem:[#allocation2 + $0x10] sm:$0xf] }
 0x364   : > { %6412 = vst [vmem:[#allocation2 + $0x9c] sm:$0xf] %v6411_v57  ;;  %v6235_v51 = vor.u32 %v6233_v5, %v6232_v36  ;;  %v6237_v46 = vrot.slane %v6232_v36, 4  ;;  %v6256_v35 = vshrl.u32 %v18105_v44, 16  ;;  %v6259_v49 = vshll.u32 %v18105_v44, 16 }
 0x365   : > { %v6218_v26 = vor.u32 %v6216_v24, %v6215_v27  ;;  %v6220_v59 = vrot.slane %v6215_v27, 4  ;;  %v6239_v21 = vshrl.u32 %v18103_v50, 16  ;;  %v6242_v62 = vshll.u32 %v18103_v50, 16  ;;  %v20825_v40 = vld [vmem:[#allocation2 + $0x90] sm:$0xff]   ;;  %v6435_v23 = vld [vmem:[#allocation2 + $0xc8] sm:$0x1] }
 0x366   : > { %v6236_v61 = vsel %vm25029_vm13, %v6228_v4, %v6235_v51  ;;  %v6422_v45 = vsel %vm25035_vm14, %v6237_v46, %v6421_v19  ;;  %v6258_v39 = vrot.slane %v6256_v35, 7  ;;  %v20824_v22 = vld [vmem:[#allocation2 + $0x84] sm:$0xff]   ;;  %v5844_v9 = vmax.f32 %v5812_v3, 0.0  ;;  %v11751_v17 = vld [vmem:[#allocation2 + $0x14] sm:$0x1] }
 0x367   : > { %6420 = vst [vmem:[#allocation2 + $0xac] sm:$0xf] %v6236_v61  ;;  %6423 = vst [vmem:[#allocation2 + $0xb0] sm:$0x1] %v6422_v45  ;;  %v6219_v2 = vsel %vm25029_vm13, %v6211_v10, %v6218_v26  ;;  %v6415_v12 = vsel %vm25035_vm14, %v6220_v59, %v6414_v11  ;;  %v6241_v29 = vrot.slane %v6239_v21, 7  ;;  %v18106_v1 = vpack.c.bf16 %v5846_v55, %v5846_v55 }
 0x368   : > { %6413 = vst [vmem:[#allocation2 + $0xa0] sm:$0xf] %v6219_v2  ;;  %6416 = vst [vmem:[#allocation2 + $0xa4] sm:$0x1] %v6415_v12  ;;  %v6261_v13 = vor.u32 %v6259_v49, %v6258_v39  ;;  %v6262_v37 = vrot.slane %v6258_v39, 4  ;;  %19441 = vmatmul.mubr.bf16.gmra.mrb[4].mxu1 %v20824_v22  ;;  %v11819_v38 = vshrl.u32 %v11749_v42, 16  ;;  %v18104_v52 = vpack.c.bf16 %v5844_v9, %v5844_v9 }
 0x369   : > { %v6244_v8 = vor.u32 %v6242_v62, %v6241_v29  ;;  %v6245_v58 = vrot.slane %v6241_v29, 4  ;;  %19444 = vmatprep.mubr.bf16.mxu1 %v20825_v40  ;;  %v11822_v28 = vshll.u32 %v11749_v42, 16  ;;  %v6264_v20 = vshrl.u32 %v18106_v1, 16  ;;  %v6428_v50 = vld [vmem:[#allocation2 + $0xbc] sm:$0x1] }
 0x36a   : > { %v6432_v4 = vsel %vm25022_vm12, %v6261_v13, %v6431_v33  ;;  %v6267_v5 = vshll.u32 %v18106_v1, 16  ;;  %v11821_v7 = vrot.slane %v11819_v38, 4  ;;  %v6247_v24 = vshrl.u32 %v18104_v52, 16  ;;  %v11753_v3 = vld [vmem:[#allocation2 + $0x1c] sm:$0xf] }
 0x36b   : > { %6433 = vst [vmem:[#allocation2 + $0xc0] sm:$0xf] %v6432_v4  ;;  %v6425_v10 = vsel %vm25022_vm12, %v6244_v8, %v6424_v31  ;;  %v6250_v43 = vshll.u32 %v18104_v52, 16  ;;  %v11824_v36 = vrot.slane %v11822_v28, 5  ;;  %v6266_v44 = vrot.slane %v6264_v20, 7 }
 0x36c   : > { %6426 = vst [vmem:[#allocation2 + $0xb4] sm:$0xf] %v6425_v10  ;;  %v11828_v57 = vshll.u32 %v11750_v0, 16  ;;  %v11832_v19 = vshrl.u32 %v11750_v0, 16  ;;  %v11838_v27 = vshll.u32 %v11751_v17, 16  ;;  %v6249_v11 = vrot.slane %v6247_v24, 7 }
 0x36d   : > { %v11825_v32 = vor.u32 %v11824_v36, %v11821_v7  ;;  %v11754_v51 = vld [vmem:[#allocation2 + $0x20] sm:$0x1]  ;;  %v11843_v46 = vshrl.u32 %v11752_v41, 16  ;;  %v11846_v35 = vshll.u32 %v11752_v41, 16  ;;  %v6269_v49 = vor.u32 %v6267_v5, %v6266_v44  ;;  %v11755_v33 = vld [vmem:[#allocation2 + $0x24] sm:$0xf] }
 0x36e   : > { %v6271_v42 = vrot.slane %v6266_v44, 4  ;;  %v11830_v63 = vrot.slane %v11828_v57, 5  ;;  %v11834_v26 = vrot.slane %v11832_v19, 4  ;;  %v6252_v59 = vor.u32 %v6250_v43, %v6249_v11  ;;  %v20830_v22 = vld [vmem:[#allocation2 + $0xa8] sm:$0xff]   ;;  %v11758_v5 = vld [vmem:[#allocation2 + $0x30] sm:$0xf] }
 0x36f   : > { %v6254_v21 = vrot.slane %v6249_v11, 4  ;;  %v20829_v62 = vld [vmem:[#allocation2 + $0x9c] sm:$0xff]   ;;  %v11826_v61 = vrot.slane %v11825_v32, 4  ;;  %v11840_v45 = vrot.slane %v11838_v27, 5  ;;  %v6270_v39 = vsel %vm25029_vm13, %v6262_v37, %v6269_v49  ;;  %v11756_v29 = vld [vmem:[#allocation2 + $0x28] sm:$0xf] }
 0x370   : > { %v6436_v55 = vsel %vm25035_vm14, %v6271_v42, %v6435_v23  ;;  %v11835_v2 = vor.u32 %v11834_v26, %v11830_v63  ;;  %v11845_v12 = vrot.slane %v11843_v46, 4  ;;  %6434 = vst [vmem:[#allocation2 + $0xc4] sm:$0xf] %v6270_v39  ;;  %v6253_v9 = vsel %vm25029_vm13, %v6245_v58, %v6252_v59  ;;  %19445 = vmatmul.mubr.bf16.gmra.mrb[8].mxu1 %v20829_v62  ;;  %v11757_v8 = vld [vmem:[#allocation2 + $0x2c] sm:$0x1] }
 0x371   : > { %6437 = vst [vmem:[#allocation2 + $0xc8] sm:$0x1] %v6436_v55  ;;  %v6429_v40 = vsel %vm25035_vm14, %v6254_v21, %v6428_v50  ;;  %v11831_v13 = vsel %vm21362_vm2, %v11826_v61, %v11830_v63  ;;  %v11848_v37 = vrot.slane %v11846_v35, 5  ;;  %6427 = vst [vmem:[#allocation2 + $0xb8] sm:$0xf] %v6253_v9  ;;  %19448 = vmatprep.mubr.bf16.mxu1 %v20830_v22  ;;  %v11852_v1 = vshll.u32 %v11753_v3, 16 }
 0x372   : > { %6430 = vst [vmem:[#allocation2 + $0xbc] sm:$0x1] %v6429_v40  ;;  %v11836_v31 = vrot.slane %v11835_v2, 4  ;;  %v11856_v38 = vshrl.u32 %v11753_v3, 16  ;;  %v11862_v41 = vshll.u32 %v11754_v51, 16  ;;  %v11867_v0 = vshrl.u32 %v11755_v33, 16 }
 0x373   : > { %v11849_v52 = vor.u32 %v11848_v37, %v11845_v12  ;;  %v11870_v14 = vshll.u32 %v11755_v33, 16  ;;  %v11876_v58 = vshll.u32 %v11756_v29, 16  ;;  %v11854_v28 = vrot.slane %v11852_v1, 5  ;;  %v11759_v43 = vld [vmem:[#allocation2 + $0x34] sm:$0xf] }
 0x374   : > { %v11841_v17 = vsel %vm21362_vm2, %v11836_v31, %v11840_v45  ;;  %v11858_v4 = vrot.slane %v11856_v38, 4  ;;  %v11864_v20 = vrot.slane %v11862_v41, 5  ;;  %v11869_v23 = vrot.slane %v11867_v0, 4  ;;  %v11760_v11 = vld [vmem:[#allocation2 + $0x38] sm:$0x1] }
 0x375   : > { %v25250_v7 = vcombine.low %v11831_v13, %v11841_v17  ;;  %v11850_v10 = vrot.slane %v11849_v52, 4  ;;  %v11872_v24 = vrot.slane %v11870_v14, 5  ;;  %v11878_v44 = vrot.slane %v11876_v58, 5  ;;  %v11761_v42 = vld [vmem:[#allocation2 + $0x3c] sm:$0xf] }
 0x376   : > { %v11859_v36 = vor.u32 %v11858_v4, %v11854_v28  ;;  %v11880_v50 = vshrl.u32 %v11756_v29, 16  ;;  %v11886_v57 = vshll.u32 %v11757_v8, 16  ;;  %v11891_v32 = vshrl.u32 %v11758_v5, 16  ;;  %v11762_v22 = vld [vmem:[#allocation2 + $0x40] sm:$0xf] }
 0x377   : > { %v11855_v19 = vsel %vm21362_vm2, %v11850_v10, %v11854_v28  ;;  %v11873_v27 = vor.u32 %v11872_v24, %v11869_v23  ;;  %v11894_v3 = vshll.u32 %v11758_v5, 16  ;;  %v11900_v49 = vshll.u32 %v11759_v43, 16  ;;  %v11763_v40 = vld [vmem:[#allocation2 + $0x44] sm:$0x1]  ;;  %v11765_v8 = vld [vmem:[#allocation2 + $0x4c] sm:$0xf] }
 0x378   : > { %v11860_v51 = vrot.slane %v11859_v36, 4  ;;  %v11882_v46 = vrot.slane %v11880_v50, 4  ;;  %v11888_v35 = vrot.slane %v11886_v57, 5  ;;  %v20834_v63 = vld [vmem:[#allocation2 + $0xb4] sm:$0xff]   ;;  %v11893_v59 = vrot.slane %v11891_v32, 4  ;;  %v20840_v5 = vld [vmem:[%s27210_s3 + $0x88] sm:$0xff]  }
 0x379   : > { %v11874_v26 = vrot.slane %v11873_v27, 4  ;;  %v11896_v21 = vrot.slane %v11894_v3, 5  ;;  %v17094_v62 = vcombine.low %v6894_v34, %v6904_v56  ;;  %v11902_v39 = vrot.slane %v11900_v49, 5  ;;  %19449 = vmatmul.mubr.bf16.gmra.mrb[12].mxu1 %v20834_v63  ;;  %v11764_v56 = vld [vmem:[#allocation2 + $0x48] sm:$0xf] }
 0x37a   : > { %v11865_v61 = vsel %vm21362_vm2, %v11860_v51, %v11864_v20  ;;  %v11883_v45 = vor.u32 %v11882_v46, %v11878_v44  ;;  %v11904_v55 = vshrl.u32 %v11759_v43, 16  ;;  %v11910_v25 = vshll.u32 %v11760_v11, 16  ;;  %19468 = vmatprep.mubr.bf16.mxu1 %v25002_v15  ;;  %v11766_v4 = vld [vmem:[#allocation2 + $0x50] sm:$0x1]  ;;  %v11767_v36 = vld [vmem:[#allocation2 + $0x54] sm:$0xf] }
 0x37b   : > { %v17720_v2 = vcombine.low %v11855_v19, %v11865_v61  ;;  %v11879_v12 = vsel %vm21362_vm2, %v11874_v26, %v11878_v44  ;;  %v11897_v33 = vor.u32 %v11896_v21, %v11893_v59  ;;  %19092 = vmatprep.mubr.msk.bf16.mxu0 %vm930_vm3, %v17094_v62  ;;  %v11915_v54 = vshrl.u32 %v11761_v42, 16  ;;  %v11768_v27 = vld [vmem:[#allocation2 + $0x58] sm:$0xf]  ;;  %v20845_v46 = vld [vmem:[%s27210_s3 + $0x90] sm:$0xff]   ;;  %v11769_v59 = vld [vmem:[#allocation2 + $0x5c] sm:$0x1] }
 0x37c   : > { %v11884_v60 = vrot.slane %v11883_v45, 4  ;;  %v11906_v6 = vrot.slane %v11904_v55, 4  ;;  %v11918_v34 = vshll.u32 %v11761_v42, 16  ;;  %v11912_v9 = vrot.slane %v11910_v25, 5 }
 0x37d   : > { %v11898_v29 = vrot.slane %v11897_v33, 4  ;;  %v11924_v13 = vshll.u32 %v11762_v22, 16  ;;  %v11928_v37 = vshrl.u32 %v11762_v22, 16  ;;  %v11917_v38 = vrot.slane %v11915_v54, 4  ;;  %v11771_v22 = vld [vmem:[#allocation2 + $0x64] sm:$0xf] }
 0x37e   : > { %v11889_v31 = vsel %vm21362_vm2, %v11884_v60, %v11888_v35  ;;  %v11907_v1 = vor.u32 %v11906_v6, %v11902_v39  ;;  %v11920_v41 = vrot.slane %v11918_v34, 5  ;;  %v11934_v28 = vshll.u32 %v11763_v40, 16 }
 0x37f   : > { %v25273_v52 = vcombine.low %v11879_v12, %v11889_v31  ;;  %v11903_v15 = vsel %vm21362_vm2, %v11898_v29, %v11902_v39  ;;  %v11926_v0 = vrot.slane %v11924_v13, 5  ;;  %v11930_v14 = vrot.slane %v11928_v37, 4  ;;  %v20850_v29 = vld [vmem:[%s27210_s3 + $0x98] sm:$0xff]   ;;  %v11772_v13 = vld [vmem:[#allocation2 + $0x68] sm:$0x1] }
 0x380   : > { %v11908_v58 = vrot.slane %v11907_v1, 4  ;;  %v11921_v17 = vor.u32 %v11920_v41, %v11917_v38  ;;  %v11939_v20 = vshrl.u32 %v11764_v56, 16  ;;  %v11942_v23 = vshll.u32 %v11764_v56, 16 }
 0x381   : > { %v11931_v10 = vor.u32 %v11930_v14, %v11926_v0  ;;  %v11948_v24 = vshll.u32 %v11765_v8, 16  ;;  %v11952_v43 = vshrl.u32 %v11765_v8, 16  ;;  %v11936_v57 = vrot.slane %v11934_v28, 5  ;;  %19469 = vmatmul.mubr.bf16.vlgmr.msra.gmra.mrb[16].mxu1 %v25250_v7  ;;  %v6837_v8 = vld [vmem:[%s21327_s8 + $0x10] sm:$0xf] }
 0x382   : > { %v11913_v44 = vsel %vm21362_vm2, %v11908_v58, %v11912_v9  ;;  %v11922_v50 = vrot.slane %v11921_v17, 4  ;;  %v11941_v19 = vrot.slane %v11939_v20, 4  ;;  %v11944_v3 = vrot.slane %v11942_v23, 5  ;;  %19501 = vmatpush3.bf16.msra.mxu1 %v25174_v16  ;;  %19472 = vmatprep.mubr.bf16.mxu1 %v17720_v2  ;;  %v11770_v16 = vld [vmem:[#allocation2 + $0x60] sm:$0xf] }
 0x383   : > { %v17722_v11 = vcombine.low %v11903_v15, %v11913_v44  ;;  %v11932_v32 = vrot.slane %v11931_v10, 4  ;;  %v11950_v51 = vrot.slane %v11948_v24, 5  ;;  %v11954_v49 = vrot.slane %v11952_v43, 4  ;;  %19502 = vmatprep.subr.bf16.mxu1 %v20840_v5  ;;  %v6838_v20 = vld [vmem:[%s21327_s8 + $0x14] sm:$0x1] }
 0x384   : > { %v11927_v35 = vsel %vm21362_vm2, %v11922_v50, %v11926_v0  ;;  %v11958_v42 = vshll.u32 %v11766_v4, 16  ;;  %v11963_v63 = vshrl.u32 %v11767_v36, 16  ;;  %v11945_v26 = vor.u32 %v11944_v3, %v11941_v19  ;;  %v21016_v24 = vld [vmem:[%s21327_s8 + $0xc] sm:$0xf]  ;;  %v11774_v3 = vld [vmem:[#allocation2 + $0x70] sm:$0xf] }
 0x385   : > { %v11937_v7 = vsel %vm21362_vm2, %v11932_v32, %v11936_v57  ;;  %v11966_v21 = vshll.u32 %v11767_v36, 16  ;;  %v11972_v62 = vshll.u32 %v11768_v27, 16  ;;  %v11955_v45 = vor.u32 %v11954_v49, %v11950_v51  ;;  %v20851_v36 = vld [vmem:[%s27210_s3 + $0xa0] sm:$0xff]  }
 0x386   : > { %v25291_v61 = vcombine.low %v11927_v35, %v11937_v7  ;;  %v11960_v39 = vrot.slane %v11958_v42, 5  ;;  %v11965_v55 = vrot.slane %v11963_v63, 4  ;;  %v11946_v2 = vrot.slane %v11945_v26, 4  ;;  %19503 = vmatpush3.bf16.msra.mxu1 %v20840_v5  ;;  %v11775_v42 = vld [vmem:[#allocation2 + $0x74] sm:$0x1] }
 0x387   : > { %v11968_v12 = vrot.slane %v11966_v21, 5  ;;  %v11974_v33 = vrot.slane %v11972_v62, 5  ;;  %v11976_v25 = vshrl.u32 %v11768_v27, 16  ;;  %v11956_v60 = vrot.slane %v11955_v45, 4  ;;  %19504 = vmatprep.subr.bf16.mxu1 %v20845_v46  ;;  %v11773_v27 = vld [vmem:[#allocation2 + $0x6c] sm:$0xf] }
 0x388   : > { %v11982_v6 = vshll.u32 %v11769_v59, 16  ;;  %v11987_v54 = vshrl.u32 %v11770_v16, 16  ;;  %v11990_v34 = vshll.u32 %v11770_v16, 16  ;;  %v11951_v56 = vsel %vm21362_vm2, %v11946_v2, %v11950_v51  ;;  %v11776_v21 = vld [vmem:[#allocation2 + $0x78] sm:$0xf]  ;;  %v20852_v62 = vld [vmem:[%s27210_s3 + $0xa8] sm:$0xff]  }
 0x389   : > { %v11969_v9 = vor.u32 %v11968_v12, %v11965_v55  ;;  %v11978_v40 = vrot.slane %v11976_v25, 4  ;;  %v11996_v37 = vshll.u32 %v11771_v22, 16  ;;  %v11961_v31 = vsel %vm21362_vm2, %v11956_v60, %v11960_v39  ;;  %19473 = vmatmul.mubr.bf16.gmra.mrb[20].mxu1 %v25273_v52  ;;  %v11778_v60 = vld [vmem:[#allocation2 + $0x80] sm:$0x1] }
 0x38a   : > { %v11984_v1 = vrot.slane %v11982_v6, 5  ;;  %v11989_v38 = vrot.slane %v11987_v54, 4  ;;  %v11992_v41 = vrot.slane %v11990_v34, 5  ;;  %v17724_v15 = vcombine.low %v11951_v56, %v11961_v31  ;;  %19476 = vmatprep.mubr.bf16.mxu1 %v17722_v11  ;;  %19505 = vmatpush3.bf16.msra.mxu1 %v20845_v46 }
 0x38b   : > { %v11970_v0 = vrot.slane %v11969_v9, 4  ;;  %v11979_v14 = vor.u32 %v11978_v40, %v11974_v33  ;;  %v11998_v58 = vrot.slane %v11996_v37, 5  ;;  %v12000_v28 = vshrl.u32 %v11771_v22, 16  ;;  %19506 = vmatprep.subr.bf16.mxu1 %v20850_v29  ;;  %v11777_v22 = vld [vmem:[#allocation2 + $0x7c] sm:$0xf] }
 0x38c   : > { %v11993_v17 = vor.u32 %v11992_v41, %v11989_v38  ;;  %v12006_v4 = vshll.u32 %v11772_v13, 16  ;;  %v6908_v5 = vrot.slane %v6906_v18, 4  ;;  %v6909_v52 = vshll.u32 %v21016_v24, 16  ;;  %v20853_v13 = vld [vmem:[%s27210_s3 + $0xb0] sm:$0xff]   ;;  %v6839_v41 = vld [vmem:[%s21327_s8 + $0x18] sm:$0xf] }
 0x38d   : > { %v11975_v10 = vsel %vm21362_vm2, %v11970_v0, %v11974_v33  ;;  %v11980_v23 = vrot.slane %v11979_v14, 4  ;;  %v6915_v43 = vshll.u32 %v6837_v8, 16  ;;  %v12002_v50 = vrot.slane %v12000_v28, 4  ;;  %v20858_v28 = vld [vmem:[%s27212_s5 + $0x48] sm:$0xff]  }
 0x38e   : > { %v11994_v44 = vrot.slane %v11993_v17, 4  ;;  %v12008_v57 = vrot.slane %v12006_v4, 5  ;;  %v6919_v19 = vshrl.u32 %v6837_v8, 16  ;;  %v6911_v18 = vrot.slane %v6909_v52, 5  ;;  %19507 = vmatpush3.bf16.msra.mxu1 %v20850_v29  ;;  %v6840_v8 = vld [vmem:[%s21327_s8 + $0x1c] sm:$0xf] }
 0x38f   : > { %v11985_v53 = vsel %vm21362_vm2, %v11980_v23, %v11984_v1  ;;  %v6917_v11 = vrot.slane %v6915_v43, 5  ;;  %v6925_v32 = vshll.u32 %v6838_v20, 16  ;;  %v12003_v35 = vor.u32 %v12002_v50, %v11998_v58  ;;  %19508 = vmatprep.subr.bf16.mxu1 %v20851_v36  ;;  %v6841_v17 = vld [vmem:[%s21327_s8 + $0x20] sm:$0x1]  ;;  %v6842_v23 = vld [vmem:[%s21327_s8 + $0x24] sm:$0xf] }
 0x390   : > { %v25313_v51 = vcombine.low %v11975_v10, %v11985_v53  ;;  %v11999_v46 = vsel %vm21362_vm2, %v11994_v44, %v11998_v58  ;;  %v6921_v49 = vrot.slane %v6919_v19, 4  ;;  %v6912_v63 = vor.u32 %v6911_v18, %v6908_v5  ;;  %v20854_v44 = vld [vmem:[%s27210_s3 + $0xb8] sm:$0xff]   ;;  %v20860_v50 = vld [vmem:[%s27212_s5 + $0x50] sm:$0xff]   ;;  %v6843_v18 = vld [vmem:[%s21327_s8 + $0x28] sm:$0xf] }
 0x391   : > { %v6927_v7 = vrot.slane %v6925_v32, 5  ;;  %v12011_v26 = vshrl.u32 %v11773_v27, 16  ;;  %v12014_v59 = vshll.u32 %v11773_v27, 16  ;;  %v12004_v16 = vrot.slane %v12003_v35, 4  ;;  %19477 = vmatmul.mubr.bf16.gmra.mrb[24].mxu1 %v25291_v61  ;;  %v25354_v35 = vld [vmem:[%s27210_s3 + $0xc0] sm:$0xff]  }
 0x392   : > { %v6922_v45 = vor.u32 %v6921_v49, %v6917_v11  ;;  %v12020_v39 = vshll.u32 %v11774_v3, 16  ;;  %v12024_v55 = vshrl.u32 %v11774_v3, 16  ;;  %v6913_v2 = vrot.slane %v6912_v63, 4  ;;  %19480 = vmatprep.mubr.bf16.mxu1 %v17724_v15  ;;  %19509 = vmatpush3.bf16.msra.mxu1 %v20851_v36 }
 0x393   : > { %v12013_v12 = vrot.slane %v12011_v26, 4  ;;  %v12016_v33 = vrot.slane %v12014_v59, 5  ;;  %v12030_v25 = vshll.u32 %v11775_v42, 16  ;;  %v12009_v6 = vsel %vm21362_vm2, %v12004_v16, %v12008_v57  ;;  %19510 = vmatprep.subr.bf16.mxu1 %v20852_v62 }
 0x394   : > { %v6923_v54 = vrot.slane %v6922_v45, 4  ;;  %v12022_v34 = vrot.slane %v12020_v39, 5  ;;  %v12026_v56 = vrot.slane %v12024_v55, 4  ;;  %v17726_v29 = vcombine.low %v11999_v46, %v12009_v6  ;;  %v6844_v39 = vld [vmem:[%s21327_s8 + $0x2c] sm:$0x1] }
 0x395   : > { %v6918_v61 = vsel %vm21362_vm2, %v6913_v2, %v6917_v11  ;;  %v12017_v9 = vor.u32 %v12016_v33, %v12013_v12  ;;  %v12032_v40 = vrot.slane %v12030_v25, 5  ;;  %v12035_v1 = vshrl.u32 %v11776_v21, 16  ;;  %v11779_v55 = vld [vmem:[#allocation2 + $0x84] sm:$0xf]  ;;  %v11780_v25 = vld [vmem:[#allocation2 + $0x88] sm:$0xf] }
 0x396   : > { %v6928_v37 = vsel %vm21362_vm2, %v6923_v54, %v6927_v7  ;;  %v12027_v31 = vor.u32 %v12026_v56, %v12022_v34  ;;  %v12038_v38 = vshll.u32 %v11776_v21, 16  ;;  %v12044_v14 = vshll.u32 %v11777_v22, 16  ;;  %19511 = vmatpush3.bf16.msra.mxu1 %v20852_v62 }
 0x397   : > { %v17095_v15 = vcombine.low %v6918_v61, %v6928_v37  ;;  %v12018_v0 = vrot.slane %v12017_v9, 4  ;;  %v12048_v58 = vshrl.u32 %v11777_v22, 16  ;;  %v12037_v20 = vrot.slane %v12035_v1, 4  ;;  %19512 = vmatprep.subr.bf16.mxu1 %v20853_v13  ;;  %v11782_v37 = vld [vmem:[#allocation2 + $0x90] sm:$0xf] }
 0x398   : > { %v12028_v4 = vrot.slane %v12027_v31, 4  ;;  %v12040_v5 = vrot.slane %v12038_v38, 5  ;;  %v12054_v10 = vshll.u32 %v11778_v60, 16  ;;  %v12046_v52 = vrot.slane %v12044_v14, 5  ;;  %v20861_v60 = vld [vmem:[%s27212_s5 + $0x58] sm:$0xff]  }
 0x399   : > { %19093 = vmatmul.mubr.msk.bf16.vlgmr.msra.gmra.mrb[32].mxu0 %vm930_vm3, %v17095_v15  ;;  %v12023_v24 = vsel %vm21362_vm2, %v12018_v0, %v12022_v34  ;;  %v12050_v43 = vrot.slane %v12048_v58, 4  ;;  %v6930_v36 = vshrl.u32 %v6839_v41, 16  ;;  %v6933_v53 = vshll.u32 %v6839_v41, 16  ;;  %19481 = vmatmul.mubr.bf16.gmra.mrb[28].mxu1 %v25313_v51 }
 0x39a   : > { %v12033_v57 = vsel %vm21362_vm2, %v12028_v4, %v12032_v40  ;;  %v12041_v19 = vor.u32 %v12040_v5, %v12037_v20  ;;  %v12056_v27 = vrot.slane %v12054_v10, 5  ;;  %19125 = vmatpush3.bf16.msra.mxu0 %v25246_v48  ;;  %v6939_v46 = vshll.u32 %v6840_v8, 16  ;;  %19484 = vmatprep.mubr.bf16.mxu1 %v17726_v29  ;;  %v11781_v29 = vld [vmem:[#allocation2 + $0x8c] sm:$0x1] }
 0x39b   : > { %v17727_v11 = vcombine.low %v12023_v24, %v12033_v57  ;;  %v12051_v32 = vor.u32 %v12050_v43, %v12046_v52  ;;  %v6932_v3 = vrot.slane %v6930_v36, 4  ;;  %19126 = vmatprep.subr.bf16.mxu0 %v20858_v28  ;;  %v6935_v42 = vrot.slane %v6933_v53, 5  ;;  %19513 = vmatpush3.bf16.msra.mxu1 %v20853_v13 }
 0x39c   : > { %v12042_v49 = vrot.slane %v12041_v19, 4  ;;  %v6943_v63 = vshrl.u32 %v6840_v8, 16  ;;  %v6949_v7 = vshll.u32 %v6841_v17, 16  ;;  %v6941_v26 = vrot.slane %v6939_v46, 5  ;;  %19514 = vmatprep.subr.bf16.mxu1 %v20854_v44  ;;  %v11783_v8 = vld [vmem:[#allocation2 + $0x94] sm:$0xf] }
 0x39d   : > { %v12052_v48 = vrot.slane %v12051_v32, 4  ;;  %v6954_v51 = vshrl.u32 %v6842_v23, 16  ;;  %v6957_v59 = vshll.u32 %v6842_v23, 16  ;;  %v6936_v62 = vor.u32 %v6935_v42, %v6932_v3  ;;  %v11784_v19 = vld [vmem:[#allocation2 + $0x98] sm:$0x1] }
 0x39e   : > { %v12047_v21 = vsel %vm21362_vm2, %v12042_v49, %v12046_v52  ;;  %v6945_v16 = vrot.slane %v6943_v63, 4  ;;  %v6951_v45 = vrot.slane %v6949_v7, 5  ;;  %19127 = vmatpush3.bf16.msra.mxu0 %v20858_v28  ;;  %v6963_v33 = vshll.u32 %v6843_v18, 16  ;;  %v6845_v52 = vld [vmem:[%s21327_s8 + $0x30] sm:$0xf] }
 0x39f   : > { %v12057_v22 = vsel %vm21362_vm2, %v12052_v48, %v12056_v27  ;;  %v6956_v2 = vrot.slane %v6954_v51, 4  ;;  %v6959_v12 = vrot.slane %v6957_v59, 5  ;;  %19128 = vmatprep.subr.bf16.mxu0 %v20860_v50  ;;  %v6937_v54 = vrot.slane %v6936_v62, 4  ;;  %19515 = vmatpush3.bf16.msra.mxu1 %v20854_v44  ;;  %v6846_v49 = vld [vmem:[%s21327_s8 + $0x34] sm:$0xf] }
 0x3a0   : > { %v17728_v6 = vcombine.low %v12047_v21, %v12057_v22  ;;  %v6946_v34 = vor.u32 %v6945_v16, %v6941_v26  ;;  %v6967_v56 = vshrl.u32 %v6843_v18, 16  ;;  %v6965_v9 = vrot.slane %v6963_v33, 5  ;;  %19548 = vmatprep.subr.bf16.mxu1 %v25354_v35  ;;  %v6848_v51 = vld [vmem:[%s21327_s8 + $0x3c] sm:$0xf] }
 0x3a1   : > { %v6960_v61 = vor.u32 %v6959_v12, %v6956_v2  ;;  %v6973_v40 = vshll.u32 %v6844_v39, 16  ;;  %v12059_v13 = vshrl.u32 %v11779_v55, 16  ;;  %v6942_v31 = vsel %vm21362_vm2, %v6937_v54, %v6941_v26  ;;  %19485 = vmatmul.mubr.bf16.gmra.mrb[0].mxu1 %v17727_v11  ;;  %v6847_v26 = vld [vmem:[%s21327_s8 + $0x38] sm:$0x1] }
 0x3a2   : > { %v6947_v1 = vrot.slane %v6946_v34, 4  ;;  %v6969_v38 = vrot.slane %v6967_v56, 4  ;;  %v12062_v41 = vshll.u32 %v11779_v55, 16  ;;  %19129 = vmatpush3.bf16.msra.mxu0 %v20860_v50  ;;  %v12068_v58 = vshll.u32 %v11780_v25, 16  ;;  %19488 = vmatprep.mubr.bf16.mxu1 %v17728_v6 }
 0x3a3   : > { %v6961_v15 = vrot.slane %v6960_v61, 4  ;;  %v6975_v0 = vrot.slane %v6973_v40, 5  ;;  %v12061_v14 = vrot.slane %v12059_v13, 4  ;;  %19130 = vmatprep.subr.bf16.mxu0 %v20861_v60  ;;  %v12072_v20 = vshrl.u32 %v11780_v25, 16 }
 0x3a4   : > { %v6952_v17 = vsel %vm21362_vm2, %v6947_v1, %v6951_v45  ;;  %v6970_v28 = vor.u32 %v6969_v38, %v6965_v9  ;;  %v12064_v4 = vrot.slane %v12062_v41, 5  ;;  %v12070_v23 = vrot.slane %v12068_v58, 5  ;;  %v6850_v1 = vld [vmem:[%s21327_s8 + $0x44] sm:$0x1]  ;;  %v11785_v41 = vld [vmem:[#allocation2 + $0x9c] sm:$0xf] }
 0x3a5   : > { %v17096_v5 = vcombine.low %v6942_v31, %v6952_v17  ;;  %v6966_v10 = vsel %vm21362_vm2, %v6961_v15, %v6965_v9  ;;  %v12078_v24 = vshll.u32 %v11781_v29, 16  ;;  %v12074_v44 = vrot.slane %v12072_v20, 4  ;;  %v6849_v9 = vld [vmem:[%s21327_s8 + $0x40] sm:$0xf] }
 0x3a6   : > { %v6971_v43 = vrot.slane %v6970_v28, 4  ;;  %v12065_v36 = vor.u32 %v12064_v4, %v12061_v14  ;;  %v12083_v50 = vshrl.u32 %v11782_v37, 16  ;;  %19131 = vmatpush3.bf16.msra.mxu0 %v20861_v60  ;;  %v12086_v27 = vshll.u32 %v11782_v37, 16 }
 0x3a7   : > { %19096 = vmatprep.mubr.msk.bf16.mxu0 %vm930_vm3, %v17096_v5  ;;  %v12080_v57 = vrot.slane %v12078_v24, 5  ;;  %v12092_v53 = vshll.u32 %v11783_v8, 16  ;;  %v12096_v18 = vshrl.u32 %v11783_v8, 16  ;;  %v12075_v3 = vor.u32 %v12074_v44, %v12070_v23 }
 0x3a8   : > { %v6976_v11 = vsel %vm21362_vm2, %v6971_v43, %v6975_v0  ;;  %v12066_v32 = vrot.slane %v12065_v36, 4  ;;  %v12085_v46 = vrot.slane %v12083_v50, 4  ;;  %v12088_v63 = vrot.slane %v12086_v27, 5  ;;  %v11787_v50 = vld [vmem:[#allocation2 + $0xa4] sm:$0x1] }
 0x3a9   : > { %v17097_v42 = vcombine.low %v6966_v10, %v6976_v11  ;;  %v12094_v7 = vrot.slane %v12092_v53, 5  ;;  %v12098_v48 = vrot.slane %v12096_v18, 4  ;;  %v12076_v21 = vrot.slane %v12075_v3, 4  ;;  %v25389_v10 = vld [vmem:[#allocation2 + $0xa0] sm:$0xf] }
 0x3aa   : > { %v12071_v59 = vsel %vm21362_vm2, %v12066_v32, %v12070_v23  ;;  %v12102_v62 = vshll.u32 %v11784_v19, 16  ;;  %v6978_v16 = vshrl.u32 %v6845_v52, 16  ;;  %v12089_v45 = vor.u32 %v12088_v63, %v12085_v46 }
 0x3ab   : > { %19097 = vmatmul.mubr.msk.bf16.gmra.mrb[36].mxu0 %vm930_vm3, %v17097_v42  ;;  %v12099_v39 = vor.u32 %v12098_v48, %v12094_v7  ;;  %v6981_v55 = vshll.u32 %v6845_v52, 16  ;;  %v6987_v22 = vshll.u32 %v6846_v49, 16  ;;  %v12081_v2 = vsel %vm21362_vm2, %v12076_v21, %v12080_v57  ;;  %v11788_v57 = vld [vmem:[#allocation2 + $0xa8] sm:$0xf] }
 0x3ac   : > { %v12104_v12 = vrot.slane %v12102_v62, 5  ;;  %v6980_v33 = vrot.slane %v6978_v16, 4  ;;  %v6991_v25 = vshrl.u32 %v6846_v49, 16  ;;  %v17729_v60 = vcombine.low %v12071_v59, %v12081_v2  ;;  %v25407_v62 = vld [vmem:[#allocation2 + $0xb0] sm:$0x1] }
 0x3ad   : > { %v12090_v6 = vrot.slane %v12089_v45, 4  ;;  %v12100_v54 = vrot.slane %v12099_v39, 4  ;;  %v6983_v34 = vrot.slane %v6981_v55, 5  ;;  %v6989_v56 = vrot.slane %v6987_v22, 5  ;;  %v6851_v2 = vld [vmem:[%s21327_s8 + $0x48] sm:$0xf] }
 0x3ae   : > { %v6993_v29 = vrot.slane %v6991_v25, 4  ;;  %v6997_v61 = vshll.u32 %v6847_v26, 16  ;;  %v7002_v40 = vshrl.u32 %v6848_v51, 16  ;;  %19489 = vmatmul.mubr.bf16.gmra.mrb[4].mxu1 %v17729_v60  ;;  %v7005_v38 = vshll.u32 %v6848_v51, 16  ;;  %v25402_v26 = vld [vmem:[%s27212_s5 + $0x60] sm:$0xff]  }
 0x3af   : > { %v12095_v13 = vsel %vm21362_vm2, %v12090_v6, %v12094_v7  ;;  %v12105_v37 = vsel %vm21362_vm2, %v12100_v54, %v12104_v12  ;;  %v6984_v31 = vor.u32 %v6983_v34, %v6980_v33  ;;  %v7011_v28 = vshll.u32 %v6849_v9, 16  ;;  %v25397_v7 = vld [vmem:[#allocation2 + $0xac] sm:$0xf]  ;;  %19164 = vmatprep.subr.bf16.mxu0 %v25402_v26 }
 0x3b0   : > { %v17730_v8 = vcombine.low %v12095_v13, %v12105_v37  ;;  %v6994_v15 = vor.u32 %v6993_v29, %v6989_v56  ;;  %v6999_v0 = vrot.slane %v6997_v61, 5  ;;  %v7004_v14 = vrot.slane %v7002_v40, 4  ;;  %v25416_v6 = vld [vmem:[%s21327_s8 + $0x4c] sm:$0xf]  ;;  %v25422_v13 = vld [vmem:[%s21327_s8 + $0x50] sm:$0x1] }
 0x3b1   : > { %v6985_v58 = vrot.slane %v6984_v31, 4  ;;  %v7007_v17 = vrot.slane %v7005_v38, 5  ;;  %v7015_v4 = vshrl.u32 %v6849_v9, 16  ;;  %v7021_v5 = vshll.u32 %v6850_v1, 16 }
 0x3b2   : > { %19492 = vmatprep.mubr.bf16.mxu1 %v17730_v8  ;;  %v6995_v20 = vrot.slane %v6994_v15, 4  ;;  %v12107_v23 = vshrl.u32 %v11785_v41, 16  ;;  %v12110_v24 = vshll.u32 %v11785_v41, 16  ;;  %v7013_v36 = vrot.slane %v7011_v28, 5 }
 0x3b3   : > { %v6990_v52 = vsel %vm21362_vm2, %v6985_v58, %v6989_v56  ;;  %v7008_v43 = vor.u32 %v7007_v17, %v7004_v14  ;;  %v7017_v44 = vrot.slane %v7015_v4, 4  ;;  %v7023_v27 = vrot.slane %v7021_v5, 5  ;;  %v6854_v58 = vld [vmem:[%s21327_s8 + $0x54] sm:$0xf]  ;;  %v25432_v5 = vld [vmem:[%s21327_s8 + $0x58] sm:$0xf] }
 0x3b4   : > { %v7000_v19 = vsel %vm21362_vm2, %v6995_v20, %v6999_v0  ;;  %v12109_v53 = vrot.slane %v12107_v23, 4  ;;  %v12112_v18 = vrot.slane %v12110_v24, 5  ;;  %v12116_v46 = vshll.u32 %v25389_v10, 16 }
 0x3b5   : > { %v17098_v11 = vcombine.low %v6990_v52, %v7000_v19  ;;  %v7009_v32 = vrot.slane %v7008_v43, 4  ;;  %v7018_v3 = vor.u32 %v7017_v44, %v7013_v36  ;;  %v12120_v42 = vshrl.u32 %v25389_v10, 16 }
 0x3b6   : > { %v12113_v49 = vor.u32 %v12112_v18, %v12109_v53  ;;  %v12126_v63 = vshll.u32 %v11787_v50, 16  ;;  %v12131_v48 = vshrl.u32 %v11788_v57, 16  ;;  %v12118_v21 = vrot.slane %v12116_v46, 5  ;;  %v25437_v50 = vld [vmem:[%s21327_s8 + $0x5c] sm:$0x1] }
 0x3b7   : > { %19100 = vmatprep.mubr.msk.bf16.mxu0 %vm930_vm3, %v17098_v11  ;;  %v7014_v51 = vsel %vm21362_vm2, %v7009_v32, %v7013_v36  ;;  %v7019_v59 = vrot.slane %v7018_v3, 4  ;;  %v12134_v16 = vshll.u32 %v11788_v57, 16  ;;  %v12122_v39 = vrot.slane %v12120_v42, 4  ;;  %v11791_v32 = vld [vmem:[#allocation2 + $0xb4] sm:$0xf] }
 0x3b8   : > { %v12114_v45 = vrot.slane %v12113_v49, 4  ;;  %v12128_v55 = vrot.slane %v12126_v63, 5  ;;  %v12133_v22 = vrot.slane %v12131_v48, 4  ;;  %v12140_v25 = vshll.u32 %v25397_v7, 16  ;;  %v25443_v63 = vld [vmem:[#allocation2 + $0xb8] sm:$0xf] }
 0x3b9   : > { %v7024_v12 = vsel %vm21362_vm2, %v7019_v59, %v7023_v27  ;;  %v12136_v33 = vrot.slane %v12134_v16, 5  ;;  %v12144_v60 = vshrl.u32 %v25397_v7, 16  ;;  %v12123_v56 = vor.u32 %v12122_v39, %v12118_v21  ;;  %v25448_v39 = vld [vmem:[#allocation2 + $0xbc] sm:$0x1] }
 0x3ba   : > { %v17099_v54 = vcombine.low %v7014_v51, %v7024_v12  ;;  %v12119_v34 = vsel %vm21362_vm2, %v12114_v45, %v12118_v21  ;;  %v12150_v29 = vshll.u32 %v25407_v62, 16  ;;  %v12142_v9 = vrot.slane %v12140_v25, 5 }
 0x3bb   : > { %v12137_v61 = vor.u32 %v12136_v33, %v12133_v22  ;;  %v12146_v40 = vrot.slane %v12144_v60, 4  ;;  %v7026_v37 = vshrl.u32 %v6851_v2, 16  ;;  %v12124_v31 = vrot.slane %v12123_v56, 4  ;;  %v6857_v60 = vld [vmem:[%s21327_s8 + $0x60] sm:$0xf] }
 0x3bc   : > { %19101 = vmatmul.mubr.msk.bf16.gmra.mrb[40].mxu0 %vm930_vm3, %v17099_v54  ;;  %v12152_v1 = vrot.slane %v12150_v29, 5  ;;  %v7029_v38 = vshll.u32 %v6851_v2, 16  ;;  %v7035_v41 = vshll.u32 %v25416_v6, 16  ;;  %v7039_v14 = vshrl.u32 %v25416_v6, 16 }
 0x3bd   : > { %v12138_v8 = vrot.slane %v12137_v61, 4  ;;  %v12147_v15 = vor.u32 %v12146_v40, %v12142_v9  ;;  %v7028_v0 = vrot.slane %v7026_v37, 4  ;;  %v12129_v17 = vsel %vm21362_vm2, %v12124_v31, %v12128_v55  ;;  %v25455_v61 = vld [vmem:[%s21327_s8 + $0x64] sm:$0xf] }
 0x3be   : > { %v7031_v28 = vrot.slane %v7029_v38, 5  ;;  %v7037_v4 = vrot.slane %v7035_v41, 5  ;;  %v7045_v20 = vshll.u32 %v25422_v13, 16  ;;  %v17731_v23 = vcombine.low %v12119_v34, %v12129_v17  ;;  %v25463_v41 = vld [vmem:[%s21327_s8 + $0x68] sm:$0x1] }
 0x3bf   : > { %v12143_v24 = vsel %vm21362_vm2, %v12138_v8, %v12142_v9  ;;  %v12148_v52 = vrot.slane %v12147_v15, 4  ;;  %v7041_v43 = vrot.slane %v7039_v14, 4  ;;  %v7050_v57 = vshrl.u32 %v6854_v58, 16 }
 0x3c0   : > { %v7032_v36 = vor.u32 %v7031_v28, %v7028_v0  ;;  %v7047_v44 = vrot.slane %v7045_v20, 5  ;;  %v7053_v19 = vshll.u32 %v6854_v58, 16  ;;  %19493 = vmatmul.mubr.bf16.gmra.mrb[8].mxu1 %v17731_v23  ;;  %v7059_v18 = vshll.u32 %v25432_v5, 16  ;;  %v6860_v28 = vld [vmem:[%s21327_s8 + $0x6c] sm:$0xf] }
 0x3c1   : > { %v12153_v27 = vsel %vm21362_vm2, %v12148_v52, %v12152_v1  ;;  %v7042_v53 = vor.u32 %v7041_v43, %v7037_v4  ;;  %v7063_v11 = vshrl.u32 %v25432_v5, 16  ;;  %v7052_v49 = vrot.slane %v7050_v57, 4  ;;  %v25470_v52 = vld [vmem:[%s21327_s8 + $0x70] sm:$0xf] }
 0x3c2   : > { %v17732_v3 = vcombine.low %v12143_v24, %v12153_v27  ;;  %v7033_v46 = vrot.slane %v7032_v36, 4  ;;  %v7055_v42 = vrot.slane %v7053_v19, 5  ;;  %v7061_v51 = vrot.slane %v7059_v18, 5 }
 0x3c3   : > { %v7043_v48 = vrot.slane %v7042_v53, 4  ;;  %v7065_v59 = vrot.slane %v7063_v11, 4  ;;  %v7069_v21 = vshll.u32 %v25437_v50, 16  ;;  %v12155_v55 = vshrl.u32 %v11791_v32, 16  ;;  %v25478_v53 = vld [vmem:[%s21327_s8 + $0x74] sm:$0x1] }
 0x3c4   : > { %19496 = vmatprep.mubr.bf16.mxu1 %v17732_v3  ;;  %v7038_v16 = vsel %vm21362_vm2, %v7033_v46, %v7037_v4  ;;  %v7056_v45 = vor.u32 %v7055_v42, %v7052_v49  ;;  %v12158_v22 = vshll.u32 %v11791_v32, 16  ;;  %v12164_v25 = vshll.u32 %v25443_v63, 16 }
 0x3c5   : > { %v7048_v2 = vsel %vm21362_vm2, %v7043_v48, %v7047_v44  ;;  %v7066_v12 = vor.u32 %v7065_v59, %v7061_v51  ;;  %v7071_v33 = vrot.slane %v7069_v21, 5  ;;  %v12157_v56 = vrot.slane %v12155_v55, 4  ;;  %v12500_v21 = vld [vmem:[#allocation2] sm:$0xe] }
 0x3c6   : > { %v17100_v54 = vcombine.low %v7038_v16, %v7048_v2  ;;  %v7057_v34 = vrot.slane %v7056_v45, 4  ;;  %v12160_v29 = vrot.slane %v12158_v22, 5  ;;  %v12166_v40 = vrot.slane %v12164_v25, 5  ;;  %v12501_v2 = vld [vmem:[#allocation2 + $0xc] sm:$0xe] }
 0x3c7   : > { %v7067_v9 = vrot.slane %v7066_v12, 4  ;;  %v12168_v37 = vshrl.u32 %v25443_v63, 16  ;;  %v12174_v31 = vshll.u32 %v25448_v39, 16  ;;  %v7074_v8 = vshrl.u32 %v6857_v60, 16 }
 0x3c8   : > { %19104 = vmatprep.mubr.msk.bf16.mxu0 %vm930_vm3, %v17100_v54  ;;  %v7062_v1 = vsel %vm21362_vm2, %v7057_v34, %v7061_v51  ;;  %v12161_v38 = vor.u32 %v12160_v29, %v12157_v56  ;;  %v7077_v15 = vshll.u32 %v6857_v60, 16  ;;  %v7083_v17 = vshll.u32 %v25455_v61, 16  ;;  %v12502_v54 = vld [vmem:[#allocation2 + $0x18] sm:$0xe] }
 0x3c9   : > { %v7072_v0 = vsel %vm21362_vm2, %v7067_v9, %v7071_v33  ;;  %v12170_v14 = vrot.slane %v12168_v37, 4  ;;  %v12176_v58 = vrot.slane %v12174_v31, 5  ;;  %v7076_v23 = vrot.slane %v7074_v8, 4  ;;  %v21017_v9 = vld [vmem:[#allocation2 + $0x4] sm:$0xf] }
 0x3ca   : > { %v17101_v4 = vcombine.low %v7062_v1, %v7072_v0  ;;  %v12162_v20 = vrot.slane %v12161_v38, 4  ;;  %v7079_v24 = vrot.slane %v7077_v15, 5  ;;  %v7085_v36 = vrot.slane %v7083_v17, 5  ;;  %v21018_v1 = vld [vmem:[#allocation2 + $0x8] sm:$0x1] }
 0x3cb   : > { %v12171_v43 = vor.u32 %v12170_v14, %v12166_v40  ;;  %v7087_v44 = vshrl.u32 %v25455_v61, 16  ;;  %v7093_v57 = vshll.u32 %v25463_v41, 16  ;;  %v7098_v18 = vshrl.u32 %v6860_v28, 16  ;;  %v6863_v15 = vld [vmem:[%s21327_s8 + $0x78] sm:$0xf] }
 0x3cc   : > { %19105 = vmatmul.mubr.msk.bf16.gmra.mrb[44].mxu0 %vm930_vm3, %v17101_v4  ;;  %v12167_v19 = vsel %vm21362_vm2, %v12162_v20, %v12166_v40  ;;  %v7080_v27 = vor.u32 %v7079_v24, %v7076_v23  ;;  %v7101_v11 = vshll.u32 %v6860_v28, 16  ;;  %v7107_v49 = vshll.u32 %v25470_v52, 16  ;;  %v21019_v17 = vld [vmem:[#allocation2 + $0x10] sm:$0xf]  ;;  %v25493_v4 = vld [vmem:[%s21327_s8 + $0x7c] sm:$0xf] }
 0x3cd   : > { %v12172_v32 = vrot.slane %v12171_v43, 4  ;;  %v7089_v3 = vrot.slane %v7087_v44, 4  ;;  %v7095_v46 = vrot.slane %v7093_v57, 5  ;;  %v7100_v48 = vrot.slane %v7098_v18, 4  ;;  %v21020_v43 = vld [vmem:[#allocation2 + $0x14] sm:$0x1] }
 0x3ce   : > { %v7081_v42 = vrot.slane %v7080_v27, 4  ;;  %v7103_v51 = vrot.slane %v7101_v11, 5  ;;  %v7111_v59 = vshrl.u32 %v25470_v52, 16  ;;  %v7109_v55 = vrot.slane %v7107_v49, 5  ;;  %v25498_v44 = vld [vmem:[%s21327_s8 + $0x80] sm:$0x1] }
 0x3cf   : > { %v12177_v16 = vsel %vm21362_vm2, %v12172_v32, %v12176_v58  ;;  %v7090_v45 = vor.u32 %v7089_v3, %v7085_v36  ;;  %v7117_v22 = vshll.u32 %v25478_v53, 16  ;;  %v17742_v29 = vrot.slane %v12500_v21, 9  ;;  %v21021_v3 = vld [vmem:[#allocation2 + $0x1c] sm:$0xf]  ;;  %v21022_v49 = vld [vmem:[#allocation2 + $0x20] sm:$0x1] }
 0x3d0   : > { %v17733_v12 = vcombine.low %v12167_v19, %v12177_v16  ;;  %v7086_v33 = vsel %vm21362_vm2, %v7081_v42, %v7085_v36  ;;  %v7104_v25 = vor.u32 %v7103_v51, %v7100_v48  ;;  %v7113_v60 = vrot.slane %v7111_v59, 4  ;;  %v6866_v48 = vld [vmem:[%s21327_s8 + $0x84] sm:$0xf]  ;;  %v20856_v51 = vld [vmem:[%s27210_s3 + $0xc8] sm:$0xff]  }
 0x3d1   : > { %v7091_v34 = vrot.slane %v7090_v45, 4  ;;  %v7119_v56 = vrot.slane %v7117_v22, 5  ;;  %v12566_v40 = vrot.slane %v21017_v9, 5  ;;  %v12569_v38 = vrot.slane %v21018_v1, 5 }
 0x3d2   : > { %19497 = vmatmul.mubr.bf16.gmra.mrb[12].mxu1 %v17733_v12  ;;  %v7105_v37 = vrot.slane %v7104_v25, 4  ;;  %v7114_v31 = vor.u32 %v7113_v60, %v7109_v55  ;;  %v17743_v8 = vrot.slane %v12501_v2, 9  ;;  %v12573_v28 = vrot.slane %v21019_v17, 5  ;;  %v25520_v25 = vld [vmem:[%s21327_s8 + $0x8c] sm:$0x1] }
 0x3d3   : > { %v7096_v0 = vsel %vm21362_vm2, %v7091_v34, %v7095_v46  ;;  %v12567_v14 = vsel %vm21791_vm6, %v17742_v29, %v12566_v40  ;;  %v12568_v58 = vrot.slane %v12566_v40, 4  ;;  %v12576_v36 = vrot.slane %v21020_v43, 5  ;;  %v12504_v43 = vld [vmem:[#allocation2 + $0x30] sm:$0xe] }
 0x3d4   : > { %v17102_v20 = vcombine.low %v7086_v33, %v7096_v0  ;;  %v7110_v23 = vsel %vm21362_vm2, %v7105_v37, %v7109_v55  ;;  %v7115_v24 = vrot.slane %v7114_v31, 4  ;;  %v12574_v19 = vsel %vm21791_vm6, %v17743_v8, %v12573_v28  ;;  %v25514_v55 = vld [vmem:[%s21327_s8 + $0x88] sm:$0xf]  ;;  %v12503_v31 = vld [vmem:[#allocation2 + $0x24] sm:$0xe] }
 0x3d5   : > { %v12570_v57 = vsel %vm21791_vm6, %v12568_v58, %v12569_v38  ;;  %v12575_v27 = vrot.slane %v12573_v28, 4  ;;  %v17744_v18 = vrot.slane %v12502_v54, 9  ;;  %v12580_v46 = vrot.slane %v21021_v3, 5  ;;  %v20859_v28 = vld [vmem:[%s27210_s3 + $0xd0] sm:$0xff]  }
 0x3d6   : > { %19108 = vmatprep.mubr.msk.bf16.mxu0 %vm930_vm3, %v17102_v20  ;;  %v7120_v11 = vsel %vm21362_vm2, %v7115_v24, %v7119_v56  ;;  %v17774_v32 = vcombine.low %v12567_v14, %v12570_v57  ;;  %v12583_v42 = vrot.slane %v21022_v49, 5  ;;  %v7122_v16 = vshrl.u32 %v6863_v15, 16  ;;  %v21024_v49 = vld [vmem:[#allocation2 + $0x2c] sm:$0x1] }
 0x3d7   : > { %v17103_v59 = vcombine.low %v7110_v23, %v7120_v11  ;;  %v12577_v21 = vsel %vm21791_vm6, %v12575_v27, %v12576_v36  ;;  %v7125_v45 = vshll.u32 %v6863_v15, 16  ;;  %v12581_v2 = vsel %vm21791_vm6, %v17744_v18, %v12580_v46  ;;  %v21023_v27 = vld [vmem:[#allocation2 + $0x28] sm:$0xf]  ;;  %v6869_v11 = vld [vmem:[%s21327_s8 + $0x90] sm:$0xf] }
 0x3d8   : > { %19516 = vmatprep.mubr.bf16.mxu1 %v17774_v32  ;;  %v17775_v22 = vcombine.low %v12574_v19, %v12577_v21  ;;  %v12582_v12 = vrot.slane %v12580_v46, 4  ;;  %v7131_v33 = vshll.u32 %v25493_v4, 16  ;;  %v7124_v60 = vrot.slane %v7122_v16, 4 }
 0x3d9   : > { %19109 = vmatmul.mubr.msk.bf16.gmra.mrb[48].mxu0 %vm930_vm3, %v17103_v59  ;;  %v7127_v54 = vrot.slane %v7125_v45, 5  ;;  %v7135_v34 = vshrl.u32 %v25493_v4, 16  ;;  %v7141_v56 = vshll.u32 %v25498_v44, 16  ;;  %v7146_v40 = vshrl.u32 %v6866_v48, 16 }
 0x3da   : > { %19517 = vmatmul.mubr.bf16.vlgmr.msra.gmra.mrb[16].mxu1 %v17775_v22  ;;  %v12584_v29 = vsel %vm21791_vm6, %v12582_v12, %v12583_v42  ;;  %v7133_v9 = vrot.slane %v7131_v33, 5  ;;  %v7149_v37 = vshll.u32 %v6866_v48, 16  ;;  %v7155_v58 = vshll.u32 %v25514_v55, 16  ;;  %v25538_v48 = vld [vmem:[%s21327_s8 + $0x94] sm:$0xf] }
 0x3db   : > { %19549 = vmatpush3.bf16.msra.mxu1 %v25354_v35  ;;  %v17776_v1 = vcombine.low %v12581_v2, %v12584_v29  ;;  %v7128_v38 = vor.u32 %v7127_v54, %v7124_v60  ;;  %v7137_v8 = vrot.slane %v7135_v34, 4  ;;  %v7143_v15 = vrot.slane %v7141_v56, 5  ;;  %v25543_v22 = vld [vmem:[%s21327_s8 + $0x98] sm:$0x1]  ;;  %v21025_v33 = vld [vmem:[#allocation2 + $0x34] sm:$0xf] }
 0x3dc   : > { %v7148_v0 = vrot.slane %v7146_v40, 4  ;;  %v7151_v14 = vrot.slane %v7149_v37, 5  ;;  %v7159_v17 = vshrl.u32 %v25514_v55, 16  ;;  %19550 = vmatprep.subr.bf16.mxu1 %v20856_v51  ;;  %v7165_v35 = vshll.u32 %v25520_v25, 16  ;;  %v20862_v2 = vld [vmem:[%s27210_s3 + $0xd8] sm:$0xff]  }
 0x3dd   : > { %19520 = vmatprep.mubr.bf16.mxu1 %v17776_v1  ;;  %v7129_v20 = vrot.slane %v7128_v38, 4  ;;  %v7138_v23 = vor.u32 %v7137_v8, %v7133_v9  ;;  %v17745_v24 = vrot.slane %v12503_v31, 9  ;;  %v7157_v57 = vrot.slane %v7155_v58, 5  ;;  %v21026_v54 = vld [vmem:[#allocation2 + $0x38] sm:$0x1] }
 0x3de   : > { %v7152_v36 = vor.u32 %v7151_v14, %v7148_v0  ;;  %v7161_v19 = vrot.slane %v7159_v17, 4  ;;  %v12587_v18 = vrot.slane %v21023_v27, 5  ;;  %v7167_v46 = vrot.slane %v7165_v35, 5  ;;  %v6872_v37 = vld [vmem:[%s21327_s8 + $0x9c] sm:$0xf]  ;;  %v20863_v35 = vld [vmem:[%s27210_s3 + $0xe0] sm:$0xff]  }
 0x3df   : > { %v7134_v32 = vsel %vm21362_vm2, %v7129_v20, %v7133_v9  ;;  %v7139_v3 = vrot.slane %v7138_v23, 4  ;;  %v12590_v42 = vrot.slane %v21024_v49, 5  ;;  %19551 = vmatpush3.bf16.msra.mxu1 %v20856_v51  ;;  %v17746_v12 = vrot.slane %v12504_v43, 9  ;;  %v25556_v31 = vld [vmem:[%s21327_s8 + $0xa0] sm:$0xf] }
 0x3e0   : > { %v7153_v59 = vrot.slane %v7152_v36, 4  ;;  %v7162_v21 = vor.u32 %v7161_v19, %v7157_v57  ;;  %v12588_v16 = vsel %vm21791_vm6, %v17745_v24, %v12587_v18  ;;  %v12589_v45 = vrot.slane %v12587_v18, 4  ;;  %19552 = vmatprep.subr.bf16.mxu1 %v20859_v28  ;;  %v25561_v0 = vld [vmem:[%s21327_s8 + $0xa4] sm:$0x1]  ;;  %v12505_v23 = vld [vmem:[#allocation2 + $0x3c] sm:$0xe] }
 0x3e1   : > { %v7144_v51 = vsel %vm21362_vm2, %v7139_v3, %v7143_v15  ;;  %v12594_v60 = vrot.slane %v21025_v33, 5  ;;  %v12597_v34 = vrot.slane %v21026_v54, 5  ;;  %v7170_v15 = vshrl.u32 %v6869_v11, 16 }
 0x3e2   : > { %v17104_v56 = vcombine.low %v7134_v32, %v7144_v51  ;;  %v7158_v29 = vsel %vm21362_vm2, %v7153_v59, %v7157_v57  ;;  %v7163_v9 = vrot.slane %v7162_v21, 4  ;;  %v12591_v40 = vsel %vm21791_vm6, %v12589_v45, %v12590_v42  ;;  %v20864_v42 = vld [vmem:[%s27210_s3 + $0xe8] sm:$0xff]  }
 0x3e3   : > { %v17777_v1 = vcombine.low %v12588_v16, %v12591_v40  ;;  %v12595_v38 = vsel %vm21791_vm6, %v17746_v12, %v12594_v60  ;;  %v12596_v8 = vrot.slane %v12594_v60, 4  ;;  %19553 = vmatpush3.bf16.msra.mxu1 %v20859_v28  ;;  %v7173_v58 = vshll.u32 %v6869_v11, 16  ;;  %v12506_v11 = vld [vmem:[#allocation2 + $0x48] sm:$0xe] }
 0x3e4   : > { %19112 = vmatprep.mubr.msk.bf16.mxu0 %vm930_vm3, %v17104_v56  ;;  %v7168_v14 = vsel %vm21362_vm2, %v7163_v9, %v7167_v46  ;;  %v7179_v17 = vshll.u32 %v25538_v48, 16  ;;  %v7183_v20 = vshrl.u32 %v25538_v48, 16  ;;  %19554 = vmatprep.subr.bf16.mxu1 %v20862_v2  ;;  %v7172_v43 = vrot.slane %v7170_v15, 4  ;;  %v21027_v9 = vld [vmem:[#allocation2 + $0x40] sm:$0xf] }
 0x3e5   : > { %v17105_v24 = vcombine.low %v7158_v29, %v7168_v14  ;;  %19521 = vmatmul.mubr.bf16.gmra.mrb[20].mxu1 %v17777_v1  ;;  %v12598_v28 = vsel %vm21791_vm6, %v12596_v8, %v12597_v34  ;;  %v7189_v36 = vshll.u32 %v25543_v22, 16  ;;  %v7175_v19 = vrot.slane %v7173_v58, 5  ;;  %v21029_v58 = vld [vmem:[#allocation2 + $0x4c] sm:$0xf] }
 0x3e6   : > { %v17778_v57 = vcombine.low %v12595_v38, %v12598_v28  ;;  %v7181_v27 = vrot.slane %v7179_v17, 5  ;;  %v7185_v18 = vrot.slane %v7183_v20, 4  ;;  %v7194_v3 = vshrl.u32 %v6872_v37, 16  ;;  %v6875_v20 = vld [vmem:[%s21327_s8 + $0xa8] sm:$0xf] }
 0x3e7   : > { %19113 = vmatmul.mubr.msk.bf16.gmra.mrb[52].mxu0 %vm930_vm3, %v17105_v24  ;;  %v7191_v32 = vrot.slane %v7189_v36, 5  ;;  %v7197_v46 = vshll.u32 %v6872_v37, 16  ;;  %v7203_v49 = vshll.u32 %v25556_v31, 16  ;;  %19555 = vmatpush3.bf16.msra.mxu1 %v20862_v2  ;;  %v7176_v59 = vor.u32 %v7175_v19, %v7172_v43  ;;  %v21028_v37 = vld [vmem:[#allocation2 + $0x44] sm:$0x1] }
 0x3e8   : > { %19524 = vmatprep.mubr.bf16.mxu1 %v17778_v57  ;;  %v7186_v21 = vor.u32 %v7185_v18, %v7181_v27  ;;  %v7207_v16 = vshrl.u32 %v25556_v31, 16  ;;  %v7213_v45 = vshll.u32 %v25561_v0, 16  ;;  %19556 = vmatprep.subr.bf16.mxu1 %v20863_v35  ;;  %v7196_v51 = vrot.slane %v7194_v3, 4  ;;  %v25592_v36 = vld [vmem:[%s21327_s8 + $0xac] sm:$0xf] }
 0x3e9   : > { %v7199_v12 = vrot.slane %v7197_v46, 5  ;;  %v7205_v33 = vrot.slane %v7203_v49, 5  ;;  %v17747_v60 = vrot.slane %v12505_v23, 9  ;;  %v7177_v54 = vrot.slane %v7176_v59, 4  ;;  %v20865_v23 = vld [vmem:[%s27210_s3 + $0xf0] sm:$0xff]  }
 0x3ea   : > { %v7187_v34 = vrot.slane %v7186_v21, 4  ;;  %v7209_v2 = vrot.slane %v7207_v16, 4  ;;  %v7215_v56 = vrot.slane %v7213_v45, 5  ;;  %v12601_v40 = vrot.slane %v21027_v9, 5  ;;  %v21030_v18 = vld [vmem:[#allocation2 + $0x50] sm:$0x1] }
 0x3eb   : > { %v7200_v29 = vor.u32 %v7199_v12, %v7196_v51  ;;  %v12604_v1 = vrot.slane %v21028_v37, 5  ;;  %v17748_v38 = vrot.slane %v12506_v11, 9  ;;  %19557 = vmatpush3.bf16.msra.mxu1 %v20863_v35  ;;  %v7182_v8 = vsel %vm21362_vm2, %v7177_v54, %v7181_v27  ;;  %v6878_v21 = vld [vmem:[%s21327_s8 + $0xb4] sm:$0xf] }
 0x3ec   : > { %v7192_v15 = vsel %vm21362_vm2, %v7187_v34, %v7191_v32  ;;  %v7210_v14 = vor.u32 %v7209_v2, %v7205_v33  ;;  %v12608_v17 = vrot.slane %v21029_v58, 5  ;;  %19558 = vmatprep.subr.bf16.mxu1 %v20864_v42  ;;  %v12602_v35 = vsel %vm21791_vm6, %v17747_v60, %v12601_v40  ;;  %v25597_v32 = vld [vmem:[%s21327_s8 + $0xb0] sm:$0x1]  ;;  %v25611_v60 = vld [vmem:[%s21327_s8 + $0xb8] sm:$0xf] }
 0x3ed   : > { %v17106_v24 = vcombine.low %v7182_v8, %v7192_v15  ;;  %v7201_v28 = vrot.slane %v7200_v29, 4  ;;  %v12603_v43 = vrot.slane %v12601_v40, 4  ;;  %v12611_v11 = vrot.slane %v21030_v18, 5  ;;  %v25614_v29 = vld [vmem:[%s21327_s8 + $0xbc] sm:$0x1] }
 0x3ee   : > { %v7211_v57 = vrot.slane %v7210_v14, 4  ;;  %v12609_v19 = vsel %vm21791_vm6, %v17748_v38, %v12608_v17  ;;  %v12610_v27 = vrot.slane %v12608_v17, 4  ;;  %v7218_v49 = vshrl.u32 %v6875_v20, 16  ;;  %v12507_v14 = vld [vmem:[#allocation2 + $0x54] sm:$0xe] }
 0x3ef   : > { %19116 = vmatprep.mubr.msk.bf16.mxu0 %vm930_vm3, %v17106_v24  ;;  %v7206_v3 = vsel %vm21362_vm2, %v7201_v28, %v7205_v33  ;;  %v12605_v46 = vsel %vm21791_vm6, %v12603_v43, %v12604_v1  ;;  %v7221_v59 = vshll.u32 %v6875_v20, 16  ;;  %19559 = vmatpush3.bf16.msra.mxu1 %v20864_v42  ;;  %v7227_v12 = vshll.u32 %v25592_v36, 16  ;;  %v20866_v42 = vld [vmem:[%s27210_s3 + $0xf8] sm:$0xff]   ;;  %v12508_v28 = vld [vmem:[#allocation2 + $0x60] sm:$0xe] }
 0x3f0   : > { %v7216_v16 = vsel %vm21362_vm2, %v7211_v57, %v7215_v56  ;;  %v17779_v45 = vcombine.low %v12602_v35, %v12605_v46  ;;  %v12612_v51 = vsel %vm21791_vm6, %v12610_v27, %v12611_v11  ;;  %19560 = vmatprep.subr.bf16.mxu1 %v20865_v23  ;;  %v7220_v34 = vrot.slane %v7218_v49, 4  ;;  %v25628_v27 = vld [vmem:[%s27210_s3 + $0x100] sm:$0xff]   ;;  %v21031_v46 = vld [vmem:[#allocation2 + $0x58] sm:$0xf] }
 0x3f1   : > { %v17107_v33 = vcombine.low %v7206_v3, %v7216_v16  ;;  %v17780_v54 = vcombine.low %v12609_v19, %v12612_v51  ;;  %v7223_v2 = vrot.slane %v7221_v59, 5  ;;  %v7229_v56 = vrot.slane %v7227_v12, 5  ;;  %v21032_v16 = vld [vmem:[#allocation2 + $0x5c] sm:$0x1]  ;;  %v7587_v51 = vld [vmem:[%s21327_s8] sm:$0xe] }
 0x3f2   : > { %19525 = vmatmul.mubr.bf16.gmra.mrb[24].mxu1 %v17779_v45  ;;  %v7231_v9 = vshrl.u32 %v25592_v36, 16  ;;  %v7237_v40 = vshll.u32 %v25597_v32, 16  ;;  %v7242_v37 = vshrl.u32 %v6878_v21, 16  ;;  %v7245_v38 = vshll.u32 %v6878_v21, 16 }
 0x3f3   : > { %19117 = vmatmul.mubr.msk.bf16.gmra.mrb[56].mxu0 %vm930_vm3, %v17107_v33  ;;  %19528 = vmatprep.mubr.bf16.mxu1 %v17780_v54  ;;  %v7224_v1 = vor.u32 %v7223_v2, %v7220_v34  ;;  %v7251_v8 = vshll.u32 %v25611_v60, 16  ;;  %v7255_v15 = vshrl.u32 %v25611_v60, 16  ;;  %v7261_v24 = vshll.u32 %v25614_v29, 16 }
 0x3f4   : > { %v7233_v58 = vrot.slane %v7231_v9, 4  ;;  %v7239_v17 = vrot.slane %v7237_v40, 5  ;;  %v7244_v20 = vrot.slane %v7242_v37, 4  ;;  %19561 = vmatpush3.bf16.msra.mxu1 %v20865_v23  ;;  %v7247_v43 = vrot.slane %v7245_v38, 5  ;;  %v21033_v40 = vld [vmem:[#allocation2 + $0x64] sm:$0xf] }
 0x3f5   : > { %v7225_v35 = vrot.slane %v7224_v1, 4  ;;  %v7253_v57 = vrot.slane %v7251_v8, 5  ;;  %v7257_v19 = vrot.slane %v7255_v15, 4  ;;  %19562 = vmatprep.subr.bf16.mxu1 %v20866_v42  ;;  %v7263_v11 = vrot.slane %v7261_v24, 5  ;;  %v21034_v1 = vld [vmem:[#allocation2 + $0x68] sm:$0x1] }
 0x3f6   : > { %v7234_v18 = vor.u32 %v7233_v58, %v7229_v56  ;;  %v17749_v3 = vrot.slane %v12507_v14, 9  ;;  %v12615_v49 = vrot.slane %v21031_v46, 5  ;;  %v7248_v23 = vor.u32 %v7247_v43, %v7244_v20  ;;  %v21035_v14 = vld [vmem:[%s21327_s8 + $0x4] sm:$0xf]  ;;  %v7588_v20 = vld [vmem:[%s21327_s8 + $0xc] sm:$0xe] }
 0x3f7   : > { %v7230_v59 = vsel %vm21362_vm2, %v7225_v35, %v7229_v56  ;;  %v7258_v21 = vor.u32 %v7257_v19, %v7253_v57  ;;  %v12618_v45 = vrot.slane %v21032_v16, 5  ;;  %v17750_v34 = vrot.slane %v12508_v28, 9  ;;  %v12509_v43 = vld [vmem:[#allocation2 + $0x6c] sm:$0xe]  ;;  %v21038_v16 = vld [vmem:[%s21327_s8 + $0x14] sm:$0x1] }
 0x3f8   : > { %v7235_v12 = vrot.slane %v7234_v18, 4  ;;  %v12616_v33 = vsel %vm21791_vm6, %v17749_v3, %v12615_v49  ;;  %v12617_v54 = vrot.slane %v12615_v49, 4  ;;  %19563 = vmatpush3.bf16.msra.mxu1 %v20866_v42  ;;  %v7249_v2 = vrot.slane %v7248_v23, 4  ;;  %v21036_v49 = vld [vmem:[%s21327_s8 + $0x8] sm:$0x1] }
 0x3f9   : > { %v7259_v9 = vrot.slane %v7258_v21, 4  ;;  %v12622_v37 = vrot.slane %v21033_v40, 5  ;;  %v12625_v56 = vrot.slane %v21034_v1, 5  ;;  %19596 = vmatprep.subr.bf16.mxu1 %v25628_v27  ;;  %v17130_v15 = vrot.slane %v7587_v51, 9 }
 0x3fa   : > { %v7240_v38 = vsel %vm21362_vm2, %v7235_v12, %v7239_v17  ;;  %v12619_v8 = vsel %vm21791_vm6, %v12617_v54, %v12618_v45  ;;  %v7653_v58 = vrot.slane %v21035_v14, 5  ;;  %v7254_v24 = vsel %vm21362_vm2, %v7249_v2, %v7253_v57  ;;  %v21039_v12 = vld [vmem:[#allocation2 + $0x70] sm:$0xf]  ;;  %v12510_v54 = vld [vmem:[#allocation2 + $0x78] sm:$0xe] }
 0x3fb   : > { %v17108_v42 = vcombine.low %v7230_v59, %v7240_v38  ;;  %v7264_v28 = vsel %vm21362_vm2, %v7259_v9, %v7263_v11  ;;  %v17781_v35 = vcombine.low %v12616_v33, %v12619_v8  ;;  %v12623_v19 = vsel %vm21791_vm6, %v17750_v34, %v12622_v37  ;;  %v21037_v11 = vld [vmem:[%s21327_s8 + $0x10] sm:$0xf] }
 0x3fc   : > { %v17109_v17 = vcombine.low %v7254_v24, %v7264_v28  ;;  %v12624_v18 = vrot.slane %v12622_v37, 4  ;;  %v7654_v3 = vsel %vm21791_vm6, %v17130_v15, %v7653_v58  ;;  %v7655_v46 = vrot.slane %v7653_v58, 4  ;;  %v7589_v37 = vld [vmem:[%s21327_s8 + $0x18] sm:$0xe]  ;;  %v7590_v24 = vld [vmem:[%s21327_s8 + $0x24] sm:$0xe] }
 0x3fd   : > { %19120 = vmatprep.mubr.msk.bf16.mxu0 %vm930_vm3, %v17108_v42  ;;  %19529 = vmatmul.mubr.bf16.gmra.mrb[28].mxu1 %v17781_v35  ;;  %v7656_v57 = vrot.slane %v21036_v49, 5  ;;  %v17131_v59 = vrot.slane %v7588_v20, 9  ;;  %v7660_v23 = vrot.slane %v21037_v11, 5  ;;  %v7663_v45 = vrot.slane %v21038_v16, 5  ;;  %v21041_v20 = vld [vmem:[#allocation2 + $0x7c] sm:$0xf] }
 0x3fe   : > { %19121 = vmatmul.mubr.msk.bf16.gmra.mrb[60].mxu0 %vm930_vm3, %v17109_v17  ;;  %v12626_v21 = vsel %vm21791_vm6, %v12624_v18, %v12625_v56  ;;  %v17751_v51 = vrot.slane %v12509_v43, 9  ;;  %v12629_v33 = vrot.slane %v21039_v12, 5  ;;  %v21040_v56 = vld [vmem:[#allocation2 + $0x74] sm:$0x1]  ;;  %v17752_v58 = vrot.slane %v12510_v54, 9  ;;  %v20875_v12 = vld [vmem:[%s27212_s5 + $0x68] sm:$0xff]  }
 0x3ff   : > { %v17782_v34 = vcombine.low %v12623_v19, %v12626_v21  ;;  %v7657_v2 = vsel %vm21791_vm6, %v7655_v46, %v7656_v57  ;;  %v7661_v9 = vsel %vm21791_vm6, %v17131_v59, %v7660_v23  ;;  %v7662_v40 = vrot.slane %v7660_v23, 4  ;;  %v21042_v17 = vld [vmem:[%s21327_s8 + $0x1c] sm:$0xf]  ;;  %v21043_v46 = vld [vmem:[#allocation2 + $0x80] sm:$0x1] }
 0x400   : > { %v17154_v1 = vcombine.low %v7654_v3, %v7657_v2  ;;  %v12631_v38 = vrot.slane %v12629_v33, 4  ;;  %v12632_v8 = vrot.slane %v21040_v56, 5  ;;  %v12630_v14 = vsel %vm21791_vm6, %v17751_v51, %v12629_v33  ;;  %v21044_v57 = vld [vmem:[%s21327_s8 + $0x20] sm:$0x1]  ;;  %v12511_v11 = vld [vmem:[#allocation2 + $0x84] sm:$0xe] }
 0x401   : > { %19532 = vmatprep.mubr.bf16.mxu1 %v17782_v34  ;;  %v7664_v15 = vsel %vm21791_vm6, %v7662_v40, %v7663_v45  ;;  %v12636_v42 = vrot.slane %v21041_v20, 5  ;;  %v17132_v43 = vrot.slane %v7589_v37, 9  ;;  %v7667_v19 = vrot.slane %v21042_v17, 5  ;;  %v21045_v45 = vld [vmem:[%s21327_s8 + $0x28] sm:$0xf] }
 0x402   : > { %19132 = vmatprep.mubr.msk.bf16.mxu0 %vm930_vm3, %v17154_v1  ;;  %v17155_v28 = vcombine.low %v7661_v9, %v7664_v15  ;;  %v12633_v35 = vsel %vm21791_vm6, %v12631_v38, %v12632_v8  ;;  %v12639_v49 = vrot.slane %v21043_v46, 5  ;;  %v7670_v59 = vrot.slane %v21044_v57, 5  ;;  %v21046_v34 = vld [vmem:[%s21327_s8 + $0x2c] sm:$0x1]  ;;  %v21047_v9 = vld [vmem:[#allocation2 + $0x88] sm:$0xf] }
 0x403   : > { %v17783_v18 = vcombine.low %v12630_v14, %v12633_v35  ;;  %v12638_v3 = vrot.slane %v12636_v42, 4  ;;  %v7668_v23 = vsel %vm21791_vm6, %v17132_v43, %v7667_v19  ;;  %v7669_v21 = vrot.slane %v7667_v19, 4  ;;  %v12512_v37 = vld [vmem:[#allocation2 + $0x90] sm:$0xe]  ;;  %v21049_v17 = vld [vmem:[#allocation2 + $0x94] sm:$0xf] }
 0x404   : > { %v17133_v16 = vrot.slane %v7590_v24, 9  ;;  %v7674_v51 = vrot.slane %v21045_v45, 5  ;;  %v12637_v33 = vsel %vm21791_vm6, %v17752_v58, %v12636_v42  ;;  %v7677_v2 = vrot.slane %v21046_v34, 5  ;;  %v7591_v15 = vld [vmem:[%s21327_s8 + $0x30] sm:$0xe] }
 0x405   : > { %19533 = vmatmul.mubr.bf16.gmra.mrb[0].mxu1 %v17783_v18  ;;  %v12640_v54 = vsel %vm21791_vm6, %v12638_v3, %v12639_v49  ;;  %v12643_v40 = vrot.slane %v21047_v9, 5  ;;  %v7671_v38 = vsel %vm21791_vm6, %v7669_v21, %v7670_v59  ;;  %v17753_v8 = vrot.slane %v12511_v11, 9  ;;  %v21048_v42 = vld [vmem:[#allocation2 + $0x8c] sm:$0x1]  ;;  %v7592_v18 = vld [vmem:[%s21327_s8 + $0x3c] sm:$0xe] }
 0x406   : > { %19133 = vmatmul.mubr.msk.bf16.vlgmr.msra.gmra.mrb[32].mxu0 %vm930_vm3, %v17155_v28  ;;  %v17784_v1 = vcombine.low %v12637_v33, %v12640_v54  ;;  %v7676_v56 = vrot.slane %v7674_v51, 4  ;;  %v17156_v14 = vcombine.low %v7668_v23, %v7671_v38  ;;  %v7675_v58 = vsel %vm21791_vm6, %v17133_v16, %v7674_v51  ;;  %v20879_v3 = vld [vmem:[%s27212_s5 + $0x70] sm:$0xff]   ;;  %v21050_v46 = vld [vmem:[#allocation2 + $0x98] sm:$0x1]  ;;  %v12513_v33 = vld [vmem:[#allocation2 + $0x9c] sm:$0xe] }
 0x407   : > { %v12645_v20 = vrot.slane %v12643_v40, 4  ;;  %v12646_v24 = vrot.slane %v21048_v42, 5  ;;  %19165 = vmatpush3.bf16.msra.mxu0 %v25402_v26  ;;  %v12644_v35 = vsel %vm21791_vm6, %v17753_v8, %v12643_v40  ;;  %v17754_v43 = vrot.slane %v12512_v37, 9  ;;  %v21051_v59 = vld [vmem:[%s21327_s8 + $0x34] sm:$0xf] }
 0x408   : > { %19536 = vmatprep.mubr.bf16.mxu1 %v17784_v1  ;;  %v7678_v28 = vsel %vm21791_vm6, %v7676_v56, %v7677_v2  ;;  %v12650_v19 = vrot.slane %v21049_v17, 5  ;;  %19166 = vmatprep.subr.bf16.mxu0 %v20875_v12  ;;  %v12653_v49 = vrot.slane %v21050_v46, 5  ;;  %v17134_v57 = vrot.slane %v7591_v15, 9  ;;  %v21052_v45 = vld [vmem:[%s21327_s8 + $0x38] sm:$0x1] }
 0x409   : > { %19136 = vmatprep.mubr.msk.bf16.mxu0 %vm930_vm3, %v17156_v14  ;;  %v12647_v26 = vsel %vm21791_vm6, %v12645_v20, %v12646_v24  ;;  %v7681_v11 = vrot.slane %v21051_v59, 5  ;;  %v17157_v23 = vcombine.low %v7675_v58, %v7678_v28  ;;  %v7684_v51 = vrot.slane %v21052_v45, 5  ;;  %v21053_v9 = vld [vmem:[%s21327_s8 + $0x40] sm:$0xf]  ;;  %v21054_v38 = vld [vmem:[%s21327_s8 + $0x44] sm:$0x1] }
 0x40a   : > { %v17785_v21 = vcombine.low %v12644_v35, %v12647_v26  ;;  %v12652_v16 = vrot.slane %v12650_v19, 4  ;;  %v17135_v2 = vrot.slane %v7592_v18, 9  ;;  %v7688_v40 = vrot.slane %v21053_v9, 5  ;;  %v12514_v15 = vld [vmem:[#allocation2 + $0xa8] sm:$0xe]  ;;  %v20880_v14 = vld [vmem:[%s27212_s5 + $0x78] sm:$0xff]  }
 0x40b   : > { %v7682_v54 = vsel %vm21791_vm6, %v17134_v57, %v7681_v11  ;;  %v7683_v34 = vrot.slane %v7681_v11, 4  ;;  %19167 = vmatpush3.bf16.msra.mxu0 %v20875_v12  ;;  %v12651_v37 = vsel %vm21791_vm6, %v17754_v43, %v12650_v19  ;;  %v7691_v56 = vrot.slane %v21054_v38, 5  ;;  %v7593_v24 = vld [vmem:[%s21327_s8 + $0x48] sm:$0xe]  ;;  %v21055_v43 = vld [vmem:[#allocation2 + $0xa4] sm:$0x1] }
 0x40c   : > { %v12654_v1 = vsel %vm21791_vm6, %v12652_v16, %v12653_v49  ;;  %v12657_v8 = vrot.slane %v25389_v10, 5  ;;  %19168 = vmatprep.subr.bf16.mxu0 %v20879_v3  ;;  %v7690_v20 = vrot.slane %v7688_v40, 4  ;;  %v17755_v42 = vrot.slane %v12513_v33, 9  ;;  %v7594_v49 = vld [vmem:[%s21327_s8 + $0x54] sm:$0xe] }
 0x40d   : > { %19537 = vmatmul.mubr.bf16.gmra.mrb[4].mxu1 %v17785_v21  ;;  %v17786_v58 = vcombine.low %v12651_v37, %v12654_v1  ;;  %v7685_v12 = vsel %vm21791_vm6, %v7683_v34, %v7684_v51  ;;  %v7689_v10 = vsel %vm21791_vm6, %v17135_v2, %v7688_v40  ;;  %v12660_v17 = vrot.slane %v21055_v43, 5 }
 0x40e   : > { %19137 = vmatmul.mubr.msk.bf16.gmra.mrb[36].mxu0 %vm930_vm3, %v17157_v23  ;;  %v17158_v28 = vcombine.low %v7682_v54, %v7685_v12  ;;  %v12659_v35 = vrot.slane %v12657_v8, 4  ;;  %v7692_v19 = vsel %vm21791_vm6, %v7690_v20, %v7691_v56  ;;  %v12658_v18 = vsel %vm21791_vm6, %v17755_v42, %v12657_v8  ;;  %v25749_v56 = vld [vmem:[%s27212_s5 + $0x80] sm:$0xff]   ;;  %v7597_v42 = vld [vmem:[%s21327_s8 + $0x78] sm:$0xe] }
 0x40f   : > { %19540 = vmatprep.mubr.bf16.mxu1 %v17786_v58  ;;  %v17756_v26 = vrot.slane %v12514_v15, 9  ;;  %v12664_v46 = vrot.slane %v25397_v7, 5  ;;  %19169 = vmatpush3.bf16.msra.mxu0 %v20879_v3  ;;  %v12667_v59 = vrot.slane %v25407_v62, 5  ;;  %v17136_v11 = vrot.slane %v7593_v24, 9  ;;  %v12515_v7 = vld [vmem:[#allocation2 + $0xb4] sm:$0xe] }
 0x410   : > { %19140 = vmatprep.mubr.msk.bf16.mxu0 %vm930_vm3, %v17158_v28  ;;  %v12661_v57 = vsel %vm21791_vm6, %v12659_v35, %v12660_v17  ;;  %v7695_v23 = vrot.slane %v25416_v6, 5  ;;  %19170 = vmatprep.subr.bf16.mxu0 %v20880_v14  ;;  %v17159_v21 = vcombine.low %v7689_v10, %v7692_v19  ;;  %v7698_v51 = vrot.slane %v25422_v13, 5  ;;  %v7595_v13 = vld [vmem:[%s21327_s8 + $0x60] sm:$0xe]  ;;  %v7598_v10 = vld [vmem:[%s21327_s8 + $0x84] sm:$0xe] }
 0x411   : > { %v17787_v16 = vcombine.low %v12658_v18, %v12661_v57  ;;  %v12666_v45 = vrot.slane %v12664_v46, 4  ;;  %v17137_v54 = vrot.slane %v7594_v49, 9  ;;  %v7702_v34 = vrot.slane %v25432_v5, 5  ;;  %v7596_v5 = vld [vmem:[%s21327_s8 + $0x6c] sm:$0xe] }
 0x412   : > { %v7696_v3 = vsel %vm21791_vm6, %v17136_v11, %v7695_v23  ;;  %v7697_v33 = vrot.slane %v7695_v23, 4  ;;  %v12665_v62 = vsel %vm21791_vm6, %v17756_v26, %v12664_v46  ;;  %v7705_v2 = vrot.slane %v25437_v50, 5 }
 0x413   : > { %v12668_v6 = vsel %vm21791_vm6, %v12666_v45, %v12667_v59  ;;  %v12671_v9 = vrot.slane %v25443_v63, 5  ;;  %19171 = vmatpush3.bf16.msra.mxu0 %v20880_v14  ;;  %v7704_v1 = vrot.slane %v7702_v34, 4  ;;  %v17757_v38 = vrot.slane %v12515_v7, 9  ;;  %v7599_v59 = vld [vmem:[%s21327_s8 + $0x90] sm:$0xe] }
 0x414   : > { %v17788_v40 = vcombine.low %v12665_v62, %v12668_v6  ;;  %v7699_v37 = vsel %vm21791_vm6, %v7697_v33, %v7698_v51  ;;  %19204 = vmatprep.subr.bf16.mxu0 %v25749_v56  ;;  %v7703_v63 = vsel %vm21791_vm6, %v17137_v54, %v7702_v34  ;;  %v12674_v15 = vrot.slane %v25448_v39, 5  ;;  %v20867_v45 = vld [vmem:[#allocation2 + $0xc] sm:$0xff]  }
 0x415   : > { %19541 = vmatmul.mubr.bf16.gmra.mrb[8].mxu1 %v17787_v16  ;;  %v17160_v50 = vcombine.low %v7696_v3, %v7699_v37  ;;  %v12673_v8 = vrot.slane %v12671_v9, 4  ;;  %v7706_v14 = vsel %vm21791_vm6, %v7704_v1, %v7705_v2  ;;  %v17138_v58 = vrot.slane %v7595_v13, 9  ;;  %v7600_v16 = vld [vmem:[%s21327_s8 + $0x9c] sm:$0xe]  ;;  %v7602_v2 = vld [vmem:[%s21327_s8 + $0xb4] sm:$0xe] }
 0x416   : > { %19141 = vmatmul.mubr.msk.bf16.gmra.mrb[40].mxu0 %vm930_vm3, %v17159_v21  ;;  %19544 = vmatprep.mubr.bf16.mxu1 %v17788_v40  ;;  %v7709_v12 = vrot.slane %v25455_v61, 5  ;;  %v7712_v20 = vrot.slane %v25463_v41, 5  ;;  %v12672_v24 = vsel %vm21791_vm6, %v17757_v38, %v12671_v9  ;;  %v17139_v28 = vrot.slane %v7596_v5, 9 }
 0x417   : > { %19144 = vmatprep.mubr.msk.bf16.mxu0 %vm930_vm3, %v17160_v50  ;;  %v7716_v39 = vrot.slane %v25470_v52, 5  ;;  %v12675_v35 = vsel %vm21791_vm6, %v12673_v8, %v12674_v15  ;;  %v7719_v41 = vrot.slane %v25478_v53, 5  ;;  %v17161_v17 = vcombine.low %v7703_v63, %v7706_v14  ;;  %v20869_v15 = vld [vmem:[#allocation2 + $0x18] sm:$0xff]  }
 0x418   : > { %v7710_v43 = vsel %vm21791_vm6, %v17138_v58, %v7709_v12  ;;  %v7711_v61 = vrot.slane %v7709_v12, 4  ;;  %v17140_v18 = vrot.slane %v7597_v42, 9  ;;  %v7723_v26 = vrot.slane %v25493_v4, 5 }
 0x419   : > { %v7718_v19 = vrot.slane %v7716_v39, 4  ;;  %v7726_v52 = vrot.slane %v25498_v44, 5  ;;  %v17141_v49 = vrot.slane %v7598_v10, 9  ;;  %v7730_v57 = vrot.slane %v25514_v55, 5  ;;  %v7601_v10 = vld [vmem:[%s21327_s8 + $0xa8] sm:$0xe] }
 0x41a   : > { %v7713_v46 = vsel %vm21791_vm6, %v7711_v61, %v7712_v20  ;;  %v17789_v11 = vcombine.low %v12672_v24, %v12675_v35  ;;  %v7717_v21 = vsel %vm21791_vm6, %v17139_v28, %v7716_v39  ;;  %v7725_v53 = vrot.slane %v7723_v26, 4  ;;  %v20870_v20 = vld [vmem:[#allocation2 + $0x24] sm:$0xff]   ;;  %v13384_v24 = vld [vmem:[#allocation2 + $0xc] sm:$0xf]  ;;  %v13385_v39 = vld [vmem:[#allocation2 + $0x10] sm:$0xf] }
 0x41b   : > { %v17162_v23 = vcombine.low %v7710_v43, %v7713_v46  ;;  %v7720_v4 = vsel %vm21791_vm6, %v7718_v19, %v7719_v41  ;;  %v25784_v51 = vsel %vm21791_vm6, %v17141_v49, %v7730_v57  ;;  %v7732_v44 = vrot.slane %v7730_v57, 4  ;;  %v20872_v19 = vld [vmem:[#allocation2 + $0x30] sm:$0xff]   ;;  %v20881_v49 = vld [vmem:[%s27210_s3 + $0x118] sm:$0xff]  }
 0x41c   : > { %v7733_v55 = vrot.slane %v25520_v25, 5  ;;  %v7724_v7 = vsel %vm21791_vm6, %v17140_v18, %v7723_v26  ;;  %v17142_v3 = vrot.slane %v7599_v59, 9  ;;  %v7737_v33 = vrot.slane %v25538_v48, 5  ;;  %v20873_v26 = vld [vmem:[#allocation2 + $0x3c] sm:$0xff]  }
 0x41d   : > { %19545 = vmatmul.mubr.bf16.gmra.mrb[12].mxu1 %v17789_v11  ;;  %v7740_v54 = vrot.slane %v25543_v22, 5  ;;  %v7727_v34 = vsel %vm21791_vm6, %v7725_v53, %v7726_v52  ;;  %v17143_v6 = vrot.slane %v7600_v16, 9  ;;  %v7744_v25 = vrot.slane %v25556_v31, 5  ;;  %v13386_v16 = vld [vmem:[#allocation2 + $0x14] sm:$0x1] }
 0x41e   : > { %19145 = vmatmul.mubr.msk.bf16.gmra.mrb[44].mxu0 %vm930_vm3, %v17161_v17  ;;  %19564 = vmatprep.mubr.bf16.mxu1 %v20867_v45  ;;  %v7734_v62 = vsel %vm21791_vm6, %v7732_v44, %v7733_v55  ;;  %v7738_v48 = vsel %vm21791_vm6, %v17142_v3, %v7737_v33  ;;  %v7739_v22 = vrot.slane %v7737_v33, 4  ;;  %v7747_v13 = vrot.slane %v25561_v0, 5  ;;  %v13389_v45 = vld [vmem:[#allocation2 + $0x20] sm:$0x1]  ;;  %v13390_v3 = vld [vmem:[#allocation2 + $0x24] sm:$0xf] }
 0x41f   : > { %19148 = vmatprep.mubr.msk.bf16.mxu0 %vm930_vm3, %v17162_v23  ;;  %v17165_v9 = vcombine.low %v25784_v51, %v7734_v62  ;;  %v25805_v40 = vsel %vm21791_vm6, %v17143_v6, %v7744_v25  ;;  %v7746_v37 = vrot.slane %v7744_v25, 4  ;;  %v17145_v31 = vrot.slane %v7602_v2, 9  ;;  %v13388_v23 = vld [vmem:[#allocation2 + $0x1c] sm:$0xf]  ;;  %v20886_v51 = vld [vmem:[%s27210_s3 + $0x120] sm:$0xff]   ;;  %v20877_v25 = vld [vmem:[#allocation2 + $0x48] sm:$0xff]  }
 0x420   : > { %v7741_v1 = vsel %vm21791_vm6, %v7739_v22, %v7740_v54  ;;  %v7758_v38 = vrot.slane %v25611_v60, 5  ;;  %v17163_v5 = vcombine.low %v7717_v21, %v7720_v4  ;;  %v17164_v50 = vcombine.low %v7724_v7, %v7727_v34  ;;  %v20871_v60 = vld [vmem:[%s27210_s3 + $0x108] sm:$0xff]   ;;  %v13393_v6 = vld [vmem:[#allocation2 + $0x30] sm:$0xf] }
 0x421   : > { %v17166_v63 = vcombine.low %v7738_v48, %v7741_v1  ;;  %v25812_v8 = vsel %vm21791_vm6, %v7746_v37, %v7747_v13  ;;  %v7761_v12 = vrot.slane %v25614_v29, 5  ;;  %v20876_v29 = vld [vmem:[%s27210_s3 + $0x110] sm:$0xff]   ;;  %v7751_v35 = vrot.slane %v25592_v36, 5  ;;  %v13391_v62 = vld [vmem:[#allocation2 + $0x28] sm:$0xf] }
 0x422   : > { %v17167_v0 = vcombine.low %v25805_v40, %v25812_v8  ;;  %v25818_v14 = vsel %vm21791_vm6, %v17145_v31, %v7758_v38  ;;  %v7760_v58 = vrot.slane %v7758_v38, 4  ;;  %v13433_v43 = vshrl.u32 %v13384_v24, 16  ;;  %v13394_v13 = vld [vmem:[#allocation2 + $0x34] sm:$0xf]  ;;  %v20891_v1 = vld [vmem:[%s27210_s3 + $0x128] sm:$0xff]  }
 0x423   : > { %v13436_v61 = vshll.u32 %v13384_v24, 16  ;;  %v13442_v41 = vshll.u32 %v13385_v39, 16  ;;  %v13446_v17 = vshrl.u32 %v13385_v39, 16  ;;  %v17144_v18 = vrot.slane %v7601_v10, 9  ;;  %v20878_v37 = vld [vmem:[#allocation2 + $0x54] sm:$0xff]  }
 0x424   : > { %v25826_v42 = vsel %vm21791_vm6, %v7760_v58, %v7761_v12  ;;  %v7753_v46 = vrot.slane %v7751_v35, 4  ;;  %v7754_v52 = vrot.slane %v25597_v32, 5  ;;  %v13435_v57 = vrot.slane %v13433_v43, 4  ;;  %v13397_v12 = vld [vmem:[#allocation2 + $0x40] sm:$0xf]  ;;  %v20896_v40 = vld [vmem:[%s27210_s3 + $0x130] sm:$0xff]  }
 0x425   : > { %19565 = vmatmul.mubr.bf16.vlgmr.msra.gmra.mrb[16].mxu1 %v20869_v15  ;;  %v17169_v28 = vcombine.low %v25818_v14, %v25826_v42  ;;  %v13438_v59 = vrot.slane %v13436_v61, 5  ;;  %v25842_v36 = vrot.slane %v13442_v41, 5  ;;  %v13448_v11 = vrot.slane %v13446_v17, 4  ;;  %v13396_v41 = vld [vmem:[#allocation2 + $0x3c] sm:$0xf]  ;;  %v25907_v14 = vld [vmem:[%s27210_s3 + $0x140] sm:$0xff]  }
 0x426   : > { %19149 = vmatmul.mubr.msk.bf16.gmra.mrb[48].mxu0 %vm930_vm3, %v17163_v5  ;;  %19597 = vmatpush3.bf16.msra.mxu1 %v25628_v27  ;;  %v13387_v27 = vld [vmem:[#allocation2 + $0x18] sm:$0xf]  ;;  %v7752_v32 = vsel %vm21791_vm6, %v17144_v18, %v7751_v35  ;;  %v7755_v4 = vsel %vm21791_vm6, %v7753_v46, %v7754_v52  ;;  %v13466_v55 = vshll.u32 %v13388_v23, 16  ;;  %v13470_v7 = vshrl.u32 %v13388_v23, 16  ;;  %v25866_v35 = vld [vmem:[#allocation2 + $0x2c] sm:$0x1] }
 0x427   : > { %19568 = vmatprep.mubr.bf16.mxu1 %v20870_v20  ;;  %19152 = vmatprep.mubr.msk.bf16.mxu0 %vm930_vm3, %v17164_v50  ;;  %v13457_v21 = vshrl.u32 %v13387_v27, 16  ;;  %v13460_v53 = vshll.u32 %v13387_v27, 16  ;;  %v13439_v44 = vor.u32 %v13438_v59, %v13435_v57  ;;  %v13449_v33 = vor.u32 %v13448_v11, %v25842_v36  ;;  %v13398_v42 = vld [vmem:[#allocation2 + $0x44] sm:$0x1] }
 0x428   : > { %19598 = vmatprep.subr.bf16.mxu1 %v20871_v60  ;;  %v17168_v2 = vcombine.low %v7752_v32, %v7755_v4  ;;  %v13476_v48 = vshll.u32 %v13389_v45, 16  ;;  %v13481_v22 = vshrl.u32 %v13390_v3, 16  ;;  %v25857_v38 = vrot.slane %v13466_v55, 5 }
 0x429   : > { %v13459_v54 = vrot.slane %v13457_v21, 4  ;;  %v13462_v34 = vrot.slane %v13460_v53, 5  ;;  %v13440_v31 = vrot.slane %v13439_v44, 4  ;;  %v13472_v5 = vrot.slane %v13470_v7, 4  ;;  %v20882_v21 = vld [vmem:[#allocation2 + $0x60] sm:$0xff]   ;;  %v20884_v53 = vld [vmem:[%s21327_s8 + $0xc] sm:$0xff]  }
 0x42a   : > { %19599 = vmatpush3.bf16.msra.mxu1 %v20871_v60  ;;  %v13450_v50 = vrot.slane %v13449_v33, 4  ;;  %v13484_v15 = vshll.u32 %v13390_v3, 16  ;;  %v13490_v58 = vshll.u32 %v13391_v62, 16  ;;  %v13494_v60 = vshrl.u32 %v13391_v62, 16  ;;  %v20901_v44 = vld [vmem:[%s27210_s3 + $0x138] sm:$0xff]  }
 0x42b   : > { %19600 = vmatprep.subr.bf16.mxu1 %v20876_v29  ;;  %v13505_v20 = vshrl.u32 %v13393_v6, 16  ;;  %v13508_v24 = vshll.u32 %v13393_v6, 16  ;;  %v13514_v39 = vshll.u32 %v13394_v13, 16  ;;  %v25864_v10 = vrot.slane %v13476_v48, 5 }
 0x42c   : > { %v25868_v43 = vrot.slane %v13481_v22, 4  ;;  %v13518_v61 = vshrl.u32 %v13394_v13, 16  ;;  %v13445_v8 = vsel %vm21362_vm2, %v13440_v31, %v25842_v36  ;;  %v13538_v17 = vshll.u32 %v13397_v12, 16  ;;  %v13400_v36 = vld [vmem:[#allocation2 + $0x4c] sm:$0xf] }
 0x42d   : > { %19569 = vmatmul.mubr.bf16.gmra.mrb[20].mxu1 %v20872_v19  ;;  %v13542_v27 = vshrl.u32 %v13397_v12, 16  ;;  %v13399_v19 = vld [vmem:[#allocation2 + $0x48] sm:$0xf]  ;;  %v13486_v46 = vrot.slane %v13484_v15, 5  ;;  %v25881_v52 = vrot.slane %v13490_v58, 5  ;;  %v13496_v57 = vrot.slane %v13494_v60, 4 }
 0x42e   : > { %19153 = vmatmul.mubr.msk.bf16.gmra.mrb[52].mxu0 %vm930_vm3, %v17165_v9  ;;  %19572 = vmatprep.mubr.bf16.mxu1 %v20873_v26  ;;  %v13452_v9 = vshll.u32 %v13386_v16, 16  ;;  %v13507_v59 = vrot.slane %v13505_v20, 4  ;;  %v13510_v11 = vrot.slane %v13508_v24, 5  ;;  %v25883_v23 = vrot.slane %v13514_v39, 5  ;;  %v13403_v13 = vld [vmem:[#allocation2 + $0x58] sm:$0xf] }
 0x42f   : > { %19156 = vmatprep.mubr.msk.bf16.mxu0 %vm930_vm3, %v17166_v63  ;;  %19601 = vmatpush3.bf16.msra.mxu1 %v20876_v29  ;;  %v13463_v63 = vor.u32 %v13462_v34, %v13459_v54  ;;  %v13520_v32 = vrot.slane %v13518_v61, 4  ;;  %v13529_v16 = vshrl.u32 %v13396_v41, 16  ;;  %v13532_v45 = vshll.u32 %v13396_v41, 16  ;;  %v20885_v24 = vld [vmem:[%s21327_s8 + $0x18] sm:$0xff]   ;;  %v20889_v41 = vld [vmem:[%s21327_s8 + $0x24] sm:$0xff]  }
 0x430   : > { %19602 = vmatprep.subr.bf16.mxu1 %v20881_v49  ;;  %v13454_v29 = vrot.slane %v13452_v9, 5  ;;  %v13553_v4 = vshrl.u32 %v13399_v19, 16  ;;  %v13500_v55 = vshll.u32 %v25866_v35, 16  ;;  %v25890_v7 = vrot.slane %v13538_v17, 5  ;;  %v20887_v61 = vld [vmem:[#allocation2 + $0x78] sm:$0xff]  }
 0x431   : > { %v25879_v26 = vrot.slane %v13463_v63, 4  ;;  %v13544_v3 = vrot.slane %v13542_v27, 4  ;;  %v13556_v33 = vshll.u32 %v13399_v19, 16  ;;  %v13562_v62 = vshll.u32 %v13400_v36, 16  ;;  %v20888_v27 = vld [vmem:[#allocation2 + $0x84] sm:$0xff]  }
 0x432   : > { %v13455_v18 = vsel %vm21362_vm2, %v13450_v50, %v13454_v29  ;;  %v13566_v6 = vshrl.u32 %v13400_v36, 16  ;;  %v13497_v9 = vor.u32 %v13496_v57, %v25881_v52  ;;  %v13511_v48 = vor.u32 %v13510_v11, %v13507_v59  ;;  %v13405_v36 = vld [vmem:[#allocation2 + $0x60] sm:$0xf] }
 0x433   : > { %19603 = vmatpush3.bf16.msra.mxu1 %v20881_v49  ;;  %v13395_v49 = vld [vmem:[#allocation2 + $0x38] sm:$0x1]  ;;  %v25892_v54 = vcombine.low %v13445_v8, %v13455_v18  ;;  %v13534_v31 = vrot.slane %v13532_v45, 5  ;;  %v13558_v50 = vrot.slane %v13556_v33, 5  ;;  %v25910_v58 = vrot.slane %v13562_v62, 5 }
 0x434   : > { %19604 = vmatprep.subr.bf16.mxu1 %v20886_v51  ;;  %v13524_v22 = vshll.u32 %v13395_v49, 16  ;;  %v13568_v12 = vrot.slane %v13566_v6, 4  ;;  %v13586_v60 = vshll.u32 %v13403_v13, 16  ;;  %v13590_v20 = vshrl.u32 %v13403_v13, 16  ;;  %v13401_v18 = vld [vmem:[#allocation2 + $0x50] sm:$0x1] }
 0x435   : > { %19573 = vmatmul.mubr.bf16.gmra.mrb[24].mxu1 %v20877_v25  ;;  %v13402_v25 = vld [vmem:[#allocation2 + $0x54] sm:$0xf]  ;;  %v13469_v39 = vsel %vm21362_vm2, %v25879_v26, %v25857_v38  ;;  %v13498_v35 = vrot.slane %v13497_v9, 4  ;;  %v13548_v17 = vshll.u32 %v13398_v42, 16  ;;  %v13512_v19 = vrot.slane %v13511_v48, 4 }
 0x436   : > { %19157 = vmatmul.mubr.msk.bf16.gmra.mrb[56].mxu0 %vm930_vm3, %v17167_v0  ;;  %19576 = vmatprep.mubr.bf16.mxu1 %v20878_v37  ;;  %v13473_v0 = vor.u32 %v13472_v5, %v25857_v38  ;;  %v13521_v37 = vor.u32 %v13520_v32, %v25883_v23  ;;  %v13555_v5 = vrot.slane %v13553_v4, 4  ;;  %v13577_v63 = vshrl.u32 %v13402_v25, 16 }
 0x437   : > { %19160 = vmatprep.mubr.msk.bf16.mxu0 %vm930_vm3, %v17168_v2  ;;  %19605 = vmatpush3.bf16.msra.mxu1 %v20886_v51  ;;  %v20883_v51 = vld [vmem:[#allocation2 + $0x6c] sm:$0xff]   ;;  %v13487_v2 = vor.u32 %v13486_v46, %v25868_v43  ;;  %v13580_v15 = vshll.u32 %v13402_v25, 16  ;;  %v13502_v43 = vrot.slane %v13500_v55, 5  ;;  %v13526_v8 = vrot.slane %v13524_v22, 5 }
 0x438   : > { %19606 = vmatprep.subr.bf16.mxu1 %v20891_v1  ;;  %v25894_v34 = vrot.slane %v13473_v0, 4  ;;  %v13559_v46 = vor.u32 %v13558_v50, %v13555_v5  ;;  %v13579_v49 = vrot.slane %v13577_v63, 4  ;;  %v13569_v26 = vor.u32 %v13568_v12, %v25910_v58  ;;  %v17266_v50 = vld [vmem:[%s21327_s8 + $0xc] sm:$0xf]  ;;  %v20893_v63 = vld [vmem:[#allocation2 + $0x9c] sm:$0xff]  }
 0x439   : > { %v13488_v29 = vrot.slane %v13487_v2, 4  ;;  %v13582_v57 = vrot.slane %v13580_v15, 5  ;;  %v25920_v59 = vrot.slane %v13586_v60, 5  ;;  %v13592_v11 = vrot.slane %v13590_v20, 4  ;;  %v20890_v2 = vld [vmem:[%s21327_s8 + $0x30] sm:$0xff]  }
 0x43a   : > { %v13503_v32 = vsel %vm21362_vm2, %v13498_v35, %v13502_v43  ;;  %v13550_v4 = vrot.slane %v13548_v17, 5  ;;  %v13601_v33 = vshrl.u32 %v13405_v36, 16  ;;  %v13570_v6 = vrot.slane %v13569_v26, 4  ;;  %v21058_v60 = vld [vmem:[%s27212_s5 + $0x90] sm:$0xff]   ;;  %v25971_v35 = vld [vmem:[#allocation2 + $0x68] sm:$0x1] }
 0x43b   : > { %19607 = vmatpush3.bf16.msra.mxu1 %v20891_v1  ;;  %v13531_v1 = vrot.slane %v13529_v16, 4  ;;  %v13583_v55 = vor.u32 %v13582_v57, %v13579_v49  ;;  %v13593_v25 = vor.u32 %v13592_v11, %v25920_v59  ;;  %v13620_v11 = vshll.u32 %v25971_v35, 16 }
 0x43c   : > { %19608 = vmatprep.subr.bf16.mxu1 %v20896_v40  ;;  %v25962_v20 = vrot.slane %v13601_v33, 4 }
 0x43d   : > { %19577 = vmatmul.mubr.bf16.gmra.mrb[28].mxu1 %v20882_v21  ;;  %v13535_v0 = vor.u32 %v13534_v31, %v13531_v1  ;;  %v13479_v21 = vsel %vm21362_vm2, %v25894_v34, %v25864_v10  ;;  %v13517_v10 = vsel %vm21362_vm2, %v13512_v19, %v25883_v23  ;;  %v13604_v34 = vshll.u32 %v13405_v36, 16  ;;  %v20892_v23 = vld [vmem:[#allocation2 + $0x90] sm:$0xff]   ;;  %v20894_v1 = vld [vmem:[%s21327_s8 + $0x3c] sm:$0xff]  }
 0x43e   : > { %19161 = vmatmul.mubr.msk.bf16.gmra.mrb[60].mxu0 %vm930_vm3, %v17169_v28  ;;  %19580 = vmatprep.mubr.bf16.mxu1 %v20883_v51  ;;  %v13545_v28 = vor.u32 %v13544_v3, %v25890_v7  ;;  %v13572_v51 = vshll.u32 %v13401_v18, 16  ;;  %v13406_v3 = vld [vmem:[#allocation2 + $0x64] sm:$0xf]  ;;  %v25946_v9 = vcombine.low %v13469_v39, %v13479_v21  ;;  %v13584_v12 = vrot.slane %v13583_v55, 4  ;;  %v25990_v36 = vld [vmem:[#allocation2 + $0x7c] sm:$0xf] }
 0x43f   : > { %19172 = vmatprep.mubr.msk.bf16.mxu0 %vm930_vm3, %v20884_v53  ;;  %19609 = vmatpush3.bf16.msra.mxu1 %v20896_v40  ;;  %v13522_v40 = vrot.slane %v13521_v37, 4  ;;  %v13493_v53 = vsel %vm21362_vm2, %v13488_v29, %v25881_v52  ;;  %v13536_v45 = vrot.slane %v13535_v0, 4  ;;  %v21057_v52 = vld [vmem:[%s27212_s5 + $0x88] sm:$0xff]   ;;  %v13409_v37 = vld [vmem:[#allocation2 + $0x70] sm:$0xf]  ;;  %v13610_v42 = vshll.u32 %v13406_v3, 16 }
 0x440   : > { %19610 = vmatprep.subr.bf16.mxu1 %v20901_v44  ;;  %v13546_v38 = vrot.slane %v13545_v28, 4  ;;  %v25948_v48 = vcombine.low %v13493_v53, %v13503_v32  ;;  %v13574_v5 = vrot.slane %v13572_v51, 5  ;;  %v13614_v28 = vshrl.u32 %v13406_v3, 16  ;;  %v25994_v53 = vld [vmem:[#allocation2 + $0x74] sm:$0x1] }
 0x441   : > { %v13527_v16 = vsel %vm21362_vm2, %v13522_v40, %v13526_v8  ;;  %v13541_v31 = vsel %vm21362_vm2, %v13536_v45, %v25890_v7  ;;  %v13594_v29 = vrot.slane %v13593_v25, 4  ;;  %v13634_v43 = vshll.u32 %v13409_v37, 16  ;;  %v20895_v45 = vld [vmem:[%s21327_s8 + $0x48] sm:$0xff]   ;;  %v20898_v55 = vld [vmem:[#allocation2 + $0xb4] sm:$0xff]  }
 0x442   : > { %v13551_v62 = vsel %vm21362_vm2, %v13546_v38, %v13550_v4  ;;  %v25950_v22 = vcombine.low %v13517_v10, %v13527_v16  ;;  %v13575_v39 = vsel %vm21362_vm2, %v13570_v6, %v13574_v5  ;;  %v13638_v40 = vshrl.u32 %v13409_v37, 16  ;;  %v21060_v38 = vld [vmem:[%s27212_s5 + $0x98] sm:$0xff]  }
 0x443   : > { %19611 = vmatpush3.bf16.msra.mxu1 %v20901_v44  ;;  %v13404_v44 = vld [vmem:[#allocation2 + $0x5c] sm:$0x1]  ;;  %v25957_v15 = vcombine.low %v13541_v31, %v13551_v62  ;;  %v8520_v8 = vshrl.u32 %v17266_v50, 16  ;;  %v8523_v0 = vshll.u32 %v17266_v50, 16  ;;  %v13616_v17 = vrot.slane %v13614_v28, 4  ;;  %v20899_v3 = vld [vmem:[%s21327_s8 + $0x54] sm:$0xff]  }
 0x444   : > { %19644 = vmatprep.subr.bf16.mxu1 %v25907_v14  ;;  %v13596_v13 = vshll.u32 %v13404_v44, 16  ;;  %v13589_v57 = vsel %vm21362_vm2, %v13584_v12, %v25920_v59  ;;  %v25996_v16 = vrot.slane %v13634_v43, 5  ;;  %v13640_v4 = vrot.slane %v13638_v40, 4  ;;  %v21061_v6 = vld [vmem:[%s21327_s8 + $0x1c] sm:$0xf] }
 0x445   : > { %19581 = vmatmul.mubr.bf16.gmra.mrb[0].mxu1 %v20887_v61  ;;  %v8522_v51 = vrot.slane %v8520_v8, 4  ;;  %v8525_v44 = vrot.slane %v8523_v0, 5  ;;  %v8553_v25 = vshll.u32 %v21061_v6, 16  ;;  %v13662_v37 = vshrl.u32 %v25990_v36, 16  ;;  %v20902_v0 = vld [vmem:[#allocation2 + $0xc0] sm:$0xff]  }
 0x446   : > { %19173 = vmatmul.mubr.msk.bf16.vlgmr.msra.gmra.mrb[32].mxu0 %vm930_vm3, %v20885_v24  ;;  %19584 = vmatprep.mubr.bf16.mxu1 %v20888_v27  ;;  %v25964_v24 = vrot.slane %v13604_v34, 5  ;;  %v13598_v61 = vrot.slane %v13596_v13, 5  ;;  %v21059_v27 = vld [vmem:[%s21327_s8 + $0x10] sm:$0xf]  ;;  %v13658_v13 = vshll.u32 %v25990_v36, 16  ;;  %v13641_v28 = vor.u32 %v13640_v4, %v25996_v16 }
 0x447   : > { %19176 = vmatprep.mubr.msk.bf16.mxu0 %vm930_vm3, %v20889_v41  ;;  %19205 = vmatpush3.bf16.msra.mxu0 %v25749_v56  ;;  %v13560_v56 = vrot.slane %v13559_v46, 4  ;;  %v13408_v41 = vld [vmem:[#allocation2 + $0x6c] sm:$0xf]  ;;  %v8529_v19 = vshll.u32 %v21059_v27, 16  ;;  %v8533_v18 = vshrl.u32 %v21059_v27, 16  ;;  %v8526_v50 = vor.u32 %v8525_v44, %v8522_v51 }
 0x448   : > { %19206 = vmatprep.subr.bf16.mxu0 %v21057_v52  ;;  %v17269_v46 = vld [vmem:[%s21327_s8 + $0x18] sm:$0xf]  ;;  %v13607_v26 = vor.u32 %v25964_v24, %v25962_v20  ;;  %v13599_v21 = vsel %vm21362_vm2, %v13594_v29, %v13598_v61  ;;  %v13625_v32 = vshrl.u32 %v13408_v41, 16  ;;  %v13628_v59 = vshll.u32 %v13408_v41, 16  ;;  %v26022_v44 = vld [vmem:[#allocation2 + $0x80] sm:$0x1] }
 0x449   : > { %v13565_v7 = vsel %vm21362_vm2, %v13560_v56, %v25910_v58  ;;  %v25975_v58 = vrot.slane %v13610_v42, 5  ;;  %v8544_v10 = vshrl.u32 %v17269_v46, 16  ;;  %v26001_v34 = vrot.slane %v8529_v19, 5 }
 0x44a   : > { %v25979_v49 = vcombine.low %v13565_v7, %v13575_v39  ;;  %v8535_v62 = vrot.slane %v8533_v18, 4  ;;  %v8547_v56 = vshll.u32 %v17269_v46, 16  ;;  %v13627_v31 = vrot.slane %v13625_v32, 4  ;;  %v13414_v7 = vld [vmem:[#allocation2 + $0x84] sm:$0xf] }
 0x44b   : > { %19207 = vmatpush3.bf16.msra.mxu0 %v21057_v52  ;;  %v20897_v52 = vld [vmem:[#allocation2 + $0xa8] sm:$0xff]   ;;  %v13617_v33 = vor.u32 %v13616_v17, %v25975_v58  ;;  %v13630_v5 = vrot.slane %v13628_v59, 5  ;;  %v13644_v42 = vshll.u32 %v25994_v53, 16  ;;  %v26014_v61 = vrot.slane %v8553_v25, 5  ;;  %v20900_v46 = vld [vmem:[%s21327_s8 + $0x60] sm:$0xff]  }
 0x44c   : > { %19208 = vmatprep.subr.bf16.mxu0 %v21058_v60  ;;  %v8536_v39 = vor.u32 %v8535_v62, %v26001_v34  ;;  %v8549_v29 = vrot.slane %v8547_v56, 5  ;;  %v26016_v40 = vrot.slane %v13658_v13, 5  ;;  %v13664_v8 = vrot.slane %v13662_v37, 4  ;;  %v26019_v59 = vld [vmem:[#allocation2 + $0x88] sm:$0xf] }
 0x44d   : > { %19585 = vmatmul.mubr.bf16.gmra.mrb[4].mxu1 %v20892_v23  ;;  %v13411_v23 = vld [vmem:[#allocation2 + $0x78] sm:$0xf]  ;;  %v13618_v17 = vrot.slane %v13617_v33, 4  ;;  %v13622_v27 = vrot.slane %v13620_v11, 5  ;;  %v13673_v19 = vshrl.u32 %v13414_v7, 16  ;;  %v13676_v18 = vshll.u32 %v13414_v7, 16 }
 0x44e   : > { %19177 = vmatmul.mubr.msk.bf16.gmra.mrb[36].mxu0 %vm930_vm3, %v20890_v2  ;;  %19588 = vmatprep.mubr.bf16.mxu1 %v20893_v63  ;;  %v8557_v2 = vshrl.u32 %v21061_v6, 16  ;;  %v21062_v63 = vld [vmem:[%s21327_s8 + $0x14] sm:$0x1]  ;;  %v13649_v35 = vshrl.u32 %v13411_v23, 16  ;;  %v13652_v43 = vshll.u32 %v13411_v23, 16  ;;  %v8527_v32 = vrot.slane %v8526_v50, 4 }
 0x44f   : > { %19180 = vmatprep.mubr.msk.bf16.mxu0 %vm930_vm3, %v20894_v1  ;;  %19209 = vmatpush3.bf16.msra.mxu0 %v21058_v60  ;;  %v26006_v1 = vcombine.low %v13589_v57, %v13599_v21  ;;  %v8539_v12 = vshll.u32 %v21062_v63, 16  ;;  %v8546_v60 = vrot.slane %v8544_v10, 4  ;;  %v13631_v57 = vor.u32 %v13630_v5, %v13627_v31  ;;  %v17272_v5 = vld [vmem:[%s21327_s8 + $0x24] sm:$0xf] }
 0x450   : > { %19210 = vmatprep.subr.bf16.mxu0 %v21060_v38  ;;  %v8559_v41 = vrot.slane %v8557_v2, 4  ;;  %v13646_v21 = vrot.slane %v13644_v42, 5  ;;  %v13651_v10 = vrot.slane %v13649_v35, 4  ;;  %v13665_v62 = vor.u32 %v13664_v8, %v26016_v40  ;;  %v20904_v35 = vld [vmem:[%s21327_s8 + $0x78] sm:$0xff]  }
 0x451   : > { %v8541_v4 = vrot.slane %v8539_v12, 5  ;;  %v8550_v51 = vor.u32 %v8549_v29, %v8546_v60  ;;  %v13675_v56 = vrot.slane %v13673_v19, 4  ;;  %v13678_v6 = vrot.slane %v13676_v18, 5  ;;  %v26046_v12 = vld [vmem:[#allocation2 + $0x8c] sm:$0x1] }
 0x452   : > { %v8560_v11 = vor.u32 %v8559_v41, %v26014_v61  ;;  %v13682_v25 = vshll.u32 %v26019_v59, 16  ;;  %v13686_v2 = vshrl.u32 %v26019_v59, 16  ;;  %v13608_v23 = vrot.slane %v13607_v26, 4 }
 0x453   : > { %19211 = vmatpush3.bf16.msra.mxu0 %v21060_v38  ;;  %v13642_v38 = vrot.slane %v13641_v28, 4  ;;  %v13623_v13 = vsel %vm21362_vm2, %v13618_v17, %v13622_v27  ;;  %v13632_v37 = vrot.slane %v13631_v57, 4  ;;  %v13668_v31 = vshll.u32 %v26022_v44, 16 }
 0x454   : > { %v8551_v28 = vrot.slane %v8550_v51, 4  ;;  %v8561_v26 = vrot.slane %v8560_v11, 4  ;;  %v13666_v63 = vrot.slane %v13665_v62, 4  ;;  %v13679_v60 = vor.u32 %v13678_v6, %v13675_v56  ;;  %v21064_v51 = vld [vmem:[%s21327_s8 + $0x28] sm:$0xf] }
 0x455   : > { %19589 = vmatmul.mubr.bf16.gmra.mrb[8].mxu1 %v20897_v52  ;;  %v13654_v52 = vrot.slane %v13652_v43, 5  ;;  %v13647_v42 = vsel %vm21362_vm2, %v13642_v38, %v13646_v21  ;;  %v26048_v7 = vrot.slane %v13682_v25, 5  ;;  %v8568_v29 = vshrl.u32 %v17272_v5, 16  ;;  %v13417_v25 = vld [vmem:[#allocation2 + $0x90] sm:$0xf] }
 0x456   : > { %19181 = vmatmul.mubr.msk.bf16.gmra.mrb[40].mxu0 %vm930_vm3, %v20895_v45  ;;  %19592 = vmatprep.mubr.bf16.mxu1 %v20898_v55  ;;  %v20903_v45 = vld [vmem:[%s21327_s8 + $0x6c] sm:$0xff]   ;;  %v8537_v55 = vrot.slane %v8536_v39, 4  ;;  %v13688_v39 = vrot.slane %v13686_v2, 4  ;;  %v13637_v43 = vsel %vm21362_vm2, %v13632_v37, %v25996_v16  ;;  %v13670_v41 = vrot.slane %v13668_v31, 5  ;;  %v13420_v37 = vld [vmem:[#allocation2 + $0x9c] sm:$0xf] }
 0x457   : > { %19184 = vmatprep.mubr.msk.bf16.mxu0 %vm930_vm3, %v20899_v3  ;;  %v21063_v3 = vld [vmem:[%s21327_s8 + $0x20] sm:$0x1]  ;;  %v13655_v20 = vor.u32 %v13654_v52, %v13651_v10  ;;  %v8571_v8 = vshll.u32 %v17272_v5, 16  ;;  %v26060_v27 = vcombine.low %v13637_v43, %v13647_v42  ;;  %v8556_v16 = vsel %vm21362_vm2, %v8551_v28, %v26014_v61  ;;  %v26081_v52 = vld [vmem:[#allocation2 + $0x94] sm:$0xf] }
 0x458   : > { %v8563_v33 = vshll.u32 %v21063_v3, 16  ;;  %v8542_v24 = vsel %vm21362_vm2, %v8537_v55, %v8541_v4  ;;  %v13671_v38 = vsel %vm21362_vm2, %v13666_v63, %v13670_v41  ;;  %v13692_v21 = vshll.u32 %v26046_v12, 16  ;;  %v21066_v42 = vld [vmem:[%s21327_s8 + $0x2c] sm:$0x1]  ;;  %v26111_v28 = vld [vmem:[#allocation2 + $0xa0] sm:$0xf] }
 0x459   : > { %v13656_v18 = vrot.slane %v13655_v20, 4  ;;  %v8570_v4 = vrot.slane %v8568_v29, 4  ;;  %v8577_v10 = vshll.u32 %v21064_v51, 16  ;;  %v8573_v61 = vrot.slane %v8571_v8, 5  ;;  %v20907_v20 = vld [vmem:[%s21327_s8 + $0x90] sm:$0xff]   ;;  %v20914_v41 = vld [vmem:[%s27210_s3 + $0x158] sm:$0xff]  }
 0x45a   : > { %v8565_v50 = vrot.slane %v8563_v33, 5  ;;  %v8581_v55 = vshrl.u32 %v21064_v51, 16  ;;  %v26098_v2 = vrot.slane %v13692_v21, 5  ;;  %v13700_v43 = vshll.u32 %v13417_v25, 16 }
 0x45b   : > { %v13661_v62 = vsel %vm21362_vm2, %v13656_v18, %v26016_v40  ;;  %v26108_v5 = vrot.slane %v8577_v10, 5  ;;  %v13730_v18 = vshll.u32 %v26111_v28, 16 }
 0x45c   : > { %v8566_v57 = vsel %vm21362_vm2, %v8561_v26, %v8565_v50  ;;  %v8583_v26 = vrot.slane %v8581_v55, 4 }
 0x45d   : > { %19593 = vmatmul.mubr.bf16.gmra.mrb[12].mxu1 %v20902_v0  ;;  %v20906_v0 = vld [vmem:[%s21327_s8 + $0x84] sm:$0xff]   ;;  %v26090_v33 = vcombine.low %v8556_v16, %v8566_v57  ;;  %v13724_v16 = vshll.u32 %v13420_v37, 16 }
 0x45e   : > { %19185 = vmatmul.mubr.msk.bf16.gmra.mrb[44].mxu0 %vm930_vm3, %v20900_v46  ;;  %19612 = vmatprep.mubr.bf16.mxu1 %v25892_v54  ;;  %v8532_v54 = vsel %vm21362_vm2, %v8527_v32, %v26001_v34  ;;  %v13613_v34 = vsel %vm21362_vm2, %v13608_v23, %v25975_v58  ;;  %v17275_v46 = vld [vmem:[%s21327_s8 + $0x30] sm:$0xf]  ;;  %v20908_v58 = vld [vmem:[%s27210_s3 + $0x148] sm:$0xff]   ;;  %v26077_v32 = vrot.slane %v13679_v60, 4  ;;  %v13706_v23 = vshll.u32 %v26081_v52, 16 }
 0x45f   : > { %19188 = vmatprep.mubr.msk.bf16.mxu0 %vm930_vm3, %v20903_v45  ;;  %v26058_v17 = vcombine.low %v13613_v34, %v13623_v13  ;;  %v26062_v19 = vcombine.low %v8532_v54, %v8542_v24  ;;  %v13689_v45 = vor.u32 %v13688_v39, %v26048_v7  ;;  %v8592_v11 = vshrl.u32 %v17275_v46, 16  ;;  %v17278_v60 = vld [vmem:[%s21327_s8 + $0x3c] sm:$0xf] }
 0x460   : > { %v8595_v3 = vshll.u32 %v17275_v46, 16  ;;  %v13710_v13 = vshrl.u32 %v26081_v52, 16  ;;  %v13685_v40 = vsel %vm21362_vm2, %v26077_v32, %v26048_v7  ;;  %v8587_v54 = vshll.u32 %v21066_v42, 16  ;;  %v20909_v39 = vld [vmem:[%s21327_s8 + $0x9c] sm:$0xff]   ;;  %v20910_v42 = vld [vmem:[%s21327_s8 + $0xa8] sm:$0xff]  }
 0x461   : > { %v26106_v31 = vrot.slane %v13689_v45, 4  ;;  %v8574_v24 = vor.u32 %v8573_v61, %v8570_v4  ;;  %v8594_v50 = vrot.slane %v8592_v11, 4  ;;  %v13697_v34 = vshrl.u32 %v13417_v25, 16  ;;  %v21067_v4 = vld [vmem:[%s21327_s8 + $0x40] sm:$0xf]  ;;  %v20918_v32 = vld [vmem:[%s27210_s3 + $0x178] sm:$0xff]  }
 0x462   : > { %v8597_v63 = vrot.slane %v8595_v3, 5  ;;  %v26121_v8 = vrot.slane %v13706_v23, 5  ;;  %v13734_v46 = vshrl.u32 %v26111_v28, 16  ;;  %v8616_v57 = vshrl.u32 %v17278_v60, 16 }
 0x463   : > { %v26128_v21 = vrot.slane %v8574_v24, 4  ;;  %v8584_v45 = vor.u32 %v8583_v26, %v26108_v5  ;;  %v8625_v51 = vshll.u32 %v21067_v4, 16  ;;  %v8629_v10 = vshrl.u32 %v21067_v4, 16  ;;  %v26148_v26 = vld [vmem:[#allocation2 + $0xa4] sm:$0x1] }
 0x464   : > { %v8598_v61 = vor.u32 %v8597_v63, %v8594_v50  ;;  %v13699_v11 = vrot.slane %v13697_v34, 4  ;;  %v13702_v3 = vrot.slane %v13700_v43, 5  ;;  %v13726_v23 = vrot.slane %v13724_v16, 5 }
 0x465   : > { %19613 = vmatmul.mubr.bf16.vlgmr.msra.gmra.mrb[16].mxu1 %v25946_v9  ;;  %v20911_v9 = vld [vmem:[%s27210_s3 + $0x150] sm:$0xff]   ;;  %v8589_v24 = vrot.slane %v8587_v54, 5  ;;  %v26150_v50 = vrot.slane %v8625_v51, 5  ;;  %v8631_v63 = vrot.slane %v8629_v10, 4  ;;  %v20916_v54 = vld [vmem:[%s27210_s3 + $0x168] sm:$0xff]  }
 0x466   : > { %19189 = vmatmul.mubr.msk.bf16.gmra.mrb[48].mxu0 %vm930_vm3, %v20904_v35  ;;  %19645 = vmatpush3.bf16.msra.mxu1 %v25907_v14  ;;  %v21065_v14 = vld [vmem:[%s21327_s8 + $0x34] sm:$0xf]  ;;  %v8599_v34 = vrot.slane %v8598_v61, 4  ;;  %v21070_v10 = vld [vmem:[%s21327_s8 + $0x4c] sm:$0xf] }
 0x467   : > { %19616 = vmatprep.mubr.bf16.mxu1 %v25948_v48  ;;  %19192 = vmatprep.mubr.msk.bf16.mxu0 %vm930_vm3, %v20906_v0  ;;  %v8601_v56 = vshll.u32 %v21065_v14, 16  ;;  %v8605_v6 = vshrl.u32 %v21065_v14, 16  ;;  %v26096_v48 = vcombine.low %v13661_v62, %v13671_v38  ;;  %v13712_v0 = vrot.slane %v13710_v13, 4  ;;  %v26138_v14 = vld [vmem:[#allocation2 + $0x98] sm:$0x1] }
 0x468   : > { %19646 = vmatprep.subr.bf16.mxu1 %v20908_v58  ;;  %v8619_v38 = vshll.u32 %v17278_v60, 16  ;;  %v8618_v13 = vrot.slane %v8616_v57, 4  ;;  %v20912_v60 = vld [vmem:[%s21327_s8 + $0xb4] sm:$0xff]   ;;  %v13716_v43 = vshll.u32 %v26138_v14, 16  ;;  %v8632_v57 = vor.u32 %v8631_v63, %v26150_v50 }
 0x469   : > { %v26116_v29 = vrot.slane %v8601_v56, 5  ;;  %v8607_v35 = vrot.slane %v8605_v6, 4  ;;  %v13713_v56 = vor.u32 %v13712_v0, %v26121_v8  ;;  %v26141_v6 = vrot.slane %v13730_v18, 5  ;;  %v17281_v0 = vld [vmem:[%s21327_s8 + $0x48] sm:$0xf] }
 0x46a   : > { %19647 = vmatpush3.bf16.msra.mxu1 %v20908_v58  ;;  %v13721_v58 = vshrl.u32 %v13420_v37, 16  ;;  %v8621_v37 = vrot.slane %v8619_v38, 5  ;;  %v13703_v18 = vor.u32 %v13702_v3, %v13699_v11  ;;  %v21069_v38 = vld [vmem:[%s21327_s8 + $0x44] sm:$0x1]  ;;  %v8643_v4 = vshll.u32 %v17281_v0, 16 }
 0x46b   : > { %19648 = vmatprep.subr.bf16.mxu1 %v20911_v9  ;;  %v8608_v62 = vor.u32 %v8607_v35, %v26116_v29  ;;  %v8585_v35 = vrot.slane %v8584_v45, 4  ;;  %v8640_v45 = vshrl.u32 %v17281_v0, 16  ;;  %v13718_v51 = vrot.slane %v13716_v43, 5  ;;  %v26194_v0 = vld [vmem:[#allocation2 + $0xac] sm:$0xf] }
 0x46c   : > { %v13723_v25 = vrot.slane %v13721_v58, 4  ;;  %v13740_v58 = vshll.u32 %v26148_v26, 16  ;;  %v8622_v16 = vor.u32 %v8621_v37, %v8618_v13  ;;  %v8649_v61 = vshll.u32 %v21070_v10, 16  ;;  %v20913_v13 = vld [vmem:[%s21327_s8 + $0xc0] sm:$0xff]  }
 0x46d   : > { %19617 = vmatmul.mubr.bf16.gmra.mrb[20].mxu1 %v25950_v22  ;;  %v21068_v22 = vld [vmem:[%s21327_s8 + $0x38] sm:$0x1]  ;;  %v13704_v11 = vrot.slane %v13703_v18, 4 }
 0x46e   : > { %19193 = vmatmul.mubr.msk.bf16.gmra.mrb[52].mxu0 %vm930_vm3, %v20907_v20  ;;  %19620 = vmatprep.mubr.bf16.mxu1 %v25957_v15  ;;  %v8611_v55 = vshll.u32 %v21068_v22, 16  ;;  %v20915_v15 = vld [vmem:[%s27210_s3 + $0x160] sm:$0xff]   ;;  %v13695_v20 = vsel %vm21362_vm2, %v26106_v31, %v26098_v2  ;;  %v8609_v2 = vrot.slane %v8608_v62, 4  ;;  %v8653_v22 = vshrl.u32 %v21070_v10, 16 }
 0x46f   : > { %19196 = vmatprep.mubr.msk.bf16.mxu0 %vm930_vm3, %v20909_v39  ;;  %19649 = vmatpush3.bf16.msra.mxu1 %v20911_v9  ;;  %v13736_v9 = vrot.slane %v13734_v46, 4  ;;  %v8580_v39 = vsel %vm21362_vm2, %v26128_v21, %v26108_v5  ;;  %v13714_v5 = vrot.slane %v13713_v56, 4  ;;  %v13727_v46 = vor.u32 %v13726_v23, %v13723_v25  ;;  %v13423_v23 = vld [vmem:[#allocation2 + $0xa8] sm:$0xf] }
 0x470   : > { %19650 = vmatprep.subr.bf16.mxu1 %v20914_v41  ;;  %v8613_v31 = vrot.slane %v8611_v55, 5  ;;  %v8635_v21 = vshll.u32 %v21069_v38, 16  ;;  %v8623_v25 = vrot.slane %v8622_v16, 4  ;;  %v26189_v63 = vcombine.low %v13685_v40, %v13695_v20  ;;  %v13426_v38 = vld [vmem:[#allocation2 + $0xb4] sm:$0xf] }
 0x471   : > { %v13719_v62 = vsel %vm21362_vm2, %v13714_v5, %v13718_v51  ;;  %v13728_v56 = vrot.slane %v13727_v46, 4  ;;  %v13709_v18 = vsel %vm21362_vm2, %v13704_v11, %v26121_v8  ;;  %v13748_v5 = vshll.u32 %v13423_v23, 16 }
 0x472   : > { %v8614_v55 = vsel %vm21362_vm2, %v8609_v2, %v8613_v31  ;;  %v8637_v37 = vrot.slane %v8635_v21, 5  ;;  %v26209_v40 = vcombine.low %v13709_v18, %v13719_v62  ;;  %v8628_v8 = vsel %vm21362_vm2, %v8623_v25, %v26150_v50  ;;  %v17287_v62 = vld [vmem:[%s21327_s8 + $0x60] sm:$0xf]  ;;  %v26259_v18 = vld [vmem:[#allocation2 + $0xc4] sm:$0xf] }
 0x473   : > { %19651 = vmatpush3.bf16.msra.mxu1 %v20914_v41  ;;  %v13737_v41 = vor.u32 %v13736_v9, %v26141_v6  ;;  %v13742_v9 = vrot.slane %v13740_v58, 5  ;;  %v13733_v20 = vsel %vm21362_vm2, %v13728_v56, %v26141_v6  ;;  %v13754_v46 = vshll.u32 %v26194_v0, 16  ;;  %v26223_v58 = vld [vmem:[#allocation2 + $0xb8] sm:$0xf] }
 0x474   : > { %19652 = vmatprep.subr.bf16.mxu1 %v20915_v15  ;;  %v13750_v11 = vrot.slane %v13748_v5, 5  ;;  %v13769_v25 = vshrl.u32 %v13426_v38, 16  ;;  %v13429_v5 = vld [vmem:[#allocation2 + $0xc0] sm:$0xf] }
 0x475   : > { %19621 = vmatmul.mubr.bf16.gmra.mrb[24].mxu1 %v25979_v49  ;;  %v8590_v49 = vsel %vm21362_vm2, %v8585_v35, %v8589_v24  ;;  %v13738_v3 = vrot.slane %v13737_v41, 4  ;;  %v8645_v24 = vrot.slane %v8643_v4, 5  ;;  %v8655_v35 = vrot.slane %v8653_v22, 4  ;;  %v21072_v4 = vld [vmem:[%s21327_s8 + $0x58] sm:$0xf] }
 0x476   : > { %19197 = vmatmul.mubr.msk.bf16.gmra.mrb[56].mxu0 %vm930_vm3, %v20910_v42  ;;  %19624 = vmatprep.mubr.bf16.mxu1 %v26006_v1  ;;  %v8604_v1 = vsel %vm21362_vm2, %v8599_v34, %v26116_v29  ;;  %v8633_v29 = vrot.slane %v8632_v57, 4  ;;  %v8642_v42 = vrot.slane %v8640_v45, 4  ;;  %v21071_v34 = vld [vmem:[%s21327_s8 + $0x50] sm:$0x1]  ;;  %v26196_v2 = vcombine.low %v8580_v39, %v8590_v49 }
 0x477   : > { %19200 = vmatprep.mubr.msk.bf16.mxu0 %vm930_vm3, %v20912_v60  ;;  %19653 = vmatpush3.bf16.msra.mxu1 %v20915_v15  ;;  %v20917_v15 = vld [vmem:[%s27210_s3 + $0x170] sm:$0xff]   ;;  %v26191_v60 = vrot.slane %v8649_v61, 5  ;;  %v8659_v43 = vshll.u32 %v21071_v34, 16  ;;  %v26198_v31 = vcombine.low %v8604_v1, %v8614_v55  ;;  %v13743_v7 = vsel %vm21362_vm2, %v13738_v3, %v13742_v9 }
 0x478   : > { %19654 = vmatprep.subr.bf16.mxu1 %v20916_v54  ;;  %v13745_v39 = vshrl.u32 %v13423_v23, 16  ;;  %v8646_v41 = vor.u32 %v8645_v24, %v8642_v42  ;;  %v26227_v6 = vcombine.low %v13733_v20, %v13743_v7  ;;  %v13758_v57 = vshrl.u32 %v26194_v0, 16 }
 0x479   : > { %v8656_v50 = vor.u32 %v8655_v35, %v26191_v60  ;;  %v26230_v16 = vrot.slane %v8659_v43, 5  ;;  %v8673_v49 = vshll.u32 %v21072_v4, 16  ;;  %v8677_v51 = vshrl.u32 %v21072_v4, 16 }
 0x47a   : > { %v13747_v61 = vrot.slane %v13745_v39, 4  ;;  %v13778_v22 = vshll.u32 %v26223_v58, 16  ;;  %v13782_v1 = vshrl.u32 %v26223_v58, 16  ;;  %v26245_v55 = vrot.slane %v8646_v41, 4  ;;  %v21074_v41 = vld [vmem:[%s21327_s8 + $0x5c] sm:$0x1] }
 0x47b   : > { %19655 = vmatpush3.bf16.msra.mxu1 %v20916_v54  ;;  %v17284_v54 = vld [vmem:[%s21327_s8 + $0x54] sm:$0xf]  ;;  %v26247_v3 = vrot.slane %v13754_v46, 5  ;;  %v26251_v56 = vrot.slane %v8656_v50, 4  ;;  %v13760_v9 = vrot.slane %v13758_v57, 4  ;;  %v13772_v23 = vshll.u32 %v13426_v38, 16 }
 0x47c   : > { %19656 = vmatprep.subr.bf16.mxu1 %v20917_v15  ;;  %v8664_v21 = vshrl.u32 %v17284_v54, 16  ;;  %v8667_v45 = vshll.u32 %v17284_v54, 16  ;;  %v8679_v42 = vrot.slane %v8677_v51, 4  ;;  %v26257_v24 = vrot.slane %v13778_v22, 5 }
 0x47d   : > { %19625 = vmatmul.mubr.bf16.gmra.mrb[28].mxu1 %v26058_v17  ;;  %v8638_v17 = vsel %vm21362_vm2, %v8633_v29, %v8637_v37  ;;  %v26253_v37 = vrot.slane %v8673_v49, 5  ;;  %v13784_v35 = vrot.slane %v13782_v1, 4  ;;  %v8688_v34 = vshrl.u32 %v17287_v62, 16 }
 0x47e   : > { %19201 = vmatmul.mubr.msk.bf16.gmra.mrb[60].mxu0 %vm930_vm3, %v20913_v13  ;;  %19628 = vmatprep.mubr.bf16.mxu1 %v26060_v27  ;;  %v26232_v27 = vld [vmem:[#allocation2 + $0xb0] sm:$0x1]  ;;  %v26241_v10 = vcombine.low %v8628_v8, %v8638_v17  ;;  %v8666_v13 = vrot.slane %v8664_v21, 4  ;;  %v8669_v29 = vrot.slane %v8667_v45, 5  ;;  %v8691_v43 = vshll.u32 %v17287_v62, 16 }
 0x47f   : > { %19212 = vmatprep.mubr.msk.bf16.mxu0 %vm930_vm3, %v26062_v19  ;;  %19657 = vmatpush3.bf16.msra.mxu1 %v20917_v15  ;;  %v26239_v19 = vld [vmem:[%s27210_s3 + $0x180] sm:$0xff]   ;;  %v13764_v15 = vshll.u32 %v26232_v27, 16  ;;  %v8652_v7 = vsel %vm21362_vm2, %v26245_v55, %v26191_v60  ;;  %v13761_v39 = vor.u32 %v13760_v9, %v26247_v3  ;;  %v13771_v54 = vrot.slane %v13769_v25, 4 }
 0x480   : > { %19658 = vmatprep.subr.bf16.mxu1 %v20918_v32  ;;  %v13774_v17 = vrot.slane %v13772_v23, 5  ;;  %v8670_v46 = vor.u32 %v8669_v29, %v8666_v13  ;;  %v8680_v50 = vor.u32 %v8679_v42, %v26253_v37  ;;  %v13802_v60 = vshll.u32 %v26259_v18, 16  ;;  %v21075_v29 = vld [vmem:[%s21327_s8 + $0x68] sm:$0x1] }
 0x481   : > { %v13806_v57 = vshrl.u32 %v26259_v18, 16  ;;  %v13785_v38 = vor.u32 %v13784_v35, %v26257_v24  ;;  %v8690_v21 = vrot.slane %v8688_v34, 4  ;;  %v8693_v45 = vrot.slane %v8691_v43, 5 }
 0x482   : > { %v13793_v51 = vshrl.u32 %v13429_v5, 16  ;;  %v13762_v22 = vrot.slane %v13761_v39, 4  ;;  %v13775_v1 = vor.u32 %v13774_v17, %v13771_v54  ;;  %v8671_v62 = vrot.slane %v8670_v46, 4  ;;  %v21076_v17 = vld [vmem:[#allocation2 + $0x10] sm:$0xf] }
 0x483   : > { %19659 = vmatpush3.bf16.msra.mxu1 %v20918_v32  ;;  %v13751_v32 = vor.u32 %v13750_v11, %v13747_v61  ;;  %v13796_v61 = vshll.u32 %v13429_v5, 16  ;;  %v8681_v9 = vrot.slane %v8680_v50, 4  ;;  %v26286_v25 = vrot.slane %v13802_v60, 5 }
 0x484   : > { %19692 = vmatprep.subr.bf16.mxu1 %v26239_v19  ;;  %v13766_v23 = vrot.slane %v13764_v15, 5  ;;  %v13786_v13 = vrot.slane %v13785_v38, 4  ;;  %v8707_v42 = vshll.u32 %v21075_v29, 16  ;;  %v8694_v35 = vor.u32 %v8693_v45, %v8690_v21  ;;  %v26296_v15 = vld [vmem:[#allocation2 + $0xc8] sm:$0x1] }
 0x485   : > { %19629 = vmatmul.mubr.bf16.gmra.mrb[0].mxu1 %v26096_v48  ;;  %v21073_v48 = vld [vmem:[%s21327_s8 + $0x64] sm:$0xf]  ;;  %v13795_v43 = vrot.slane %v13793_v51, 4  ;;  %v14138_v45 = vld [vmem:[#allocation2 + $0xc] sm:$0xe] }
 0x486   : > { %19213 = vmatmul.mubr.msk.bf16.vlgmr.msra.gmra.mrb[32].mxu0 %vm930_vm3, %v26090_v33  ;;  %19632 = vmatprep.mubr.bf16.mxu1 %v26189_v63  ;;  %v8697_v20 = vshll.u32 %v21073_v48, 16  ;;  %v8701_v8 = vshrl.u32 %v21073_v48, 16  ;;  %v8683_v33 = vshll.u32 %v21074_v41, 16  ;;  %v26273_v63 = vld [vmem:[#allocation2 + $0xbc] sm:$0x1]  ;;  %v13798_v48 = vrot.slane %v13796_v61, 5 }
 0x487   : > { %19216 = vmatprep.mubr.msk.bf16.mxu0 %vm930_vm3, %v26196_v2  ;;  %v8662_v2 = vsel %vm21362_vm2, %v26251_v56, %v26230_v16  ;;  %v13788_v55 = vshll.u32 %v26273_v63, 16  ;;  %v13808_v16 = vrot.slane %v13806_v57, 4  ;;  %v13752_v56 = vrot.slane %v13751_v32, 4 }
 0x488   : > { %v26283_v4 = vrot.slane %v8697_v20, 5  ;;  %v8703_v49 = vrot.slane %v8701_v8, 4  ;;  %v8685_v11 = vrot.slane %v8683_v33, 5  ;;  %v17327_v20 = vcombine.low %v8652_v7, %v8662_v2  ;;  %v21077_v2 = vld [vmem:[#allocation2 + $0x1c] sm:$0xf] }
 0x489   : > { %v13790_v32 = vrot.slane %v13788_v55, 5  ;;  %v13767_v8 = vsel %vm21362_vm2, %v13762_v22, %v13766_v23  ;;  %v13809_v39 = vor.u32 %v13808_v16, %v26286_v25  ;;  %v8709_v54 = vrot.slane %v8707_v42, 5  ;;  %v14140_v23 = vld [vmem:[#allocation2 + $0x24] sm:$0xe] }
 0x48a   : > { %v8704_v34 = vor.u32 %v8703_v49, %v26283_v4  ;;  %v14204_v41 = vrot.slane %v21076_v17, 5  ;;  %v8695_v33 = vrot.slane %v8694_v35, 4  ;;  %v13799_v46 = vor.u32 %v13798_v48, %v13795_v43  ;;  %v21078_v49 = vld [vmem:[#allocation2 + $0x28] sm:$0xf]  ;;  %v14149_v17 = vld [vmem:[#allocation2 + $0x90] sm:$0xe] }
 0x48b   : > { %v13791_v7 = vsel %vm21362_vm2, %v13786_v13, %v13790_v32  ;;  %v14211_v38 = vrot.slane %v21077_v2, 5  ;;  %v13810_v21 = vrot.slane %v13809_v39, 4  ;;  %v14218_v51 = vrot.slane %v21078_v49, 5  ;;  %v21081_v32 = vld [vmem:[#allocation2 + $0x2c] sm:$0x1] }
 0x48c   : > { %v8705_v5 = vrot.slane %v8704_v34, 4  ;;  %v14206_v61 = vrot.slane %v14204_v41, 4  ;;  %v8700_v22 = vsel %vm21362_vm2, %v8695_v33, %v26283_v4  ;;  %v21080_v34 = vld [vmem:[#allocation2 + $0x20] sm:$0x1]  ;;  %v26333_v39 = vld [vmem:[#allocation2 + $0x34] sm:$0xf] }
 0x48d   : > { %19633 = vmatmul.mubr.bf16.gmra.mrb[4].mxu1 %v26209_v40  ;;  %v13776_v40 = vrot.slane %v13775_v1, 4  ;;  %v13800_v1 = vrot.slane %v13799_v46, 4  ;;  %v14220_v29 = vrot.slane %v14218_v51, 4  ;;  %v14214_v43 = vrot.slane %v21080_v34, 5 }
 0x48e   : > { %19217 = vmatmul.mubr.msk.bf16.gmra.mrb[36].mxu0 %vm930_vm3, %v26198_v31  ;;  %19636 = vmatprep.mubr.bf16.mxu1 %v26227_v6  ;;  %v8676_v31 = vsel %vm21362_vm2, %v8671_v62, %v26253_v37  ;;  %v8686_v6 = vsel %vm21362_vm2, %v8681_v9, %v8685_v11  ;;  %v13812_v37 = vshll.u32 %v26296_v15, 16  ;;  %v14139_v11 = vld [vmem:[#allocation2 + $0x18] sm:$0xe]  ;;  %v17878_v62 = vrot.slane %v14138_v45, 9  ;;  %v21079_v9 = vld [vmem:[#allocation2 + $0x14] sm:$0x1] }
 0x48f   : > { %19220 = vmatprep.mubr.msk.bf16.mxu0 %vm930_vm3, %v26241_v10  ;;  %v13757_v10 = vsel %vm21362_vm2, %v13752_v56, %v26247_v3  ;;  %v13781_v60 = vsel %vm21362_vm2, %v13776_v40, %v26257_v24  ;;  %v17328_v57 = vcombine.low %v8676_v31, %v8686_v6  ;;  %v8710_v24 = vsel %vm21362_vm2, %v8705_v5, %v8709_v54 }
 0x490   : > { %v17867_v50 = vcombine.low %v13757_v10, %v13767_v8  ;;  %v17868_v3 = vcombine.low %v13781_v60, %v13791_v7  ;;  %v13814_v55 = vrot.slane %v13812_v37, 5  ;;  %v14207_v16 = vrot.slane %v21079_v9, 5  ;;  %v26336_v7 = vld [vmem:[#allocation2 + $0x40] sm:$0xf]  ;;  %v14150_v37 = vld [vmem:[#allocation2 + $0x9c] sm:$0xe] }
 0x491   : > { %v14213_v56 = vrot.slane %v14211_v38, 4  ;;  %v17329_v42 = vcombine.low %v8700_v22, %v8710_v24  ;;  %v14205_v4 = vsel %vm21791_vm6, %v17878_v62, %v14204_v41  ;;  %v13805_v48 = vsel %vm21362_vm2, %v13800_v1, %v26286_v25  ;;  %v14152_v22 = vld [vmem:[#allocation2 + $0xb4] sm:$0xe] }
 0x492   : > { %v13815_v13 = vsel %vm21362_vm2, %v13810_v21, %v13814_v55  ;;  %v14208_v35 = vsel %vm21791_vm6, %v14206_v61, %v14207_v16  ;;  %v17880_v40 = vrot.slane %v14140_v23, 9  ;;  %v14221_v8 = vrot.slane %v21081_v32, 5  ;;  %v14142_v32 = vld [vmem:[#allocation2 + $0x3c] sm:$0xe] }
 0x493   : > { %v17869_v31 = vcombine.low %v13805_v48, %v13815_v13  ;;  %v14215_v6 = vsel %vm21791_vm6, %v14213_v56, %v14214_v43  ;;  %v14225_v10 = vrot.slane %v26333_v39, 5  ;;  %v14232_v54 = vrot.slane %v26336_v7, 5  ;;  %v14153_v56 = vld [vmem:[#allocation2 + $0xc0] sm:$0xe] }
 0x494   : > { %v17910_v41 = vcombine.low %v14205_v4, %v14208_v35  ;;  %v14222_v25 = vsel %vm21791_vm6, %v14220_v29, %v14221_v8  ;;  %v14281_v33 = vrot.slane %v26081_v52, 5  ;;  %v14219_v46 = vsel %vm21791_vm6, %v17880_v40, %v14218_v51  ;;  %v14141_v35 = vld [vmem:[#allocation2 + $0x30] sm:$0xe] }
 0x495   : > { %19637 = vmatmul.mubr.bf16.gmra.mrb[8].mxu1 %v17867_v50  ;;  %v17889_v60 = vrot.slane %v14149_v17, 9  ;;  %v14284_v2 = vrot.slane %v26138_v14, 5  ;;  %v17912_v21 = vcombine.low %v14219_v46, %v14222_v25  ;;  %v14227_v52 = vrot.slane %v14225_v10, 4 }
 0x496   : > { %19221 = vmatmul.mubr.msk.bf16.gmra.mrb[40].mxu0 %vm930_vm3, %v17327_v20  ;;  %19640 = vmatprep.mubr.bf16.mxu1 %v17868_v3  ;;  %v17879_v20 = vrot.slane %v14139_v11, 9  ;;  %v14151_v3 = vld [vmem:[#allocation2 + $0xa8] sm:$0xe]  ;;  %v14288_v45 = vrot.slane %v26111_v28, 5  ;;  %v17890_v61 = vrot.slane %v14150_v37, 9  ;;  %v14295_v14 = vrot.slane %v26194_v0, 5 }
 0x497   : > { %19224 = vmatprep.mubr.msk.bf16.mxu0 %vm930_vm3, %v17328_v57  ;;  %v14283_v57 = vrot.slane %v14281_v33, 4  ;;  %v26355_v49 = vsel %vm21791_vm6, %v17889_v60, %v14281_v33  ;;  %v14291_v55 = vrot.slane %v26148_v26, 5  ;;  %v17891_v11 = vrot.slane %v14151_v3, 9  ;;  %v20920_v0 = vld [vmem:[%s27210_s3 + $0x188] sm:$0xff]  }
 0x498   : > { %v14212_v5 = vsel %vm21791_vm6, %v17879_v20, %v14211_v38  ;;  %v14234_v38 = vrot.slane %v14232_v54, 4  ;;  %v14290_v1 = vrot.slane %v14288_v45, 4  ;;  %v26367_v28 = vsel %vm21791_vm6, %v17890_v61, %v14288_v45  ;;  %v20922_v45 = vld [vmem:[%s27210_s3 + $0x198] sm:$0xff]  }
 0x499   : > { %v17911_v50 = vcombine.low %v14212_v5, %v14215_v6  ;;  %v26359_v51 = vsel %vm21791_vm6, %v14283_v57, %v14284_v2  ;;  %v14297_v62 = vrot.slane %v14295_v14, 4  ;;  %v14298_v9 = vrot.slane %v26232_v27, 5  ;;  %v21086_v5 = vld [vmem:[#allocation2 + $0x4c] sm:$0xf]  ;;  %v21087_v57 = vld [vmem:[#allocation2 + $0x58] sm:$0xf] }
 0x49a   : > { %v17921_v24 = vcombine.low %v26355_v49, %v26359_v51  ;;  %v14302_v16 = vrot.slane %v26223_v58, 5  ;;  %v26376_v23 = vsel %vm21791_vm6, %v14290_v1, %v14291_v55  ;;  %v26380_v26 = vsel %vm21791_vm6, %v17891_v11, %v14295_v14  ;;  %v14143_v14 = vld [vmem:[#allocation2 + $0x48] sm:$0xe]  ;;  %v14144_v1 = vld [vmem:[#allocation2 + $0x54] sm:$0xe] }
 0x49b   : > { %v17892_v13 = vrot.slane %v14152_v22, 9  ;;  %v14309_v29 = vrot.slane %v26259_v18, 5  ;;  %v17922_v27 = vcombine.low %v26367_v28, %v26376_v23  ;;  %v26387_v58 = vsel %vm21791_vm6, %v14297_v62, %v14298_v9  ;;  %v21084_v18 = vld [vmem:[#allocation2 + $0x38] sm:$0x1]  ;;  %v21088_v22 = vld [vmem:[#allocation2 + $0x50] sm:$0x1] }
 0x49c   : > { %v14305_v4 = vrot.slane %v26273_v63, 5  ;;  %v17923_v34 = vcombine.low %v26380_v26, %v26387_v58  ;;  %v17893_v43 = vrot.slane %v14153_v56, 9  ;;  %v14312_v20 = vrot.slane %v26296_v15, 5  ;;  %v20921_v15 = vld [vmem:[%s27210_s3 + $0x190] sm:$0xff]   ;;  %v21089_v55 = vld [vmem:[#allocation2 + $0x5c] sm:$0x1] }
 0x49d   : > { %19641 = vmatmul.mubr.bf16.gmra.mrb[12].mxu1 %v17869_v31  ;;  %v14311_v48 = vrot.slane %v14309_v29, 4  ;;  %v14228_v40 = vrot.slane %v21084_v18, 5  ;;  %v26396_v8 = vsel %vm21791_vm6, %v17892_v13, %v14302_v16  ;;  %v21085_v31 = vld [vmem:[#allocation2 + $0x44] sm:$0x1]  ;;  %v17881_v25 = vrot.slane %v14141_v35, 9  ;;  %v20931_v51 = vld [vmem:[%s27210_s3 + $0x1c8] sm:$0xff]  }
 0x49e   : > { %19225 = vmatmul.mubr.msk.bf16.gmra.mrb[44].mxu0 %vm930_vm3, %v17329_v42  ;;  %19660 = vmatprep.mubr.bf16.mxu1 %v17910_v41  ;;  %v14304_v42 = vrot.slane %v14302_v16, 4  ;;  %v14235_v6 = vrot.slane %v21085_v31, 5  ;;  %v26409_v17 = vsel %vm21791_vm6, %v17893_v43, %v14309_v29  ;;  %v14239_v46 = vrot.slane %v21086_v5, 5  ;;  %v21090_v9 = vld [vmem:[#allocation2 + $0x64] sm:$0xf]  ;;  %v20924_v43 = vld [vmem:[%s27210_s3 + $0x1a8] sm:$0xff]  }
 0x49f   : > { %v26413_v41 = vsel %vm21791_vm6, %v14311_v48, %v14312_v20  ;;  %v14229_v33 = vsel %vm21791_vm6, %v14227_v52, %v14228_v40  ;;  %v14246_v2 = vrot.slane %v21087_v57, 5  ;;  %v14226_v3 = vsel %vm21791_vm6, %v17881_v25, %v14225_v10  ;;  %v21091_v13 = vld [vmem:[#allocation2 + $0x70] sm:$0xf]  ;;  %v14145_v18 = vld [vmem:[#allocation2 + $0x60] sm:$0xe]  ;;  %v20929_v49 = vld [vmem:[#allocation2 + $0x24] sm:$0xff]  }
 0x4a0   : > { %v26400_v63 = vsel %vm21791_vm6, %v14304_v42, %v14305_v4  ;;  %v17925_v37 = vcombine.low %v26409_v17, %v26413_v41  ;;  %v14236_v60 = vsel %vm21791_vm6, %v14234_v38, %v14235_v6  ;;  %v14241_v61 = vrot.slane %v14239_v46, 4  ;;  %v14146_v6 = vld [vmem:[#allocation2 + $0x6c] sm:$0xe]  ;;  %v20925_v25 = vld [vmem:[%s27210_s3 + $0x1b0] sm:$0xff]   ;;  %v15024_v23 = vld [vmem:[#allocation2 + $0x1c] sm:$0xf] }
 0x4a1   : > { %v14248_v39 = vrot.slane %v14246_v2, 4  ;;  %v14242_v10 = vrot.slane %v21088_v22, 5  ;;  %v14249_v7 = vrot.slane %v21089_v55, 5  ;;  %v17883_v11 = vrot.slane %v14143_v14, 9  ;;  %v20934_v28 = vld [vmem:[%s27210_s3 + $0x1d0] sm:$0xff]   ;;  %v20937_v58 = vld [vmem:[%s27210_s3 + $0x1d8] sm:$0xff]  }
 0x4a2   : > { %v14253_v16 = vrot.slane %v21090_v9, 5  ;;  %v17884_v56 = vrot.slane %v14144_v1, 9  ;;  %v14260_v29 = vrot.slane %v21091_v13, 5  ;;  %v14274_v57 = vrot.slane %v26019_v59, 5  ;;  %v26497_v26 = vld [vmem:[#allocation2 + $0x34] sm:$0xf] }
 0x4a3   : > { %v14243_v62 = vsel %vm21791_vm6, %v14241_v61, %v14242_v10  ;;  %v14240_v42 = vsel %vm21791_vm6, %v17883_v11, %v14239_v46  ;;  %v14267_v46 = vrot.slane %v25990_v36, 5  ;;  %v14270_v59 = vrot.slane %v26022_v44, 5  ;;  %v14148_v61 = vld [vmem:[#allocation2 + $0x84] sm:$0xe]  ;;  %v20927_v11 = vld [vmem:[#allocation2 + $0x18] sm:$0xff]  }
 0x4a4   : > { %v17915_v4 = vcombine.low %v14240_v42, %v14243_v62  ;;  %v14247_v35 = vsel %vm21791_vm6, %v17884_v56, %v14246_v2  ;;  %v14255_v20 = vrot.slane %v14253_v16, 4  ;;  %v14262_v40 = vrot.slane %v14260_v29, 4  ;;  %v26506_v41 = vld [vmem:[#allocation2 + $0x40] sm:$0xf]  ;;  %v15780_v56 = vld [vmem:[#allocation2 + $0x3c] sm:$0xe] }
 0x4a5   : > { %19661 = vmatmul.mubr.bf16.vlgmr.msra.gmra.mrb[16].mxu1 %v17911_v50  ;;  %v17882_v50 = vrot.slane %v14142_v32, 9  ;;  %v21092_v32 = vld [vmem:[#allocation2 + $0x68] sm:$0x1]  ;;  %v14277_v14 = vrot.slane %v26046_v12, 5  ;;  %v17888_v1 = vrot.slane %v14148_v61, 9  ;;  %v15081_v17 = vshll.u32 %v15024_v23, 16 }
 0x4a6   : > { %19693 = vmatpush3.bf16.msra.mxu1 %v26239_v19  ;;  %19664 = vmatprep.mubr.bf16.mxu1 %v17912_v21  ;;  %v17924_v19 = vcombine.low %v26396_v8, %v26400_v63  ;;  %v17913_v21 = vcombine.low %v14226_v3, %v14229_v33  ;;  %v14256_v31 = vrot.slane %v21092_v32, 5  ;;  %v17885_v33 = vrot.slane %v14145_v18, 9  ;;  %v20933_v8 = vld [vmem:[#allocation2 + $0x48] sm:$0xff]   ;;  %v26504_v63 = vld [vmem:[#allocation2 + $0x38] sm:$0x1] }
 0x4a7   : > { %19694 = vmatprep.subr.bf16.mxu1 %v20920_v0  ;;  %v14233_v52 = vsel %vm21791_vm6, %v17882_v50, %v14232_v54  ;;  %v20923_v54 = vld [vmem:[%s27210_s3 + $0x1a0] sm:$0xff]   ;;  %v17886_v50 = vrot.slane %v14146_v6, 9  ;;  %v14275_v12 = vsel %vm21791_vm6, %v17888_v1, %v14274_v57  ;;  %v15857_v62 = vrot.slane %v26497_v26, 5  ;;  %v26516_v13 = vld [vmem:[#allocation2 + $0x50] sm:$0x1] }
 0x4a8   : > { %v17914_v38 = vcombine.low %v14233_v52, %v14236_v60  ;;  %v14257_v5 = vsel %vm21791_vm6, %v14255_v20, %v14256_v31  ;;  %v14269_v52 = vrot.slane %v14267_v46, 4  ;;  %v15085_v9 = vshrl.u32 %v15024_v23, 16  ;;  %v26520_v42 = vld [vmem:[#allocation2 + $0x64] sm:$0xf]  ;;  %v26525_v18 = vld [vmem:[#allocation2 + $0x5c] sm:$0x1] }
 0x4a9   : > { %v14261_v3 = vsel %vm21791_vm6, %v17886_v50, %v14260_v29  ;;  %v26518_v29 = vld [vmem:[#allocation2 + $0x58] sm:$0xf]  ;;  %v15781_v32 = vld [vmem:[#allocation2 + $0x48] sm:$0xe]  ;;  %v26528_v31 = vrot.slane %v15081_v17, 5  ;;  %v20946_v23 = vld [vmem:[%s27210_s3 + $0x1f0] sm:$0xff]  }
 0x4aa   : > { %19695 = vmatpush3.bf16.msra.mxu1 %v20920_v0  ;;  %v14250_v0 = vsel %vm21791_vm6, %v14248_v39, %v14249_v7  ;;  %v20928_v39 = vld [vmem:[%s27210_s3 + $0x1c0] sm:$0xff]   ;;  %v14271_v10 = vsel %vm21791_vm6, %v14269_v52, %v14270_v59  ;;  %v26530_v6 = vld [vmem:[#allocation2 + $0x68] sm:$0x1]  ;;  %v26540_v50 = vrot.slane %v15085_v9, 4  ;;  %v18018_v52 = vrot.slane %v15781_v32, 9 }
 0x4ab   : > { %19696 = vmatprep.subr.bf16.mxu1 %v20921_v15  ;;  %v17916_v48 = vcombine.low %v14247_v35, %v14250_v0  ;;  %v20940_v0 = vld [vmem:[%s27210_s3 + $0x1e0] sm:$0xff]   ;;  %v15859_v35 = vrot.slane %v15857_v62, 4  ;;  %v26556_v61 = vld [vmem:[#allocation2 + $0x74] sm:$0x1]  ;;  %v26564_v1 = vld [vmem:[#allocation2 + $0x7c] sm:$0xf] }
 0x4ac   : > { %v20936_v59 = vld [vmem:[#allocation2 + $0x60] sm:$0xff]   ;;  %v26594_v9 = vld [vmem:[#allocation2 + $0x94] sm:$0xf] }
 0x4ad   : > { %19665 = vmatmul.mubr.bf16.gmra.mrb[20].mxu1 %v17913_v21  ;;  %v20926_v21 = vld [vmem:[%s27210_s3 + $0x1b8] sm:$0xff]  }
 0x4ae   : > { %19668 = vmatprep.mubr.bf16.mxu1 %v17914_v38  ;;  %19697 = vmatpush3.bf16.msra.mxu1 %v20921_v15  ;;  %v14263_v15 = vrot.slane %v25994_v53, 5  ;;  %v14254_v53 = vsel %vm21791_vm6, %v17885_v33, %v14253_v16  ;;  %v14276_v38 = vrot.slane %v14274_v57, 4  ;;  %v26511_v16 = vld [vmem:[#allocation2 + $0x4c] sm:$0xf]  ;;  %v18017_v33 = vrot.slane %v15780_v56, 9 }
 0x4af   : > { %19698 = vmatprep.subr.bf16.mxu1 %v20922_v45  ;;  %v17917_v2 = vcombine.low %v14254_v53, %v14257_v5  ;;  %v15782_v5 = vld [vmem:[#allocation2 + $0x54] sm:$0xe] }
 0x4b0   : > { %v14264_v60 = vsel %vm21791_vm6, %v14262_v40, %v14263_v15  ;;  %v14278_v55 = vsel %vm21791_vm6, %v14276_v38, %v14277_v14  ;;  %v15864_v40 = vrot.slane %v26506_v41, 5  ;;  %v15878_v38 = vrot.slane %v26518_v29, 5 }
 0x4b1   : > { %v17918_v36 = vcombine.low %v14261_v3, %v14264_v60  ;;  %v20943_v3 = vld [vmem:[%s27210_s3 + $0x1e8] sm:$0xff]  }
 0x4b2   : > { %19699 = vmatpush3.bf16.msra.mxu1 %v20922_v45  ;;  %v14147_v45 = vld [vmem:[#allocation2 + $0x78] sm:$0xe]  ;;  %v15866_v57 = vrot.slane %v15864_v40, 4 }
 0x4b3   : > { %19700 = vmatprep.subr.bf16.mxu1 %v20923_v54  ;;  %v17887_v22 = vrot.slane %v14147_v45, 9  ;;  %v15871_v45 = vrot.slane %v26511_v16, 5 }
 0x4b5   : > { %19669 = vmatmul.mubr.bf16.gmra.mrb[24].mxu1 %v17915_v4  ;;  %v14268_v44 = vsel %vm21791_vm6, %v17887_v22, %v14267_v46  ;;  %v20935_v46 = vld [vmem:[#allocation2 + $0x54] sm:$0xff]   ;;  %v18019_v22 = vrot.slane %v15782_v5, 9 }
 0x4b6   : > { %19672 = vmatprep.mubr.bf16.mxu1 %v17916_v48  ;;  %19701 = vmatpush3.bf16.msra.mxu1 %v20923_v54  ;;  %v17919_v7 = vcombine.low %v14268_v44, %v14271_v10  ;;  %v17920_v54 = vcombine.low %v14275_v12, %v14278_v55  ;;  %v15885_v10 = vrot.slane %v26520_v42, 5  ;;  %v15873_v44 = vrot.slane %v15871_v45, 4  ;;  %v15789_v55 = vld [vmem:[#allocation2 + $0xa8] sm:$0xe] }
 0x4b7   : > { %19702 = vmatprep.subr.bf16.mxu1 %v20924_v43 }
 0x4ba   : > { %19703 = vmatpush3.bf16.msra.mxu1 %v20924_v43  ;;  %v15860_v43 = vrot.slane %v26504_v63, 5 }
 0x4bb   : > { %19704 = vmatprep.subr.bf16.mxu1 %v20925_v25 }
 0x4bd   : > { %19673 = vmatmul.mubr.bf16.gmra.mrb[28].mxu1 %v17917_v2  ;;  %v15783_v2 = vld [vmem:[#allocation2 + $0x60] sm:$0xe] }
 0x4be   : > { %19676 = vmatprep.mubr.bf16.mxu1 %v17918_v36  ;;  %19705 = vmatpush3.bf16.msra.mxu1 %v20925_v25  ;;  %v26538_v25 = vsel %vm21791_vm6, %v15859_v35, %v15860_v43  ;;  %v26552_v36 = vsel %vm21791_vm6, %v18017_v33, %v15864_v40  ;;  %v18020_v12 = vrot.slane %v15783_v2, 9  ;;  %v15786_v43 = vld [vmem:[#allocation2 + $0x84] sm:$0xe]  ;;  %v26606_v40 = vld [vmem:[#allocation2 + $0x8c] sm:$0x1] }
 0x4bf   : > { %19706 = vmatprep.subr.bf16.mxu1 %v20926_v21  ;;  %27554 = vst [vmem:[#allocation8_spill] sm:$0xff] %v26538_v25  ;;  %27555 = vst [vmem:[#allocation9_spill] sm:$0xff] %v26552_v36  ;;  %v26613_v2 = vld [vmem:[#allocation2 + $0x98] sm:$0x1] }
 0x4c0   : > { %v15916_v56 = vrot.slane %v26613_v2, 5 }
 0x4c2   : > { %19707 = vmatpush3.bf16.msra.mxu1 %v20926_v21  ;;  %v26548_v21 = vld [vmem:[#allocation2 + $0x70] sm:$0xf] }
 0x4c3   : > { %19740 = vmatprep.subr.bf16.mxu1 %v20928_v39  ;;  %v15892_v17 = vrot.slane %v26548_v21, 5 }
 0x4c5   : > { %19677 = vmatmul.mubr.bf16.gmra.mrb[0].mxu1 %v17919_v7  ;;  %v15881_v7 = vrot.slane %v26525_v18, 5  ;;  %v15894_v5 = vrot.slane %v15892_v17, 4 }
 0x4c6   : > { %19680 = vmatprep.mubr.bf16.mxu1 %v17920_v54  ;;  %v15784_v54 = vld [vmem:[#allocation2 + $0x6c] sm:$0xe] }
 0x4c7   : > { %v18021_v35 = vrot.slane %v15784_v54, 9  ;;  %v26632_v54 = vld [vmem:[#allocation2 + $0x24] sm:$0xf] }
 0x4cd   : > { %19681 = vmatmul.mubr.bf16.gmra.mrb[4].mxu1 %v17921_v24  ;;  %v20930_v24 = vld [vmem:[#allocation2 + $0x30] sm:$0xff]  }
 0x4ce   : > { %19684 = vmatprep.mubr.bf16.mxu1 %v17922_v27  ;;  %v20932_v27 = vld [vmem:[#allocation2 + $0x3c] sm:$0xff]  }
 0x4d5   : > { %19685 = vmatmul.mubr.bf16.gmra.mrb[8].mxu1 %v17923_v34  ;;  %v26502_v34 = vld [vmem:[#allocation2 + $0x18] sm:$0xf] }
 0x4d6   : > { %19688 = vmatprep.mubr.bf16.mxu1 %v17924_v19  ;;  %v15779_v19 = vld [vmem:[#allocation2 + $0x30] sm:$0xe] }
 0x4d7   : > { %v18016_v4 = vrot.slane %v15779_v19, 9  ;;  %v26591_v19 = vsel %vm21791_vm6, %v18020_v12, %v15885_v10  ;;  %v20939_v12 = vld [vmem:[#allocation2 + $0x78] sm:$0xff]  }
 0x4d8   : > { %27560 = vst [vmem:[#allocation16_spill] sm:$0xff] %v26591_v19 }
 0x4d9   : > { %v26534_v15 = vsel %vm21791_vm6, %v18016_v4, %v15857_v62  ;;  %v15785_v62 = vld [vmem:[#allocation2 + $0x78] sm:$0xe] }
 0x4da   : > { %27553 = vst [vmem:[#allocation39_spill] sm:$0xff] %v26534_v15 }
 0x4dd   : > { %19689 = vmatmul.mubr.bf16.gmra.mrb[12].mxu1 %v17925_v37  ;;  %v26508_v37 = vld [vmem:[#allocation2 + $0x44] sm:$0x1] }
 0x4de   : > { %19708 = vmatprep.mubr.bf16.mxu1 %v20927_v11  ;;  %v15867_v53 = vrot.slane %v26508_v37, 5  ;;  %v26569_v11 = vld [vmem:[#allocation2 + $0x80] sm:$0x1] }
 0x4e0   : > { %v26560_v14 = vsel %vm21791_vm6, %v15866_v57, %v15867_v53  ;;  %v15787_v57 = vld [vmem:[#allocation2 + $0x90] sm:$0xe] }
 0x4e1   : > { %27556 = vst [vmem:[#allocation26_spill] sm:$0xff] %v26560_v14  ;;  %v20938_v53 = vld [vmem:[#allocation2 + $0x6c] sm:$0xff]  }
 0x4e5   : > { %19709 = vmatmul.mubr.bf16.vlgmr.msra.gmra.mrb[16].mxu1 %v20929_v49  ;;  %v26573_v49 = vsel %vm21791_vm6, %v18018_v52, %v15871_v45  ;;  %v26617_v52 = vsel %vm21791_vm6, %v18021_v35, %v15892_v17  ;;  %v18022_v45 = vrot.slane %v15785_v62, 9  ;;  %v15909_v17 = vrot.slane %v26606_v40, 5  ;;  %v15788_v35 = vld [vmem:[#allocation2 + $0x9c] sm:$0xe] }
 0x4e6   : > { %19741 = vmatpush3.bf16.msra.mxu1 %v20928_v39  ;;  %19712 = vmatprep.mubr.bf16.mxu1 %v20930_v24  ;;  %v15874_v39 = vrot.slane %v26516_v13, 5  ;;  %27557 = vst [vmem:[#allocation27_spill] sm:$0xff] %v26573_v49  ;;  %v15887_v24 = vrot.slane %v15885_v10, 4  ;;  %27563 = vst [vmem:[#allocation20_spill] sm:$0xff] %v26617_v52  ;;  %v15902_v10 = vrot.slane %v26569_v11, 5  ;;  %v18024_v62 = vrot.slane %v15787_v57, 9 }
 0x4e7   : > { %19742 = vmatprep.subr.bf16.mxu1 %v20931_v51 }
 0x4ea   : > { %19743 = vmatpush3.bf16.msra.mxu1 %v20931_v51  ;;  %v15880_v51 = vrot.slane %v15878_v38, 4 }
 0x4eb   : > { %19744 = vmatprep.subr.bf16.mxu1 %v20934_v28 }
 0x4ed   : > { %19713 = vmatmul.mubr.bf16.gmra.mrb[20].mxu1 %v20932_v27  ;;  %v26579_v27 = vld [vmem:[#allocation2 + $0x88] sm:$0xf] }
 0x4ee   : > { %19716 = vmatprep.mubr.bf16.mxu1 %v20933_v8  ;;  %19745 = vmatpush3.bf16.msra.mxu1 %v20934_v28  ;;  %v15888_v28 = vrot.slane %v26530_v6, 5  ;;  %v26587_v8 = vsel %vm21791_vm6, %v18019_v22, %v15878_v38  ;;  %v15899_v38 = vrot.slane %v26564_v1, 5  ;;  %v26624_v22 = vld [vmem:[#allocation2 + $0xa0] sm:$0xf] }
 0x4ef   : > { %19746 = vmatprep.subr.bf16.mxu1 %v20937_v58  ;;  %27559 = vst [vmem:[#allocation12_spill] sm:$0xff] %v26587_v8 }
 0x4f0   : > { %v26604_v4 = vsel %vm21791_vm6, %v15887_v24, %v15888_v28  ;;  %v15901_v28 = vrot.slane %v15899_v38, 4  ;;  %v26648_v24 = vld [vmem:[#allocation2 + $0xb8] sm:$0xf] }
 0x4f1   : > { %27562 = vst [vmem:[#allocation19_spill] sm:$0xff] %v26604_v4  ;;  %v15099_v4 = vshll.u32 %v26632_v54, 16 }
 0x4f2   : > { %19747 = vmatpush3.bf16.msra.mxu1 %v20937_v58  ;;  %v26583_v58 = vsel %vm21791_vm6, %v15873_v44, %v15874_v39  ;;  %v20949_v39 = vld [vmem:[%s27210_s3 + $0x1f8] sm:$0xff]   ;;  %v18023_v44 = vrot.slane %v15786_v43, 9  ;;  %v26645_v43 = vsel %vm21791_vm6, %v18022_v45, %v15899_v38  ;;  %v26652_v57 = vsel %vm21791_vm6, %v15901_v28, %v15902_v10  ;;  %v26670_v10 = vld [vmem:[#allocation2 + $0xc4] sm:$0xf] }
 0x4f3   : > { %19748 = vmatprep.subr.bf16.mxu1 %v20940_v0  ;;  %27558 = vst [vmem:[#allocation11_spill] sm:$0xff] %v26583_v58  ;;  %27565 = vst [vmem:[#allocation23_spill] sm:$0xff] %v26645_v43  ;;  %v15920_v38 = vrot.slane %v26624_v22, 5  ;;  %v18025_v28 = vrot.slane %v15788_v35, 9 }
 0x4f4   : > { %27566 = vst [vmem:[#allocation24_spill] sm:$0xff] %v26652_v57  ;;  %v15790_v57 = vld [vmem:[#allocation2 + $0xb4] sm:$0xe] }
 0x4f5   : > { %19717 = vmatmul.mubr.bf16.gmra.mrb[24].mxu1 %v20935_v46  ;;  %v15895_v46 = vrot.slane %v26556_v61, 5  ;;  %v15922_v48 = vrot.slane %v15920_v38, 4  ;;  %v26694_v35 = vsel %vm21791_vm6, %v18025_v28, %v15920_v38  ;;  %v20942_v38 = vld [vmem:[#allocation2 + $0x90] sm:$0xff]  }
 0x4f6   : > { %19720 = vmatprep.mubr.bf16.mxu1 %v20936_v59  ;;  %19749 = vmatpush3.bf16.msra.mxu1 %v20940_v0  ;;  %v26600_v0 = vsel %vm21791_vm6, %v15880_v51, %v15881_v7  ;;  %v15906_v59 = vrot.slane %v26579_v27, 5  ;;  %v15913_v7 = vrot.slane %v26594_v9, 5  ;;  %v26634_v51 = vld [vmem:[#allocation2 + $0xac] sm:$0xf]  ;;  %27571 = vst [vmem:[#allocation33_spill] sm:$0xff] %v26694_v35 }
 0x4f7   : > { %19750 = vmatprep.subr.bf16.mxu1 %v20943_v3  ;;  %27561 = vst [vmem:[#allocation17_spill] sm:$0xff] %v26600_v0  ;;  %v15927_v43 = vrot.slane %v26634_v51, 5  ;;  %v15032_v35 = vld [vmem:[#allocation2 + $0x3c] sm:$0xf] }
 0x4f8   : > { %v15908_v33 = vrot.slane %v15906_v59, 4  ;;  %v15915_v32 = vrot.slane %v15913_v7, 4  ;;  %v26660_v45 = vsel %vm21791_vm6, %v18024_v62, %v15913_v7  ;;  %v26682_v62 = vld [vmem:[#allocation2 + $0xc8] sm:$0x1] }
 0x4f9   : > { %27568 = vst [vmem:[#allocation6_spill] sm:$0xff] %v26660_v45  ;;  %v20941_v45 = vld [vmem:[#allocation2 + $0x84] sm:$0xff]  }
 0x4fa   : > { %19751 = vmatpush3.bf16.msra.mxu1 %v20943_v3  ;;  %v26628_v3 = vsel %vm21791_vm6, %v15894_v5, %v15895_v46  ;;  %v26639_v5 = vld [vmem:[#allocation2 + $0xa4] sm:$0x1]  ;;  %v26641_v46 = vld [vmem:[#allocation2 + $0xb0] sm:$0x1]  ;;  %v26680_v7 = vsel %vm21791_vm6, %v15915_v32, %v15916_v56  ;;  %v15934_v56 = vrot.slane %v26648_v24, 5 }
 0x4fb   : > { %19752 = vmatprep.subr.bf16.mxu1 %v20946_v23  ;;  %27564 = vst [vmem:[#allocation25_spill] sm:$0xff] %v26628_v3  ;;  %27570 = vst [vmem:[#allocation31_spill] sm:$0xff] %v26680_v7  ;;  %v15791_v32 = vld [vmem:[#allocation2 + $0xc0] sm:$0xe]  ;;  %v15930_v60 = vrot.slane %v26641_v46, 5  ;;  %v15941_v7 = vrot.slane %v26670_v10, 5 }
 0x4fc   : > { %v15936_v28 = vrot.slane %v15934_v56, 4  ;;  %v18028_v3 = vrot.slane %v15791_v32, 9 }
 0x4fd   : > { %19721 = vmatmul.mubr.bf16.gmra.mrb[28].mxu1 %v20938_v53  ;;  %v26656_v53 = vsel %vm21791_vm6, %v18023_v44, %v15906_v59  ;;  %v26676_v44 = vsel %vm21791_vm6, %v15908_v33, %v15909_v17  ;;  %v15923_v59 = vrot.slane %v26639_v5, 5  ;;  %v15096_v33 = vshrl.u32 %v26632_v54, 16 }
 0x4fe   : > { %19724 = vmatprep.mubr.bf16.mxu1 %v20939_v12  ;;  %19753 = vmatpush3.bf16.msra.mxu1 %v20946_v23  ;;  %27567 = vst [vmem:[#allocation28_spill] sm:$0xff] %v26656_v53  ;;  %v26666_v23 = vld [vmem:[%s27210_s3 + $0x200] sm:$0xff]   ;;  %v26668_v12 = vld [vmem:[#allocation2 + $0xbc] sm:$0x1]  ;;  %27569 = vst [vmem:[#allocation30_spill] sm:$0xff] %v26676_v44  ;;  %v18026_v17 = vrot.slane %v15789_v55, 9  ;;  %v26730_v54 = vsel %vm21791_vm6, %v18028_v3, %v15941_v7 }
 0x4ff   : > { %19754 = vmatprep.subr.bf16.mxu1 %v20949_v39  ;;  %v26698_v20 = vsel %vm21791_vm6, %v15922_v48, %v15923_v59  ;;  %v15929_v44 = vrot.slane %v15927_v43, 4  ;;  %v15937_v53 = vrot.slane %v26668_v12, 5  ;;  %v15943_v52 = vrot.slane %v15941_v7, 4  ;;  %v26707_v59 = vld [vmem:[#allocation2 + $0x28] sm:$0xf]  ;;  %27577 = vst [vmem:[#allocation34_spill] sm:$0xff] %v26730_v54 }
 0x500   : > { %27572 = vst [vmem:[#allocation21_spill] sm:$0xff] %v26698_v20  ;;  %v15944_v48 = vrot.slane %v26682_v62, 5  ;;  %v26712_v19 = vsel %vm21791_vm6, %v18026_v17, %v15927_v43  ;;  %v27579_v43 = vshrl.u32 %v26502_v34, 16  ;;  %v27580_v17 = vshll.u32 %v26502_v34, 16  ;;  %v20944_v34 = vld [vmem:[#allocation2 + $0x9c] sm:$0xff]  }
 0x501   : > { %27573 = vst [vmem:[#allocation22_spill] sm:$0xff] %v26712_v19  ;;  %v26726_v32 = vsel %vm21791_vm6, %v15936_v28, %v15937_v53  ;;  %v15105_v3 = vshll.u32 %v26707_v59, 16  ;;  %v15098_v7 = vrot.slane %v15096_v33, 4  ;;  %v15101_v28 = vrot.slane %v15099_v4, 5 }
 0x502   : > { %19755 = vmatpush3.bf16.msra.mxu1 %v20949_v39  ;;  %v18027_v39 = vrot.slane %v15790_v57, 9  ;;  %v26716_v57 = vsel %vm21791_vm6, %v15929_v44, %v15930_v60  ;;  %27576 = vst [vmem:[#allocation7_spill] sm:$0xff] %v26726_v32  ;;  %v26734_v60 = vsel %vm21791_vm6, %v15943_v52, %v15944_v48  ;;  %v15074_v44 = vrot.slane %v27579_v43, 4  ;;  %v15029_v43 = vld [vmem:[#allocation2 + $0x30] sm:$0xf] }
 0x503   : > { %19788 = vmatprep.subr.bf16.mxu1 %v26666_v23  ;;  %27574 = vst [vmem:[#allocation37_spill] sm:$0xff] %v26716_v57  ;;  %27578 = vst [vmem:[#allocation35_spill] sm:$0xff] %v26734_v60  ;;  %v15088_v52 = vor.u32 %v26540_v50, %v26528_v31  ;;  %v15109_v48 = vshrl.u32 %v26707_v59, 16  ;;  %v26751_v32 = vld [vmem:[#allocation2 + $0x2c] sm:$0x1]  ;;  %v26753_v53 = vrot.slane %v15105_v3, 5 }
 0x504   : > { %v26720_v55 = vsel %vm21791_vm6, %v18027_v39, %v15934_v56  ;;  %v15077_v56 = vrot.slane %v27580_v17, 5  ;;  %v20945_v39 = vld [vmem:[#allocation2 + $0xa8] sm:$0xff]   ;;  %27581 = vst [vmem:[#allocation36_spill] sm:$0xff] %v26751_v32  ;;  %v15120_v60 = vshrl.u32 %v15029_v43, 16  ;;  %v15123_v50 = vshll.u32 %v15029_v43, 16 }
 0x505   : > { %19725 = vmatmul.mubr.bf16.gmra.mrb[0].mxu1 %v20941_v45  ;;  %27575 = vst [vmem:[#allocation10_spill] sm:$0xff] %v26720_v55  ;;  %v15089_v54 = vrot.slane %v15088_v52, 4  ;;  %v15102_v55 = vor.u32 %v15101_v28, %v15098_v7  ;;  %v15111_v57 = vrot.slane %v15109_v48, 4  ;;  %v15129_v4 = vshll.u32 %v26497_v26, 16  ;;  %v20947_v48 = vld [vmem:[#allocation2 + $0xb4] sm:$0xff]  }
 0x506   : > { %19728 = vmatprep.mubr.bf16.mxu1 %v20942_v38  ;;  %v26744_v38 = vld [vmem:[#allocation2 + $0x20] sm:$0x1]  ;;  %v15078_v17 = vor.u32 %v15077_v56, %v15074_v44  ;;  %v15133_v33 = vshrl.u32 %v26497_v26, 16  ;;  %v15115_v56 = vshll.u32 %v26751_v32, 16  ;;  %v15122_v20 = vrot.slane %v15120_v60, 4 }
 0x507   : > { %v15091_v45 = vshll.u32 %v26744_v38, 16  ;;  %v26760_v0 = vrot.slane %v15102_v55, 4  ;;  %v15112_v52 = vor.u32 %v15111_v57, %v26753_v53  ;;  %v15125_v7 = vrot.slane %v15123_v50, 5  ;;  %v15035_v50 = vld [vmem:[#allocation2 + $0x48] sm:$0xf] }
 0x508   : > { %v15079_v19 = vrot.slane %v15078_v17, 4  ;;  %v26763_v28 = vrot.slane %v15129_v4, 5  ;;  %v15139_v60 = vshll.u32 %v26504_v63, 16  ;;  %v15144_v43 = vshrl.u32 %v15032_v35, 16  ;;  %v26778_v63 = vld [vmem:[#allocation2 + $0xd0] sm:$0xf] }
 0x509   : > { %v15093_v44 = vrot.slane %v15091_v45, 5  ;;  %v26768_v45 = vrot.slane %v15115_v56, 5  ;;  %v15147_v55 = vshll.u32 %v15032_v35, 16  ;;  %v15153_v17 = vshll.u32 %v26506_v41, 16  ;;  %v15792_v56 = vld [vmem:[#allocation2 + $0xcc] sm:$0xe] }
 0x50a   : > { %v15084_v26 = vsel %vm21362_vm2, %v15079_v19, %v26528_v31  ;;  %v15157_v57 = vshrl.u32 %v26506_v41, 16  ;;  %v15108_v4 = vsel %vm21362_vm2, %v26760_v0, %v26753_v53  ;;  %v15113_v31 = vrot.slane %v15112_v52, 4  ;;  %v15038_v0 = vld [vmem:[#allocation2 + $0x54] sm:$0xf] }
 0x50b   : > { %v15094_v3 = vsel %vm21362_vm2, %v15089_v54, %v15093_v44  ;;  %v15126_v19 = vor.u32 %v15125_v7, %v15122_v20  ;;  %v26780_v44 = vld [vmem:[#allocation2 + $0xd4] sm:$0x1]  ;;  %v15181_v41 = vshrl.u32 %v26511_v16, 16  ;;  %v15201_v20 = vshll.u32 %v26518_v29, 16 }
 0x50c   : > { %v17990_v54 = vcombine.low %v15084_v26, %v15094_v3  ;;  %v15948_v3 = vrot.slane %v26778_v63, 5  ;;  %v15146_v26 = vrot.slane %v15144_v43, 4  ;;  %v15205_v53 = vshrl.u32 %v26518_v29, 16 }
 0x50d   : > { %19729 = vmatmul.mubr.bf16.gmra.mrb[4].mxu1 %v20944_v34  ;;  %v20948_v34 = vld [vmem:[#allocation2 + $0xc0] sm:$0xff]   ;;  %v18029_v52 = vrot.slane %v15792_v56, 9  ;;  %v15149_v7 = vrot.slane %v15147_v55, 5  ;;  %v26788_v8 = vrot.slane %v15153_v17, 5  ;;  %v15168_v49 = vshrl.u32 %v15035_v50, 16 }
 0x50e   : > { %19732 = vmatprep.mubr.bf16.mxu1 %v20945_v39  ;;  %v15135_v39 = vrot.slane %v15133_v33, 4  ;;  %v15177_v33 = vshll.u32 %v26511_v16, 16  ;;  %v15950_v58 = vrot.slane %v15948_v3, 4  ;;  %v15171_v16 = vshll.u32 %v15035_v50, 16  ;;  %v15041_v56 = vld [vmem:[#allocation2 + $0x60] sm:$0xf] }
 0x50f   : > { %v26794_v36 = vsel %vm21791_vm6, %v18029_v52, %v15948_v3  ;;  %v15183_v43 = vrot.slane %v15181_v41, 4  ;;  %v15192_v25 = vshrl.u32 %v15038_v0, 16  ;;  %v15195_v15 = vshll.u32 %v15038_v0, 16 }
 0x510   : > { %v15136_v35 = vor.u32 %v15135_v39, %v26763_v28  ;;  %v20950_v39 = vld [vmem:[#allocation2 + $0xcc] sm:$0xff]   ;;  %v26790_v14 = vrot.slane %v15177_v33, 5  ;;  %27582 = vst [vmem:[#allocation14_spill] sm:$0xff] %v26794_v36  ;;  %v15141_v55 = vrot.slane %v15139_v60, 5  ;;  %v26800_v17 = vrot.slane %v15201_v20, 5 }
 0x511   : > { %v15118_v33 = vsel %vm21362_vm2, %v15113_v31, %v26768_v45  ;;  %v15127_v3 = vrot.slane %v15126_v19, 4  ;;  %v15163_v0 = vshll.u32 %v26508_v37, 16  ;;  %v15150_v52 = vor.u32 %v15149_v7, %v15146_v26 }
 0x512   : > { %v15137_v41 = vrot.slane %v15136_v35, 4  ;;  %v15170_v60 = vrot.slane %v15168_v49, 4  ;;  %v15184_v20 = vor.u32 %v15183_v43, %v26790_v14  ;;  %v15197_v32 = vrot.slane %v15195_v15, 5 }
 0x513   : > { %v15216_v50 = vshrl.u32 %v15041_v56, 16  ;;  %v15219_v36 = vshll.u32 %v15041_v56, 16  ;;  %v15225_v45 = vshll.u32 %v26520_v42, 16  ;;  %v15229_v31 = vshrl.u32 %v26520_v42, 16  ;;  %v15044_v42 = vld [vmem:[#allocation2 + $0x6c] sm:$0xf] }
 0x514   : > { %v17991_v37 = vcombine.low %v15108_v4, %v15118_v33  ;;  %v15132_v19 = vsel %vm21362_vm2, %v15127_v3, %v26763_v28  ;;  %v15142_v49 = vsel %vm21362_vm2, %v15137_v41, %v15141_v55  ;;  %v15165_v35 = vrot.slane %v15163_v0, 5  ;;  %v20952_v4 = vld [vmem:[%s27210_s3 + $0x208] sm:$0xff]   ;;  %v15047_v0 = vld [vmem:[#allocation2 + $0x78] sm:$0xf] }
 0x515   : > { %19733 = vmatmul.mubr.bf16.gmra.mrb[8].mxu1 %v20947_v48  ;;  %v15951_v48 = vrot.slane %v26780_v44, 5  ;;  %v15211_v26 = vshll.u32 %v26525_v18, 16  ;;  %v15221_v43 = vrot.slane %v15219_v36, 5  ;;  %v15231_v55 = vrot.slane %v15229_v31, 4 }
 0x516   : > { %19736 = vmatprep.mubr.bf16.mxu1 %v20948_v34  ;;  %v15159_v34 = vrot.slane %v15157_v57, 4  ;;  %v15207_v57 = vrot.slane %v15205_v53, 4  ;;  %v15194_v53 = vrot.slane %v15192_v25, 4  ;;  %v15151_v25 = vrot.slane %v15150_v52, 4 }
 0x517   : > { %v26798_v29 = vsel %vm21791_vm6, %v15950_v58, %v15951_v48  ;;  %v15173_v48 = vrot.slane %v15171_v16, 5  ;;  %v15218_v16 = vrot.slane %v15216_v50, 4  ;;  %v15249_v33 = vshll.u32 %v26548_v21, 16 }
 0x518   : > { %27583 = vst [vmem:[#allocation15_spill] sm:$0xff] %v26798_v29  ;;  %v15160_v58 = vor.u32 %v15159_v34, %v26788_v8  ;;  %v15208_v29 = vor.u32 %v15207_v57, %v26800_v17  ;;  %v15185_v34 = vrot.slane %v15184_v20, 4  ;;  %v26823_v57 = vrot.slane %v15225_v45, 5 }
 0x519   : > { %v15174_v7 = vor.u32 %v15173_v48, %v15170_v60  ;;  %v15253_v18 = vshrl.u32 %v26548_v21, 16  ;;  %v15213_v50 = vrot.slane %v15211_v26, 5  ;;  %v15240_v3 = vshrl.u32 %v15044_v42, 16 }
 0x51a   : > { %v15161_v15 = vrot.slane %v15160_v58, 4  ;;  %v15209_v28 = vrot.slane %v15208_v29, 4  ;;  %v15243_v41 = vshll.u32 %v15044_v42, 16  ;;  %v15222_v60 = vor.u32 %v15221_v43, %v15218_v16 }
 0x51b   : > { %v15175_v29 = vrot.slane %v15174_v7, 4  ;;  %v15235_v48 = vshll.u32 %v26530_v6, 16  ;;  %v26842_v20 = vrot.slane %v15249_v33, 5  ;;  %v15264_v45 = vshrl.u32 %v15047_v0, 16 }
 0x51c   : > { %v15166_v36 = vsel %vm21362_vm2, %v15161_v15, %v15165_v35  ;;  %v15214_v58 = vsel %vm21362_vm2, %v15209_v28, %v15213_v50  ;;  %v15267_v31 = vshll.u32 %v15047_v0, 16  ;;  %v15223_v7 = vrot.slane %v15222_v60, 4  ;;  %v20955_v50 = vld [vmem:[%s27210_s3 + $0x220] sm:$0xff]  }
 0x51d   : > { %19737 = vmatmul.mubr.bf16.gmra.mrb[12].mxu1 %v20950_v39  ;;  %v15198_v39 = vor.u32 %v15197_v32, %v15194_v53  ;;  %v15156_v32 = vsel %vm21362_vm2, %v15151_v25, %v26788_v8  ;;  %v20953_v8 = vld [vmem:[%s27210_s3 + $0x210] sm:$0xff]   ;;  %v15255_v53 = vrot.slane %v15253_v18, 4  ;;  %v15180_v15 = vsel %vm21362_vm2, %v15175_v29, %v26790_v14 }
 0x51e   : > { %19756 = vmatprep.mubr.bf16.mxu1 %v17990_v54  ;;  %v15187_v54 = vshll.u32 %v26516_v13, 16  ;;  %v17992_v13 = vcombine.low %v15132_v19, %v15142_v49  ;;  %v15245_v19 = vrot.slane %v15243_v41, 5  ;;  %v15273_v49 = vshll.u32 %v26564_v1, 16  ;;  %v15053_v14 = vld [vmem:[#allocation2 + $0x90] sm:$0xf] }
 0x51f   : > { %v15199_v21 = vrot.slane %v15198_v39, 4  ;;  %v17993_v25 = vcombine.low %v15156_v32, %v15166_v36  ;;  %v20954_v39 = vld [vmem:[%s27210_s3 + $0x218] sm:$0xff]   ;;  %v15256_v42 = vor.u32 %v15255_v53, %v26842_v20  ;;  %v15269_v28 = vrot.slane %v15267_v31, 5 }
 0x520   : > { %v15189_v56 = vrot.slane %v15187_v54, 5  ;;  %v15277_v54 = vshrl.u32 %v26564_v1, 16  ;;  %v15050_v1 = vld [vmem:[#allocation2 + $0x84] sm:$0xf]  ;;  %v15297_v18 = vshll.u32 %v26579_v27, 16  ;;  %v15301_v32 = vshrl.u32 %v26579_v27, 16 }
 0x521   : > { %v15204_v6 = vsel %vm21362_vm2, %v15199_v21, %v26800_v17  ;;  %v15259_v17 = vshll.u32 %v26556_v61, 16  ;;  %v15291_v33 = vshll.u32 %v15050_v1, 16  ;;  %v15315_v41 = vshll.u32 %v15053_v14, 16 }
 0x522   : > { %v15190_v52 = vsel %vm21362_vm2, %v15185_v34, %v15189_v56  ;;  %v17995_v26 = vcombine.low %v15204_v6, %v15214_v58  ;;  %v15237_v34 = vrot.slane %v15235_v48, 5  ;;  %v15288_v56 = vshrl.u32 %v15050_v1, 16 }
 0x523   : > { %v17994_v35 = vcombine.low %v15180_v15, %v15190_v52  ;;  %v15321_v61 = vshll.u32 %v26594_v9, 16  ;;  %v15325_v0 = vshrl.u32 %v26594_v9, 16  ;;  %v15228_v36 = vsel %vm21362_vm2, %v15223_v7, %v26823_v57 }
 0x524   : > { %v15257_v52 = vrot.slane %v15256_v42, 4  ;;  %v15283_v60 = vshll.u32 %v26569_v11, 16  ;;  %v15293_v48 = vrot.slane %v15291_v33, 5  ;;  %v26873_v53 = vrot.slane %v15297_v18, 5 }
 0x525   : > { %19757 = vmatmul.mubr.bf16.vlgmr.msra.gmra.mrb[16].mxu1 %v17991_v37  ;;  %v15242_v37 = vrot.slane %v15240_v3, 4  ;;  %v15312_v3 = vshrl.u32 %v15053_v14, 16  ;;  %v15303_v9 = vrot.slane %v15301_v32, 4  ;;  %v15317_v31 = vrot.slane %v15315_v41, 5 }
 0x526   : > { %19789 = vmatpush3.bf16.msra.mxu1 %v26666_v23  ;;  %19760 = vmatprep.mubr.bf16.mxu1 %v17992_v13  ;;  %v15232_v23 = vor.u32 %v15231_v55, %v26823_v57  ;;  %v26857_v55 = vrot.slane %v15273_v49, 5  ;;  %v15279_v13 = vrot.slane %v15277_v54, 4  ;;  %v20956_v49 = vld [vmem:[%s27210_s3 + $0x228] sm:$0xff]   ;;  %v15345_v14 = vshll.u32 %v26624_v22, 16 }
 0x527   : > { %19790 = vmatprep.subr.bf16.mxu1 %v20952_v4  ;;  %v15246_v43 = vor.u32 %v15245_v19, %v15242_v37  ;;  %v15314_v57 = vrot.slane %v15312_v3, 4  ;;  %v26875_v37 = vrot.slane %v15321_v61, 5  ;;  %v15327_v19 = vrot.slane %v15325_v0, 4 }
 0x528   : > { %v15233_v16 = vrot.slane %v15232_v23, 4  ;;  %v15280_v58 = vor.u32 %v15279_v13, %v26857_v55  ;;  %v15290_v23 = vrot.slane %v15288_v56, 4  ;;  %v15304_v7 = vor.u32 %v15303_v9, %v26873_v53 }
 0x529   : > { %v15247_v21 = vrot.slane %v15246_v43, 4  ;;  %v15318_v42 = vor.u32 %v15317_v31, %v15314_v57  ;;  %v15349_v43 = vshrl.u32 %v26624_v22, 16  ;;  %v15331_v33 = vshll.u32 %v26613_v2, 16  ;;  %v20958_v2 = vld [vmem:[%s27210_s3 + $0x238] sm:$0xff]  }
 0x52a   : > { %19791 = vmatpush3.bf16.msra.mxu1 %v20952_v4  ;;  %v15266_v4 = vrot.slane %v15264_v45, 4  ;;  %v15238_v29 = vsel %vm21362_vm2, %v15233_v16, %v15237_v34  ;;  %v15056_v45 = vld [vmem:[#allocation2 + $0x9c] sm:$0xf]  ;;  %v15281_v6 = vrot.slane %v15280_v58, 4  ;;  %v15285_v16 = vrot.slane %v15283_v60, 5 }
 0x52b   : > { %19792 = vmatprep.subr.bf16.mxu1 %v20953_v8  ;;  %v17996_v54 = vcombine.low %v15228_v36, %v15238_v29  ;;  %v15252_v15 = vsel %vm21362_vm2, %v15247_v21, %v26842_v20  ;;  %v15336_v34 = vshrl.u32 %v15056_v45, 16  ;;  %v15369_v18 = vshll.u32 %v26634_v51, 16 }
 0x52c   : > { %v15270_v27 = vor.u32 %v15269_v28, %v15266_v4  ;;  %v15328_v4 = vor.u32 %v15327_v19, %v26875_v37  ;;  %v15307_v28 = vshll.u32 %v26606_v40, 16  ;;  %v15286_v13 = vsel %vm21362_vm2, %v15281_v6, %v15285_v16 }
 0x52d   : > { %19761 = vmatmul.mubr.bf16.gmra.mrb[20].mxu1 %v17993_v25  ;;  %v15373_v32 = vshrl.u32 %v26634_v51, 16  ;;  %v15305_v40 = vrot.slane %v15304_v7, 4  ;;  %v15338_v3 = vrot.slane %v15336_v34, 4  ;;  %v15319_v61 = vrot.slane %v15318_v42, 4 }
 0x52e   : > { %19764 = vmatprep.mubr.bf16.mxu1 %v17994_v35  ;;  %19793 = vmatpush3.bf16.msra.mxu1 %v20953_v8  ;;  %v15261_v8 = vrot.slane %v15259_v17, 5  ;;  %v15271_v25 = vrot.slane %v15270_v27, 4  ;;  %v15294_v35 = vor.u32 %v15293_v48, %v15290_v23  ;;  %v15059_v17 = vld [vmem:[#allocation2 + $0xa8] sm:$0xf]  ;;  %v15329_v0 = vrot.slane %v15328_v4, 4 }
 0x52f   : > { %19794 = vmatprep.subr.bf16.mxu1 %v20954_v39  ;;  %v15360_v36 = vshrl.u32 %v15059_v17, 16  ;;  %v15363_v29 = vshll.u32 %v15059_v17, 16  ;;  %v15309_v51 = vrot.slane %v15307_v28, 5  ;;  %v26912_v21 = vrot.slane %v15345_v14, 5  ;;  %v15062_v48 = vld [vmem:[#allocation2 + $0xb4] sm:$0xf] }
 0x530   : > { %v15262_v11 = vsel %vm21362_vm2, %v15257_v52, %v15261_v8  ;;  %v15276_v20 = vsel %vm21362_vm2, %v15271_v25, %v26857_v55  ;;  %v15295_v55 = vrot.slane %v15294_v35, 4  ;;  %v15351_v8 = vrot.slane %v15349_v43, 4  ;;  %v15065_v35 = vld [vmem:[#allocation2 + $0xc0] sm:$0xf]  ;;  %v15068_v17 = vld [vmem:[#allocation2 + $0xcc] sm:$0xf] }
 0x531   : > { %v17997_v1 = vcombine.low %v15252_v15, %v15262_v11  ;;  %v17998_v52 = vcombine.low %v15276_v20, %v15286_v13  ;;  %v15333_v58 = vrot.slane %v15331_v33, 5  ;;  %v26914_v60 = vrot.slane %v15369_v18, 5 }
 0x532   : > { %19795 = vmatpush3.bf16.msra.mxu1 %v20954_v39  ;;  %v15339_v39 = vshll.u32 %v15056_v45, 16  ;;  %v15375_v23 = vrot.slane %v15373_v32, 4  ;;  %v15300_v9 = vsel %vm21362_vm2, %v15295_v55, %v26873_v53  ;;  %v15310_v45 = vsel %vm21362_vm2, %v15305_v40, %v15309_v51 }
 0x533   : > { %19796 = vmatprep.subr.bf16.mxu1 %v20955_v50  ;;  %v15355_v31 = vshll.u32 %v26639_v5, 16  ;;  %v15324_v19 = vsel %vm21362_vm2, %v15319_v61, %v26875_v37  ;;  %v15365_v11 = vrot.slane %v15363_v29, 5  ;;  %v15352_v25 = vor.u32 %v15351_v8, %v26912_v21 }
 0x534   : > { %v15341_v41 = vrot.slane %v15339_v39, 5  ;;  %v15384_v53 = vshrl.u32 %v15062_v48, 16  ;;  %v15393_v15 = vshll.u32 %v26648_v24, 16  ;;  %v15397_v6 = vshrl.u32 %v26648_v24, 16 }
 0x535   : > { %19765 = vmatmul.mubr.bf16.gmra.mrb[24].mxu1 %v17995_v26  ;;  %v20957_v26 = vld [vmem:[%s27210_s3 + $0x230] sm:$0xff]   ;;  %v15376_v7 = vor.u32 %v15375_v23, %v26914_v60  ;;  %v15387_v34 = vshll.u32 %v15062_v48, 16  ;;  %v15417_v37 = vshll.u32 %v26670_v10, 16  ;;  %v15421_v39 = vshrl.u32 %v26670_v10, 16 }
 0x536   : > { %19768 = vmatprep.mubr.bf16.mxu1 %v17996_v54  ;;  %19797 = vmatpush3.bf16.msra.mxu1 %v20955_v50  ;;  %v15342_v57 = vor.u32 %v15341_v41, %v15338_v3  ;;  %v15362_v54 = vrot.slane %v15360_v36, 4  ;;  %v15379_v28 = vshll.u32 %v26641_v46, 16  ;;  %v15408_v14 = vshrl.u32 %v15065_v35, 16 }
 0x537   : > { %19798 = vmatprep.subr.bf16.mxu1 %v20956_v49  ;;  %v15411_v43 = vshll.u32 %v15065_v35, 16  ;;  %v15353_v33 = vrot.slane %v15352_v25, 4  ;;  %v15386_v18 = vrot.slane %v15384_v53, 4  ;;  %v15395_v10 = vrot.slane %v15393_v15, 5 }
 0x538   : > { %v15343_v4 = vrot.slane %v15342_v57, 4  ;;  %v15366_v24 = vor.u32 %v15365_v11, %v15362_v54  ;;  %v15399_v32 = vrot.slane %v15397_v6, 4  ;;  %v15377_v55 = vrot.slane %v15376_v7, 4 }
 0x539   : > { %v26898_v56 = vpop.f32.mrb[48].mxu0  ;;  %v15389_v40 = vrot.slane %v15387_v34, 5  ;;  %v15419_v3 = vrot.slane %v15417_v37, 5  ;;  %v15423_v41 = vrot.slane %v15421_v39, 4  ;;  %v15432_v61 = vshrl.u32 %v15068_v17, 16 }
 0x53a   : > { %v26903_v50 = vpop.f32.mrb[49].mxu0  ;;  %19799 = vmatpush3.bf16.msra.mxu1 %v20956_v49  ;;  %v15334_v49 = vsel %vm21362_vm2, %v15329_v0, %v15333_v58  ;;  %v15435_v0 = vshll.u32 %v15068_v17, 16  ;;  %v15441_v36 = vshll.u32 %v26778_v63, 16  ;;  %v15445_v46 = vshrl.u32 %v26778_v63, 16 }
 0x53b   : > { %v26905_v22 = vpop.f32.mrb[50].mxu0  ;;  %19800 = vmatprep.subr.bf16.mxu1 %v20957_v26  ;;  %v18000_v16 = vcombine.low %v15324_v19, %v15334_v49  ;;  %v15367_v29 = vrot.slane %v15366_v24, 4  ;;  %v15413_v51 = vrot.slane %v15411_v43, 5  ;;  %v15348_v8 = vsel %vm21362_vm2, %v15343_v4, %v26912_v21 }
 0x53c   : > { %v26910_v27 = vpop.f32.mrb[51].mxu0  ;;  %v15400_v23 = vor.u32 %v15399_v32, %v15395_v10  ;;  %v15403_v63 = vshll.u32 %v26668_v12, 16  ;;  %v15424_v57 = vor.u32 %v15423_v41, %v15419_v3  ;;  %v15434_v19 = vrot.slane %v15432_v61, 4 }
 0x53d   : > { %19769 = vmatmul.mubr.bf16.gmra.mrb[28].mxu1 %v17997_v1  ;;  %v17999_v1 = vcombine.low %v15300_v9, %v15310_v45  ;;  %v15390_v45 = vor.u32 %v15389_v40, %v15386_v18  ;;  %v15437_v49 = vrot.slane %v15435_v0, 5  ;;  %v15443_v54 = vrot.slane %v15441_v36, 5 }
 0x53e   : > { %19772 = vmatprep.mubr.bf16.mxu1 %v17998_v52  ;;  %19801 = vmatpush3.bf16.msra.mxu1 %v20957_v26  ;;  %v15357_v26 = vrot.slane %v15355_v31, 5  ;;  %v15410_v52 = vrot.slane %v15408_v14, 4  ;;  %v15447_v11 = vrot.slane %v15445_v46, 4  ;;  %v15372_v53 = vsel %vm21362_vm2, %v15367_v29, %v26914_v60  ;;  %v21093_v14 = vld [vmem:[#allocation2 + $0x1c] sm:$0xf] }
 0x53f   : > { %19802 = vmatprep.subr.bf16.mxu1 %v20958_v2  ;;  %v15427_v6 = vshll.u32 %v26682_v62, 16  ;;  %v15401_v7 = vrot.slane %v15400_v23, 4  ;;  %v15405_v34 = vrot.slane %v15403_v63, 5  ;;  %v15425_v37 = vrot.slane %v15424_v57, 4  ;;  %v15777_v29 = vld [vmem:[#allocation2 + $0x18] sm:$0xe] }
 0x540   : > { %v15358_v58 = vsel %vm21362_vm2, %v15353_v33, %v15357_v26  ;;  %v15414_v15 = vor.u32 %v15413_v51, %v15410_v52  ;;  %v15391_v39 = vrot.slane %v15390_v45, 4  ;;  %v15451_v4 = vshll.u32 %v26780_v44, 16 }
 0x541   : > { %v26930_v5 = vpop.f32.mrb[52].mxu0  ;;  %v18001_v25 = vcombine.low %v15348_v8, %v15358_v58  ;;  %v15429_v24 = vrot.slane %v15427_v6, 5  ;;  %v15406_v60 = vsel %vm21362_vm2, %v15401_v7, %v15405_v34  ;;  %v15843_v43 = vrot.slane %v21093_v14, 5  ;;  %v27585_v7 = vld [vmem:[#allocation39_spill] sm:$0xff]  ;;  %v27586_v34 = vld [vmem:[#allocation8_spill] sm:$0xff] }
 0x542   : > { %v26935_v42 = vpop.f32.mrb[53].mxu0  ;;  %19803 = vmatpush3.bf16.msra.mxu1 %v20958_v2  ;;  %v15381_v2 = vrot.slane %v15379_v28, 5  ;;  %v15415_v26 = vrot.slane %v15414_v15, 4  ;;  %v15396_v33 = vsel %vm21362_vm2, %v15391_v39, %v15395_v10  ;;  %v15453_v44 = vrot.slane %v15451_v4, 5 }
 0x543   : > { %v26937_v20 = vpop.f32.mrb[54].mxu0  ;;  %v15430_v62 = vsel %vm21362_vm2, %v15425_v37, %v15429_v24  ;;  %v18003_v40 = vcombine.low %v15396_v33, %v15406_v60  ;;  %v15845_v36 = vrot.slane %v15843_v43, 4  ;;  %v15850_v52 = vrot.slane %v26707_v59, 5  ;;  %v27589_v24 = vld [vmem:[#allocation26_spill] sm:$0xff]  ;;  %v27591_v60 = vld [vmem:[#allocation27_spill] sm:$0xff] }
 0x544   : > { %v26940_v13 = vpop.f32.mrb[55].mxu0  ;;  %v15382_v9 = vsel %vm21362_vm2, %v15377_v55, %v15381_v2  ;;  %v15420_v41 = vsel %vm21362_vm2, %v15415_v26, %v15419_v3  ;;  %v15846_v2 = vrot.slane %v26744_v38, 5  ;;  %v18014_v3 = vrot.slane %v15777_v29, 9  ;;  %v27584_v38 = vld [vmem:[#allocation36_spill] sm:$0xff]  ;;  %v27588_v26 = vld [vmem:[#allocation9_spill] sm:$0xff] }
 0x545   : > { %19773 = vmatmul.mubr.bf16.gmra.mrb[0].mxu1 %v17999_v1  ;;  %v18002_v12 = vcombine.low %v15372_v53, %v15382_v9  ;;  %v15438_v1 = vor.u32 %v15437_v49, %v15434_v19  ;;  %v18004_v0 = vcombine.low %v15420_v41, %v15430_v62  ;;  %v15852_v30 = vrot.slane %v15850_v52, 4  ;;  %v15778_v19 = vld [vmem:[#allocation2 + $0x24] sm:$0xe]  ;;  %v27601_v29 = vld [vmem:[#allocation25_spill] sm:$0xff] }
 0x546   : > { %19776 = vmatprep.mubr.bf16.mxu1 %v18000_v16  ;;  %v15448_v16 = vor.u32 %v15447_v11, %v15443_v54  ;;  %v15847_v58 = vsel %vm21791_vm6, %v15845_v36, %v15846_v2  ;;  %v15844_v45 = vsel %vm21791_vm6, %v18014_v3, %v15843_v43  ;;  %v15853_v49 = vrot.slane %v27584_v38, 5  ;;  %v27592_v62 = vld [vmem:[#allocation11_spill] sm:$0xff] }
 0x547   : > { %v15439_v18 = vrot.slane %v15438_v1, 4  ;;  %v18046_v57 = vcombine.low %v15844_v45, %v15847_v58  ;;  %v18015_v59 = vrot.slane %v15778_v19, 9  ;;  %v27587_v37 = vcombine.low %v27585_v7, %v27586_v34  ;;  %v27598_v36 = vld [vmem:[#allocation19_spill] sm:$0xff]  ;;  %v27606_v58 = vld [vmem:[#allocation28_spill] sm:$0xff]  ;;  %v27607_v45 = vld [vmem:[#allocation30_spill] sm:$0xff] }
 0x548   : > { %v15449_v32 = vrot.slane %v15448_v16, 4  ;;  %v27590_v47 = vcombine.low %v27588_v26, %v27589_v24  ;;  %v27593_v14 = vcombine.low %v27591_v60, %v27592_v62  ;;  %v27610_v19 = vld [vmem:[#allocation31_spill] sm:$0xff]  ;;  %v27618_v34 = vld [vmem:[#allocation10_spill] sm:$0xff] }
 0x549   : > { %v26949_v48 = vpop.f32.mrb[56].mxu0  ;;  %v15444_v46 = vsel %vm21362_vm2, %v15439_v18, %v15443_v54  ;;  %v15854_v54 = vsel %vm21791_vm6, %v15852_v30, %v15853_v49  ;;  %v15851_v53 = vsel %vm21791_vm6, %v18015_v59, %v15850_v52  ;;  %v27603_v52 = vld [vmem:[#allocation23_spill] sm:$0xff]  ;;  %v27609_v30 = vld [vmem:[#allocation6_spill] sm:$0xff]  ;;  %v27612_v49 = vld [vmem:[#allocation33_spill] sm:$0xff] }
 0x54a   : > { %v26954_v31 = vpop.f32.mrb[57].mxu0  ;;  %v15454_v10 = vsel %vm21362_vm2, %v15449_v32, %v15453_v44  ;;  %v18047_v6 = vcombine.low %v15851_v53, %v15854_v54  ;;  %v27594_v44 = vld [vmem:[#allocation12_spill] sm:$0xff]  ;;  %v27611_v38 = vcombine.low %v27609_v30, %v27610_v19  ;;  %v27613_v59 = vld [vmem:[#allocation21_spill] sm:$0xff]  ;;  %v27615_v53 = vld [vmem:[#allocation22_spill] sm:$0xff] }
 0x54b   : > { %v26956_v21 = vpop.f32.mrb[58].mxu0  ;;  %v18005_v8 = vcombine.low %v15444_v46, %v15454_v10  ;;  %v27600_v10 = vld [vmem:[#allocation20_spill] sm:$0xff]  ;;  %v27614_v54 = vcombine.low %v27612_v49, %v27613_v59  ;;  %v27621_v24 = vld [vmem:[#allocation34_spill] sm:$0xff] }
 0x54c   : > { %v26962_v35 = vpop.f32.mrb[59].mxu0  ;;  %v27602_v2 = vcombine.low %v27600_v10, %v27601_v29  ;;  %v27624_v62 = vld [vmem:[#allocation14_spill] sm:$0xff] }
 0x54d   : > { %19777 = vmatmul.mubr.bf16.gmra.mrb[4].mxu1 %v18001_v25 }
 0x54e   : > { %19780 = vmatprep.mubr.bf16.mxu1 %v18002_v12 }
 0x551   : > { %v26967_v28 = vpop.f32.mrb[60].mxu0 }
 0x552   : > { %v26971_v17 = vpop.f32.mrb[61].mxu0 }
 0x553   : > { %v26975_v55 = vpop.f32.mrb[62].mxu0 }
 0x554   : > { %v26979_v61 = vpop.f32.mrb[63].mxu0 }
 0x555   : > { %19781 = vmatmul.mubr.bf16.gmra.mrb[8].mxu1 %v18003_v40  ;;  %v27595_v40 = vld [vmem:[#allocation17_spill] sm:$0xff] }
 0x556   : > { %19784 = vmatprep.mubr.bf16.mxu1 %v18004_v0  ;;  %v27596_v41 = vcombine.low %v27594_v44, %v27595_v40  ;;  %v27597_v0 = vld [vmem:[#allocation16_spill] sm:$0xff]  ;;  %v6442_v40 = vlaneseq }
 0x557   : > { %v27599_v46 = vcombine.low %v27597_v0, %v27598_v36  ;;  %v6438_v0 = vld [vmem:[%s27211_s4] sm:$0x1] }
 0x558   : > { %v6439_v36 = vld [vmem:[%s27213_s6] sm:$0x1] }
 0x559   : > { %v19214_v51 = vpop.f32.mrb[32].mxu0 }
 0x55a   : > { %v9066_v23 = vpop.f32.mrb[33].mxu0 }
 0x55b   : > { %v19215_v9 = vpop.f32.mrb[34].mxu0 }
 0x55c   : > { %v9069_v63 = vpop.f32.mrb[35].mxu0 }
 0x55d   : > { %19785 = vmatmul.mubr.bf16.gmra.mrb[12].mxu1 %v18005_v8  ;;  %v27604_v8 = vld [vmem:[#allocation24_spill] sm:$0xff] }
 0x55e   : > { %19804 = vmatprep.mubr.bf16.mxu1 %v18046_v57  ;;  %v27605_v3 = vcombine.low %v27603_v52, %v27604_v8  ;;  %v27608_v57 = vcombine.low %v27606_v58, %v27607_v45 }
 0x561   : > { %v19218_v11 = vpop.f32.mrb[36].mxu0 }
 0x562   : > { %v9082_v25 = vpop.f32.mrb[37].mxu0 }
 0x563   : > { %v19219_v15 = vpop.f32.mrb[38].mxu0 }
 0x564   : > { %v9085_v12 = vpop.f32.mrb[39].mxu0 }
 0x565   : > { %19805 = vmatmul.mubr.bf16.vlgmr.msra.gmra.mrb[16].mxu1 %v18047_v6  ;;  %v27616_v6 = vld [vmem:[#allocation37_spill] sm:$0xff] }
 0x566   : > { %19808 = vmatprep.mubr.bf16.mxu1 %v27587_v37  ;;  %v27617_v7 = vcombine.low %v27615_v53, %v27616_v6  ;;  %v27619_v37 = vld [vmem:[#allocation7_spill] sm:$0xff] }
 0x567   : > { %v27620_v26 = vcombine.low %v27618_v34, %v27619_v37 }
 0x569   : > { %v26999_v39 = vpop.f32.mrb[40].mxu0 }
 0x56a   : > { %v27001_v1 = vpop.f32.mrb[41].mxu0 }
 0x56b   : > { %v27003_v16 = vpop.f32.mrb[42].mxu0 }
 0x56c   : > { %v27005_v4 = vpop.f32.mrb[43].mxu0 }
 0x56d   : > { %19809 = vmatmul.mubr.bf16.gmra.mrb[20].mxu1 %v27590_v47  ;;  %v27622_v47 = vld [vmem:[#allocation35_spill] sm:$0xff] }
 0x56e   : > { %19812 = vmatprep.mubr.bf16.mxu1 %v27593_v14  ;;  %v27623_v60 = vcombine.low %v27621_v24, %v27622_v47  ;;  %v27625_v14 = vld [vmem:[#allocation15_spill] sm:$0xff] }
 0x56f   : > { %v27626_v44 = vcombine.low %v27624_v62, %v27625_v14 }
 0x571   : > { %v27013_v43 = vpop.f32.mrb[44].mxu0 }
 0x572   : > { %v27015_v33 = vpop.f32.mrb[45].mxu0 }
 0x573   : > { %v27017_v18 = vpop.f32.mrb[46].mxu0 }
 0x574   : > { %v27019_v32 = vpop.f32.mrb[47].mxu0 }
 0x575   : > { %19813 = vmatmul.mubr.bf16.gmra.mrb[24].mxu1 %v27596_v41  ;;  %v6443_v41 = vshrl.u32 %v6442_v40, 7 }
 0x576   : > { %19816 = vmatprep.mubr.bf16.mxu1 %v27599_v46  ;;  %v6440_v46 = vadd.f32 %v6439_v36, %v6438_v0 }
 0x577   : > { %v6444_v10 = vsub.s32 0, %v6443_v41 }
 0x579   : > { %v27061_v29 = vrot.slane %v6440_v46, %v6444_v10 }
 0x57b   : > { %v19846_v52 = vadd.f32 %v9066_v23, %v27061_v29  ;;  %v19856_v59 = vadd.f32 %v19219_v15, %v27061_v29  ;;  %v19858_v6 = vadd.f32 %v9085_v12, %v27061_v29  ;;  %v19864_v12 = vadd.f32 %v27003_v16, %v27061_v29 }
 0x57c   : > { %v19866_v62 = vadd.f32 %v27005_v4, %v27061_v29  ;;  %v19870_v16 = vadd.f32 %v27015_v33, %v27061_v29  ;;  %v19872_v0 = vadd.f32 %v27017_v18, %v27061_v29  ;;  %v19874_v10 = vadd.f32 %v27019_v32, %v27061_v29 }
 0x57d   : > { %19817 = vmatmul.mubr.bf16.gmra.mrb[28].mxu1 %v27602_v2  ;;  %v19844_v2 = vadd.f32 %v19214_v51, %v27061_v29  ;;  %v19876_v33 = vadd.f32 %v26898_v56, %v27061_v29  ;;  %v19878_v18 = vadd.f32 %v26903_v50, %v27061_v29  ;;  %v19884_v50 = vadd.f32 %v26930_v5, %v27061_v29 }
 0x57e   : > { %19820 = vmatprep.mubr.bf16.mxu1 %v27605_v3  ;;  %v19848_v3 = vadd.f32 %v19215_v9, %v27061_v29  ;;  %v19852_v9 = vadd.f32 %v19218_v11, %v27061_v29  ;;  %v19860_v11 = vadd.f32 %v26999_v39, %v27061_v29 }
 0x585   : > { %19821 = vmatmul.mubr.bf16.gmra.mrb[0].mxu1 %v27608_v57  ;;  %v19850_v57 = vadd.f32 %v9069_v63, %v27061_v29  ;;  %v19854_v63 = vadd.f32 %v9082_v25, %v27061_v29  ;;  %v19862_v25 = vadd.f32 %v27001_v1, %v27061_v29  ;;  %v19868_v1 = vadd.f32 %v27013_v43, %v27061_v29 }
 0x586   : > { %19824 = vmatprep.mubr.bf16.mxu1 %v27611_v38 }
 0x58d   : > { %19825 = vmatmul.mubr.bf16.gmra.mrb[4].mxu1 %v27614_v54 }
 0x58e   : > { %19828 = vmatprep.mubr.bf16.mxu1 %v27617_v7 }
 0x595   : > { %19829 = vmatmul.mubr.bf16.gmra.mrb[8].mxu1 %v27620_v26 }
 0x596   : > { %19832 = vmatprep.mubr.bf16.mxu1 %v27623_v60 }
 0x59d   : > { %19833 = vmatmul.mubr.bf16.gmra.mrb[12].mxu1 %v27626_v44 }
 0x638   : > { %v19806_v8 = vpop.f32.mrb[16].mxu1 }
 0x639   : > { %v19845_v58 = vadd.f32 %v19844_v2, %v19806_v8  ;;  %v16116_v45 = vpop.f32.mrb[17].mxu1 }
 0x63a   : > { %v19847_v30 = vadd.f32 %v19846_v52, %v16116_v45  ;;  %v19807_v19 = vpop.f32.mrb[18].mxu1 }
 0x63b   : > { %16277 = vst [vmem:[%s27069_s18 + $0x10] sm:$0xff] %v19845_v58  ;;  %v19849_v51 = vadd.f32 %v19848_v3, %v19807_v19  ;;  %v16119_v38 = vpop.f32.mrb[19].mxu1  ;;  %v19880_v58 = vadd.f32 %v26905_v22, %v27061_v29  ;;  %v19886_v22 = vadd.f32 %v26935_v42, %v27061_v29  ;;  %v19892_v42 = vadd.f32 %v26949_v48, %v27061_v29 }
 0x63c   : > { %16275 = vst [vmem:[%s27069_s18] sm:$0xff] %v19847_v30  ;;  %v19851_v23 = vadd.f32 %v19850_v57, %v16119_v38  ;;  %v19882_v30 = vadd.f32 %v26910_v27, %v27061_v29 }
 0x63d   : > { %16278 = vst [vmem:[%s27069_s18 + $0x18] sm:$0xff] %v19849_v51 }
 0x63e   : > { %16276 = vst [vmem:[%s27069_s18 + $0x8] sm:$0xff] %v19851_v23 }
 0x640   : > { %v19810_v49 = vpop.f32.mrb[20].mxu1 }
 0x641   : > { %v19853_v54 = vadd.f32 %v19852_v9, %v19810_v49  ;;  %v16132_v53 = vpop.f32.mrb[21].mxu1  ;;  %v19888_v9 = vadd.f32 %v26937_v20, %v27061_v29  ;;  %v19894_v20 = vadd.f32 %v26954_v31, %v27061_v29  ;;  %v19900_v31 = vadd.f32 %v26967_v28, %v27061_v29 }
 0x642   : > { %v19855_v7 = vadd.f32 %v19854_v63, %v16132_v53  ;;  %v19811_v34 = vpop.f32.mrb[22].mxu1 }
 0x643   : > { %16281 = vst [vmem:[%s27069_s18 + $0x30] sm:$0xff] %v19853_v54  ;;  %v19857_v37 = vadd.f32 %v19856_v59, %v19811_v34  ;;  %v16135_v26 = vpop.f32.mrb[23].mxu1  ;;  %v19890_v59 = vadd.f32 %v26940_v13, %v27061_v29  ;;  %v19896_v34 = vadd.f32 %v26956_v21, %v27061_v29  ;;  %v19902_v21 = vadd.f32 %v26971_v17, %v27061_v29 }
 0x644   : > { %16279 = vst [vmem:[%s27069_s18 + $0x20] sm:$0xff] %v19855_v7  ;;  %v19859_v24 = vadd.f32 %v19858_v6, %v16135_v26 }
 0x645   : > { %16282 = vst [vmem:[%s27069_s18 + $0x38] sm:$0xff] %v19857_v37 }
 0x646   : > { %16280 = vst [vmem:[%s27069_s18 + $0x28] sm:$0xff] %v19859_v24  ;;  %v19898_v24 = vadd.f32 %v26962_v35, %v27061_v29  ;;  %v19904_v35 = vadd.f32 %v26975_v55, %v27061_v29 }
 0x648   : > { %v19814_v15 = vpop.f32.mrb[24].mxu1 }
 0x649   : > { %v19861_v47 = vadd.f32 %v19860_v11, %v19814_v15  ;;  %v16148_v60 = vpop.f32.mrb[25].mxu1 }
 0x64a   : > { %v19863_v14 = vadd.f32 %v19862_v25, %v16148_v60  ;;  %v19815_v44 = vpop.f32.mrb[26].mxu1 }
 0x64b   : > { %16285 = vst [vmem:[%s27069_s18 + $0x50] sm:$0xff] %v19861_v47  ;;  %v19865_v40 = vadd.f32 %v19864_v12, %v19815_v44  ;;  %v16151_v41 = vpop.f32.mrb[27].mxu1 }
 0x64c   : > { %16283 = vst [vmem:[%s27069_s18 + $0x40] sm:$0xff] %v19863_v14  ;;  %v19867_v39 = vadd.f32 %v19866_v62, %v16151_v41  ;;  %v19906_v14 = vadd.f32 %v26979_v61, %v27061_v29 }
 0x64d   : > { %16286 = vst [vmem:[%s27069_s18 + $0x58] sm:$0xff] %v19865_v40 }
 0x64e   : > { %16284 = vst [vmem:[%s27069_s18 + $0x48] sm:$0xff] %v19867_v39 }
 0x650   : > { %v19818_v4 = vpop.f32.mrb[28].mxu1 }
 0x651   : > { %v19869_v36 = vadd.f32 %v19868_v1, %v19818_v4  ;;  %v16164_v46 = vpop.f32.mrb[29].mxu1 }
 0x652   : > { %v19871_v2 = vadd.f32 %v19870_v16, %v16164_v46  ;;  %v19819_v52 = vpop.f32.mrb[30].mxu1 }
 0x653   : > { %16289 = vst [vmem:[%s27069_s18 + $0x70] sm:$0xff] %v19869_v36  ;;  %v19873_v8 = vadd.f32 %v19872_v0, %v19819_v52  ;;  %v16167_v3 = vpop.f32.mrb[31].mxu1 }
 0x654   : > { %16287 = vst [vmem:[%s27069_s18 + $0x60] sm:$0xff] %v19871_v2  ;;  %v19875_v43 = vadd.f32 %v19874_v10, %v16167_v3 }
 0x655   : > { %16290 = vst [vmem:[%s27069_s18 + $0x78] sm:$0xff] %v19873_v8 }
 0x656   : > { %16288 = vst [vmem:[%s27069_s18 + $0x68] sm:$0xff] %v19875_v43 }
 0x658   : > { %v19822_v32 = vpop.f32.mrb[0].mxu1 }
 0x659   : > { %v19877_v45 = vadd.f32 %v19876_v33, %v19822_v32  ;;  %v16180_v57 = vpop.f32.mrb[1].mxu1 }
 0x65a   : > { %v19879_v19 = vadd.f32 %v19878_v18, %v16180_v57  ;;  %v19823_v51 = vpop.f32.mrb[2].mxu1 }
 0x65b   : > { %16293 = vst [vmem:[%s27069_s18 + $0x90] sm:$0xff] %v19877_v45  ;;  %v19881_v38 = vadd.f32 %v19880_v58, %v19823_v51  ;;  %v16183_v23 = vpop.f32.mrb[3].mxu1 }
 0x65c   : > { %16291 = vst [vmem:[%s27069_s18 + $0x80] sm:$0xff] %v19879_v19  ;;  %v19883_v56 = vadd.f32 %v19882_v30, %v16183_v23 }
 0x65d   : > { %16294 = vst [vmem:[%s27069_s18 + $0x98] sm:$0xff] %v19881_v38 }
 0x65e   : > { %16292 = vst [vmem:[%s27069_s18 + $0x88] sm:$0xff] %v19883_v56 }
 0x660   : > { %v19826_v27 = vpop.f32.mrb[4].mxu1 }
 0x661   : > { %v19885_v63 = vadd.f32 %v19884_v50, %v19826_v27  ;;  %v16196_v49 = vpop.f32.mrb[5].mxu1 }
 0x662   : > { %v19887_v54 = vadd.f32 %v19886_v22, %v16196_v49  ;;  %v19827_v53 = vpop.f32.mrb[6].mxu1 }
 0x663   : > { %16297 = vst [vmem:[%s27069_s18 + $0xb0] sm:$0xff] %v19885_v63  ;;  %v19889_v6 = vadd.f32 %v19888_v9, %v19827_v53  ;;  %v16199_v7 = vpop.f32.mrb[7].mxu1 }
 0x664   : > { %16295 = vst [vmem:[%s27069_s18 + $0xa0] sm:$0xff] %v19887_v54  ;;  %v19891_v5 = vadd.f32 %v19890_v59, %v16199_v7 }
 0x665   : > { %16298 = vst [vmem:[%s27069_s18 + $0xb8] sm:$0xff] %v19889_v6 }
 0x666   : > { %16296 = vst [vmem:[%s27069_s18 + $0xa8] sm:$0xff] %v19891_v5 }
 0x668   : > { %v19830_v13 = vpop.f32.mrb[8].mxu1 }
 0x669   : > { %v19893_v37 = vadd.f32 %v19892_v42, %v19830_v13  ;;  %v16212_v26 = vpop.f32.mrb[9].mxu1 }
 0x66a   : > { %v19895_v11 = vadd.f32 %v19894_v20, %v16212_v26  ;;  %v19831_v25 = vpop.f32.mrb[10].mxu1 }
 0x66b   : > { %16301 = vst [vmem:[%s27069_s18 + $0xd0] sm:$0xff] %v19893_v37  ;;  %v19897_v15 = vadd.f32 %v19896_v34, %v19831_v25  ;;  %v16215_v12 = vpop.f32.mrb[11].mxu1 }
 0x66c   : > { %16299 = vst [vmem:[%s27069_s18 + $0xc0] sm:$0xff] %v19895_v11  ;;  %v19899_v48 = vadd.f32 %v19898_v24, %v16215_v12 }
 0x66d   : > { %16302 = vst [vmem:[%s27069_s18 + $0xd8] sm:$0xff] %v19897_v15 }
 0x66e   : > { %16300 = vst [vmem:[%s27069_s18 + $0xc8] sm:$0xff] %v19899_v48 }
 0x670   : > { %v19834_v47 = vpop.f32.mrb[12].mxu1 }
 0x671   : > { %v19901_v60 = vadd.f32 %v19900_v31, %v19834_v47  ;;  %v16228_v62 = vpop.f32.mrb[13].mxu1 }
 0x672   : > { %v19903_v28 = vadd.f32 %v19902_v21, %v16228_v62  ;;  %v19835_v44 = vpop.f32.mrb[14].mxu1 }
 0x673   : > { %16305 = vst [vmem:[%s27069_s18 + $0xf0] sm:$0xff] %v19901_v60  ;;  %v19905_v40 = vadd.f32 %v19904_v35, %v19835_v44  ;;  %v16231_v17 = vpop.f32.mrb[15].mxu1 }
 0x674   : > { %16303 = vst [vmem:[%s27069_s18 + $0xe0] sm:$0xff] %v19903_v28  ;;  %v19907_v55 = vadd.f32 %v19906_v14, %v16231_v17 }
 0x675   : > { %16306 = vst [vmem:[%s27069_s18 + $0xf8] sm:$0xff] %v19905_v40 }
 0x676   : > { %16304 = vst [vmem:[%s27069_s18 + $0xe8] sm:$0xff] %v19907_v55 }
 0x677   : > { %21107 = shalt.err (!%p21104_p3)
}
 0x678   : > { %s21108_s14 = scalar_lea.hbm %s27157_s28, 4096  ;;  %s21112_s17 = scalar_lea.hbm %s27214_s7, 16384 }
 0x679   : > { %p21109_p4 = scmp.ne.s32.totalorder %s27157_s28, %s21108_s14  ;;  %p21113_p9 = scmp.lt.u32.totalorder %s27157_s28, %s27214_s7 }
 0x67a   : > { %p21114_p10 = scmp.lt.u32.totalorder %s21112_s17, %s21108_s14  ;;  %p21116_p12 = scmp.lt.u32.totalorder %s21108_s14, %s27157_s28 }
 0x67b   : > { %p21110_p7 = pnand %p21109_p4, %p21240_p5 }
 0x67c   : > { %p21115_p11 = por %p21114_p10, %p21113_p9 }
 0x67d   : > { %p21111_p8 = pneg %p21110_p7 }
 0x67e   : > { %p21117_p13 = por %p21116_p12, %p21115_p11 }
 0x680   : > { %p21118_p0 = pnand %p21117_p13, %p21111_p8 }
 0x682   : > { %21121 = shalt.err (!%p21118_p0)
}
 0x683   : > { %s21160_s21 = smov 128   ;;  %s21161_s8 = smov 8  }
 0x684   : > { %20677 = dma.vmem_to_hbm [thread:$0]  (%p21240_p5), %s27159_s20, 4096, %s27157_s28, %s27166_s22, %s21160_s21, %s21160_s21, %s21161_s8  }
 0x685 PF: > { %p20683_p1 = scmp.ge.s32.totalorder %s21156_s27, 2  ;;  %s16336_s23 = sand.u32 1, %s21144_s24  }
 0x686   : > { %s16337_s29 = scalar_lea.sflag [#allocation4], %s16336_s23 }
 0x687   : > { %p20680_p2 = pnand %p20683_p1, %p21244_p6 }
 0x689   : > { %21139 = dma.done.wait (!%p20680_p2), %s16337_s29, 4096  }
 0x68a   : > { %21141 = vsyncadd (!%p20680_p2), %s16337_s29, 4294963200  ;;  %p17_p3 = scmp.ge.s32.totalorder %s21227_s30, 6   ;;  %s27627_s24 = smov %s21148_s25 }
 0x68b   : > { %s27628_s25 = smov %s21152_s26  ;;  %s27629_s26 = smov %s21238_s10 }
 0x68c   : > { %s27630_s27 = smov %s21227_s30  ;;  %19 = sbr.rel (!%p17_p3) target bundleno = 3 (0x3), region = 111 }
 0x693   :  { %16342 = vsyncpa [#allocation4], 1 }
 0x694   :  { %16344 = vsyncpa [#allocation4 + $0x1], 1 }

</bundles_post_ra>
